<compile_context>
chip_gen: v7x
topology: tpu7x:2x2x1
jax: 0.10.0
libtpu: 0.0.40
codegen_flags: <defaults>
</compile_context>

<pallas_src>
import jax
import jax.numpy as jnp
from jax import lax
from jax.experimental import pallas as pl
from jax.experimental.pallas import tpu as pltpu


F_KTH = 9
CONV1_KSHAPE = (3, 10, 8)   # nn.Conv3d(1, 2, (3, 10, 8))
CONV2_KSHAPE = (3, 5, 4)    # nn.Conv3d(2, 6, (3, 5, 4))


# ----------------------------------------------------------------------------
# Pallas kernels
# ----------------------------------------------------------------------------
def _conv_matmul_kernel(g_ref, t_ref, b_ref, o_ref):
    """Fused (M_blk, K) @ (K, Co*Wo) matmul + bias + ReLU for one grid step.

    g_ref : (M_blk, K)      bf16   batch-merged patch rows (K = Ci*KD*KH*W)
    t_ref : (K, Co*Wo)      bf16   width-Toeplitz conv weights
    b_ref : (1, Co*Wo)      f32    bias broadcast over wo
    o_ref : (M_blk, Co*Wo)  f32
    """
    acc = jnp.dot(g_ref[...], t_ref[...], preferred_element_type=jnp.float32)
    o_ref[...] = jnp.maximum(acc + b_ref[...], 0.0)


def _head_kernel(a_ref, w3_ref, b3_ref, wf_ref, o_ref):
    """Fused conv3 (1x1 spatial output) + ReLU + fc1 (no bias)."""
    h = jnp.dot(a_ref[...], w3_ref[...], preferred_element_type=jnp.float32)
    h = jnp.maximum(h + b3_ref[...], 0.0)
    o_ref[...] = jnp.dot(h, wf_ref[...], preferred_element_type=jnp.float32)


# ----------------------------------------------------------------------------
# Host-side prep (weights once, patches per forward)
# ----------------------------------------------------------------------------
def _width_toeplitz(w, W):
    """w: (Co,Ci,KD,KH,KW) -> (Ci*KD*KH*W, Co*Wo) with
    T[((ci*KD+kd)*KH+kh)*W + w_in, co*Wo + wo] = w[co,ci,kd,kh,w_in-wo]
    for valid taps (0 <= w_in-wo < KW), else 0."""
    Co, Ci, KD, KH, KW = w.shape
    Wo = W - KW + 1
    d = jnp.arange(W)[:, None] - jnp.arange(Wo)[None, :]            # (W, Wo)
    valid = (d >= 0) & (d < KW)
    dc = jnp.clip(d, 0, KW - 1)
    wt = jnp.transpose(w, (1, 2, 3, 0, 4))                          # (Ci,KD,KH,Co,KW)
    t = jnp.take(wt, dc, axis=4)                                    # (Ci,KD,KH,Co,W,Wo)
    t = jnp.where(valid[None, None, None, None], t, 0.0)
    t = jnp.transpose(t, (0, 1, 2, 4, 3, 5))                        # (Ci,KD,KH,W,Co,Wo)
    return t.reshape(Ci * KD * KH * W, Co * Wo)


def _build_patches(x5, KD, KH):
    """x5: (B,Ci,D,H,W) -> (B*Do*Ho, Ci*KD*KH*W).  Only (kd,kh) are replicated
    (the width taps live in the Toeplitz weights), so the expansion is KD*KH x
    on a sub-MB input instead of a full im2col."""
    B, Ci, D, H, W = x5.shape
    Do, Ho = D - KD + 1, H - KH + 1
    cols = [x5[:, :, kd:kd + Do, kh:kh + Ho, :]
            for kd in range(KD) for kh in range(KH)]
    g = jnp.stack(cols, axis=4)                                     # (B,Ci,Do,Ho,KD*KH,W)
    g = jnp.transpose(g, (0, 2, 3, 1, 4, 5))                        # (B,Do,Ho,Ci,KD*KH,W)
    return g.reshape(B * Do * Ho, Ci * KD * KH * W)


def prepare_params(params, H, W):
    """One-time weight prep, hoisted out of the jitted forward (review item):
    Toeplitz conv weights (bf16), broadcast biases, head matrices."""
    c1 = params["conv1_w"]
    KH1, KW1 = c1.shape[3], c1.shape[4]
    Wo1 = W - KW1 + 1
    t1 = _width_toeplitz(c1.astype(jnp.float32), W).astype(jnp.bfloat16)
    b1 = jnp.repeat(params["conv1_b"].astype(jnp.float32), Wo1)[None, :]

    w1 = Wo1 // 2                                  # width after pool1 (MaxPool2d(2))
    c2 = params["conv2_w"]
    KW2 = c2.shape[4]
    Wo2 = w1 - KW2 + 1
    t2 = _width_toeplitz(c2.astype(jnp.float32), w1).astype(jnp.bfloat16)
    b2 = jnp.repeat(params["conv2_b"].astype(jnp.float32), Wo2)[None, :]

    w3 = params["conv3_w"]                                           # (128, 180, 4, 3)
    w3m = w3.reshape(w3.shape[0], -1).T.astype(jnp.bfloat16)         # (2160, 128)
    b3 = params["conv3_b"].astype(jnp.float32)[None, :]              # (1, 128)
    wfm = params["fc1_w"].T.astype(jnp.float32)                      # (128, nclass)
    return {"t1": t1, "b1": b1, "t2": t2, "b2": b2,
            "w3m": w3m, "b3": b3, "wfm": wfm}


# ----------------------------------------------------------------------------
# Wrappers around pallas_call
# ----------------------------------------------------------------------------
def conv3d_relu(x5, t, bias_cols, kshape):
    """Valid stride-1 Conv3d + bias + ReLU as one batch-merged Pallas matmul.
    x5: (B,Ci,D,H,W); t: (Ci*KD*KH*W, Co*Wo) bf16 (precomputed Toeplitz);
    bias_cols: (1, Co*Wo) f32.  Returns (B, Do, Ho, Co, Wo) f32."""
    KD, KH, KW = kshape
    B, Ci, D, H, W = x5.shape
    Do, Ho, Wo = D - KD + 1, H - KH + 1, W - KW + 1
    K = Ci * KD * KH * W
    CoWo = bias_cols.shape[1]
    Co = CoWo // Wo
    assert t.shape == (K, CoWo)

    g = _build_patches(x5.astype(jnp.bfloat16), KD, KH)              # (M, K) bf16
    M = B * Do * Ho
    # 2 'parallel' steps when the halved block stays 16-row (bf16) aligned,
    # so both v7x TensorCores get work; otherwise a single step (conv2 here —
    # it is overhead-bound anyway).
    nblk = 2 if (M % 2 == 0 and (M // 2) % 16 == 0) else 1
    Mblk = M // nblk

    out = pl.pallas_call(
        _conv_matmul_kernel,
        out_shape=jax.ShapeDtypeStruct((M, CoWo), jnp.float32),
        grid=(nblk,),
        in_specs=[
            pl.BlockSpec((Mblk, K), lambda i: (i, 0)),
            pl.BlockSpec((K, CoWo), lambda i: (0, 0)),
            pl.BlockSpec((1, CoWo), lambda i: (0, 0)),
        ],
        out_specs=pl.BlockSpec((Mblk, CoWo), lambda i: (i, 0)),
        compiler_params=pltpu.CompilerParams(
            dimension_semantics=("parallel",)),
    )(g, t, bias_cols)
    return out.reshape(B, Do, Ho, Co, Wo)


def conv3_fc1(p2, w3m, b3_row, wfm):
    """Fused Conv2d(dim2,128,(4,3)) + ReLU + Linear(128,nclass,bias=False).
    Requires conv3's spatial output to be 1x1 (torch's x.view(-1,128))."""
    N = p2.shape[0]
    K3 = p2.shape[1] * p2.shape[2] * p2.shape[3]
    assert K3 == w3m.shape[0], "conv3 output must be 1x1 (torch view(-1,128))"
    a = p2.reshape(N, K3).astype(jnp.bfloat16)
    Co, ncls = w3m.shape[1], wfm.shape[1]
    return pl.pallas_call(
        _head_kernel,
        out_shape=jax.ShapeDtypeStruct((N, ncls), jnp.float32),
        grid=(1,),
        in_specs=[
            pl.BlockSpec((N, K3), lambda i: (0, 0)),
            pl.BlockSpec((K3, Co), lambda i: (0, 0)),
            pl.BlockSpec((1, Co), lambda i: (0, 0)),
            pl.BlockSpec((Co, ncls), lambda i: (0, 0)),
        ],
        out_specs=pl.BlockSpec((N, ncls), lambda i: (0, 0)),
    )(a, w3m, b3_row, wfm)


def maxpool_last2(x, k):
    """nn.MaxPool2d(k) (stride=k, floor mode) over the last two dims — plain
    jnp reduction (sub-MB arrays; per perf review this beats a Pallas kernel)."""
    *lead, H, W = x.shape
    Ho, Wo = H // k, W // k
    x = x[..., :Ho * k, :Wo * k]
    x = x.reshape(*lead, Ho, k, Wo, k)
    return x.max(axis=(-3, -1))


# ----------------------------------------------------------------------------
# Model (mode='KTH'): f=9, dim=54, dim1=84, dim2=180
# ----------------------------------------------------------------------------
def init_params(key):
    ks = jax.random.split(key, 7)

    def u(k, shape, fan_in):
        bnd = 1.0 / (fan_in ** 0.5)
        return jax.random.uniform(k, shape, jnp.float32, -bnd, bnd)

    return {
        "conv1_w": u(ks[0], (2, 1, 3, 10, 8), 1 * 3 * 10 * 8),
        "conv1_b": u(ks[1], (2,), 1 * 3 * 10 * 8),
        "conv2_w": u(ks[2], (6, 2, 3, 5, 4), 2 * 3 * 5 * 4),
        "conv2_b": u(ks[3], (6,), 2 * 3 * 5 * 4),
        "conv3_w": u(ks[4], (128, 180, 4, 3), 180 * 4 * 3),
        "conv3_b": u(ks[5], (128,), 180 * 4 * 3),
        "fc1_w": u(ks[6], (6, 128), 128),          # nn.Linear(128, 6, bias=False)
    }


def forward(x, prep):
    """x: (N, 1, 54, H, W) f32 -> (N, 6) f32 (mode='KTH')."""
    N, Cin, D, H, W = x.shape
    f = F_KTH
    assert Cin == 1 and D == 6 * f
    # torch splits the depth into 6 chunks of f and runs conv1 on each with
    # shared weights; since Cin == 1 this is a pure reshape into a 6N batch.
    xs = x.reshape(N * 6, 1, f, H, W)

    # conv1 + ReLU (one batch-merged Pallas matmul, grid=(2,) parallel)
    y1 = conv3d_relu(xs, prep["t1"], prep["b1"], CONV1_KSHAPE)    # (6N,Do1,Ho1,2,Wo1)

    # pool1 = MaxPool2d(2) is per-channel, so it runs directly on the batched
    # split layout: (b, do, ho, co, wo) -> (b, co, do, ho, wo) -> pool
    y1 = jnp.transpose(y1, (0, 3, 1, 2, 4))                       # (6N,2,Do1,Ho1,Wo1)
    x2 = maxpool_last2(y1, 2)                                     # (6N,2,Do1,h1,w1)

    # conv2 + ReLU (shared weights across the 6 splits -> same 6N batch)
    y2 = conv3d_relu(x2, prep["t2"], prep["b2"], CONV2_KSHAPE)    # (6N,Do2,Ho2,6,Wo2)
    Do2, Ho2, Co2, Wo2 = y2.shape[1], y2.shape[2], y2.shape[3], y2.shape[4]

    # torch channel order after cat+view: c = c2*(6*Do2) + s*Do2 + do2
    y2 = y2.reshape(N, 6, Do2, Ho2, Co2, Wo2)                     # (n,s,do2,ho2,c2,wo2)
    y2 = jnp.transpose(y2, (0, 4, 1, 2, 3, 5))                    # (n,c2,s,do2,ho2,wo2)
    y2 = y2.reshape(N, Co2 * 6 * Do2, Ho2, Wo2)                   # (N, 180, Ho2, Wo2)

    # pool2 = MaxPool2d(3)
    p2 = maxpool_last2(y2, 3)                                     # (N, 180, 4, 3)

    # conv3 (-> 1x1 spatial) + ReLU + fc1, fused in one tiny Pallas call
    return conv3_fc1(p2, prep["w3m"], prep["b3"], prep["wfm"])


# ----------------------------------------------------------------------------
# Pure-JAX reference (same bf16 operand rounding) for a correctness check
# ----------------------------------------------------------------------------
def _conv_nd_ref(x, w, b, dims):
    out = lax.conv_general_dilated(
        x.astype(jnp.bfloat16), w.astype(jnp.bfloat16),
        window_strides=(1,) * (x.ndim - 2), padding="VALID",
        dimension_numbers=dims, preferred_element_type=jnp.float32)
    bshape = (1, -1) + (1,) * (x.ndim - 2)
    return jnp.maximum(out + b.astype(jnp.float32).reshape(bshape), 0.0)


def reference_forward(x, params):
    N = x.shape[0]
    f = F_KTH
    dims3 = ("NCDHW", "OIDHW", "NCDHW")
    parts = [x[:, :, s * f:(s + 1) * f] for s in range(6)]
    ys = [_conv_nd_ref(p, params["conv1_w"], params["conv1_b"], dims3) for p in parts]
    y = jnp.concatenate(ys, axis=2)
    y = y.reshape(N, -1, y.shape[3], y.shape[4])
    y = maxpool_last2(y, 2)
    y = y.reshape(N, 2, -1, y.shape[2], y.shape[3])
    parts = [y[:, :, s * (f - 2):(s + 1) * (f - 2)] for s in range(6)]
    zs = [_conv_nd_ref(p, params["conv2_w"], params["conv2_b"], dims3) for p in parts]
    z = jnp.concatenate(zs, axis=2)
    z = z.reshape(N, -1, z.shape[3], z.shape[4])
    z = maxpool_last2(z, 3)
    dims2 = ("NCHW", "OIHW", "NCHW")
    h = _conv_nd_ref(z, params["conv3_w"], params["conv3_b"], dims2)
    h = h.reshape(-1, params["conv3_w"].shape[0])
    return h @ params["fc1_w"].T.astype(jnp.float32)


if __name__ == "__main__":
    key = jax.random.PRNGKey(0)
    k_params, k_x = jax.random.split(key)
    params = init_params(k_params)

    # Spatial size chosen so the KTH pipeline closes exactly:
    # (41,31) -conv1-> (32,24) -pool2-> (16,12) -conv2-> (12,9) -pool3-> (4,3) -conv3-> (1,1)
    N, H, W = 2, 41, 31
    x = jax.random.normal(k_x, (N, 1, 6 * F_KTH, H, W), dtype=jnp.float32)

    prep = prepare_params(params, H, W)           # one-time, outside the jitted path
    fwd = jax.jit(forward)
    out = jax.block_until_ready(fwd(x, prep))
    assert out.shape == (N, 6), out.shape
    assert bool(jnp.all(jnp.isfinite(out)))

    # Correctness check vs pure-JAX reference (identical bf16 operand rounding;
    # remaining difference is f32 accumulation order only).
    ref = jax.block_until_ready(jax.jit(reference_forward)(x, params))
    err = float(jnp.max(jnp.abs(out - ref)))
    scale = float(jnp.max(jnp.abs(ref)))
    assert err <= 2e-3 + 2e-2 * scale, f"mismatch: max abs err {err} (scale {scale})"

    print("KERNEL_OK")
</pallas_src>

<mosaic_0001>
module attributes {stable_mosaic.version = 11 : i64} {
  func.func @_conv_matmul_kernel(%arg0: i32, %arg1: memref<1344x930xbf16, #tpu.memory_space<vmem>>, %arg2: memref<930x48xbf16, #tpu.memory_space<vmem>>, %arg3: memref<1x48xf32, #tpu.memory_space<vmem>>, %arg4: memref<1344x48xf32, #tpu.memory_space<vmem>>) attributes {dimension_semantics = [#tpu.dimension_semantics<parallel>], iteration_bounds = array<i64: 2>, scalar_prefetch = 0 : i64, scratch_operands = 0 : i64, tpu.core_type = #tpu.core_type<tc>, window_params = [{transform_indices = @transform_0, window_bounds = array<i64: 1344, 930>}, {pipeline_mode = #tpu.pipeline_mode<synchronous>, transform_indices = @transform_1, window_bounds = array<i64: 930, 48>}, {pipeline_mode = #tpu.pipeline_mode<synchronous>, transform_indices = @transform_2, window_bounds = array<i64: 1, 48>}, {transform_indices = @transform_3, window_bounds = array<i64: 1344, 48>}]} {
    %c0 = arith.constant 0 : index
    %c0_0 = arith.constant 0 : index
    %0 = vector.load %arg1[%c0, %c0_0] : memref<1344x930xbf16, #tpu.memory_space<vmem>>, vector<1344x930xbf16>
    %c0_1 = arith.constant 0 : index
    %c0_2 = arith.constant 0 : index
    %1 = vector.load %arg2[%c0_1, %c0_2] : memref<930x48xbf16, #tpu.memory_space<vmem>>, vector<930x48xbf16>
    %cst = arith.constant dense<0.000000e+00> : vector<1344x48xf32>
    %2 = tpu.matmul %0, %1, %cst {dimension_numbers = #tpu.dot_dimension_numbers<[1], [0], [0], [1], [0, 0, 1, 1], [], []>} : vector<1344x930xbf16>, vector<930x48xbf16>, vector<1344x48xf32> -> vector<1344x48xf32>
    %c0_3 = arith.constant 0 : index
    %c0_4 = arith.constant 0 : index
    %3 = vector.load %arg3[%c0_3, %c0_4] : memref<1x48xf32, #tpu.memory_space<vmem>>, vector<1x48xf32>
    %4 = vector.broadcast %3 : vector<1x48xf32> to vector<1344x48xf32>
    %5 = arith.addf %2, %4 : vector<1344x48xf32>
    %cst_5 = arith.constant 0.000000e+00 : f32
    %6 = vector.broadcast %cst_5 : f32 to vector<1344x48xf32>
    %7 = arith.maximumf %5, %6 : vector<1344x48xf32>
    %c0_6 = arith.constant 0 : index
    %c0_7 = arith.constant 0 : index
    %8 = vector.load %arg4[%c0_6, %c0_7] : memref<1344x48xf32, #tpu.memory_space<vmem>>, vector<1344x48xf32>
    tpu.vector_store %arg4[%c0_6, %c0_7], %7 {strides = array<i32>} : memref<1344x48xf32, #tpu.memory_space<vmem>>, vector<1344x48xf32>,
    return
  }
  func.func @transform_0(%arg0: i32) -> (i32, i32) {
    %c0_i32 = arith.constant 0 : i32
    %c0_i32_0 = arith.constant 0 : i32
    return %arg0, %c0_i32 : i32, i32
  }
  func.func @transform_1(%arg0: i32) -> (i32, i32) {
    %c0_i32 = arith.constant 0 : i32
    %c0_i32_0 = arith.constant 0 : i32
    %c0_i32_1 = arith.constant 0 : i32
    return %c0_i32, %c0_i32_0 : i32, i32
  }
  func.func @transform_2(%arg0: i32) -> (i32, i32) {
    %c0_i32 = arith.constant 0 : i32
    %c0_i32_0 = arith.constant 0 : i32
    %c0_i32_1 = arith.constant 0 : i32
    return %c0_i32, %c0_i32_0 : i32, i32
  }
  func.func @transform_3(%arg0: i32) -> (i32, i32) {
    %c0_i32 = arith.constant 0 : i32
    %c0_i32_0 = arith.constant 0 : i32
    return %arg0, %c0_i32 : i32, i32
  }
}

module attributes {stable_mosaic.version = 11 : i64} {
  func.func @_conv_matmul_kernel(%arg0: i32, %arg1: memref<720x360xbf16, #tpu.memory_space<vmem>>, %arg2: memref<360x54xbf16, #tpu.memory_space<vmem>>, %arg3: memref<1x54xf32, #tpu.memory_space<vmem>>, %arg4: memref<720x54xf32, #tpu.memory_space<vmem>>) attributes {dimension_semantics = [#tpu.dimension_semantics<parallel>], iteration_bounds = array<i64: 1>, scalar_prefetch = 0 : i64, scratch_operands = 0 : i64, tpu.core_type = #tpu.core_type<tc>, window_params = [{transform_indices = @transform_0, window_bounds = array<i64: 720, 360>}, {pipeline_mode = #tpu.pipeline_mode<synchronous>, transform_indices = @transform_1, window_bounds = array<i64: 360, 54>}, {pipeline_mode = #tpu.pipeline_mode<synchronous>, transform_indices = @transform_2, window_bounds = array<i64: 1, 54>}, {transform_indices = @transform_3, window_bounds = array<i64: 720, 54>}]} {
    %c0 = arith.constant 0 : index
    %c0_0 = arith.constant 0 : index
    %0 = vector.load %arg1[%c0, %c0_0] : memref<720x360xbf16, #tpu.memory_space<vmem>>, vector<720x360xbf16>
    %c0_1 = arith.constant 0 : index
    %c0_2 = arith.constant 0 : index
    %1 = vector.load %arg2[%c0_1, %c0_2] : memref<360x54xbf16, #tpu.memory_space<vmem>>, vector<360x54xbf16>
    %cst = arith.constant dense<0.000000e+00> : vector<720x54xf32>
    %2 = tpu.matmul %0, %1, %cst {dimension_numbers = #tpu.dot_dimension_numbers<[1], [0], [0], [1], [0, 0, 1, 1], [], []>} : vector<720x360xbf16>, vector<360x54xbf16>, vector<720x54xf32> -> vector<720x54xf32>
    %c0_3 = arith.constant 0 : index
    %c0_4 = arith.constant 0 : index
    %3 = vector.load %arg3[%c0_3, %c0_4] : memref<1x54xf32, #tpu.memory_space<vmem>>, vector<1x54xf32>
    %4 = vector.broadcast %3 : vector<1x54xf32> to vector<720x54xf32>
    %5 = arith.addf %2, %4 : vector<720x54xf32>
    %cst_5 = arith.constant 0.000000e+00 : f32
    %6 = vector.broadcast %cst_5 : f32 to vector<720x54xf32>
    %7 = arith.maximumf %5, %6 : vector<720x54xf32>
    %c0_6 = arith.constant 0 : index
    %c0_7 = arith.constant 0 : index
    %8 = vector.load %arg4[%c0_6, %c0_7] : memref<720x54xf32, #tpu.memory_space<vmem>>, vector<720x54xf32>
    tpu.vector_store %arg4[%c0_6, %c0_7], %7 {strides = array<i32>} : memref<720x54xf32, #tpu.memory_space<vmem>>, vector<720x54xf32>,
    return
  }
  func.func @transform_0(%arg0: i32) -> (i32, i32) {
    %c0_i32 = arith.constant 0 : i32
    %c0_i32_0 = arith.constant 0 : i32
    return %arg0, %c0_i32 : i32, i32
  }
  func.func @transform_1(%arg0: i32) -> (i32, i32) {
    %c0_i32 = arith.constant 0 : i32
    %c0_i32_0 = arith.constant 0 : i32
    %c0_i32_1 = arith.constant 0 : i32
    return %c0_i32, %c0_i32_0 : i32, i32
  }
  func.func @transform_2(%arg0: i32) -> (i32, i32) {
    %c0_i32 = arith.constant 0 : i32
    %c0_i32_0 = arith.constant 0 : i32
    %c0_i32_1 = arith.constant 0 : i32
    return %c0_i32, %c0_i32_0 : i32, i32
  }
  func.func @transform_3(%arg0: i32) -> (i32, i32) {
    %c0_i32 = arith.constant 0 : i32
    %c0_i32_0 = arith.constant 0 : i32
    return %arg0, %c0_i32 : i32, i32
  }
}

module attributes {stable_mosaic.version = 11 : i64} {
  func.func @_head_kernel(%arg0: i32, %arg1: memref<2x2160xbf16, #tpu.memory_space<vmem>>, %arg2: memref<2160x128xbf16, #tpu.memory_space<vmem>>, %arg3: memref<1x128xf32, #tpu.memory_space<vmem>>, %arg4: memref<128x6xf32, #tpu.memory_space<vmem>>, %arg5: memref<2x6xf32, #tpu.memory_space<vmem>>) attributes {dimension_semantics = [#tpu.dimension_semantics<arbitrary>], iteration_bounds = array<i64: 1>, scalar_prefetch = 0 : i64, scratch_operands = 0 : i64, tpu.core_type = #tpu.core_type<tc>, window_params = [{pipeline_mode = #tpu.pipeline_mode<synchronous>, transform_indices = @transform_0, window_bounds = array<i64: 2, 2160>}, {pipeline_mode = #tpu.pipeline_mode<synchronous>, transform_indices = @transform_1, window_bounds = array<i64: 2160, 128>}, {pipeline_mode = #tpu.pipeline_mode<synchronous>, transform_indices = @transform_2, window_bounds = array<i64: 1, 128>}, {pipeline_mode = #tpu.pipeline_mode<synchronous>, transform_indices = @transform_3, window_bounds = array<i64: 128, 6>}, {pipeline_mode = #tpu.pipeline_mode<synchronous>, transform_indices = @transform_4, window_bounds = array<i64: 2, 6>}]} {
    %c0 = arith.constant 0 : index
    %c0_0 = arith.constant 0 : index
    %0 = vector.load %arg1[%c0, %c0_0] : memref<2x2160xbf16, #tpu.memory_space<vmem>>, vector<2x2160xbf16>
    %c0_1 = arith.constant 0 : index
    %c0_2 = arith.constant 0 : index
    %1 = vector.load %arg2[%c0_1, %c0_2] : memref<2160x128xbf16, #tpu.memory_space<vmem>>, vector<2160x128xbf16>
    %cst = arith.constant dense<0.000000e+00> : vector<2x128xf32>
    %2 = tpu.matmul %0, %1, %cst {dimension_numbers = #tpu.dot_dimension_numbers<[1], [0], [0], [1], [0, 0, 1, 1], [], []>} : vector<2x2160xbf16>, vector<2160x128xbf16>, vector<2x128xf32> -> vector<2x128xf32>
    %c0_3 = arith.constant 0 : index
    %c0_4 = arith.constant 0 : index
    %3 = vector.load %arg3[%c0_3, %c0_4] : memref<1x128xf32, #tpu.memory_space<vmem>>, vector<1x128xf32>
    %4 = vector.broadcast %3 : vector<1x128xf32> to vector<2x128xf32>
    %5 = arith.addf %2, %4 : vector<2x128xf32>
    %cst_5 = arith.constant 0.000000e+00 : f32
    %6 = vector.broadcast %cst_5 : f32 to vector<2x128xf32>
    %7 = arith.maximumf %5, %6 : vector<2x128xf32>
    %c0_6 = arith.constant 0 : index
    %c0_7 = arith.constant 0 : index
    %8 = vector.load %arg4[%c0_6, %c0_7] : memref<128x6xf32, #tpu.memory_space<vmem>>, vector<128x6xf32>
    %cst_8 = arith.constant dense<0.000000e+00> : vector<2x6xf32>
    %9 = tpu.matmul %7, %8, %cst_8 {dimension_numbers = #tpu.dot_dimension_numbers<[1], [0], [0], [1], [0, 0, 1, 1], [], []>} : vector<2x128xf32>, vector<128x6xf32>, vector<2x6xf32> -> vector<2x6xf32>
    %c0_9 = arith.constant 0 : index
    %c0_10 = arith.constant 0 : index
    %10 = vector.load %arg5[%c0_9, %c0_10] : memref<2x6xf32, #tpu.memory_space<vmem>>, vector<2x6xf32>
    tpu.vector_store %arg5[%c0_9, %c0_10], %9 {strides = array<i32>} : memref<2x6xf32, #tpu.memory_space<vmem>>, vector<2x6xf32>,
    return
  }
  func.func @transform_0(%arg0: i32) -> (i32, i32) {
    %c0_i32 = arith.constant 0 : i32
    %c0_i32_0 = arith.constant 0 : i32
    %c0_i32_1 = arith.constant 0 : i32
    return %c0_i32, %c0_i32_0 : i32, i32
  }
  func.func @transform_1(%arg0: i32) -> (i32, i32) {
    %c0_i32 = arith.constant 0 : i32
    %c0_i32_0 = arith.constant 0 : i32
    %c0_i32_1 = arith.constant 0 : i32
    return %c0_i32, %c0_i32_0 : i32, i32
  }
  func.func @transform_2(%arg0: i32) -> (i32, i32) {
    %c0_i32 = arith.constant 0 : i32
    %c0_i32_0 = arith.constant 0 : i32
    %c0_i32_1 = arith.constant 0 : i32
    return %c0_i32, %c0_i32_0 : i32, i32
  }
  func.func @transform_3(%arg0: i32) -> (i32, i32) {
    %c0_i32 = arith.constant 0 : i32
    %c0_i32_0 = arith.constant 0 : i32
    %c0_i32_1 = arith.constant 0 : i32
    return %c0_i32, %c0_i32_0 : i32, i32
  }
  func.func @transform_4(%arg0: i32) -> (i32, i32) {
    %c0_i32 = arith.constant 0 : i32
    %c0_i32_0 = arith.constant 0 : i32
    %c0_i32_1 = arith.constant 0 : i32
    return %c0_i32, %c0_i32_0 : i32, i32
  }
}

</mosaic_0001>

<bundles_post_ra>
// kernel: forward.3
= control target key start
LH: loop header
LB: loop body
LE: loop exit
PB: predicated region body
PF: predicated region fallthrough
CT: control target
= control target key end

     0   :  { %s9927_s12 = smov 0   ;;  %s11725_s0 = inlined_call_operand.vmem [shape: bf16[2688,930], index: 0, kind: input, shape index: {}]   ;;  %s11726_s1 = inlined_call_operand.vmem [shape: bf16[930,48], index: 1, kind: input, shape index: {}]   ;;  %s11727_s2 = inlined_call_operand.vmem [shape: f32[1,48], index: 2, kind: input, shape index: {}]   ;;  %s11728_s3 = inlined_call_operand.vmem [shape: f32[2688,48], index: 3, kind: output, shape index: {}]  }
   0x1 LB: > { %s8071_s13 = sadd.s32 4294967295, %s9904_s12   ;;  %p8075_p0 = scmp.ge.s32.totalorder %s9904_s12, 1  ;;  %s9904_s12 = sphi %s9927_s12, %s13_s12  }
   0x2   : > { %p139_p1 = scmp.lt.s32.totalorder %s9904_s12, 3 }
   0x4   : > { %p140_p2 = pnand %p8075_p0, %p139_p1 }
   0x6   : > { %143 = sbr.rel (%p140_p2) target bundleno = 1635 (0x663), region = 32 }
   0xd   : > { %v9835_v0 = vld [vmem:[%s11726_s1] sm:$0xff]   ;;  %v9906_v1 = vmov 0   ;;  %v9837_v3 = vld [vmem:[%s11726_s1 + $0x8] sm:$0xff]   ;;  %v9839_v5 = vld [vmem:[%s11726_s1 + $0x10] sm:$0xff]   ;;  %s164_s5 = smul.u32 168, %s8071_s13  ;;  %vm4854_vm0 = vcmask 1040384  }
   0xe   : > { %4858 = vmatprep.subr.bf16.mxu1 %v9906_v1  ;;  %6268 = vmatprep.subr.bf16.mxu0 %v9906_v1  ;;  %v9836_v2 = vld [vmem:[%s11726_s1 + $0x100] sm:$0xff]   ;;  %v9838_v4 = vld [vmem:[%s11726_s1 + $0x108] sm:$0xff]   ;;  %v9840_v6 = vld [vmem:[%s11726_s1 + $0x110] sm:$0xff]   ;;  %vm4601_vm1 = vcmask 277504   ;;  %vm7846_vm2 = vcmask 392192  }
   0xf   : > { %4859 = vmatpush1.bf16.msra.mxu1 %v9835_v0  ;;  %6269 = vmatpush1.bf16.msra.mxu0 %v9836_v2  ;;  %v9841_v7 = vld [vmem:[%s11726_s1 + $0x18] sm:$0xff]   ;;  %v9843_v9 = vld [vmem:[%s11726_s1 + $0x20] sm:$0xff]   ;;  %v9845_v11 = vld [vmem:[%s11726_s1 + $0x28] sm:$0xff]   ;;  %p165_p3 = scmp.lt.s32.totalorder %s164_s5, 335 }
  0x10   : > { %4860 = vmatprep.subr.bf16.mxu1 %v9906_v1  ;;  %6270 = vmatprep.subr.bf16.mxu0 %v9906_v1  ;;  %v9842_v8 = vld [vmem:[%s11726_s1 + $0x118] sm:$0xff]   ;;  %v9844_v10 = vld [vmem:[%s11726_s1 + $0x120] sm:$0xff]   ;;  %v9846_v12 = vld [vmem:[%s11726_s1 + $0x128] sm:$0xff]  }
  0x11   : > { %v9847_v13 = vld [vmem:[%s11726_s1 + $0x30] sm:$0xff]   ;;  %s11810_s5 = smov (!%p165_p3, %s164_s5), 335  ;;  %v9849_v15 = vld [vmem:[%s11726_s1 + $0x38] sm:$0xff]   ;;  %v9851_v17 = vld [vmem:[%s11726_s1 + $0x40] sm:$0xff]  }
  0x12   : > { %v9848_v14 = vld [vmem:[%s11726_s1 + $0x130] sm:$0xff]   ;;  %s8897_s19 = sshll.u32 %s11810_s5, 5  ;;  %v9850_v16 = vld [vmem:[%s11726_s1 + $0x138] sm:$0xff]   ;;  %v9852_v18 = vld [vmem:[%s11726_s1 + $0x140] sm:$0xff]   ;;  %s8078_s16 = sshll.u32 %s11810_s5, 3 }
  0x13   : > { %4861 = vmatpush1.bf16.msra.mxu1 %v9837_v3  ;;  %6271 = vmatpush1.bf16.msra.mxu0 %v9838_v4  ;;  %s10007_s24 = scalar_lea.vmem %s11725_s0, %s8897_s19  ;;  %v9853_v24 = vld [vmem:[%s11726_s1 + $0x48] sm:$0xff]   ;;  %v9855_v27 = vld [vmem:[%s11726_s1 + $0x50] sm:$0xff]   ;;  %v9857_v29 = vld [vmem:[%s11726_s1 + $0x58] sm:$0xff]   ;;  %s10848_s5 = scalar_lea.vmem %s11728_s3, %s8078_s16 }
  0x14   : > { %4862 = vmatprep.subr.bf16.mxu1 %v9906_v1  ;;  %6272 = vmatprep.subr.bf16.mxu0 %v9906_v1  ;;  %v10018_v19 = vld [vmem:[%s10007_s24] sm:$0xff]  ;;  %v10024_v21 = vld [vmem:[%s10007_s24 + $0x10] sm:$0xff]  ;;  %v9854_v26 = vld [vmem:[%s11726_s1 + $0x148] sm:$0xff]  }
  0x15   : > { %v10021_v20 = vld [vmem:[%s10007_s24 + $0x20] sm:$0xff]  ;;  %v10029_v23 = vld [vmem:[%s10007_s24 + $0x30] sm:$0xff]  ;;  %v9858_v30 = vld [vmem:[%s11726_s1 + $0x158] sm:$0xff]  }
  0x16   : > { %v8081_v22 = vcombine.high %v10018_v19, %v10021_v20  ;;  %v8085_v25 = vcombine.high %v10024_v21, %v10029_v23  ;;  %v9856_v28 = vld [vmem:[%s11726_s1 + $0x150] sm:$0xff]   ;;  %v9859_v31 = vld [vmem:[%s11726_s1 + $0x60] sm:$0xff]   ;;  %v9861_v33 = vld [vmem:[%s11726_s1 + $0x68] sm:$0xff]   ;;  %v8080_v42 = vcombine.low %v10018_v19, %v10021_v20  ;;  %v8084_v46 = vcombine.low %v10024_v21, %v10029_v23 }
  0x17   : > { %4863 = vmatpush1.bf16.msra.mxu1 %v9839_v5  ;;  %6273 = vmatpush1.bf16.msra.mxu0 %v9840_v6  ;;  %v9860_v32 = vld [vmem:[%s11726_s1 + $0x160] sm:$0xff]   ;;  %v9862_v34 = vld [vmem:[%s11726_s1 + $0x168] sm:$0xff]   ;;  %v9863_v35 = vld [vmem:[%s11726_s1 + $0x70] sm:$0xff]  }
  0x18   : > { %4864 = vmatprep.subr.bf16.mxu1 %v9906_v1  ;;  %6274 = vmatprep.subr.bf16.mxu0 %v9906_v1  ;;  %v9864_v36 = vld [vmem:[%s11726_s1 + $0x170] sm:$0xff]   ;;  %v9865_v37 = vld [vmem:[%s11726_s1 + $0x78] sm:$0xff]   ;;  %v186_v39 = vld [vmem:[%s10007_s24 + $0x40] sm:$0xff] }
  0x19   : > { %4890 = vmatprep.mubr.bf16.mxu1 %v8081_v22  ;;  %6300 = vmatprep.mubr.bf16.mxu0 %v8085_v25  ;;  %v9866_v38 = vld [vmem:[%s11726_s1 + $0x178] sm:$0xff]   ;;  %v9867_v40 = vld [vmem:[%s11726_s1 + $0x80] sm:$0xff]   ;;  %v188_v44 = vld [vmem:[%s10007_s24 + $0x50] sm:$0xff] }
  0x1a   : > { %v190_v41 = vld [vmem:[%s10007_s24 + $0x60] sm:$0xff]  ;;  %v192_v45 = vld [vmem:[%s10007_s24 + $0x70] sm:$0xff]  ;;  %v9869_v53 = vld [vmem:[%s11726_s1 + $0x88] sm:$0xff]  }
  0x1b   : > { %4865 = vmatpush1.bf16.msra.mxu1 %v9841_v7  ;;  %6275 = vmatpush1.bf16.msra.mxu0 %v9842_v8  ;;  %v9868_v43 = vld [vmem:[%s11726_s1 + $0x180] sm:$0xff]   ;;  %v8089_v47 = vcombine.high %v186_v39, %v190_v41  ;;  %v8093_v48 = vcombine.high %v188_v44, %v192_v45  ;;  %v196_v51 = vld [vmem:[%s10007_s24 + $0x90] sm:$0xff]  ;;  %v9870_v54 = vld [vmem:[%s11726_s1 + $0x188] sm:$0xff]   ;;  %v8088_v55 = vcombine.low %v186_v39, %v190_v41 }
  0x1c   : > { %4866 = vmatprep.subr.bf16.mxu1 %v9906_v1  ;;  %6276 = vmatprep.subr.bf16.mxu0 %v9906_v1  ;;  %v194_v49 = vld [vmem:[%s10007_s24 + $0x80] sm:$0xff]  ;;  %v200_v52 = vld [vmem:[%s10007_s24 + $0xb0] sm:$0xff]  ;;  %v8092_v57 = vcombine.low %v188_v44, %v192_v45  ;;  %v9873_v2 = vld [vmem:[%s11726_s1 + $0x98] sm:$0xff]  }
  0x1d   : > { %v198_v50 = vld [vmem:[%s10007_s24 + $0xa0] sm:$0xff]  ;;  %v9871_v56 = vld [vmem:[%s11726_s1 + $0x90] sm:$0xff]   ;;  %v8101_v60 = vcombine.high %v196_v51, %v200_v52  ;;  %v8100_v4 = vcombine.low %v196_v51, %v200_v52 }
  0x1e   : > { %v8097_v58 = vcombine.high %v194_v49, %v198_v50  ;;  %v9872_v59 = vld [vmem:[%s11726_s1 + $0x190] sm:$0xff]   ;;  %v202_v61 = vld [vmem:[%s10007_s24 + $0xc0] sm:$0xff]  ;;  %v8096_v3 = vcombine.low %v194_v49, %v198_v50 }
  0x1f   : > { %4867 = vmatpush1.bf16.msra.mxu1 %v9843_v9  ;;  %6277 = vmatpush1.bf16.msra.mxu0 %v9844_v10  ;;  %v206_v62 = vld [vmem:[%s10007_s24 + $0xe0] sm:$0xff]  ;;  %v204_v63 = vld [vmem:[%s10007_s24 + $0xd0] sm:$0xff] }
  0x20   : > { %4868 = vmatprep.subr.bf16.mxu1 %v9906_v1  ;;  %6278 = vmatprep.subr.bf16.mxu0 %v9906_v1  ;;  %v208_v0 = vld [vmem:[%s10007_s24 + $0xf0] sm:$0xff]  ;;  %v8105_v5 = vcombine.high %v202_v61, %v206_v62  ;;  %v210_v7 = vld [vmem:[%s10007_s24 + $0x100] sm:$0xff] }
  0x21   : > { %v8109_v6 = vcombine.high %v204_v63, %v208_v0  ;;  %v214_v8 = vld [vmem:[%s10007_s24 + $0x120] sm:$0xff]  ;;  %v212_v9 = vld [vmem:[%s10007_s24 + $0x110] sm:$0xff] }
  0x22   : > { %v216_v10 = vld [vmem:[%s10007_s24 + $0x130] sm:$0xff]  ;;  %v8112_v19 = vcombine.low %v210_v7, %v214_v8  ;;  %v226_v23 = vld [vmem:[%s10007_s24 + $0x180] sm:$0xff] }
  0x23   : > { %4869 = vmatpush1.bf16.msra.mxu1 %v9845_v11  ;;  %6279 = vmatpush1.bf16.msra.mxu0 %v9846_v12  ;;  %v8104_v11 = vcombine.low %v202_v61, %v206_v62  ;;  %v8108_v12 = vcombine.low %v204_v63, %v208_v0  ;;  %v8116_v20 = vcombine.low %v212_v9, %v216_v10  ;;  %v228_v25 = vld [vmem:[%s10007_s24 + $0x190] sm:$0xff]  ;;  %v246_v41 = vld [vmem:[%s10007_s24 + $0x220] sm:$0xff] }
  0x24   : > { %4870 = vmatprep.subr.bf16.mxu1 %v9906_v1  ;;  %6280 = vmatprep.subr.bf16.mxu0 %v9906_v1  ;;  %v250_v49 = vld [vmem:[%s10007_s24 + $0x240] sm:$0xff]  ;;  %v252_v51 = vld [vmem:[%s10007_s24 + $0x250] sm:$0xff] }
  0x25   : > { %v254_v50 = vld [vmem:[%s10007_s24 + $0x260] sm:$0xff]  ;;  %v256_v52 = vld [vmem:[%s10007_s24 + $0x270] sm:$0xff] }
  0x26   : > { %v8152_v61 = vcombine.low %v250_v49, %v254_v50  ;;  %v8156_v62 = vcombine.low %v252_v51, %v256_v52 }
  0x27   : > { %4871 = vmatpush1.bf16.msra.mxu1 %v9847_v13  ;;  %6281 = vmatpush1.bf16.msra.mxu0 %v9848_v14  ;;  %v8113_v13 = vcombine.high %v210_v7, %v214_v8  ;;  %v8117_v14 = vcombine.high %v212_v9, %v216_v10  ;;  %v9876_v10 = vld [vmem:[%s11726_s1 + $0xa8] sm:$0xff]  }
  0x28   : > { %4872 = vmatprep.subr.bf16.mxu1 %v9906_v1  ;;  %6282 = vmatprep.subr.bf16.mxu0 %v9906_v1 }
  0x2b   : > { %4873 = vmatpush1.bf16.msra.mxu1 %v9849_v15  ;;  %6283 = vmatpush1.bf16.msra.mxu0 %v9850_v16  ;;  %v218_v15 = vld [vmem:[%s10007_s24 + $0x140] sm:$0xff] }
  0x2c   : > { %4874 = vmatprep.subr.bf16.mxu1 %v9906_v1  ;;  %6284 = vmatprep.subr.bf16.mxu0 %v9906_v1  ;;  %v222_v16 = vld [vmem:[%s10007_s24 + $0x160] sm:$0xff] }
  0x2d   : > { %v8121_v21 = vcombine.high %v218_v15, %v222_v16 }
  0x2f   : > { %4875 = vmatpush1.bf16.msra.mxu1 %v9851_v17  ;;  %6285 = vmatpush1.bf16.msra.mxu0 %v9852_v18  ;;  %v220_v17 = vld [vmem:[%s10007_s24 + $0x150] sm:$0xff] }
  0x30   : > { %4876 = vmatprep.subr.bf16.mxu1 %v9906_v1  ;;  %6286 = vmatprep.subr.bf16.mxu0 %v9906_v1  ;;  %v224_v18 = vld [vmem:[%s10007_s24 + $0x170] sm:$0xff] }
  0x31   : > { %v8125_v22 = vcombine.high %v220_v17, %v224_v18 }
  0x33   : > { %4877 = vmatpush1.bf16.msra.mxu1 %v9853_v24  ;;  %6287 = vmatpush1.bf16.msra.mxu0 %v9854_v26  ;;  %v230_v24 = vld [vmem:[%s10007_s24 + $0x1a0] sm:$0xff]  ;;  %v232_v26 = vld [vmem:[%s10007_s24 + $0x1b0] sm:$0xff] }
  0x34   : > { %4878 = vmatprep.subr.bf16.mxu1 %v9906_v1  ;;  %6288 = vmatprep.subr.bf16.mxu0 %v9906_v1 }
  0x37   : > { %4879 = vmatpush1.bf16.msra.mxu1 %v9855_v27  ;;  %6289 = vmatpush1.bf16.msra.mxu0 %v9856_v28  ;;  %v8120_v27 = vcombine.low %v218_v15, %v222_v16  ;;  %v8124_v28 = vcombine.low %v220_v17, %v224_v18 }
  0x38   : > { %4880 = vmatprep.subr.bf16.mxu1 %v9906_v1  ;;  %6290 = vmatprep.subr.bf16.mxu0 %v9906_v1 }
  0x3b   : > { %4881 = vmatpush1.bf16.msra.mxu1 %v9857_v29  ;;  %6291 = vmatpush1.bf16.msra.mxu0 %v9858_v30  ;;  %v8129_v29 = vcombine.high %v226_v23, %v230_v24  ;;  %v8133_v30 = vcombine.high %v228_v25, %v232_v26 }
  0x3c   : > { %4882 = vmatprep.subr.bf16.mxu1 %v9906_v1  ;;  %6292 = vmatprep.subr.bf16.mxu0 %v9906_v1 }
  0x3f   : > { %4883 = vmatpush1.bf16.msra.mxu1 %v9859_v31  ;;  %6293 = vmatpush1.bf16.msra.mxu0 %v9860_v32  ;;  %v9874_v31 = vld [vmem:[%s11726_s1 + $0xa0] sm:$0xff]  }
  0x40   : > { %4884 = vmatprep.subr.bf16.mxu1 %v9906_v1  ;;  %6294 = vmatprep.subr.bf16.mxu0 %v9906_v1  ;;  %v234_v32 = vld [vmem:[%s10007_s24 + $0x1c0] sm:$0xff] }
  0x43   : > { %4885 = vmatpush1.bf16.msra.mxu1 %v9861_v33  ;;  %6295 = vmatpush1.bf16.msra.mxu0 %v9862_v34  ;;  %v238_v33 = vld [vmem:[%s10007_s24 + $0x1e0] sm:$0xff]  ;;  %v236_v34 = vld [vmem:[%s10007_s24 + $0x1d0] sm:$0xff] }
  0x44   : > { %4886 = vmatprep.subr.bf16.mxu1 %v9906_v1  ;;  %6296 = vmatprep.subr.bf16.mxu0 %v9906_v1  ;;  %v8136_v44 = vcombine.low %v234_v32, %v238_v33 }
  0x47   : > { %4887 = vmatpush1.bf16.msra.mxu1 %v9863_v35  ;;  %6297 = vmatpush1.bf16.msra.mxu0 %v9864_v36  ;;  %v240_v35 = vld [vmem:[%s10007_s24 + $0x1f0] sm:$0xff]  ;;  %v8128_v36 = vcombine.low %v226_v23, %v230_v24 }
  0x48   : > { %4888 = vmatprep.subr.bf16.mxu1 %v9906_v1  ;;  %6298 = vmatprep.subr.bf16.mxu0 %v9906_v1  ;;  %v8141_v39 = vcombine.high %v236_v34, %v240_v35  ;;  %v8140_v45 = vcombine.low %v236_v34, %v240_v35  ;;  %v298_v35 = vld [vmem:[%s10007_s24 + $0x3c0] sm:$0xff] }
  0x4b   : > { %4889 = vmatpush1.bf16.msra.mxu1 %v9865_v37  ;;  %6299 = vmatpush1.bf16.msra.mxu0 %v9866_v38  ;;  %v8132_v37 = vcombine.low %v228_v25, %v232_v26  ;;  %v8137_v38 = vcombine.high %v234_v32, %v238_v33 }
  0x4c   : > { %5563 = vmatprep.subr.bf16.mxu1 %v9906_v1  ;;  %6973 = vmatprep.subr.bf16.mxu0 %v9906_v1 }
  0x4e   : > { %4891 = vmatmul.mubr.bf16.vlgmr.msra.gmra.mrb[0].mxu1 %v8080_v42  ;;  %6301 = vmatmul.mubr.bf16.vlgmr.msra.gmra.mrb[0].mxu0 %v8084_v46  ;;  %v244_v42 = vld [vmem:[%s10007_s24 + $0x210] sm:$0xff] }
  0x4f   : > { %5564 = vmatpush1.bf16.msra.mxu1 %v9867_v40  ;;  %6974 = vmatpush1.bf16.msra.mxu0 %v9868_v43  ;;  %v242_v40 = vld [vmem:[%s10007_s24 + $0x200] sm:$0xff]  ;;  %v248_v43 = vld [vmem:[%s10007_s24 + $0x230] sm:$0xff] }
  0x50   : > { %4898 = vmatprep.mubr.bf16.mxu1 %v8089_v47  ;;  %6308 = vmatprep.mubr.bf16.mxu0 %v8093_v48  ;;  %v8145_v46 = vcombine.high %v242_v40, %v246_v41  ;;  %v8149_v47 = vcombine.high %v244_v42, %v248_v43  ;;  %v9875_v48 = vld [vmem:[%s11726_s1 + $0x198] sm:$0xff]  }
  0x51   : > { %5565 = vmatprep.subr.bf16.mxu1 %v9906_v1  ;;  %6975 = vmatprep.subr.bf16.mxu0 %v9906_v1 }
  0x53   : > { %5566 = vmatpush1.bf16.msra.mxu1 %v9869_v53  ;;  %6976 = vmatpush1.bf16.msra.mxu0 %v9870_v54  ;;  %v8144_v53 = vcombine.low %v242_v40, %v246_v41  ;;  %v8148_v54 = vcombine.low %v244_v42, %v248_v43  ;;  %v306_v43 = vld [vmem:[%s10007_s24 + $0x400] sm:$0xff] }
  0x54   : > { %5567 = vmatprep.subr.bf16.mxu1 %v9906_v1  ;;  %6977 = vmatprep.subr.bf16.mxu0 %v9906_v1 }
  0x56   : > { %4899 = vmatmul.mubr.bf16.gmra.mrb[4].mxu1 %v8088_v55  ;;  %6309 = vmatmul.mubr.bf16.gmra.mrb[4].mxu0 %v8092_v57  ;;  %v8153_v55 = vcombine.high %v250_v49, %v254_v50  ;;  %v258_v57 = vld [vmem:[%s10007_s24 + $0x280] sm:$0xff] }
  0x57   : > { %4906 = vmatprep.mubr.bf16.mxu1 %v8097_v58  ;;  %6316 = vmatprep.mubr.bf16.mxu0 %v8101_v60  ;;  %v262_v58 = vld [vmem:[%s10007_s24 + $0x2a0] sm:$0xff]  ;;  %v264_v60 = vld [vmem:[%s10007_s24 + $0x2b0] sm:$0xff] }
  0x58   : > { %5568 = vmatpush1.bf16.msra.mxu1 %v9871_v56  ;;  %6978 = vmatpush1.bf16.msra.mxu0 %v9872_v59  ;;  %v8157_v56 = vcombine.high %v252_v51, %v256_v52  ;;  %v260_v59 = vld [vmem:[%s10007_s24 + $0x290] sm:$0xff]  ;;  %v8161_v63 = vcombine.high %v258_v57, %v262_v58  ;;  %v9877_v51 = vld [vmem:[%s11726_s1 + $0x1a0] sm:$0xff]  }
  0x59   : > { %5569 = vmatprep.subr.bf16.mxu1 %v9906_v1  ;;  %6979 = vmatprep.subr.bf16.mxu0 %v9906_v1  ;;  %v8165_v0 = vcombine.high %v260_v59, %v264_v60  ;;  %v8164_v7 = vcombine.low %v260_v59, %v264_v60  ;;  %v9878_v52 = vld [vmem:[%s11726_s1 + $0xb0] sm:$0xff]  }
  0x5c   : > { %5570 = vmatpush1.bf16.msra.mxu1 %v9873_v2  ;;  %6980 = vmatpush1.bf16.msra.mxu0 %v9875_v48  ;;  %v266_v2 = vld [vmem:[%s10007_s24 + $0x2c0] sm:$0xff] }
  0x5d   : > { %5571 = vmatprep.subr.bf16.mxu1 %v9906_v1  ;;  %6981 = vmatprep.subr.bf16.mxu0 %v9906_v1 }
  0x5e   : > { %4907 = vmatmul.mubr.bf16.gmra.mrb[8].mxu1 %v8096_v3  ;;  %6317 = vmatmul.mubr.bf16.gmra.mrb[8].mxu0 %v8100_v4  ;;  %v270_v3 = vld [vmem:[%s10007_s24 + $0x2e0] sm:$0xff]  ;;  %v268_v4 = vld [vmem:[%s10007_s24 + $0x2d0] sm:$0xff] }
  0x5f   : > { %4914 = vmatprep.mubr.bf16.mxu1 %v8105_v5  ;;  %6324 = vmatprep.mubr.bf16.mxu0 %v8109_v6  ;;  %v272_v5 = vld [vmem:[%s10007_s24 + $0x2f0] sm:$0xff]  ;;  %v8160_v6 = vcombine.low %v258_v57, %v262_v58  ;;  %v8169_v8 = vcombine.high %v266_v2, %v270_v3  ;;  %v8168_v15 = vcombine.low %v266_v2, %v270_v3 }
  0x60   : > { %5572 = vmatpush1.bf16.msra.mxu1 %v9874_v31  ;;  %v8173_v9 = vcombine.high %v268_v4, %v272_v5  ;;  %v8172_v16 = vcombine.low %v268_v4, %v272_v5  ;;  %6982 = vmatpush1.bf16.msra.mxu0 %v9877_v51  ;;  %v376_v51 = vld [vmem:[%s10007_s24 + $0x630] sm:$0xff] }
  0x61   : > { %5573 = vmatprep.subr.bf16.mxu1 %v9906_v1  ;;  %6983 = vmatprep.subr.bf16.mxu0 %v9906_v1 }
  0x64   : > { %5574 = vmatpush1.bf16.msra.mxu1 %v9876_v10 }
  0x65   : > { %5575 = vmatprep.subr.bf16.mxu1 %v9906_v1 }
  0x66   : > { %4915 = vmatmul.mubr.bf16.gmra.mrb[12].mxu1 %v8104_v11  ;;  %6325 = vmatmul.mubr.bf16.gmra.mrb[12].mxu0 %v8108_v12  ;;  %v274_v11 = vld [vmem:[%s10007_s24 + $0x300] sm:$0xff] }
  0x67   : > { %4922 = vmatprep.mubr.bf16.mxu1 %v8113_v13  ;;  %6332 = vmatprep.mubr.bf16.mxu0 %v8117_v14  ;;  %v278_v12 = vld [vmem:[%s10007_s24 + $0x320] sm:$0xff]  ;;  %v276_v13 = vld [vmem:[%s10007_s24 + $0x310] sm:$0xff] }
  0x68   : > { %v280_v14 = vld [vmem:[%s10007_s24 + $0x330] sm:$0xff]  ;;  %v8177_v17 = vcombine.high %v274_v11, %v278_v12  ;;  %v8176_v23 = vcombine.low %v274_v11, %v278_v12  ;;  %5576 = vmatpush1.bf16.msra.mxu1 %v9878_v52 }
  0x69   : > { %v8181_v18 = vcombine.high %v276_v13, %v280_v14  ;;  %v8180_v24 = vcombine.low %v276_v13, %v280_v14  ;;  %5577 = vmatprep.subr.bf16.mxu1 %v9906_v1  ;;  %v338_v14 = vld [vmem:[%s10007_s24 + $0x500] sm:$0xff] }
  0x6e   : > { %4923 = vmatmul.mubr.bf16.gmra.mrb[16].mxu1 %v8112_v19  ;;  %6333 = vmatmul.mubr.bf16.gmra.mrb[16].mxu0 %v8116_v20  ;;  %v282_v19 = vld [vmem:[%s10007_s24 + $0x340] sm:$0xff] }
  0x6f   : > { %4930 = vmatprep.mubr.bf16.mxu1 %v8121_v21  ;;  %6340 = vmatprep.mubr.bf16.mxu0 %v8125_v22  ;;  %v286_v20 = vld [vmem:[%s10007_s24 + $0x360] sm:$0xff]  ;;  %v284_v21 = vld [vmem:[%s10007_s24 + $0x350] sm:$0xff] }
  0x70   : > { %v288_v22 = vld [vmem:[%s10007_s24 + $0x370] sm:$0xff]  ;;  %v8185_v25 = vcombine.high %v282_v19, %v286_v20  ;;  %v8184_v31 = vcombine.low %v282_v19, %v286_v20 }
  0x71   : > { %v8189_v26 = vcombine.high %v284_v21, %v288_v22  ;;  %v8188_v32 = vcombine.low %v284_v21, %v288_v22  ;;  %v346_v22 = vld [vmem:[%s10007_s24 + $0x540] sm:$0xff] }
  0x76   : > { %4931 = vmatmul.mubr.bf16.gmra.mrb[20].mxu1 %v8120_v27  ;;  %6341 = vmatmul.mubr.bf16.gmra.mrb[20].mxu0 %v8124_v28  ;;  %v290_v27 = vld [vmem:[%s10007_s24 + $0x380] sm:$0xff] }
  0x77   : > { %4938 = vmatprep.mubr.bf16.mxu1 %v8129_v29  ;;  %6348 = vmatprep.mubr.bf16.mxu0 %v8133_v30  ;;  %v294_v28 = vld [vmem:[%s10007_s24 + $0x3a0] sm:$0xff]  ;;  %v292_v29 = vld [vmem:[%s10007_s24 + $0x390] sm:$0xff] }
  0x78   : > { %v296_v30 = vld [vmem:[%s10007_s24 + $0x3b0] sm:$0xff]  ;;  %v8193_v33 = vcombine.high %v290_v27, %v294_v28 }
  0x79   : > { %v8197_v34 = vcombine.high %v292_v29, %v296_v30  ;;  %v8196_v40 = vcombine.low %v292_v29, %v296_v30  ;;  %v9879_v30 = vld [vmem:[%s11726_s1 + $0xb8] sm:$0xff]  }
  0x7a   : > { %5578 = vmatpush1.bf16.msra.mxu1 %v9879_v30 }
  0x7b   : > { %5579 = vmatprep.subr.bf16.mxu1 %v9906_v1 }
  0x7e   : > { %4939 = vmatmul.mubr.bf16.gmra.mrb[24].mxu1 %v8128_v36  ;;  %6349 = vmatmul.mubr.bf16.gmra.mrb[24].mxu0 %v8132_v37  ;;  %v302_v36 = vld [vmem:[%s10007_s24 + $0x3e0] sm:$0xff]  ;;  %v300_v37 = vld [vmem:[%s10007_s24 + $0x3d0] sm:$0xff] }
  0x7f   : > { %4946 = vmatprep.mubr.bf16.mxu1 %v8137_v38  ;;  %6356 = vmatprep.mubr.bf16.mxu0 %v8141_v39  ;;  %v304_v38 = vld [vmem:[%s10007_s24 + $0x3f0] sm:$0xff]  ;;  %v8192_v39 = vcombine.low %v290_v27, %v294_v28  ;;  %v8201_v41 = vcombine.high %v298_v35, %v302_v36 }
  0x80   : > { %v8205_v42 = vcombine.high %v300_v37, %v304_v38  ;;  %v8204_v48 = vcombine.low %v300_v37, %v304_v38 }
  0x86   : > { %4947 = vmatmul.mubr.bf16.gmra.mrb[28].mxu1 %v8136_v44  ;;  %6357 = vmatmul.mubr.bf16.gmra.mrb[28].mxu0 %v8140_v45  ;;  %v310_v44 = vld [vmem:[%s10007_s24 + $0x420] sm:$0xff]  ;;  %v308_v45 = vld [vmem:[%s10007_s24 + $0x410] sm:$0xff] }
  0x87   : > { %4954 = vmatprep.mubr.bf16.mxu1 %v8145_v46  ;;  %6364 = vmatprep.mubr.bf16.mxu0 %v8149_v47  ;;  %v312_v46 = vld [vmem:[%s10007_s24 + $0x430] sm:$0xff]  ;;  %v8200_v47 = vcombine.low %v298_v35, %v302_v36  ;;  %v8209_v49 = vcombine.high %v306_v43, %v310_v44  ;;  %v8208_v57 = vcombine.low %v306_v43, %v310_v44 }
  0x88   : > { %v8213_v50 = vcombine.high %v308_v45, %v312_v46  ;;  %v8212_v58 = vcombine.low %v308_v45, %v312_v46 }
  0x8e   : > { %4955 = vmatmul.mubr.bf16.gmra.mrb[32].mxu1 %v8144_v53  ;;  %6365 = vmatmul.mubr.bf16.gmra.mrb[32].mxu0 %v8148_v54  ;;  %v314_v53 = vld [vmem:[%s10007_s24 + $0x440] sm:$0xff] }
  0x8f   : > { %4962 = vmatprep.mubr.bf16.mxu1 %v8153_v55  ;;  %6372 = vmatprep.mubr.bf16.mxu0 %v8157_v56  ;;  %v318_v54 = vld [vmem:[%s10007_s24 + $0x460] sm:$0xff]  ;;  %v316_v55 = vld [vmem:[%s10007_s24 + $0x450] sm:$0xff] }
  0x90   : > { %v320_v56 = vld [vmem:[%s10007_s24 + $0x470] sm:$0xff]  ;;  %v8217_v59 = vcombine.high %v314_v53, %v318_v54  ;;  %v8216_v2 = vcombine.low %v314_v53, %v318_v54 }
  0x91   : > { %v8221_v60 = vcombine.high %v316_v55, %v320_v56  ;;  %v8220_v3 = vcombine.low %v316_v55, %v320_v56  ;;  %v378_v56 = vld [vmem:[%s10007_s24 + $0x640] sm:$0xff] }
  0x96   : > { %4963 = vmatmul.mubr.bf16.gmra.mrb[36].mxu1 %v8152_v61  ;;  %6373 = vmatmul.mubr.bf16.gmra.mrb[36].mxu0 %v8156_v62  ;;  %v322_v61 = vld [vmem:[%s10007_s24 + $0x480] sm:$0xff] }
  0x97   : > { %4970 = vmatprep.mubr.bf16.mxu1 %v8161_v63  ;;  %6380 = vmatprep.mubr.bf16.mxu0 %v8165_v0  ;;  %v326_v62 = vld [vmem:[%s10007_s24 + $0x4a0] sm:$0xff]  ;;  %v324_v63 = vld [vmem:[%s10007_s24 + $0x490] sm:$0xff] }
  0x98   : > { %v328_v0 = vld [vmem:[%s10007_s24 + $0x4b0] sm:$0xff]  ;;  %v8225_v4 = vcombine.high %v322_v61, %v326_v62  ;;  %v8224_v10 = vcombine.low %v322_v61, %v326_v62 }
  0x99   : > { %v8229_v5 = vcombine.high %v324_v63, %v328_v0  ;;  %v8228_v11 = vcombine.low %v324_v63, %v328_v0  ;;  %v386_v0 = vld [vmem:[%s10007_s24 + $0x680] sm:$0xff] }
  0x9e   : > { %4971 = vmatmul.mubr.bf16.gmra.mrb[40].mxu1 %v8160_v6  ;;  %6381 = vmatmul.mubr.bf16.gmra.mrb[40].mxu0 %v8164_v7  ;;  %v330_v6 = vld [vmem:[%s10007_s24 + $0x4c0] sm:$0xff] }
  0x9f   : > { %4978 = vmatprep.mubr.bf16.mxu1 %v8169_v8  ;;  %6388 = vmatprep.mubr.bf16.mxu0 %v8173_v9  ;;  %v334_v7 = vld [vmem:[%s10007_s24 + $0x4e0] sm:$0xff]  ;;  %v332_v8 = vld [vmem:[%s10007_s24 + $0x4d0] sm:$0xff] }
  0xa0   : > { %v336_v9 = vld [vmem:[%s10007_s24 + $0x4f0] sm:$0xff]  ;;  %v8233_v12 = vcombine.high %v330_v6, %v334_v7 }
  0xa1   : > { %v8237_v13 = vcombine.high %v332_v8, %v336_v9  ;;  %v8236_v19 = vcombine.low %v332_v8, %v336_v9  ;;  %v394_v9 = vld [vmem:[%s10007_s24 + $0x6c0] sm:$0xff] }
  0xa6   : > { %4979 = vmatmul.mubr.bf16.gmra.mrb[44].mxu1 %v8168_v15  ;;  %6389 = vmatmul.mubr.bf16.gmra.mrb[44].mxu0 %v8172_v16  ;;  %v342_v15 = vld [vmem:[%s10007_s24 + $0x520] sm:$0xff]  ;;  %v340_v16 = vld [vmem:[%s10007_s24 + $0x510] sm:$0xff] }
  0xa7   : > { %4986 = vmatprep.mubr.bf16.mxu1 %v8177_v17  ;;  %6396 = vmatprep.mubr.bf16.mxu0 %v8181_v18  ;;  %v344_v17 = vld [vmem:[%s10007_s24 + $0x530] sm:$0xff]  ;;  %v8232_v18 = vcombine.low %v330_v6, %v334_v7  ;;  %v8241_v20 = vcombine.high %v338_v14, %v342_v15 }
  0xa8   : > { %v8245_v21 = vcombine.high %v340_v16, %v344_v17  ;;  %v8244_v27 = vcombine.low %v340_v16, %v344_v17  ;;  %v9881_v17 = vld [vmem:[%s11726_s1 + $0xc0] sm:$0xff]  }
  0xa9   : > { %5580 = vmatpush1.bf16.msra.mxu1 %v9881_v17 }
  0xaa   : > { %5581 = vmatprep.subr.bf16.mxu1 %v9906_v1 }
  0xae   : > { %4987 = vmatmul.mubr.bf16.gmra.mrb[48].mxu1 %v8176_v23  ;;  %6397 = vmatmul.mubr.bf16.gmra.mrb[48].mxu0 %v8180_v24  ;;  %v350_v23 = vld [vmem:[%s10007_s24 + $0x560] sm:$0xff]  ;;  %v348_v24 = vld [vmem:[%s10007_s24 + $0x550] sm:$0xff] }
  0xaf   : > { %4994 = vmatprep.mubr.bf16.mxu1 %v8185_v25  ;;  %6404 = vmatprep.mubr.bf16.mxu0 %v8189_v26  ;;  %v352_v25 = vld [vmem:[%s10007_s24 + $0x570] sm:$0xff]  ;;  %v8240_v26 = vcombine.low %v338_v14, %v342_v15  ;;  %v8249_v28 = vcombine.high %v346_v22, %v350_v23  ;;  %v8248_v35 = vcombine.low %v346_v22, %v350_v23 }
  0xb0   : > { %v8253_v29 = vcombine.high %v348_v24, %v352_v25  ;;  %v8252_v36 = vcombine.low %v348_v24, %v352_v25 }
  0xb6   : > { %4995 = vmatmul.mubr.bf16.gmra.mrb[52].mxu1 %v8184_v31  ;;  %6405 = vmatmul.mubr.bf16.gmra.mrb[52].mxu0 %v8188_v32  ;;  %v354_v31 = vld [vmem:[%s10007_s24 + $0x580] sm:$0xff] }
  0xb7   : > { %5002 = vmatprep.mubr.bf16.mxu1 %v8193_v33  ;;  %6412 = vmatprep.mubr.bf16.mxu0 %v8197_v34  ;;  %v358_v32 = vld [vmem:[%s10007_s24 + $0x5a0] sm:$0xff]  ;;  %v356_v33 = vld [vmem:[%s10007_s24 + $0x590] sm:$0xff] }
  0xb8   : > { %v360_v34 = vld [vmem:[%s10007_s24 + $0x5b0] sm:$0xff]  ;;  %v8257_v37 = vcombine.high %v354_v31, %v358_v32  ;;  %v8256_v43 = vcombine.low %v354_v31, %v358_v32 }
  0xb9   : > { %v8261_v38 = vcombine.high %v356_v33, %v360_v34  ;;  %v8260_v44 = vcombine.low %v356_v33, %v360_v34  ;;  %v418_v34 = vld [vmem:[%s10007_s24 + $0x780] sm:$0xff] }
  0xbe   : > { %5003 = vmatmul.mubr.bf16.gmra.mrb[56].mxu1 %v8192_v39  ;;  %6413 = vmatmul.mubr.bf16.gmra.mrb[56].mxu0 %v8196_v40  ;;  %v362_v39 = vld [vmem:[%s10007_s24 + $0x5c0] sm:$0xff] }
  0xbf   : > { %5010 = vmatprep.mubr.bf16.mxu1 %v8201_v41  ;;  %6420 = vmatprep.mubr.bf16.mxu0 %v8205_v42  ;;  %v366_v40 = vld [vmem:[%s10007_s24 + $0x5e0] sm:$0xff]  ;;  %v364_v41 = vld [vmem:[%s10007_s24 + $0x5d0] sm:$0xff] }
  0xc0   : > { %v368_v42 = vld [vmem:[%s10007_s24 + $0x5f0] sm:$0xff]  ;;  %v8265_v45 = vcombine.high %v362_v39, %v366_v40  ;;  %v8264_v52 = vcombine.low %v362_v39, %v366_v40 }
  0xc1   : > { %v8269_v46 = vcombine.high %v364_v41, %v368_v42  ;;  %v8268_v53 = vcombine.low %v364_v41, %v368_v42  ;;  %v426_v42 = vld [vmem:[%s10007_s24 + $0x7c0] sm:$0xff] }
  0xc6   : > { %5011 = vmatmul.mubr.bf16.gmra.mrb[60].mxu1 %v8200_v47  ;;  %6421 = vmatmul.mubr.bf16.gmra.mrb[60].mxu0 %v8204_v48  ;;  %v9880_v47 = vld [vmem:[%s11726_s1 + $0x1a8] sm:$0xff]   ;;  %v370_v48 = vld [vmem:[%s10007_s24 + $0x600] sm:$0xff] }
  0xc7   : > { %5018 = vmatprep.mubr.bf16.mxu1 %v8209_v49  ;;  %6428 = vmatprep.mubr.bf16.mxu0 %v8213_v50  ;;  %v374_v49 = vld [vmem:[%s10007_s24 + $0x620] sm:$0xff]  ;;  %v372_v50 = vld [vmem:[%s10007_s24 + $0x610] sm:$0xff] }
  0xc8   : > { %6984 = vmatpush1.bf16.msra.mxu0 %v9880_v47  ;;  %v8273_v54 = vcombine.high %v370_v48, %v374_v49  ;;  %v8277_v55 = vcombine.high %v372_v50, %v376_v51  ;;  %v8276_v61 = vcombine.low %v372_v50, %v376_v51  ;;  %v9882_v50 = vld [vmem:[%s11726_s1 + $0x1b0] sm:$0xff]   ;;  %v434_v51 = vld [vmem:[%s10007_s24 + $0x800] sm:$0xff] }
  0xc9   : > { %6985 = vmatprep.subr.bf16.mxu0 %v9906_v1 }
  0xcc   : > { %6986 = vmatpush1.bf16.msra.mxu0 %v9882_v50  ;;  %v496_v50 = vld [vmem:[%s10007_s24 + $0x9f0] sm:$0xff] }
  0xcd   : > { %6987 = vmatprep.subr.bf16.mxu0 %v9906_v1 }
  0xce   : > { %5019 = vmatmul.mubr.bf16.gmra.mrb[64].mxu1 %v8208_v57  ;;  %6429 = vmatmul.mubr.bf16.gmra.mrb[64].mxu0 %v8212_v58  ;;  %v382_v57 = vld [vmem:[%s10007_s24 + $0x660] sm:$0xff]  ;;  %v380_v58 = vld [vmem:[%s10007_s24 + $0x650] sm:$0xff] }
  0xcf   : > { %5026 = vmatprep.mubr.bf16.mxu1 %v8217_v59  ;;  %6436 = vmatprep.mubr.bf16.mxu0 %v8221_v60  ;;  %v384_v59 = vld [vmem:[%s10007_s24 + $0x670] sm:$0xff]  ;;  %v8272_v60 = vcombine.low %v370_v48, %v374_v49  ;;  %v8281_v62 = vcombine.high %v378_v56, %v382_v57 }
  0xd0   : > { %v8285_v63 = vcombine.high %v380_v58, %v384_v59  ;;  %v8284_v6 = vcombine.low %v380_v58, %v384_v59  ;;  %v9883_v59 = vld [vmem:[%s11726_s1 + $0xc8] sm:$0xff]  }
  0xd1   : > { %5582 = vmatpush1.bf16.msra.mxu1 %v9883_v59 }
  0xd2   : > { %5583 = vmatprep.subr.bf16.mxu1 %v9906_v1 }
  0xd6   : > { %5027 = vmatmul.mubr.bf16.gmra.mrb[68].mxu1 %v8216_v2  ;;  %6437 = vmatmul.mubr.bf16.gmra.mrb[68].mxu0 %v8220_v3  ;;  %v390_v2 = vld [vmem:[%s10007_s24 + $0x6a0] sm:$0xff]  ;;  %v388_v3 = vld [vmem:[%s10007_s24 + $0x690] sm:$0xff] }
  0xd7   : > { %5034 = vmatprep.mubr.bf16.mxu1 %v8225_v4  ;;  %6444 = vmatprep.mubr.bf16.mxu0 %v8229_v5  ;;  %v392_v4 = vld [vmem:[%s10007_s24 + $0x6b0] sm:$0xff]  ;;  %v8280_v5 = vcombine.low %v378_v56, %v382_v57  ;;  %v8289_v7 = vcombine.high %v386_v0, %v390_v2 }
  0xd8   : > { %v8293_v8 = vcombine.high %v388_v3, %v392_v4  ;;  %v8292_v14 = vcombine.low %v388_v3, %v392_v4 }
  0xde   : > { %5035 = vmatmul.mubr.bf16.gmra.mrb[72].mxu1 %v8224_v10  ;;  %6445 = vmatmul.mubr.bf16.gmra.mrb[72].mxu0 %v8228_v11  ;;  %v398_v10 = vld [vmem:[%s10007_s24 + $0x6e0] sm:$0xff]  ;;  %v396_v11 = vld [vmem:[%s10007_s24 + $0x6d0] sm:$0xff] }
  0xdf   : > { %5042 = vmatprep.mubr.bf16.mxu1 %v8233_v12  ;;  %6452 = vmatprep.mubr.bf16.mxu0 %v8237_v13  ;;  %v400_v12 = vld [vmem:[%s10007_s24 + $0x6f0] sm:$0xff]  ;;  %v8288_v13 = vcombine.low %v386_v0, %v390_v2  ;;  %v8297_v15 = vcombine.high %v394_v9, %v398_v10  ;;  %v8296_v22 = vcombine.low %v394_v9, %v398_v10 }
  0xe0   : > { %v8301_v16 = vcombine.high %v396_v11, %v400_v12  ;;  %v8300_v23 = vcombine.low %v396_v11, %v400_v12 }
  0xe6   : > { %5043 = vmatmul.mubr.bf16.gmra.mrb[76].mxu1 %v8232_v18  ;;  %6453 = vmatmul.mubr.bf16.gmra.mrb[76].mxu0 %v8236_v19  ;;  %v402_v18 = vld [vmem:[%s10007_s24 + $0x700] sm:$0xff] }
  0xe7   : > { %5050 = vmatprep.mubr.bf16.mxu1 %v8241_v20  ;;  %6460 = vmatprep.mubr.bf16.mxu0 %v8245_v21  ;;  %v406_v19 = vld [vmem:[%s10007_s24 + $0x720] sm:$0xff]  ;;  %v404_v20 = vld [vmem:[%s10007_s24 + $0x710] sm:$0xff] }
  0xe8   : > { %v408_v21 = vld [vmem:[%s10007_s24 + $0x730] sm:$0xff]  ;;  %v8305_v24 = vcombine.high %v402_v18, %v406_v19  ;;  %v8304_v30 = vcombine.low %v402_v18, %v406_v19 }
  0xe9   : > { %v8309_v25 = vcombine.high %v404_v20, %v408_v21  ;;  %v8308_v31 = vcombine.low %v404_v20, %v408_v21  ;;  %v466_v21 = vld [vmem:[%s10007_s24 + $0x900] sm:$0xff] }
  0xee   : > { %5051 = vmatmul.mubr.bf16.gmra.mrb[80].mxu1 %v8240_v26  ;;  %6461 = vmatmul.mubr.bf16.gmra.mrb[80].mxu0 %v8244_v27  ;;  %v410_v26 = vld [vmem:[%s10007_s24 + $0x740] sm:$0xff] }
  0xef   : > { %5058 = vmatprep.mubr.bf16.mxu1 %v8249_v28  ;;  %6468 = vmatprep.mubr.bf16.mxu0 %v8253_v29  ;;  %v414_v27 = vld [vmem:[%s10007_s24 + $0x760] sm:$0xff]  ;;  %v412_v28 = vld [vmem:[%s10007_s24 + $0x750] sm:$0xff] }
  0xf0   : > { %v416_v29 = vld [vmem:[%s10007_s24 + $0x770] sm:$0xff]  ;;  %v8313_v32 = vcombine.high %v410_v26, %v414_v27 }
  0xf1   : > { %v8317_v33 = vcombine.high %v412_v28, %v416_v29  ;;  %v8316_v39 = vcombine.low %v412_v28, %v416_v29  ;;  %v474_v29 = vld [vmem:[%s10007_s24 + $0x940] sm:$0xff] }
  0xf6   : > { %5059 = vmatmul.mubr.bf16.gmra.mrb[84].mxu1 %v8248_v35  ;;  %6469 = vmatmul.mubr.bf16.gmra.mrb[84].mxu0 %v8252_v36  ;;  %v422_v35 = vld [vmem:[%s10007_s24 + $0x7a0] sm:$0xff]  ;;  %v420_v36 = vld [vmem:[%s10007_s24 + $0x790] sm:$0xff] }
  0xf7   : > { %5066 = vmatprep.mubr.bf16.mxu1 %v8257_v37  ;;  %6476 = vmatprep.mubr.bf16.mxu0 %v8261_v38  ;;  %v424_v37 = vld [vmem:[%s10007_s24 + $0x7b0] sm:$0xff]  ;;  %v8312_v38 = vcombine.low %v410_v26, %v414_v27  ;;  %v8321_v40 = vcombine.high %v418_v34, %v422_v35 }
  0xf8   : > { %v8325_v41 = vcombine.high %v420_v36, %v424_v37  ;;  %v8324_v47 = vcombine.low %v420_v36, %v424_v37  ;;  %v9884_v37 = vld [vmem:[%s11726_s1 + $0xd0] sm:$0xff]  }
  0xf9   : > { %5584 = vmatpush1.bf16.msra.mxu1 %v9884_v37 }
  0xfa   : > { %5585 = vmatprep.subr.bf16.mxu1 %v9906_v1 }
  0xfe   : > { %5067 = vmatmul.mubr.bf16.gmra.mrb[88].mxu1 %v8256_v43  ;;  %6477 = vmatmul.mubr.bf16.gmra.mrb[88].mxu0 %v8260_v44  ;;  %v430_v43 = vld [vmem:[%s10007_s24 + $0x7e0] sm:$0xff]  ;;  %v428_v44 = vld [vmem:[%s10007_s24 + $0x7d0] sm:$0xff] }
  0xff   : > { %5074 = vmatprep.mubr.bf16.mxu1 %v8265_v45  ;;  %6484 = vmatprep.mubr.bf16.mxu0 %v8269_v46  ;;  %v432_v45 = vld [vmem:[%s10007_s24 + $0x7f0] sm:$0xff]  ;;  %v8320_v46 = vcombine.low %v418_v34, %v422_v35  ;;  %v8329_v48 = vcombine.high %v426_v42, %v430_v43 }
 0x100   : > { %v8333_v49 = vcombine.high %v428_v44, %v432_v45  ;;  %v8332_v56 = vcombine.low %v428_v44, %v432_v45 }
 0x106   : > { %5075 = vmatmul.mubr.bf16.gmra.mrb[92].mxu1 %v8264_v52  ;;  %6485 = vmatmul.mubr.bf16.gmra.mrb[92].mxu0 %v8268_v53  ;;  %v438_v52 = vld [vmem:[%s10007_s24 + $0x820] sm:$0xff]  ;;  %v436_v53 = vld [vmem:[%s10007_s24 + $0x810] sm:$0xff] }
 0x107   : > { %5082 = vmatprep.mubr.bf16.mxu1 %v8273_v54  ;;  %6492 = vmatprep.mubr.bf16.mxu0 %v8277_v55  ;;  %v440_v54 = vld [vmem:[%s10007_s24 + $0x830] sm:$0xff]  ;;  %v8328_v55 = vcombine.low %v426_v42, %v430_v43  ;;  %v8337_v57 = vcombine.high %v434_v51, %v438_v52  ;;  %v8336_v0 = vcombine.low %v434_v51, %v438_v52 }
 0x108   : > { %v8341_v58 = vcombine.high %v436_v53, %v440_v54  ;;  %v8340_v2 = vcombine.low %v436_v53, %v440_v54 }
 0x10e   : > { %5083 = vmatmul.mubr.bf16.gmra.mrb[96].mxu1 %v8272_v60  ;;  %6493 = vmatmul.mubr.bf16.gmra.mrb[96].mxu0 %v8276_v61  ;;  %v442_v60 = vld [vmem:[%s10007_s24 + $0x840] sm:$0xff] }
 0x10f   : > { %5090 = vmatprep.mubr.bf16.mxu1 %v8281_v62  ;;  %6500 = vmatprep.mubr.bf16.mxu0 %v8285_v63  ;;  %v446_v61 = vld [vmem:[%s10007_s24 + $0x860] sm:$0xff]  ;;  %v444_v62 = vld [vmem:[%s10007_s24 + $0x850] sm:$0xff] }
 0x110   : > { %v448_v63 = vld [vmem:[%s10007_s24 + $0x870] sm:$0xff]  ;;  %v8345_v3 = vcombine.high %v442_v60, %v446_v61  ;;  %v8344_v9 = vcombine.low %v442_v60, %v446_v61 }
 0x111   : > { %v8349_v4 = vcombine.high %v444_v62, %v448_v63  ;;  %v8348_v10 = vcombine.low %v444_v62, %v448_v63  ;;  %v506_v63 = vld [vmem:[%s10007_s24 + $0xa40] sm:$0xff] }
 0x116   : > { %5091 = vmatmul.mubr.bf16.gmra.mrb[100].mxu1 %v8280_v5  ;;  %6501 = vmatmul.mubr.bf16.gmra.mrb[100].mxu0 %v8284_v6  ;;  %v450_v5 = vld [vmem:[%s10007_s24 + $0x880] sm:$0xff] }
 0x117   : > { %5098 = vmatprep.mubr.bf16.mxu1 %v8289_v7  ;;  %6508 = vmatprep.mubr.bf16.mxu0 %v8293_v8  ;;  %v454_v6 = vld [vmem:[%s10007_s24 + $0x8a0] sm:$0xff]  ;;  %v452_v7 = vld [vmem:[%s10007_s24 + $0x890] sm:$0xff] }
 0x118   : > { %v456_v8 = vld [vmem:[%s10007_s24 + $0x8b0] sm:$0xff]  ;;  %v8353_v11 = vcombine.high %v450_v5, %v454_v6  ;;  %v8352_v17 = vcombine.low %v450_v5, %v454_v6 }
 0x119   : > { %v8357_v12 = vcombine.high %v452_v7, %v456_v8  ;;  %v8356_v18 = vcombine.low %v452_v7, %v456_v8  ;;  %v514_v8 = vld [vmem:[%s10007_s24 + $0xa80] sm:$0xff] }
 0x11e   : > { %5099 = vmatmul.mubr.bf16.gmra.mrb[104].mxu1 %v8288_v13  ;;  %6509 = vmatmul.mubr.bf16.gmra.mrb[104].mxu0 %v8292_v14  ;;  %v458_v13 = vld [vmem:[%s10007_s24 + $0x8c0] sm:$0xff] }
 0x11f   : > { %5106 = vmatprep.mubr.bf16.mxu1 %v8297_v15  ;;  %6516 = vmatprep.mubr.bf16.mxu0 %v8301_v16  ;;  %v462_v14 = vld [vmem:[%s10007_s24 + $0x8e0] sm:$0xff]  ;;  %v460_v15 = vld [vmem:[%s10007_s24 + $0x8d0] sm:$0xff] }
 0x120   : > { %v464_v16 = vld [vmem:[%s10007_s24 + $0x8f0] sm:$0xff]  ;;  %v8361_v19 = vcombine.high %v458_v13, %v462_v14 }
 0x121   : > { %v8365_v20 = vcombine.high %v460_v15, %v464_v16  ;;  %v8364_v26 = vcombine.low %v460_v15, %v464_v16  ;;  %v9886_v16 = vld [vmem:[%s11726_s1 + $0xd8] sm:$0xff]  }
 0x122   : > { %5586 = vmatpush1.bf16.msra.mxu1 %v9886_v16 }
 0x123   : > { %5587 = vmatprep.subr.bf16.mxu1 %v9906_v1 }
 0x126   : > { %5107 = vmatmul.mubr.bf16.gmra.mrb[108].mxu1 %v8296_v22  ;;  %6517 = vmatmul.mubr.bf16.gmra.mrb[108].mxu0 %v8300_v23  ;;  %v470_v22 = vld [vmem:[%s10007_s24 + $0x920] sm:$0xff]  ;;  %v468_v23 = vld [vmem:[%s10007_s24 + $0x910] sm:$0xff] }
 0x127   : > { %5114 = vmatprep.mubr.bf16.mxu1 %v8305_v24  ;;  %6524 = vmatprep.mubr.bf16.mxu0 %v8309_v25  ;;  %v472_v24 = vld [vmem:[%s10007_s24 + $0x930] sm:$0xff]  ;;  %v8360_v25 = vcombine.low %v458_v13, %v462_v14  ;;  %v8369_v27 = vcombine.high %v466_v21, %v470_v22 }
 0x128   : > { %v8373_v28 = vcombine.high %v468_v23, %v472_v24  ;;  %v8372_v34 = vcombine.low %v468_v23, %v472_v24 }
 0x12e   : > { %5115 = vmatmul.mubr.bf16.gmra.mrb[112].mxu1 %v8304_v30  ;;  %6525 = vmatmul.mubr.bf16.gmra.mrb[112].mxu0 %v8308_v31  ;;  %v478_v30 = vld [vmem:[%s10007_s24 + $0x960] sm:$0xff]  ;;  %v476_v31 = vld [vmem:[%s10007_s24 + $0x950] sm:$0xff] }
 0x12f   : > { %5122 = vmatprep.mubr.bf16.mxu1 %v8313_v32  ;;  %6532 = vmatprep.mubr.bf16.mxu0 %v8317_v33  ;;  %v480_v32 = vld [vmem:[%s10007_s24 + $0x970] sm:$0xff]  ;;  %v8368_v33 = vcombine.low %v466_v21, %v470_v22  ;;  %v8377_v35 = vcombine.high %v474_v29, %v478_v30  ;;  %v8376_v42 = vcombine.low %v474_v29, %v478_v30 }
 0x130   : > { %v8381_v36 = vcombine.high %v476_v31, %v480_v32  ;;  %v8380_v43 = vcombine.low %v476_v31, %v480_v32 }
 0x136   : > { %5123 = vmatmul.mubr.bf16.gmra.mrb[116].mxu1 %v8312_v38  ;;  %6533 = vmatmul.mubr.bf16.gmra.mrb[116].mxu0 %v8316_v39  ;;  %v482_v38 = vld [vmem:[%s10007_s24 + $0x980] sm:$0xff] }
 0x137   : > { %5130 = vmatprep.mubr.bf16.mxu1 %v8321_v40  ;;  %6540 = vmatprep.mubr.bf16.mxu0 %v8325_v41  ;;  %v486_v39 = vld [vmem:[%s10007_s24 + $0x9a0] sm:$0xff]  ;;  %v484_v40 = vld [vmem:[%s10007_s24 + $0x990] sm:$0xff] }
 0x138   : > { %v488_v41 = vld [vmem:[%s10007_s24 + $0x9b0] sm:$0xff]  ;;  %v8385_v44 = vcombine.high %v482_v38, %v486_v39  ;;  %v8384_v51 = vcombine.low %v482_v38, %v486_v39 }
 0x139   : > { %v8389_v45 = vcombine.high %v484_v40, %v488_v41  ;;  %v8388_v52 = vcombine.low %v484_v40, %v488_v41  ;;  %v546_v41 = vld [vmem:[%s10007_s24 + $0xb80] sm:$0xff] }
 0x13e   : > { %5131 = vmatmul.mubr.bf16.gmra.mrb[120].mxu1 %v8320_v46  ;;  %6541 = vmatmul.mubr.bf16.gmra.mrb[120].mxu0 %v8324_v47  ;;  %v490_v46 = vld [vmem:[%s10007_s24 + $0x9c0] sm:$0xff] }
 0x13f   : > { %5138 = vmatprep.mubr.bf16.mxu1 %v8329_v48  ;;  %6548 = vmatprep.mubr.bf16.mxu0 %v8333_v49  ;;  %v494_v47 = vld [vmem:[%s10007_s24 + $0x9e0] sm:$0xff]  ;;  %v9885_v48 = vld [vmem:[%s11726_s1 + $0x1b8] sm:$0xff]   ;;  %v492_v49 = vld [vmem:[%s10007_s24 + $0x9d0] sm:$0xff] }
 0x140   : > { %6988 = vmatpush1.bf16.msra.mxu0 %v9885_v48  ;;  %v8393_v53 = vcombine.high %v490_v46, %v494_v47  ;;  %v8397_v54 = vcombine.high %v492_v49, %v496_v50  ;;  %v8392_v59 = vcombine.low %v490_v46, %v494_v47  ;;  %v8396_v60 = vcombine.low %v492_v49, %v496_v50  ;;  %v9887_v49 = vld [vmem:[%s11726_s1 + $0x1c0] sm:$0xff]  }
 0x141   : > { %6989 = vmatprep.subr.bf16.mxu0 %v9906_v1  ;;  %v554_v50 = vld [vmem:[%s10007_s24 + $0xbc0] sm:$0xff] }
 0x144   : > { %6990 = vmatpush1.bf16.msra.mxu0 %v9887_v49 }
 0x145   : > { %6991 = vmatprep.subr.bf16.mxu0 %v9906_v1 }
 0x146   : > { %5139 = vmatmul.mubr.bf16.gmra.mrb[124].mxu1 %v8328_v55  ;;  %6549 = vmatmul.mubr.bf16.gmra.mrb[124].mxu0 %v8332_v56  ;;  %v498_v55 = vld [vmem:[%s10007_s24 + $0xa00] sm:$0xff] }
 0x147   : > { %5146 = vmatprep.mubr.bf16.mxu1 %v8337_v57  ;;  %6556 = vmatprep.mubr.bf16.mxu0 %v8341_v58  ;;  %v502_v56 = vld [vmem:[%s10007_s24 + $0xa20] sm:$0xff]  ;;  %v500_v57 = vld [vmem:[%s10007_s24 + $0xa10] sm:$0xff] }
 0x148   : > { %v504_v58 = vld [vmem:[%s10007_s24 + $0xa30] sm:$0xff]  ;;  %v8401_v61 = vcombine.high %v498_v55, %v502_v56 }
 0x149   : > { %v8405_v62 = vcombine.high %v500_v57, %v504_v58  ;;  %v8404_v5 = vcombine.low %v500_v57, %v504_v58  ;;  %v562_v58 = vld [vmem:[%s10007_s24 + $0xc00] sm:$0xff] }
 0x14e   : > { %5147 = vmatmul.mubr.bf16.gmra.mrb[128].mxu1 %v8336_v0  ;;  %6557 = vmatmul.mubr.bf16.gmra.mrb[128].mxu0 %v8340_v2  ;;  %v510_v0 = vld [vmem:[%s10007_s24 + $0xa60] sm:$0xff]  ;;  %v508_v2 = vld [vmem:[%s10007_s24 + $0xa50] sm:$0xff] }
 0x14f   : > { %5154 = vmatprep.mubr.bf16.mxu1 %v8345_v3  ;;  %6564 = vmatprep.mubr.bf16.mxu0 %v8349_v4  ;;  %v512_v3 = vld [vmem:[%s10007_s24 + $0xa70] sm:$0xff]  ;;  %v8400_v4 = vcombine.low %v498_v55, %v502_v56  ;;  %v8409_v6 = vcombine.high %v506_v63, %v510_v0 }
 0x150   : > { %v8413_v7 = vcombine.high %v508_v2, %v512_v3  ;;  %v8412_v13 = vcombine.low %v508_v2, %v512_v3  ;;  %v9888_v3 = vld [vmem:[%s11726_s1 + $0xe0] sm:$0xff]  }
 0x151   : > { %5588 = vmatpush1.bf16.msra.mxu1 %v9888_v3 }
 0x152   : > { %5589 = vmatprep.subr.bf16.mxu1 %v9906_v1 }
 0x156   : > { %5155 = vmatmul.mubr.bf16.gmra.mrb[132].mxu1 %v8344_v9  ;;  %6565 = vmatmul.mubr.bf16.gmra.mrb[132].mxu0 %v8348_v10  ;;  %v518_v9 = vld [vmem:[%s10007_s24 + $0xaa0] sm:$0xff]  ;;  %v516_v10 = vld [vmem:[%s10007_s24 + $0xa90] sm:$0xff] }
 0x157   : > { %5162 = vmatprep.mubr.bf16.mxu1 %v8353_v11  ;;  %6572 = vmatprep.mubr.bf16.mxu0 %v8357_v12  ;;  %v520_v11 = vld [vmem:[%s10007_s24 + $0xab0] sm:$0xff]  ;;  %v8408_v12 = vcombine.low %v506_v63, %v510_v0  ;;  %v8417_v14 = vcombine.high %v514_v8, %v518_v9  ;;  %v8416_v21 = vcombine.low %v514_v8, %v518_v9 }
 0x158   : > { %v8421_v15 = vcombine.high %v516_v10, %v520_v11  ;;  %v8420_v22 = vcombine.low %v516_v10, %v520_v11 }
 0x15e   : > { %5163 = vmatmul.mubr.bf16.gmra.mrb[136].mxu1 %v8352_v17  ;;  %6573 = vmatmul.mubr.bf16.gmra.mrb[136].mxu0 %v8356_v18  ;;  %v522_v17 = vld [vmem:[%s10007_s24 + $0xac0] sm:$0xff] }
 0x15f   : > { %5170 = vmatprep.mubr.bf16.mxu1 %v8361_v19  ;;  %6580 = vmatprep.mubr.bf16.mxu0 %v8365_v20  ;;  %v526_v18 = vld [vmem:[%s10007_s24 + $0xae0] sm:$0xff]  ;;  %v524_v19 = vld [vmem:[%s10007_s24 + $0xad0] sm:$0xff] }
 0x160   : > { %v528_v20 = vld [vmem:[%s10007_s24 + $0xaf0] sm:$0xff]  ;;  %v8425_v23 = vcombine.high %v522_v17, %v526_v18  ;;  %v8424_v29 = vcombine.low %v522_v17, %v526_v18 }
 0x161   : > { %v8429_v24 = vcombine.high %v524_v19, %v528_v20  ;;  %v8428_v30 = vcombine.low %v524_v19, %v528_v20  ;;  %v586_v20 = vld [vmem:[%s10007_s24 + $0xcc0] sm:$0xff] }
 0x166   : > { %5171 = vmatmul.mubr.bf16.gmra.mrb[140].mxu1 %v8360_v25  ;;  %6581 = vmatmul.mubr.bf16.gmra.mrb[140].mxu0 %v8364_v26  ;;  %v530_v25 = vld [vmem:[%s10007_s24 + $0xb00] sm:$0xff] }
 0x167   : > { %5178 = vmatprep.mubr.bf16.mxu1 %v8369_v27  ;;  %6588 = vmatprep.mubr.bf16.mxu0 %v8373_v28  ;;  %v534_v26 = vld [vmem:[%s10007_s24 + $0xb20] sm:$0xff]  ;;  %v532_v27 = vld [vmem:[%s10007_s24 + $0xb10] sm:$0xff] }
 0x168   : > { %v536_v28 = vld [vmem:[%s10007_s24 + $0xb30] sm:$0xff]  ;;  %v8433_v31 = vcombine.high %v530_v25, %v534_v26  ;;  %v8432_v37 = vcombine.low %v530_v25, %v534_v26 }
 0x169   : > { %v8437_v32 = vcombine.high %v532_v27, %v536_v28  ;;  %v8436_v38 = vcombine.low %v532_v27, %v536_v28  ;;  %v594_v28 = vld [vmem:[%s10007_s24 + $0xd00] sm:$0xff] }
 0x16e   : > { %5179 = vmatmul.mubr.bf16.gmra.mrb[144].mxu1 %v8368_v33  ;;  %6589 = vmatmul.mubr.bf16.gmra.mrb[144].mxu0 %v8372_v34  ;;  %v538_v33 = vld [vmem:[%s10007_s24 + $0xb40] sm:$0xff] }
 0x16f   : > { %5186 = vmatprep.mubr.bf16.mxu1 %v8377_v35  ;;  %6596 = vmatprep.mubr.bf16.mxu0 %v8381_v36  ;;  %v542_v34 = vld [vmem:[%s10007_s24 + $0xb60] sm:$0xff]  ;;  %v540_v35 = vld [vmem:[%s10007_s24 + $0xb50] sm:$0xff] }
 0x170   : > { %v544_v36 = vld [vmem:[%s10007_s24 + $0xb70] sm:$0xff]  ;;  %v8441_v39 = vcombine.high %v538_v33, %v542_v34 }
 0x171   : > { %v8445_v40 = vcombine.high %v540_v35, %v544_v36  ;;  %v8444_v46 = vcombine.low %v540_v35, %v544_v36  ;;  %v602_v36 = vld [vmem:[%s10007_s24 + $0xd40] sm:$0xff] }
 0x176   : > { %5187 = vmatmul.mubr.bf16.gmra.mrb[148].mxu1 %v8376_v42  ;;  %6597 = vmatmul.mubr.bf16.gmra.mrb[148].mxu0 %v8380_v43  ;;  %v550_v42 = vld [vmem:[%s10007_s24 + $0xba0] sm:$0xff]  ;;  %v548_v43 = vld [vmem:[%s10007_s24 + $0xb90] sm:$0xff] }
 0x177   : > { %5194 = vmatprep.mubr.bf16.mxu1 %v8385_v44  ;;  %6604 = vmatprep.mubr.bf16.mxu0 %v8389_v45  ;;  %v552_v44 = vld [vmem:[%s10007_s24 + $0xbb0] sm:$0xff]  ;;  %v8440_v45 = vcombine.low %v538_v33, %v542_v34  ;;  %v8449_v47 = vcombine.high %v546_v41, %v550_v42 }
 0x178   : > { %v8453_v48 = vcombine.high %v548_v43, %v552_v44  ;;  %v8452_v55 = vcombine.low %v548_v43, %v552_v44  ;;  %v610_v44 = vld [vmem:[%s10007_s24 + $0xd80] sm:$0xff] }
 0x17e   : > { %5195 = vmatmul.mubr.bf16.gmra.mrb[152].mxu1 %v8384_v51  ;;  %6605 = vmatmul.mubr.bf16.gmra.mrb[152].mxu0 %v8388_v52  ;;  %v558_v51 = vld [vmem:[%s10007_s24 + $0xbe0] sm:$0xff]  ;;  %v556_v52 = vld [vmem:[%s10007_s24 + $0xbd0] sm:$0xff] }
 0x17f   : > { %5202 = vmatprep.mubr.bf16.mxu1 %v8393_v53  ;;  %6612 = vmatprep.mubr.bf16.mxu0 %v8397_v54  ;;  %v560_v53 = vld [vmem:[%s10007_s24 + $0xbf0] sm:$0xff]  ;;  %v8448_v54 = vcombine.low %v546_v41, %v550_v42  ;;  %v8457_v56 = vcombine.high %v554_v50, %v558_v51 }
 0x180   : > { %v8461_v57 = vcombine.high %v556_v52, %v560_v53  ;;  %v8460_v63 = vcombine.low %v556_v52, %v560_v53  ;;  %v9890_v53 = vld [vmem:[%s11726_s1 + $0x1c8] sm:$0xff]  }
 0x181   : > { %6992 = vmatpush1.bf16.msra.mxu0 %v9890_v53 }
 0x182   : > { %6993 = vmatprep.subr.bf16.mxu0 %v9906_v1 }
 0x186   : > { %5203 = vmatmul.mubr.bf16.gmra.mrb[156].mxu1 %v8392_v59  ;;  %6613 = vmatmul.mubr.bf16.gmra.mrb[156].mxu0 %v8396_v60  ;;  %v566_v59 = vld [vmem:[%s10007_s24 + $0xc20] sm:$0xff]  ;;  %v564_v60 = vld [vmem:[%s10007_s24 + $0xc10] sm:$0xff] }
 0x187   : > { %5210 = vmatprep.mubr.bf16.mxu1 %v8401_v61  ;;  %6620 = vmatprep.mubr.bf16.mxu0 %v8405_v62  ;;  %v568_v61 = vld [vmem:[%s10007_s24 + $0xc30] sm:$0xff]  ;;  %v8456_v62 = vcombine.low %v554_v50, %v558_v51  ;;  %v8465_v0 = vcombine.high %v562_v58, %v566_v59  ;;  %v8464_v8 = vcombine.low %v562_v58, %v566_v59 }
 0x188   : > { %v8469_v2 = vcombine.high %v564_v60, %v568_v61  ;;  %v8468_v9 = vcombine.low %v564_v60, %v568_v61 }
 0x18e   : > { %5211 = vmatmul.mubr.bf16.gmra.mrb[160].mxu1 %v8400_v4  ;;  %6621 = vmatmul.mubr.bf16.gmra.mrb[160].mxu0 %v8404_v5  ;;  %v570_v4 = vld [vmem:[%s10007_s24 + $0xc40] sm:$0xff] }
 0x18f   : > { %5218 = vmatprep.mubr.bf16.mxu1 %v8409_v6  ;;  %6628 = vmatprep.mubr.bf16.mxu0 %v8413_v7  ;;  %v574_v5 = vld [vmem:[%s10007_s24 + $0xc60] sm:$0xff]  ;;  %v572_v6 = vld [vmem:[%s10007_s24 + $0xc50] sm:$0xff] }
 0x190   : > { %v576_v7 = vld [vmem:[%s10007_s24 + $0xc70] sm:$0xff]  ;;  %v8473_v10 = vcombine.high %v570_v4, %v574_v5  ;;  %v8472_v16 = vcombine.low %v570_v4, %v574_v5 }
 0x191   : > { %v8477_v11 = vcombine.high %v572_v6, %v576_v7  ;;  %v8476_v17 = vcombine.low %v572_v6, %v576_v7  ;;  %v634_v7 = vld [vmem:[%s10007_s24 + $0xe40] sm:$0xff] }
 0x196   : > { %5219 = vmatmul.mubr.bf16.gmra.mrb[164].mxu1 %v8408_v12  ;;  %6629 = vmatmul.mubr.bf16.gmra.mrb[164].mxu0 %v8412_v13  ;;  %v578_v12 = vld [vmem:[%s10007_s24 + $0xc80] sm:$0xff] }
 0x197   : > { %5226 = vmatprep.mubr.bf16.mxu1 %v8417_v14  ;;  %6636 = vmatprep.mubr.bf16.mxu0 %v8421_v15  ;;  %v582_v13 = vld [vmem:[%s10007_s24 + $0xca0] sm:$0xff]  ;;  %v580_v14 = vld [vmem:[%s10007_s24 + $0xc90] sm:$0xff] }
 0x198   : > { %v584_v15 = vld [vmem:[%s10007_s24 + $0xcb0] sm:$0xff]  ;;  %v8481_v18 = vcombine.high %v578_v12, %v582_v13 }
 0x199   : > { %v8485_v19 = vcombine.high %v580_v14, %v584_v15  ;;  %v8484_v25 = vcombine.low %v580_v14, %v584_v15  ;;  %v642_v15 = vld [vmem:[%s10007_s24 + $0xe80] sm:$0xff] }
 0x19e   : > { %5227 = vmatmul.mubr.bf16.gmra.mrb[168].mxu1 %v8416_v21  ;;  %6637 = vmatmul.mubr.bf16.gmra.mrb[168].mxu0 %v8420_v22  ;;  %v590_v21 = vld [vmem:[%s10007_s24 + $0xce0] sm:$0xff]  ;;  %v588_v22 = vld [vmem:[%s10007_s24 + $0xcd0] sm:$0xff] }
 0x19f   : > { %5234 = vmatprep.mubr.bf16.mxu1 %v8425_v23  ;;  %6644 = vmatprep.mubr.bf16.mxu0 %v8429_v24  ;;  %v592_v23 = vld [vmem:[%s10007_s24 + $0xcf0] sm:$0xff]  ;;  %v8480_v24 = vcombine.low %v578_v12, %v582_v13  ;;  %v8489_v26 = vcombine.high %v586_v20, %v590_v21 }
 0x1a0   : > { %v8493_v27 = vcombine.high %v588_v22, %v592_v23  ;;  %v8492_v33 = vcombine.low %v588_v22, %v592_v23  ;;  %v650_v23 = vld [vmem:[%s10007_s24 + $0xec0] sm:$0xff] }
 0x1a6   : > { %5235 = vmatmul.mubr.bf16.gmra.mrb[172].mxu1 %v8424_v29  ;;  %6645 = vmatmul.mubr.bf16.gmra.mrb[172].mxu0 %v8428_v30  ;;  %v598_v29 = vld [vmem:[%s10007_s24 + $0xd20] sm:$0xff]  ;;  %v596_v30 = vld [vmem:[%s10007_s24 + $0xd10] sm:$0xff] }
 0x1a7   : > { %5242 = vmatprep.mubr.bf16.mxu1 %v8433_v31  ;;  %6652 = vmatprep.mubr.bf16.mxu0 %v8437_v32  ;;  %v600_v31 = vld [vmem:[%s10007_s24 + $0xd30] sm:$0xff]  ;;  %v8488_v32 = vcombine.low %v586_v20, %v590_v21  ;;  %v8497_v34 = vcombine.high %v594_v28, %v598_v29 }
 0x1a8   : > { %v8501_v35 = vcombine.high %v596_v30, %v600_v31  ;;  %v8500_v41 = vcombine.low %v596_v30, %v600_v31  ;;  %v9891_v30 = vld [vmem:[%s11726_s1 + $0xf0] sm:$0xff]  }
 0x1ae   : > { %5243 = vmatmul.mubr.bf16.gmra.mrb[176].mxu1 %v8432_v37  ;;  %6653 = vmatmul.mubr.bf16.gmra.mrb[176].mxu0 %v8436_v38  ;;  %v606_v37 = vld [vmem:[%s10007_s24 + $0xd60] sm:$0xff]  ;;  %v604_v38 = vld [vmem:[%s10007_s24 + $0xd50] sm:$0xff] }
 0x1af   : > { %5250 = vmatprep.mubr.bf16.mxu1 %v8441_v39  ;;  %6660 = vmatprep.mubr.bf16.mxu0 %v8445_v40  ;;  %v608_v39 = vld [vmem:[%s10007_s24 + $0xd70] sm:$0xff]  ;;  %v8496_v40 = vcombine.low %v594_v28, %v598_v29  ;;  %v8505_v42 = vcombine.high %v602_v36, %v606_v37  ;;  %v8504_v49 = vcombine.low %v602_v36, %v606_v37 }
 0x1b0   : > { %v8509_v43 = vcombine.high %v604_v38, %v608_v39  ;;  %v8508_v50 = vcombine.low %v604_v38, %v608_v39 }
 0x1b6   : > { %5251 = vmatmul.mubr.bf16.gmra.mrb[180].mxu1 %v8440_v45  ;;  %6661 = vmatmul.mubr.bf16.gmra.mrb[180].mxu0 %v8444_v46  ;;  %v614_v45 = vld [vmem:[%s10007_s24 + $0xda0] sm:$0xff]  ;;  %v612_v46 = vld [vmem:[%s10007_s24 + $0xd90] sm:$0xff] }
 0x1b7   : > { %5258 = vmatprep.mubr.bf16.mxu1 %v8449_v47  ;;  %6668 = vmatprep.mubr.bf16.mxu0 %v8453_v48  ;;  %v616_v47 = vld [vmem:[%s10007_s24 + $0xdb0] sm:$0xff]  ;;  %v9889_v48 = vld [vmem:[%s11726_s1 + $0xe8] sm:$0xff]   ;;  %v8513_v51 = vcombine.high %v610_v44, %v614_v45  ;;  %v8512_v58 = vcombine.low %v610_v44, %v614_v45 }
 0x1b8   : > { %5590 = vmatpush1.bf16.msra.mxu1 %v9889_v48  ;;  %v8517_v52 = vcombine.high %v612_v46, %v616_v47  ;;  %v8516_v59 = vcombine.low %v612_v46, %v616_v47  ;;  %v674_v47 = vld [vmem:[%s10007_s24 + $0xf80] sm:$0xff] }
 0x1b9   : > { %5591 = vmatprep.subr.bf16.mxu1 %v9906_v1  ;;  %v678_v48 = vld [vmem:[%s10007_s24 + $0xfa0] sm:$0xff] }
 0x1ba   : > { %v8577_v53 = vcombine.high %v674_v47, %v678_v48 }
 0x1bc   : > { %5592 = vmatpush1.bf16.msra.mxu1 %v9891_v30  ;;  %v708_v30 = vld [vmem:[%s10007_s24 + $0x1090] sm:$0xff] }
 0x1bd   : > { %5593 = vmatprep.subr.bf16.mxu1 %v9906_v1  ;;  %v666_v1 = vld [vmem:[%s10007_s24 + $0xf40] sm:$0xff] }
 0x1be   : > { %5259 = vmatmul.mubr.bf16.gmra.mrb[184].mxu1 %v8448_v54  ;;  %6669 = vmatmul.mubr.bf16.gmra.mrb[184].mxu0 %v8452_v55  ;;  %v618_v54 = vld [vmem:[%s10007_s24 + $0xdc0] sm:$0xff] }
 0x1bf   : > { %5266 = vmatprep.mubr.bf16.mxu1 %v8457_v56  ;;  %6676 = vmatprep.mubr.bf16.mxu0 %v8461_v57  ;;  %v622_v55 = vld [vmem:[%s10007_s24 + $0xde0] sm:$0xff]  ;;  %v620_v56 = vld [vmem:[%s10007_s24 + $0xdd0] sm:$0xff] }
 0x1c0   : > { %v624_v57 = vld [vmem:[%s10007_s24 + $0xdf0] sm:$0xff]  ;;  %v8521_v60 = vcombine.high %v618_v54, %v622_v55  ;;  %v8520_v3 = vcombine.low %v618_v54, %v622_v55 }
 0x1c1   : > { %v8525_v61 = vcombine.high %v620_v56, %v624_v57  ;;  %v8524_v4 = vcombine.low %v620_v56, %v624_v57  ;;  %v9892_v55 = vld [vmem:[%s11726_s1 + $0x1d0] ss:$0 sps:$4 sm:$0x11]   ;;  %v682_v57 = vld [vmem:[%s10007_s24 + $0xfc0] sm:$0xff] }
 0x1c2   : > { %v4856_v56 = vsel %vm4854_vm0, %v9892_v55, 0 }
 0x1c3   : > { %6994 = vmatpush1.bf16.msra.mxu0 %v4856_v56 }
 0x1c6   : > { %5267 = vmatmul.mubr.bf16.gmra.mrb[188].mxu1 %v8456_v62  ;;  %6677 = vmatmul.mubr.bf16.gmra.mrb[188].mxu0 %v8460_v63  ;;  %v626_v62 = vld [vmem:[%s10007_s24 + $0xe00] sm:$0xff] }
 0x1c7   : > { %5274 = vmatprep.mubr.bf16.mxu1 %v8465_v0  ;;  %6684 = vmatprep.mubr.bf16.mxu0 %v8469_v2  ;;  %v630_v63 = vld [vmem:[%s10007_s24 + $0xe20] sm:$0xff]  ;;  %v628_v0 = vld [vmem:[%s10007_s24 + $0xe10] sm:$0xff] }
 0x1c8   : > { %v632_v2 = vld [vmem:[%s10007_s24 + $0xe30] sm:$0xff]  ;;  %v8529_v5 = vcombine.high %v626_v62, %v630_v63 }
 0x1c9   : > { %v8533_v6 = vcombine.high %v628_v0, %v632_v2  ;;  %v8532_v12 = vcombine.low %v628_v0, %v632_v2  ;;  %v690_v2 = vld [vmem:[%s10007_s24 + $0x1000] sm:$0xff] }
 0x1ce   : > { %5275 = vmatmul.mubr.bf16.gmra.mrb[192].mxu1 %v8464_v8  ;;  %6685 = vmatmul.mubr.bf16.gmra.mrb[192].mxu0 %v8468_v9  ;;  %v638_v8 = vld [vmem:[%s10007_s24 + $0xe60] sm:$0xff]  ;;  %v636_v9 = vld [vmem:[%s10007_s24 + $0xe50] sm:$0xff] }
 0x1cf   : > { %5282 = vmatprep.mubr.bf16.mxu1 %v8473_v10  ;;  %6692 = vmatprep.mubr.bf16.mxu0 %v8477_v11  ;;  %v640_v10 = vld [vmem:[%s10007_s24 + $0xe70] sm:$0xff]  ;;  %v8528_v11 = vcombine.low %v626_v62, %v630_v63  ;;  %v8537_v13 = vcombine.high %v634_v7, %v638_v8 }
 0x1d0   : > { %v8541_v14 = vcombine.high %v636_v9, %v640_v10  ;;  %v8540_v20 = vcombine.low %v636_v9, %v640_v10  ;;  %v9893_v10 = vld [vmem:[%s11726_s1 + $0xf8] sm:$0xff]  }
 0x1d1   : > { %5594 = vmatpush1.bf16.msra.mxu1 %v9893_v10 }
 0x1d6   : > { %5283 = vmatmul.mubr.bf16.gmra.mrb[196].mxu1 %v8472_v16  ;;  %6693 = vmatmul.mubr.bf16.gmra.mrb[196].mxu0 %v8476_v17  ;;  %v646_v16 = vld [vmem:[%s10007_s24 + $0xea0] sm:$0xff]  ;;  %v644_v17 = vld [vmem:[%s10007_s24 + $0xe90] sm:$0xff] }
 0x1d7   : > { %5290 = vmatprep.mubr.bf16.mxu1 %v8481_v18  ;;  %6700 = vmatprep.mubr.bf16.mxu0 %v8485_v19  ;;  %v648_v18 = vld [vmem:[%s10007_s24 + $0xeb0] sm:$0xff]  ;;  %v8536_v19 = vcombine.low %v634_v7, %v638_v8  ;;  %v8545_v21 = vcombine.high %v642_v15, %v646_v16 }
 0x1d8   : > { %v8549_v22 = vcombine.high %v644_v17, %v648_v18  ;;  %v8548_v28 = vcombine.low %v644_v17, %v648_v18 }
 0x1de   : > { %5291 = vmatmul.mubr.bf16.gmra.mrb[200].mxu1 %v8480_v24  ;;  %6701 = vmatmul.mubr.bf16.gmra.mrb[200].mxu0 %v8484_v25  ;;  %v654_v24 = vld [vmem:[%s10007_s24 + $0xee0] sm:$0xff]  ;;  %v652_v25 = vld [vmem:[%s10007_s24 + $0xed0] sm:$0xff] }
 0x1df   : > { %5298 = vmatprep.mubr.bf16.mxu1 %v8489_v26  ;;  %6708 = vmatprep.mubr.bf16.mxu0 %v8493_v27  ;;  %v656_v26 = vld [vmem:[%s10007_s24 + $0xef0] sm:$0xff]  ;;  %v8544_v27 = vcombine.low %v642_v15, %v646_v16  ;;  %v8553_v29 = vcombine.high %v650_v23, %v654_v24  ;;  %v8552_v36 = vcombine.low %v650_v23, %v654_v24 }
 0x1e0   : > { %v8557_v31 = vcombine.high %v652_v25, %v656_v26  ;;  %v8556_v37 = vcombine.low %v652_v25, %v656_v26  ;;  %v704_v15 = vld [vmem:[%s10007_s24 + $0x1070] sm:$0xff] }
 0x1e6   : > { %5299 = vmatmul.mubr.bf16.gmra.mrb[204].mxu1 %v8488_v32  ;;  %6709 = vmatmul.mubr.bf16.gmra.mrb[204].mxu0 %v8492_v33  ;;  %v658_v32 = vld [vmem:[%s10007_s24 + $0xf00] sm:$0xff] }
 0x1e7   : > { %5306 = vmatprep.mubr.bf16.mxu1 %v8497_v34  ;;  %6716 = vmatprep.mubr.bf16.mxu0 %v8501_v35  ;;  %v662_v33 = vld [vmem:[%s10007_s24 + $0xf20] sm:$0xff]  ;;  %v660_v34 = vld [vmem:[%s10007_s24 + $0xf10] sm:$0xff] }
 0x1e8   : > { %v664_v35 = vld [vmem:[%s10007_s24 + $0xf30] sm:$0xff]  ;;  %v8561_v38 = vcombine.high %v658_v32, %v662_v33 }
 0x1e9   : > { %v8565_v39 = vcombine.high %v660_v34, %v664_v35  ;;  %v8564_v44 = vcombine.low %v660_v34, %v664_v35 }
 0x1ee   : > { %5307 = vmatmul.mubr.bf16.gmra.mrb[208].mxu1 %v8496_v40  ;;  %6717 = vmatmul.mubr.bf16.gmra.mrb[208].mxu0 %v8500_v41  ;;  %v670_v40 = vld [vmem:[%s10007_s24 + $0xf60] sm:$0xff]  ;;  %v668_v41 = vld [vmem:[%s10007_s24 + $0xf50] sm:$0xff] }
 0x1ef   : > { %5314 = vmatprep.mubr.bf16.mxu1 %v8505_v42  ;;  %6724 = vmatprep.mubr.bf16.mxu0 %v8509_v43  ;;  %v672_v42 = vld [vmem:[%s10007_s24 + $0xf70] sm:$0xff]  ;;  %v8560_v43 = vcombine.low %v658_v32, %v662_v33  ;;  %v8569_v45 = vcombine.high %v666_v1, %v670_v40 }
 0x1f0   : > { %v8573_v46 = vcombine.high %v668_v41, %v672_v42 }
 0x1f6   : > { %5315 = vmatmul.mubr.bf16.gmra.mrb[212].mxu1 %v8504_v49  ;;  %6725 = vmatmul.mubr.bf16.gmra.mrb[212].mxu0 %v8508_v50  ;;  %v676_v49 = vld [vmem:[%s10007_s24 + $0xf90] sm:$0xff] }
 0x1f7   : > { %5322 = vmatprep.mubr.bf16.mxu1 %v8513_v51  ;;  %6732 = vmatprep.mubr.bf16.mxu0 %v8517_v52  ;;  %v680_v50 = vld [vmem:[%s10007_s24 + $0xfb0] sm:$0xff]  ;;  %v8568_v51 = vcombine.low %v666_v1, %v670_v40  ;;  %v8572_v52 = vcombine.low %v668_v41, %v672_v42  ;;  %v714_v42 = vld [vmem:[%s10007_s24 + $0x10c0] sm:$0xff] }
 0x1f8   : > { %v8581_v54 = vcombine.high %v676_v49, %v680_v50  ;;  %v8580_v62 = vcombine.low %v676_v49, %v680_v50 }
 0x1fe   : > { %5323 = vmatmul.mubr.bf16.gmra.mrb[216].mxu1 %v8512_v58  ;;  %6733 = vmatmul.mubr.bf16.gmra.mrb[216].mxu0 %v8516_v59  ;;  %v686_v58 = vld [vmem:[%s10007_s24 + $0xfe0] sm:$0xff]  ;;  %v684_v59 = vld [vmem:[%s10007_s24 + $0xfd0] sm:$0xff] }
 0x1ff   : > { %5330 = vmatprep.mubr.bf16.mxu1 %v8521_v60  ;;  %6740 = vmatprep.mubr.bf16.mxu0 %v8525_v61  ;;  %v688_v60 = vld [vmem:[%s10007_s24 + $0xff0] sm:$0xff]  ;;  %v8576_v61 = vcombine.low %v674_v47, %v678_v48  ;;  %v8585_v63 = vcombine.high %v682_v57, %v686_v58 }
 0x200   : > { %v8589_v0 = vcombine.high %v684_v59, %v688_v60  ;;  %v8588_v7 = vcombine.low %v684_v59, %v688_v60  ;;  %v726_v59 = vld [vmem:[%s10007_s24 + $0x1120] sm:$0xff] }
 0x206   : > { %5331 = vmatmul.mubr.bf16.gmra.mrb[220].mxu1 %v8520_v3  ;;  %6741 = vmatmul.mubr.bf16.gmra.mrb[220].mxu0 %v8524_v4  ;;  %v694_v3 = vld [vmem:[%s10007_s24 + $0x1020] sm:$0xff]  ;;  %v692_v4 = vld [vmem:[%s10007_s24 + $0x1010] sm:$0xff] }
 0x207   : > { %5338 = vmatprep.mubr.bf16.mxu1 %v8529_v5  ;;  %6748 = vmatprep.mubr.bf16.mxu0 %v8533_v6  ;;  %v696_v5 = vld [vmem:[%s10007_s24 + $0x1030] sm:$0xff]  ;;  %v8584_v6 = vcombine.low %v682_v57, %v686_v58  ;;  %v8593_v8 = vcombine.high %v690_v2, %v694_v3  ;;  %v8592_v18 = vcombine.low %v690_v2, %v694_v3  ;;  %v722_v58 = vld [vmem:[%s10007_s24 + $0x1100] sm:$0xff] }
 0x208   : > { %v8597_v9 = vcombine.high %v692_v4, %v696_v5 }
 0x20e   : > { %5339 = vmatmul.mubr.bf16.gmra.mrb[224].mxu1 %v8528_v11  ;;  %6749 = vmatmul.mubr.bf16.gmra.mrb[224].mxu0 %v8532_v12  ;;  %v698_v11 = vld [vmem:[%s10007_s24 + $0x1040] sm:$0xff] }
 0x20f   : > { %5346 = vmatprep.mubr.bf16.mxu1 %v8537_v13  ;;  %6756 = vmatprep.mubr.bf16.mxu0 %v8541_v14  ;;  %v702_v12 = vld [vmem:[%s10007_s24 + $0x1060] sm:$0xff]  ;;  %v700_v14 = vld [vmem:[%s10007_s24 + $0x1050] sm:$0xff] }
 0x210   : > { %v8605_v25 = vcombine.high %v700_v14, %v704_v15  ;;  %v8600_v34 = vcombine.low %v698_v11, %v702_v12 }
 0x216   : > { %5347 = vmatmul.mubr.bf16.gmra.mrb[228].mxu1 %v8536_v19  ;;  %6757 = vmatmul.mubr.bf16.gmra.mrb[228].mxu0 %v8540_v20 }
 0x217   : > { %5354 = vmatprep.mubr.bf16.mxu1 %v8545_v21  ;;  %6764 = vmatprep.mubr.bf16.mxu0 %v8549_v22  ;;  %v8596_v21 = vcombine.low %v692_v4, %v696_v5  ;;  %v8601_v22 = vcombine.high %v698_v11, %v702_v12  ;;  %v730_v11 = vld [vmem:[%s10007_s24 + $0x1140] sm:$0xff] }
 0x218   : > { %v734_v12 = vld [vmem:[%s10007_s24 + $0x1160] sm:$0xff] }
 0x21e   : > { %5355 = vmatmul.mubr.bf16.gmra.mrb[232].mxu1 %v8544_v27  ;;  %6765 = vmatmul.mubr.bf16.gmra.mrb[232].mxu0 %v8548_v28  ;;  %v706_v27 = vld [vmem:[%s10007_s24 + $0x1080] sm:$0xff] }
 0x21f   : > { %5362 = vmatprep.mubr.bf16.mxu1 %v8553_v29  ;;  %6772 = vmatprep.mubr.bf16.mxu0 %v8557_v31  ;;  %v710_v28 = vld [vmem:[%s10007_s24 + $0x10a0] sm:$0xff]  ;;  %v712_v31 = vld [vmem:[%s10007_s24 + $0x10b0] sm:$0xff] }
 0x220   : > { %v8613_v40 = vcombine.high %v708_v30, %v712_v31  ;;  %v8608_v49 = vcombine.low %v706_v27, %v710_v28 }
 0x226   : > { %5363 = vmatmul.mubr.bf16.gmra.mrb[236].mxu1 %v8552_v36  ;;  %6773 = vmatmul.mubr.bf16.gmra.mrb[236].mxu0 %v8556_v37  ;;  %v8604_v37 = vcombine.low %v700_v14, %v704_v15  ;;  %v732_v15 = vld [vmem:[%s10007_s24 + $0x1150] sm:$0xff] }
 0x227   : > { %5370 = vmatprep.mubr.bf16.mxu1 %v8561_v38  ;;  %6780 = vmatprep.mubr.bf16.mxu0 %v8565_v39  ;;  %v8609_v38 = vcombine.high %v706_v27, %v710_v28 }
 0x22e   : > { %5371 = vmatmul.mubr.bf16.gmra.mrb[240].mxu1 %v8560_v43  ;;  %6781 = vmatmul.mubr.bf16.gmra.mrb[240].mxu0 %v8564_v44  ;;  %v718_v43 = vld [vmem:[%s10007_s24 + $0x10e0] sm:$0xff] }
 0x22f   : > { %5378 = vmatprep.mubr.bf16.mxu1 %v8569_v45  ;;  %6788 = vmatprep.mubr.bf16.mxu0 %v8573_v46  ;;  %v716_v45 = vld [vmem:[%s10007_s24 + $0x10d0] sm:$0xff]  ;;  %v8616_v2 = vcombine.low %v714_v42, %v718_v43 }
 0x230   : > { %v720_v46 = vld [vmem:[%s10007_s24 + $0x10f0] sm:$0xff] }
 0x231   : > { %v8621_v56 = vcombine.high %v716_v45, %v720_v46  ;;  %v8620_v5 = vcombine.low %v716_v45, %v720_v46 }
 0x236   : > { %5379 = vmatmul.mubr.bf16.gmra.mrb[244].mxu1 %v8568_v51  ;;  %6789 = vmatmul.mubr.bf16.gmra.mrb[244].mxu0 %v8572_v52  ;;  %v8612_v52 = vcombine.low %v708_v30, %v712_v31 }
 0x237   : > { %5386 = vmatprep.mubr.bf16.mxu1 %v8577_v53  ;;  %6796 = vmatprep.mubr.bf16.mxu0 %v8581_v54  ;;  %v8617_v53 = vcombine.high %v714_v42, %v718_v43 }
 0x23e   : > { %5387 = vmatmul.mubr.bf16.gmra.mrb[248].mxu1 %v8576_v61  ;;  %6797 = vmatmul.mubr.bf16.gmra.mrb[248].mxu0 %v8580_v62  ;;  %v724_v61 = vld [vmem:[%s10007_s24 + $0x1110] sm:$0xff] }
 0x23f   : > { %5394 = vmatprep.mubr.bf16.mxu1 %v8585_v63  ;;  %6804 = vmatprep.mubr.bf16.mxu0 %v8589_v0  ;;  %v728_v62 = vld [vmem:[%s10007_s24 + $0x1130] sm:$0xff] }
 0x246   : > { %5395 = vmatmul.mubr.bf16.gmra.mrb[252].mxu1 %v8584_v6  ;;  %6805 = vmatmul.mubr.bf16.gmra.mrb[252].mxu0 %v8588_v7  ;;  %v8625_v6 = vcombine.high %v722_v58, %v726_v59 }
 0x247   : > { %5402 = vmatprep.mubr.bf16.mxu1 %v8593_v8  ;;  %6812 = vmatprep.mubr.bf16.mxu0 %v8597_v9  ;;  %v8629_v9 = vcombine.high %v724_v61, %v728_v62 }
 0x249   : > { %v10459_v13 = vpop.f32.mrb[148].mxu1  ;;  %v10463_v16 = vpop.f32.mrb[148].mxu0 }
 0x24a   : > { %v5190_v17 = vpop.f32.mrb[149].mxu1  ;;  %v6600_v19 = vpop.f32.mrb[149].mxu0 }
 0x24b   : > { %v10465_v20 = vpop.f32.mrb[150].mxu1  ;;  %v10467_v23 = vpop.f32.mrb[150].mxu0  ;;  %v736_v17 = vld [vmem:[%s10007_s24 + $0x1170] sm:$0xff] }
 0x24c   : > { %v5193_v24 = vpop.f32.mrb[151].mxu1  ;;  %v6603_v26 = vpop.f32.mrb[151].mxu0  ;;  %v8637_v30 = vcombine.high %v732_v15, %v736_v17  ;;  %v8636_v45 = vcombine.low %v732_v15, %v736_v17  ;;  %v756_v17 = vld [vmem:[%s10007_s24 + $0x1210] sm:$0xff] }
 0x24d   : > { %v8633_v26 = vcombine.high %v730_v11, %v734_v12 }
 0x24e   : > { %5403 = vmatmul.mubr.bf16.gmra.mrb[148].mxu1 %v8592_v18  ;;  %6813 = vmatmul.mubr.bf16.gmra.mrb[148].mxu0 %v8596_v21  ;;  %v8624_v21 = vcombine.low %v722_v58, %v726_v59  ;;  %v752_v58 = vld [vmem:[%s10007_s24 + $0x11f0] sm:$0xff] }
 0x24f   : > { %5410 = vmatprep.mubr.bf16.mxu1 %v8601_v22  ;;  %6820 = vmatprep.mubr.bf16.mxu0 %v8605_v25  ;;  %v8628_v25 = vcombine.low %v724_v61, %v728_v62 }
 0x251   : > { %v10471_v29 = vpop.f32.mrb[152].mxu1  ;;  %v10475_v32 = vpop.f32.mrb[152].mxu0 }
 0x252   : > { %v5198_v33 = vpop.f32.mrb[153].mxu1  ;;  %v6608_v35 = vpop.f32.mrb[153].mxu0 }
 0x253   : > { %v10477_v36 = vpop.f32.mrb[154].mxu1  ;;  %v10479_v39 = vpop.f32.mrb[154].mxu0  ;;  %v738_v33 = vld [vmem:[%s10007_s24 + $0x1180] sm:$0xff] }
 0x254   : > { %v5201_v1 = vpop.f32.mrb[155].mxu1  ;;  %v6611_v41 = vpop.f32.mrb[155].mxu0 }
 0x255   : > { %v8632_v41 = vcombine.low %v730_v11, %v734_v12  ;;  %v754_v11 = vld [vmem:[%s10007_s24 + $0x1200] sm:$0xff] }
 0x256   : > { %5411 = vmatmul.mubr.bf16.gmra.mrb[152].mxu1 %v8600_v34  ;;  %6821 = vmatmul.mubr.bf16.gmra.mrb[152].mxu0 %v8604_v37  ;;  %v742_v34 = vld [vmem:[%s10007_s24 + $0x11a0] sm:$0xff]  ;;  %v740_v37 = vld [vmem:[%s10007_s24 + $0x1190] sm:$0xff] }
 0x257   : > { %5418 = vmatprep.mubr.bf16.mxu1 %v8609_v38  ;;  %6828 = vmatprep.mubr.bf16.mxu0 %v8613_v40  ;;  %v744_v38 = vld [vmem:[%s10007_s24 + $0x11b0] sm:$0xff]  ;;  %v8641_v46 = vcombine.high %v738_v33, %v742_v34  ;;  %v8640_v62 = vcombine.low %v738_v33, %v742_v34  ;;  %v758_v12 = vld [vmem:[%s10007_s24 + $0x1220] sm:$0xff] }
 0x259   : > { %v10483_v44 = vpop.f32.mrb[156].mxu1  ;;  %v10487_v47 = vpop.f32.mrb[156].mxu0 }
 0x25a   : > { %v5206_v48 = vpop.f32.mrb[157].mxu1  ;;  %v6616_v50 = vpop.f32.mrb[157].mxu0 }
 0x25b   : > { %v10489_v51 = vpop.f32.mrb[158].mxu1  ;;  %v10491_v54 = vpop.f32.mrb[158].mxu0  ;;  %v8645_v50 = vcombine.high %v740_v37, %v744_v38 }
 0x25c   : > { %v5209_v55 = vpop.f32.mrb[159].mxu1  ;;  %v6619_v57 = vpop.f32.mrb[159].mxu0 }
 0x25d   : > { %v750_v55 = vld [vmem:[%s10007_s24 + $0x11e0] sm:$0xff]  ;;  %v748_v57 = vld [vmem:[%s10007_s24 + $0x11d0] sm:$0xff] }
 0x25e   : > { %5419 = vmatmul.mubr.bf16.gmra.mrb[156].mxu1 %v8608_v49  ;;  %6829 = vmatmul.mubr.bf16.gmra.mrb[156].mxu0 %v8612_v52 }
 0x25f   : > { %5426 = vmatprep.mubr.bf16.mxu1 %v8617_v53  ;;  %6836 = vmatprep.mubr.bf16.mxu0 %v8621_v56  ;;  %v746_v53 = vld [vmem:[%s10007_s24 + $0x11c0] sm:$0xff] }
 0x261   : > { %v10495_v60 = vpop.f32.mrb[160].mxu1  ;;  %v10499_v63 = vpop.f32.mrb[160].mxu0 }
 0x262   : > { %v5214_v0 = vpop.f32.mrb[161].mxu1  ;;  %v6624_v3 = vpop.f32.mrb[161].mxu0 }
 0x263   : > { %v10501_v4 = vpop.f32.mrb[162].mxu1  ;;  %v10503_v7 = vpop.f32.mrb[162].mxu0  ;;  %v8644_v3 = vcombine.low %v740_v37, %v744_v38 }
 0x264   : > { %v5217_v8 = vpop.f32.mrb[163].mxu1  ;;  %v6627_v10 = vpop.f32.mrb[163].mxu0 }
 0x266   : > { %5427 = vmatmul.mubr.bf16.gmra.mrb[160].mxu1 %v8616_v2  ;;  %6837 = vmatmul.mubr.bf16.gmra.mrb[160].mxu0 %v8620_v5  ;;  %v8649_v5 = vcombine.high %v746_v53, %v750_v55 }
 0x267   : > { %5434 = vmatprep.mubr.bf16.mxu1 %v8625_v6  ;;  %6844 = vmatprep.mubr.bf16.mxu0 %v8629_v9  ;;  %v8653_v9 = vcombine.high %v748_v57, %v752_v58 }
 0x269   : > { %v10507_v14 = vpop.f32.mrb[164].mxu1  ;;  %v10511_v18 = vpop.f32.mrb[164].mxu0 }
 0x26a   : > { %v5222_v19 = vpop.f32.mrb[165].mxu1  ;;  %v6632_v22 = vpop.f32.mrb[165].mxu0 }
 0x26b   : > { %v10513_v24 = vpop.f32.mrb[166].mxu1  ;;  %v10515_v27 = vpop.f32.mrb[166].mxu0  ;;  %v760_v19 = vld [vmem:[%s10007_s24 + $0x1230] sm:$0xff] }
 0x26c   : > { %v5225_v28 = vpop.f32.mrb[167].mxu1  ;;  %v6635_v31 = vpop.f32.mrb[167].mxu0  ;;  %v8661_v37 = vcombine.high %v756_v17, %v760_v19 }
 0x26d   : > { %v8657_v31 = vcombine.high %v754_v11, %v758_v12 }
 0x26e   : > { %5435 = vmatmul.mubr.bf16.gmra.mrb[164].mxu1 %v8624_v21  ;;  %6845 = vmatmul.mubr.bf16.gmra.mrb[164].mxu0 %v8628_v25  ;;  %v8648_v25 = vcombine.low %v746_v53, %v750_v55 }
 0x26f   : > { %5442 = vmatprep.mubr.bf16.mxu1 %v8633_v26  ;;  %6852 = vmatprep.mubr.bf16.mxu0 %v8637_v30  ;;  %v8652_v30 = vcombine.low %v748_v57, %v752_v58  ;;  %v8660_v57 = vcombine.low %v756_v17, %v760_v19 }
 0x271   : > { %v10519_v35 = vpop.f32.mrb[168].mxu1  ;;  %v10523_v1 = vpop.f32.mrb[168].mxu0 }
 0x272   : > { %v5230_v40 = vpop.f32.mrb[169].mxu1  ;;  %v6640_v42 = vpop.f32.mrb[169].mxu0 }
 0x273   : > { %v10525_v43 = vpop.f32.mrb[170].mxu1  ;;  %v10527_v48 = vpop.f32.mrb[170].mxu0  ;;  %v762_v40 = vld [vmem:[%s10007_s24 + $0x1240] sm:$0xff] }
 0x274   : > { %v5233_v49 = vpop.f32.mrb[171].mxu1  ;;  %v6643_v52 = vpop.f32.mrb[171].mxu0 }
 0x275   : > { %v8656_v52 = vcombine.low %v754_v11, %v758_v12  ;;  %v776_v11 = vld [vmem:[%s10007_s24 + $0x12b0] sm:$0xff] }
 0x276   : > { %5443 = vmatmul.mubr.bf16.gmra.mrb[168].mxu1 %v8632_v41  ;;  %6853 = vmatmul.mubr.bf16.gmra.mrb[168].mxu0 %v8636_v45  ;;  %v766_v41 = vld [vmem:[%s10007_s24 + $0x1260] sm:$0xff]  ;;  %v764_v45 = vld [vmem:[%s10007_s24 + $0x1250] sm:$0xff] }
 0x277   : > { %5450 = vmatprep.mubr.bf16.mxu1 %v8641_v46  ;;  %6860 = vmatprep.mubr.bf16.mxu0 %v8645_v50  ;;  %v768_v46 = vld [vmem:[%s10007_s24 + $0x1270] sm:$0xff]  ;;  %v8665_v58 = vcombine.high %v762_v40, %v766_v41  ;;  %v8664_v19 = vcombine.low %v762_v40, %v766_v41 }
 0x278   : > { %v780_v40 = vld [vmem:[%s10007_s24 + $0x12d0] sm:$0xff] }
 0x279   : > { %v10531_v56 = vpop.f32.mrb[172].mxu1  ;;  %v10535_v59 = vpop.f32.mrb[172].mxu0  ;;  %v784_v41 = vld [vmem:[%s10007_s24 + $0x12f0] sm:$0xff] }
 0x27a   : > { %v5238_v61 = vpop.f32.mrb[173].mxu1  ;;  %v6648_v0 = vpop.f32.mrb[173].mxu0 }
 0x27b   : > { %v10537_v2 = vpop.f32.mrb[174].mxu1  ;;  %v10539_v6 = vpop.f32.mrb[174].mxu0  ;;  %v8669_v0 = vcombine.high %v764_v45, %v768_v46 }
 0x27c   : > { %v5241_v8 = vpop.f32.mrb[175].mxu1  ;;  %v6651_v10 = vpop.f32.mrb[175].mxu0 }
 0x27d   : > { %v774_v8 = vld [vmem:[%s10007_s24 + $0x12a0] sm:$0xff]  ;;  %v772_v10 = vld [vmem:[%s10007_s24 + $0x1290] sm:$0xff] }
 0x27e   : > { %5451 = vmatmul.mubr.bf16.gmra.mrb[172].mxu1 %v8640_v62  ;;  %6861 = vmatmul.mubr.bf16.gmra.mrb[172].mxu0 %v8644_v3 }
 0x27f   : > { %5458 = vmatprep.mubr.bf16.mxu1 %v8649_v5  ;;  %6868 = vmatprep.mubr.bf16.mxu0 %v8653_v9  ;;  %v770_v5 = vld [vmem:[%s10007_s24 + $0x1280] sm:$0xff] }
 0x281   : > { %v10543_v15 = vpop.f32.mrb[176].mxu1  ;;  %v10547_v21 = vpop.f32.mrb[176].mxu0 }
 0x282   : > { %v5246_v22 = vpop.f32.mrb[177].mxu1  ;;  %v6656_v26 = vpop.f32.mrb[177].mxu0 }
 0x283   : > { %v10549_v28 = vpop.f32.mrb[178].mxu1  ;;  %v10551_v33 = vpop.f32.mrb[178].mxu0  ;;  %v8668_v26 = vcombine.low %v764_v45, %v768_v46  ;;  %v8672_v46 = vcombine.low %v770_v5, %v774_v8 }
 0x284   : > { %v5249_v34 = vpop.f32.mrb[179].mxu1  ;;  %v6659_v38 = vpop.f32.mrb[179].mxu0 }
 0x286   : > { %5459 = vmatmul.mubr.bf16.gmra.mrb[176].mxu1 %v8648_v25  ;;  %6869 = vmatmul.mubr.bf16.gmra.mrb[176].mxu0 %v8652_v30  ;;  %v8673_v30 = vcombine.high %v770_v5, %v774_v8  ;;  %v788_v5 = vld [vmem:[%s10007_s24 + $0x1310] sm:$0xff] }
 0x287   : > { %5466 = vmatprep.mubr.bf16.mxu1 %v8657_v31  ;;  %6876 = vmatprep.mubr.bf16.mxu0 %v8661_v37  ;;  %v8677_v37 = vcombine.high %v772_v10, %v776_v11  ;;  %v792_v8 = vld [vmem:[%s10007_s24 + $0x1330] sm:$0xff] }
 0x289   : > { %v10555_v42 = vpop.f32.mrb[180].mxu1  ;;  %v10559_v49 = vpop.f32.mrb[180].mxu0 }
 0x28a   : > { %v5254_v50 = vpop.f32.mrb[181].mxu1  ;;  %v6664_v53 = vpop.f32.mrb[181].mxu0 }
 0x28b   : > { %v10561_v55 = vpop.f32.mrb[182].mxu1  ;;  %v10563_v61 = vpop.f32.mrb[182].mxu0  ;;  %v778_v50 = vld [vmem:[%s10007_s24 + $0x12c0] sm:$0xff] }
 0x28c   : > { %v5257_v62 = vpop.f32.mrb[183].mxu1  ;;  %v6667_v3 = vpop.f32.mrb[183].mxu0 }
 0x28e   : > { %5467 = vmatmul.mubr.bf16.gmra.mrb[180].mxu1 %v8656_v52  ;;  %6877 = vmatmul.mubr.bf16.gmra.mrb[180].mxu0 %v8660_v57  ;;  %v782_v52 = vld [vmem:[%s10007_s24 + $0x12e0] sm:$0xff] }
 0x28f   : > { %5474 = vmatprep.mubr.bf16.mxu1 %v8665_v58  ;;  %6884 = vmatprep.mubr.bf16.mxu0 %v8669_v0  ;;  %v8676_v0 = vcombine.low %v772_v10, %v776_v11  ;;  %v8681_v3 = vcombine.high %v778_v50, %v782_v52  ;;  %v8680_v11 = vcombine.low %v778_v50, %v782_v52  ;;  %v796_v50 = vld [vmem:[%s10007_s24 + $0x1350] sm:$0xff] }
 0x290   : > { %v800_v52 = vld [vmem:[%s10007_s24 + $0x1370] sm:$0xff] }
 0x291   : > { %v10567_v9 = vpop.f32.mrb[184].mxu1  ;;  %v10571_v12 = vpop.f32.mrb[184].mxu0 }
 0x292   : > { %v5262_v17 = vpop.f32.mrb[185].mxu1  ;;  %v6672_v22 = vpop.f32.mrb[185].mxu0 }
 0x293   : > { %v10573_v25 = vpop.f32.mrb[186].mxu1  ;;  %v10575_v31 = vpop.f32.mrb[186].mxu0  ;;  %v8685_v22 = vcombine.high %v780_v40, %v784_v41 }
 0x294   : > { %v5265_v34 = vpop.f32.mrb[187].mxu1  ;;  %v6675_v38 = vpop.f32.mrb[187].mxu0 }
 0x295   : > { %v790_v34 = vld [vmem:[%s10007_s24 + $0x1320] sm:$0xff] }
 0x296   : > { %5475 = vmatmul.mubr.bf16.gmra.mrb[184].mxu1 %v8664_v19  ;;  %6885 = vmatmul.mubr.bf16.gmra.mrb[184].mxu0 %v8668_v26 }
 0x297   : > { %5482 = vmatprep.mubr.bf16.mxu1 %v8673_v30  ;;  %6892 = vmatprep.mubr.bf16.mxu0 %v8677_v37  ;;  %v786_v30 = vld [vmem:[%s10007_s24 + $0x1300] sm:$0xff] }
 0x299   : > { %v10579_v53 = vpop.f32.mrb[188].mxu1  ;;  %v10583_v57 = vpop.f32.mrb[188].mxu0 }
 0x29a   : > { %11729 = vst [vmem:[#allocation2_spill] sm:$0xff] %v10579_v53  ;;  %11730 = vst [vmem:[#allocation3_spill] sm:$0xff] %v10583_v57  ;;  %v5270_v45 = vpop.f32.mrb[189].mxu1  ;;  %v6680_v58 = vpop.f32.mrb[189].mxu0 }
 0x29b   : > { %v10585_v62 = vpop.f32.mrb[190].mxu1  ;;  %v10587_v17 = vpop.f32.mrb[190].mxu0 }
 0x29c   : > { %11731 = vst [vmem:[#allocation4_spill] sm:$0xff] %v10585_v62  ;;  %11732 = vst [vmem:[#allocation5_spill] sm:$0xff] %v10587_v17  ;;  %v5273_v19 = vpop.f32.mrb[191].mxu1  ;;  %v6683_v26 = vpop.f32.mrb[191].mxu0 }
 0x29e   : > { %5483 = vmatmul.mubr.bf16.gmra.mrb[188].mxu1 %v8672_v46  ;;  %6893 = vmatmul.mubr.bf16.gmra.mrb[188].mxu0 %v8676_v0  ;;  %v8684_v46 = vcombine.low %v780_v40, %v784_v41  ;;  %v8689_v0 = vcombine.high %v786_v30, %v790_v34  ;;  %v8688_v41 = vcombine.low %v786_v30, %v790_v34  ;;  %v804_v30 = vld [vmem:[%s10007_s24 + $0x1390] sm:$0xff] }
 0x29f   : > { %5490 = vmatprep.mubr.bf16.mxu1 %v8681_v3  ;;  %6900 = vmatprep.mubr.bf16.mxu0 %v8685_v22  ;;  %v8693_v22 = vcombine.high %v788_v5, %v792_v8  ;;  %v808_v34 = vld [vmem:[%s10007_s24 + $0x13b0] sm:$0xff] }
 0x2a1   : > { %v10591_v37 = vpop.f32.mrb[192].mxu1  ;;  %v10595_v38 = vpop.f32.mrb[192].mxu0 }
 0x2a2   : > { %11733 = vst [vmem:[#allocation6_spill] sm:$0xff] %v10591_v37  ;;  %11734 = vst [vmem:[#allocation7_spill] sm:$0xff] %v10595_v38  ;;  %v5278_v10 = vpop.f32.mrb[193].mxu1  ;;  %v6688_v45 = vpop.f32.mrb[193].mxu0  ;;  %v794_v38 = vld [vmem:[%s10007_s24 + $0x1340] sm:$0xff] }
 0x2a3   : > { %v10597_v58 = vpop.f32.mrb[194].mxu1  ;;  %v10599_v3 = vpop.f32.mrb[194].mxu0  ;;  %v798_v37 = vld [vmem:[%s10007_s24 + $0x1360] sm:$0xff] }
 0x2a4   : > { %11735 = vst [vmem:[#allocation8_spill] sm:$0xff] %v10597_v58  ;;  %11736 = vst [vmem:[#allocation9_spill] sm:$0xff] %v10599_v3  ;;  %v5281_v19 = vpop.f32.mrb[195].mxu1  ;;  %v6691_v26 = vpop.f32.mrb[195].mxu0  ;;  %v8701_v3 = vcombine.high %v796_v50, %v800_v52  ;;  %v806_v58 = vld [vmem:[%s10007_s24 + $0x13a0] sm:$0xff] }
 0x2a6   : > { %5491 = vmatmul.mubr.bf16.gmra.mrb[192].mxu1 %v8680_v11  ;;  %6901 = vmatmul.mubr.bf16.gmra.mrb[192].mxu0 %v8684_v46  ;;  %v8692_v11 = vcombine.low %v788_v5, %v792_v8  ;;  %v8697_v46 = vcombine.high %v794_v38, %v798_v37  ;;  %v8696_v8 = vcombine.low %v794_v38, %v798_v37  ;;  %v812_v37 = vld [vmem:[%s10007_s24 + $0x13d0] sm:$0xff] }
 0x2a7   : > { %5498 = vmatprep.mubr.bf16.mxu1 %v8689_v0  ;;  %6908 = vmatprep.mubr.bf16.mxu0 %v8693_v22  ;;  %v816_v38 = vld [vmem:[%s10007_s24 + $0x13f0] sm:$0xff] }
 0x2a9   : > { %v10603_v10 = vpop.f32.mrb[196].mxu1  ;;  %v10607_v45 = vpop.f32.mrb[196].mxu0 }
 0x2aa   : > { %11737 = vst [vmem:[#allocation10_spill] sm:$0xff] %v10603_v10  ;;  %11738 = vst [vmem:[#allocation11_spill] sm:$0xff] %v10607_v45  ;;  %v5286_v40 = vpop.f32.mrb[197].mxu1  ;;  %v6696_v19 = vpop.f32.mrb[197].mxu0  ;;  %v802_v45 = vld [vmem:[%s10007_s24 + $0x1380] sm:$0xff] }
 0x2ab   : > { %v10609_v26 = vpop.f32.mrb[198].mxu1  ;;  %v10611_v0 = vpop.f32.mrb[198].mxu0 }
 0x2ac   : > { %11739 = vst [vmem:[#allocation12_spill] sm:$0xff] %v10609_v26  ;;  %11740 = vst [vmem:[#allocation13_spill] sm:$0xff] %v10611_v0  ;;  %v5289_v22 = vpop.f32.mrb[199].mxu1  ;;  %v6699_v10 = vpop.f32.mrb[199].mxu0  ;;  %v8709_v0 = vcombine.high %v804_v30, %v808_v34  ;;  %v814_v26 = vld [vmem:[%s10007_s24 + $0x13e0] sm:$0xff] }
 0x2ae   : > { %5499 = vmatmul.mubr.bf16.gmra.mrb[196].mxu1 %v8688_v41  ;;  %6909 = vmatmul.mubr.bf16.gmra.mrb[196].mxu0 %v8692_v11  ;;  %v8700_v41 = vcombine.low %v796_v50, %v800_v52  ;;  %v8705_v11 = vcombine.high %v802_v45, %v806_v58  ;;  %v8704_v52 = vcombine.low %v802_v45, %v806_v58  ;;  %v820_v58 = vld [vmem:[%s10007_s24 + $0x1410] sm:$0xff] }
 0x2af   : > { %5506 = vmatprep.mubr.bf16.mxu1 %v8697_v46  ;;  %6916 = vmatprep.mubr.bf16.mxu0 %v8701_v3  ;;  %v824_v45 = vld [vmem:[%s10007_s24 + $0x1430] sm:$0xff] }
 0x2b1   : > { %v10615_v40 = vpop.f32.mrb[200].mxu1  ;;  %v10619_v19 = vpop.f32.mrb[200].mxu0 }
 0x2b2   : > { %11741 = vst [vmem:[#allocation14_spill] sm:$0xff] %v10615_v40  ;;  %11742 = vst [vmem:[#allocation15_spill] sm:$0xff] %v10619_v19  ;;  %v5294_v5 = vpop.f32.mrb[201].mxu1  ;;  %v6704_v22 = vpop.f32.mrb[201].mxu0  ;;  %v810_v19 = vld [vmem:[%s10007_s24 + $0x13c0] sm:$0xff] }
 0x2b3   : > { %v10621_v10 = vpop.f32.mrb[202].mxu1  ;;  %v10623_v3 = vpop.f32.mrb[202].mxu0 }
 0x2b4   : > { %11743 = vst [vmem:[#allocation16_spill] sm:$0xff] %v10621_v10  ;;  %11744 = vst [vmem:[#allocation17_spill] sm:$0xff] %v10623_v3  ;;  %v5297_v46 = vpop.f32.mrb[203].mxu1  ;;  %v6707_v40 = vpop.f32.mrb[203].mxu0  ;;  %v8717_v3 = vcombine.high %v812_v37, %v816_v38  ;;  %v822_v10 = vld [vmem:[%s10007_s24 + $0x1420] sm:$0xff] }
 0x2b6   : > { %5507 = vmatmul.mubr.bf16.gmra.mrb[200].mxu1 %v8696_v8  ;;  %6917 = vmatmul.mubr.bf16.gmra.mrb[200].mxu0 %v8700_v41  ;;  %v8708_v8 = vcombine.low %v804_v30, %v808_v34  ;;  %v8713_v41 = vcombine.high %v810_v19, %v814_v26  ;;  %v8712_v34 = vcombine.low %v810_v19, %v814_v26  ;;  %v828_v26 = vld [vmem:[%s10007_s24 + $0x1450] sm:$0xff] }
 0x2b7   : > { %5514 = vmatprep.mubr.bf16.mxu1 %v8705_v11  ;;  %6924 = vmatprep.mubr.bf16.mxu0 %v8709_v0  ;;  %v832_v19 = vld [vmem:[%s10007_s24 + $0x1470] sm:$0xff] }
 0x2b9   : > { %v10627_v5 = vpop.f32.mrb[204].mxu1  ;;  %v10631_v22 = vpop.f32.mrb[204].mxu0 }
 0x2ba   : > { %11745 = vst [vmem:[#allocation18_spill] sm:$0xff] %v10627_v5  ;;  %11746 = vst [vmem:[#allocation19_spill] sm:$0xff] %v10631_v22  ;;  %v5302_v50 = vpop.f32.mrb[205].mxu1  ;;  %v6712_v46 = vpop.f32.mrb[205].mxu0  ;;  %v818_v22 = vld [vmem:[%s10007_s24 + $0x1400] sm:$0xff] }
 0x2bb   : > { %v10633_v40 = vpop.f32.mrb[206].mxu1  ;;  %v10635_v0 = vpop.f32.mrb[206].mxu0 }
 0x2bc   : > { %11747 = vst [vmem:[#allocation20_spill] sm:$0xff] %v10633_v40  ;;  %11748 = vst [vmem:[#allocation21_spill] sm:$0xff] %v10635_v0  ;;  %v5305_v11 = vpop.f32.mrb[207].mxu1  ;;  %v6715_v5 = vpop.f32.mrb[207].mxu0  ;;  %v8725_v0 = vcombine.high %v820_v58, %v824_v45  ;;  %v830_v40 = vld [vmem:[%s10007_s24 + $0x1460] sm:$0xff] }
 0x2be   : > { %5515 = vmatmul.mubr.bf16.gmra.mrb[204].mxu1 %v8704_v52  ;;  %6925 = vmatmul.mubr.bf16.gmra.mrb[204].mxu0 %v8708_v8  ;;  %v8716_v52 = vcombine.low %v812_v37, %v816_v38  ;;  %v8721_v8 = vcombine.high %v818_v22, %v822_v10  ;;  %v8720_v38 = vcombine.low %v818_v22, %v822_v10  ;;  %v836_v10 = vld [vmem:[%s10007_s24 + $0x1490] sm:$0xff] }
 0x2bf   : > { %5522 = vmatprep.mubr.bf16.mxu1 %v8713_v41  ;;  %6932 = vmatprep.mubr.bf16.mxu0 %v8717_v3  ;;  %v840_v22 = vld [vmem:[%s10007_s24 + $0x14b0] sm:$0xff] }
 0x2c1   : > { %v10639_v50 = vpop.f32.mrb[208].mxu1  ;;  %v10643_v46 = vpop.f32.mrb[208].mxu0 }
 0x2c2   : > { %11749 = vst [vmem:[#allocation22_spill] sm:$0xff] %v10639_v50  ;;  %11750 = vst [vmem:[#allocation23_spill] sm:$0xff] %v10643_v46  ;;  %v5310_v30 = vpop.f32.mrb[209].mxu1  ;;  %v6720_v11 = vpop.f32.mrb[209].mxu0  ;;  %v826_v46 = vld [vmem:[%s10007_s24 + $0x1440] sm:$0xff] }
 0x2c3   : > { %v10645_v5 = vpop.f32.mrb[210].mxu1  ;;  %v10647_v3 = vpop.f32.mrb[210].mxu0 }
 0x2c4   : > { %11751 = vst [vmem:[#allocation24_spill] sm:$0xff] %v10645_v5  ;;  %11752 = vst [vmem:[#allocation25_spill] sm:$0xff] %v10647_v3  ;;  %v5313_v41 = vpop.f32.mrb[211].mxu1  ;;  %v6723_v50 = vpop.f32.mrb[211].mxu0  ;;  %v8733_v3 = vcombine.high %v828_v26, %v832_v19  ;;  %v838_v5 = vld [vmem:[%s10007_s24 + $0x14a0] sm:$0xff] }
 0x2c6   : > { %5523 = vmatmul.mubr.bf16.gmra.mrb[208].mxu1 %v8712_v34  ;;  %6933 = vmatmul.mubr.bf16.gmra.mrb[208].mxu0 %v8716_v52  ;;  %v8724_v34 = vcombine.low %v820_v58, %v824_v45  ;;  %v8729_v52 = vcombine.high %v826_v46, %v830_v40  ;;  %v8728_v45 = vcombine.low %v826_v46, %v830_v40  ;;  %v844_v40 = vld [vmem:[%s10007_s24 + $0x14d0] sm:$0xff] }
 0x2c7   : > { %5530 = vmatprep.mubr.bf16.mxu1 %v8721_v8  ;;  %6940 = vmatprep.mubr.bf16.mxu0 %v8725_v0  ;;  %v848_v46 = vld [vmem:[%s10007_s24 + $0x14f0] sm:$0xff] }
 0x2c9   : > { %v10651_v30 = vpop.f32.mrb[212].mxu1  ;;  %v10655_v11 = vpop.f32.mrb[212].mxu0 }
 0x2ca   : > { %11753 = vst [vmem:[#allocation26_spill] sm:$0xff] %v10651_v30  ;;  %11754 = vst [vmem:[#allocation27_spill] sm:$0xff] %v10655_v11  ;;  %v5318_v37 = vpop.f32.mrb[213].mxu1  ;;  %v6728_v41 = vpop.f32.mrb[213].mxu0  ;;  %v834_v11 = vld [vmem:[%s10007_s24 + $0x1480] sm:$0xff] }
 0x2cb   : > { %v10657_v50 = vpop.f32.mrb[214].mxu1  ;;  %v10659_v0 = vpop.f32.mrb[214].mxu0 }
 0x2cc   : > { %11755 = vst [vmem:[#allocation28_spill] sm:$0xff] %v10657_v50  ;;  %11756 = vst [vmem:[#allocation29_spill] sm:$0xff] %v10659_v0  ;;  %v5321_v8 = vpop.f32.mrb[215].mxu1  ;;  %v6731_v30 = vpop.f32.mrb[215].mxu0  ;;  %v8741_v0 = vcombine.high %v836_v10, %v840_v22  ;;  %v846_v50 = vld [vmem:[%s10007_s24 + $0x14e0] sm:$0xff] }
 0x2ce   : > { %5531 = vmatmul.mubr.bf16.gmra.mrb[212].mxu1 %v8720_v38  ;;  %6941 = vmatmul.mubr.bf16.gmra.mrb[212].mxu0 %v8724_v34  ;;  %v8732_v38 = vcombine.low %v828_v26, %v832_v19  ;;  %v8737_v34 = vcombine.high %v834_v11, %v838_v5  ;;  %v8736_v19 = vcombine.low %v834_v11, %v838_v5  ;;  %v181_v5 = vld [vmem:[%s10007_s24 + $0x18] sm:$0xff] }
 0x2cf   : > { %5538 = vmatprep.mubr.bf16.mxu1 %v8729_v52  ;;  %6948 = vmatprep.mubr.bf16.mxu0 %v8733_v3  ;;  %v185_v11 = vld [vmem:[%s10007_s24 + $0x38] sm:$0xff] }
 0x2d1   : > { %v10663_v37 = vpop.f32.mrb[216].mxu1  ;;  %v10667_v41 = vpop.f32.mrb[216].mxu0 }
 0x2d2   : > { %11757 = vst [vmem:[#allocation30_spill] sm:$0xff] %v10663_v37  ;;  %11758 = vst [vmem:[#allocation31_spill] sm:$0xff] %v10667_v41  ;;  %v5326_v58 = vpop.f32.mrb[217].mxu1  ;;  %v6736_v8 = vpop.f32.mrb[217].mxu0  ;;  %v842_v41 = vld [vmem:[%s10007_s24 + $0x14c0] sm:$0xff] }
 0x2d3   : > { %v10669_v30 = vpop.f32.mrb[218].mxu1  ;;  %v10671_v3 = vpop.f32.mrb[218].mxu0 }
 0x2d4   : > { %11759 = vst [vmem:[#allocation32_spill] sm:$0xff] %v10669_v30  ;;  %11760 = vst [vmem:[#allocation33_spill] sm:$0xff] %v10671_v3  ;;  %v5329_v52 = vpop.f32.mrb[219].mxu1  ;;  %v6739_v37 = vpop.f32.mrb[219].mxu0  ;;  %v8749_v3 = vcombine.high %v844_v40, %v848_v46  ;;  %v183_v30 = vld [vmem:[%s10007_s24 + $0x28] sm:$0xff] }
 0x2d6   : > { %5539 = vmatmul.mubr.bf16.gmra.mrb[216].mxu1 %v8728_v45  ;;  %6949 = vmatmul.mubr.bf16.gmra.mrb[216].mxu0 %v8732_v38  ;;  %v8740_v45 = vcombine.low %v836_v10, %v840_v22  ;;  %v8745_v38 = vcombine.high %v842_v41, %v846_v50  ;;  %v8744_v22 = vcombine.low %v842_v41, %v846_v50  ;;  %v187_v50 = vld [vmem:[%s10007_s24 + $0x48] sm:$0xff] }
 0x2d7   : > { %5546 = vmatprep.mubr.bf16.mxu1 %v8737_v34  ;;  %6956 = vmatprep.mubr.bf16.mxu0 %v8741_v0  ;;  %v191_v41 = vld [vmem:[%s10007_s24 + $0x68] sm:$0xff] }
 0x2d9   : > { %v10675_v58 = vpop.f32.mrb[220].mxu1  ;;  %v10679_v8 = vpop.f32.mrb[220].mxu0 }
 0x2da   : > { %11761 = vst [vmem:[#allocation34_spill] sm:$0xff] %v10675_v58  ;;  %11762 = vst [vmem:[#allocation35_spill] sm:$0xff] %v10679_v8  ;;  %v5334_v26 = vpop.f32.mrb[221].mxu1  ;;  %v6744_v52 = vpop.f32.mrb[221].mxu0  ;;  %v179_v8 = vld [vmem:[%s10007_s24 + $0x8] sm:$0xff] }
 0x2db   : > { %v10681_v37 = vpop.f32.mrb[222].mxu1  ;;  %v10683_v0 = vpop.f32.mrb[222].mxu0 }
 0x2dc   : > { %11763 = vst [vmem:[#allocation36_spill] sm:$0xff] %v10681_v37  ;;  %11764 = vst [vmem:[#allocation37_spill] sm:$0xff] %v10683_v0  ;;  %v5337_v34 = vpop.f32.mrb[223].mxu1  ;;  %v6747_v58 = vpop.f32.mrb[223].mxu0  ;;  %v8087_v0 = vcombine.high %v181_v5, %v185_v11 }
 0x2de   : > { %5547 = vmatmul.mubr.bf16.gmra.mrb[220].mxu1 %v8736_v19  ;;  %6957 = vmatmul.mubr.bf16.gmra.mrb[220].mxu0 %v8740_v45  ;;  %v8748_v19 = vcombine.low %v844_v40, %v848_v46  ;;  %v8083_v45 = vcombine.high %v179_v8, %v183_v30  ;;  %v193_v40 = vld [vmem:[%s10007_s24 + $0x78] sm:$0xff]  ;;  %v8082_v46 = vcombine.low %v179_v8, %v183_v30  ;;  %v203_v8 = vld [vmem:[%s10007_s24 + $0xc8] sm:$0xff] }
 0x2df   : > { %5554 = vmatprep.mubr.bf16.mxu1 %v8745_v38  ;;  %6964 = vmatprep.mubr.bf16.mxu0 %v8749_v3 }
 0x2e1   : > { %v10687_v26 = vpop.f32.mrb[224].mxu1  ;;  %v10691_v52 = vpop.f32.mrb[224].mxu0 }
 0x2e2   : > { %11765 = vst [vmem:[#allocation38_spill] sm:$0xff] %v10687_v26  ;;  %11766 = vst [vmem:[#allocation39_spill] sm:$0xff] %v10691_v52  ;;  %v5342_v10 = vpop.f32.mrb[225].mxu1  ;;  %v6752_v34 = vpop.f32.mrb[225].mxu0 }
 0x2e3   : > { %v10693_v58 = vpop.f32.mrb[226].mxu1  ;;  %v10695_v3 = vpop.f32.mrb[226].mxu0  ;;  %v189_v10 = vld [vmem:[%s10007_s24 + $0x58] sm:$0xff]  ;;  %v8086_v34 = vcombine.low %v181_v5, %v185_v11  ;;  %v207_v5 = vld [vmem:[%s10007_s24 + $0xe8] sm:$0xff] }
 0x2e4   : > { %11767 = vst [vmem:[#allocation40_spill] sm:$0xff] %v10693_v58  ;;  %11768 = vst [vmem:[#allocation41_spill] sm:$0xff] %v10695_v3  ;;  %v5345_v38 = vpop.f32.mrb[227].mxu1  ;;  %v6755_v26 = vpop.f32.mrb[227].mxu0  ;;  %v8091_v3 = vcombine.high %v187_v50, %v191_v41  ;;  %v8094_v52 = vcombine.low %v189_v10, %v193_v40  ;;  %v205_v11 = vld [vmem:[%s10007_s24 + $0xd8] sm:$0xff] }
 0x2e5   : > { %v8095_v38 = vcombine.high %v189_v10, %v193_v40  ;;  %v195_v26 = vld [vmem:[%s10007_s24 + $0x88] sm:$0xff]  ;;  %v217_v10 = vld [vmem:[%s10007_s24 + $0x138] sm:$0xff]  ;;  %v8106_v40 = vcombine.low %v203_v8, %v207_v5 }
 0x2e6   : > { %5555 = vmatmul.mubr.bf16.gmra.mrb[224].mxu1 %v8744_v22  ;;  %6965 = vmatmul.mubr.bf16.gmra.mrb[224].mxu0 %v8748_v19  ;;  %v197_v22 = vld [vmem:[%s10007_s24 + $0x98] sm:$0xff] }
 0x2e7   : > { %5595 = vmatprep.mubr.bf16.mxu1 %v8083_v45  ;;  %8811 = vmatprep.mubr.msk.bf16.mxu0 %vm4601_vm1, %v8087_v0  ;;  %v199_v0 = vld [vmem:[%s10007_s24 + $0xa8] sm:$0xff]  ;;  %v201_v19 = vld [vmem:[%s10007_s24 + $0xb8] sm:$0xff]  ;;  %v8090_v45 = vcombine.low %v187_v50, %v191_v41 }
 0x2e8   : > { %v8099_v58 = vcombine.high %v195_v26, %v199_v0  ;;  %v8103_v30 = vcombine.high %v197_v22, %v201_v19  ;;  %v213_v41 = vld [vmem:[%s10007_s24 + $0x118] sm:$0xff] }
 0x2ee   : > { %5596 = vmatmul.mubr.bf16.vlgmr.msra.gmra.mrb[0].mxu1 %v8082_v46  ;;  %7006 = vmatmul.mubr.bf16.vlgmr.msra.gmra.mrb[0].mxu0 %v8086_v34  ;;  %v8098_v46 = vcombine.low %v195_v26, %v199_v0  ;;  %v8102_v34 = vcombine.low %v197_v22, %v201_v19  ;;  %v8119_v26 = vcombine.high %v213_v41, %v217_v10  ;;  %v219_v0 = vld [vmem:[%s10007_s24 + $0x148] sm:$0xff]  ;;  %v221_v19 = vld [vmem:[%s10007_s24 + $0x158] sm:$0xff] }
 0x2ef   : > { %5603 = vmatprep.mubr.bf16.mxu1 %v8091_v3  ;;  %8812 = vmatprep.mubr.msk.bf16.mxu0 %vm4601_vm1, %v8095_v38  ;;  %v209_v3 = vld [vmem:[%s10007_s24 + $0xf8] sm:$0xff]  ;;  %v8107_v38 = vcombine.high %v203_v8, %v207_v5  ;;  %v223_v22 = vld [vmem:[%s10007_s24 + $0x168] sm:$0xff] }
 0x2f0   : > { %v8111_v50 = vcombine.high %v205_v11, %v209_v3  ;;  %v227_v5 = vld [vmem:[%s10007_s24 + $0x188] sm:$0xff] }
 0x2f6   : > { %5604 = vmatmul.mubr.bf16.gmra.mrb[4].mxu1 %v8090_v45  ;;  %7014 = vmatmul.mubr.bf16.gmra.mrb[4].mxu0 %v8094_v52  ;;  %v211_v52 = vld [vmem:[%s10007_s24 + $0x108] sm:$0xff]  ;;  %v8110_v45 = vcombine.low %v205_v11, %v209_v3  ;;  %v229_v3 = vld [vmem:[%s10007_s24 + $0x198] sm:$0xff] }
 0x2f7   : > { %5611 = vmatprep.mubr.bf16.mxu1 %v8099_v58  ;;  %8813 = vmatprep.mubr.msk.bf16.mxu0 %vm4601_vm1, %v8103_v30  ;;  %v215_v58 = vld [vmem:[%s10007_s24 + $0x128] sm:$0xff] }
 0x2f8   : > { %v8115_v30 = vcombine.high %v211_v52, %v215_v58  ;;  %v231_v11 = vld [vmem:[%s10007_s24 + $0x1a8] sm:$0xff] }
 0x2fe   : > { %5612 = vmatmul.mubr.bf16.gmra.mrb[8].mxu1 %v8098_v46  ;;  %7022 = vmatmul.mubr.bf16.gmra.mrb[8].mxu0 %v8102_v34  ;;  %v225_v46 = vld [vmem:[%s10007_s24 + $0x178] sm:$0xff]  ;;  %v8114_v34 = vcombine.low %v211_v52, %v215_v58  ;;  %v235_v58 = vld [vmem:[%s10007_s24 + $0x1c8] sm:$0xff] }
 0x2ff   : > { %5619 = vmatprep.mubr.bf16.mxu1 %v8107_v38  ;;  %8814 = vmatprep.mubr.msk.bf16.mxu0 %vm4601_vm1, %v8111_v50  ;;  %v8118_v38 = vcombine.low %v213_v41, %v217_v10  ;;  %v8123_v50 = vcombine.high %v219_v0, %v223_v22  ;;  %v8127_v8 = vcombine.high %v221_v19, %v225_v46  ;;  %v239_v41 = vld [vmem:[%s10007_s24 + $0x1e8] sm:$0xff]  ;;  %v237_v10 = vld [vmem:[%s10007_s24 + $0x1d8] sm:$0xff] }
 0x306   : > { %5620 = vmatmul.mubr.bf16.gmra.mrb[12].mxu1 %v8106_v40  ;;  %7030 = vmatmul.mubr.bf16.gmra.mrb[12].mxu0 %v8110_v45  ;;  %v233_v40 = vld [vmem:[%s10007_s24 + $0x1b8] sm:$0xff]  ;;  %v8122_v45 = vcombine.low %v219_v0, %v223_v22  ;;  %v243_v22 = vld [vmem:[%s10007_s24 + $0x208] sm:$0xff] }
 0x307   : > { %5627 = vmatprep.mubr.bf16.mxu1 %v8115_v30  ;;  %8815 = vmatprep.mubr.msk.bf16.mxu0 %vm4601_vm1, %v8119_v26  ;;  %v8126_v30 = vcombine.low %v221_v19, %v225_v46  ;;  %v8131_v26 = vcombine.high %v227_v5, %v231_v11  ;;  %v8135_v52 = vcombine.high %v229_v3, %v233_v40  ;;  %v247_v19 = vld [vmem:[%s10007_s24 + $0x228] sm:$0xff]  ;;  %v245_v46 = vld [vmem:[%s10007_s24 + $0x218] sm:$0xff] }
 0x30e   : > { %5628 = vmatmul.mubr.bf16.gmra.mrb[16].mxu1 %v8114_v34  ;;  %7038 = vmatmul.mubr.bf16.gmra.mrb[16].mxu0 %v8118_v38  ;;  %v241_v34 = vld [vmem:[%s10007_s24 + $0x1f8] sm:$0xff]  ;;  %v8130_v38 = vcombine.low %v227_v5, %v231_v11  ;;  %v251_v11 = vld [vmem:[%s10007_s24 + $0x248] sm:$0xff] }
 0x30f   : > { %5635 = vmatprep.mubr.bf16.mxu1 %v8123_v50  ;;  %8816 = vmatprep.mubr.msk.bf16.mxu0 %vm4601_vm1, %v8127_v8  ;;  %v8134_v50 = vcombine.low %v229_v3, %v233_v40  ;;  %v8139_v8 = vcombine.high %v235_v58, %v239_v41  ;;  %v8143_v0 = vcombine.high %v237_v10, %v241_v34  ;;  %v255_v3 = vld [vmem:[%s10007_s24 + $0x268] sm:$0xff]  ;;  %v253_v40 = vld [vmem:[%s10007_s24 + $0x258] sm:$0xff] }
 0x316   : > { %5636 = vmatmul.mubr.bf16.gmra.mrb[20].mxu1 %v8122_v45  ;;  %7046 = vmatmul.mubr.bf16.gmra.mrb[20].mxu0 %v8126_v30  ;;  %v249_v45 = vld [vmem:[%s10007_s24 + $0x238] sm:$0xff]  ;;  %v8138_v30 = vcombine.low %v235_v58, %v239_v41  ;;  %v259_v41 = vld [vmem:[%s10007_s24 + $0x288] sm:$0xff] }
 0x317   : > { %5643 = vmatprep.mubr.bf16.mxu1 %v8131_v26  ;;  %8817 = vmatprep.mubr.msk.bf16.mxu0 %vm4601_vm1, %v8135_v52  ;;  %v8142_v26 = vcombine.low %v237_v10, %v241_v34  ;;  %v8147_v52 = vcombine.high %v243_v22, %v247_v19  ;;  %v8151_v5 = vcombine.high %v245_v46, %v249_v45  ;;  %v263_v10 = vld [vmem:[%s10007_s24 + $0x2a8] sm:$0xff]  ;;  %v261_v34 = vld [vmem:[%s10007_s24 + $0x298] sm:$0xff] }
 0x31e   : > { %5644 = vmatmul.mubr.bf16.gmra.mrb[24].mxu1 %v8130_v38  ;;  %7054 = vmatmul.mubr.bf16.gmra.mrb[24].mxu0 %v8134_v50  ;;  %v257_v38 = vld [vmem:[%s10007_s24 + $0x278] sm:$0xff]  ;;  %v8146_v50 = vcombine.low %v243_v22, %v247_v19  ;;  %v267_v19 = vld [vmem:[%s10007_s24 + $0x2c8] sm:$0xff] }
 0x31f   : > { %5651 = vmatprep.mubr.bf16.mxu1 %v8139_v8  ;;  %8818 = vmatprep.mubr.msk.bf16.mxu0 %vm4601_vm1, %v8143_v0  ;;  %v8150_v8 = vcombine.low %v245_v46, %v249_v45  ;;  %v8155_v0 = vcombine.high %v251_v11, %v255_v3  ;;  %v8159_v58 = vcombine.high %v253_v40, %v257_v38  ;;  %v271_v46 = vld [vmem:[%s10007_s24 + $0x2e8] sm:$0xff]  ;;  %v269_v45 = vld [vmem:[%s10007_s24 + $0x2d8] sm:$0xff] }
 0x326   : > { %5652 = vmatmul.mubr.bf16.gmra.mrb[28].mxu1 %v8138_v30  ;;  %7062 = vmatmul.mubr.bf16.gmra.mrb[28].mxu0 %v8142_v26  ;;  %v265_v30 = vld [vmem:[%s10007_s24 + $0x2b8] sm:$0xff]  ;;  %v8154_v26 = vcombine.low %v251_v11, %v255_v3  ;;  %v275_v3 = vld [vmem:[%s10007_s24 + $0x308] sm:$0xff] }
 0x327   : > { %5659 = vmatprep.mubr.bf16.mxu1 %v8147_v52  ;;  %8819 = vmatprep.mubr.msk.bf16.mxu0 %vm4601_vm1, %v8151_v5  ;;  %v8158_v52 = vcombine.low %v253_v40, %v257_v38  ;;  %v8163_v5 = vcombine.high %v259_v41, %v263_v10  ;;  %v8167_v22 = vcombine.high %v261_v34, %v265_v30  ;;  %v279_v40 = vld [vmem:[%s10007_s24 + $0x328] sm:$0xff]  ;;  %v277_v38 = vld [vmem:[%s10007_s24 + $0x318] sm:$0xff] }
 0x32e   : > { %5660 = vmatmul.mubr.bf16.gmra.mrb[32].mxu1 %v8146_v50  ;;  %7070 = vmatmul.mubr.bf16.gmra.mrb[32].mxu0 %v8150_v8  ;;  %v273_v50 = vld [vmem:[%s10007_s24 + $0x2f8] sm:$0xff]  ;;  %v8162_v8 = vcombine.low %v259_v41, %v263_v10  ;;  %v283_v10 = vld [vmem:[%s10007_s24 + $0x348] sm:$0xff] }
 0x32f   : > { %5667 = vmatprep.mubr.bf16.mxu1 %v8155_v0  ;;  %8820 = vmatprep.mubr.msk.bf16.mxu0 %vm4601_vm1, %v8159_v58  ;;  %v8166_v0 = vcombine.low %v261_v34, %v265_v30  ;;  %v8171_v58 = vcombine.high %v267_v19, %v271_v46  ;;  %v8175_v11 = vcombine.high %v269_v45, %v273_v50  ;;  %v287_v34 = vld [vmem:[%s10007_s24 + $0x368] sm:$0xff]  ;;  %v285_v30 = vld [vmem:[%s10007_s24 + $0x358] sm:$0xff] }
 0x336   : > { %5668 = vmatmul.mubr.bf16.gmra.mrb[36].mxu1 %v8154_v26  ;;  %7078 = vmatmul.mubr.bf16.gmra.mrb[36].mxu0 %v8158_v52  ;;  %v281_v26 = vld [vmem:[%s10007_s24 + $0x338] sm:$0xff]  ;;  %v8170_v52 = vcombine.low %v267_v19, %v271_v46  ;;  %v291_v46 = vld [vmem:[%s10007_s24 + $0x388] sm:$0xff] }
 0x337   : > { %5675 = vmatprep.mubr.bf16.mxu1 %v8163_v5  ;;  %8821 = vmatprep.mubr.msk.bf16.mxu0 %vm4601_vm1, %v8167_v22  ;;  %v8174_v5 = vcombine.low %v269_v45, %v273_v50  ;;  %v8179_v22 = vcombine.high %v275_v3, %v279_v40  ;;  %v8183_v41 = vcombine.high %v277_v38, %v281_v26  ;;  %v295_v45 = vld [vmem:[%s10007_s24 + $0x3a8] sm:$0xff]  ;;  %v293_v50 = vld [vmem:[%s10007_s24 + $0x398] sm:$0xff] }
 0x33e   : > { %5676 = vmatmul.mubr.bf16.gmra.mrb[40].mxu1 %v8162_v8  ;;  %7086 = vmatmul.mubr.bf16.gmra.mrb[40].mxu0 %v8166_v0  ;;  %v289_v8 = vld [vmem:[%s10007_s24 + $0x378] sm:$0xff]  ;;  %v8178_v0 = vcombine.low %v275_v3, %v279_v40  ;;  %v299_v40 = vld [vmem:[%s10007_s24 + $0x3c8] sm:$0xff] }
 0x33f   : > { %5683 = vmatprep.mubr.bf16.mxu1 %v8171_v58  ;;  %8822 = vmatprep.mubr.msk.bf16.mxu0 %vm4601_vm1, %v8175_v11  ;;  %v8182_v58 = vcombine.low %v277_v38, %v281_v26  ;;  %v8187_v11 = vcombine.high %v283_v10, %v287_v34  ;;  %v8191_v19 = vcombine.high %v285_v30, %v289_v8  ;;  %v303_v38 = vld [vmem:[%s10007_s24 + $0x3e8] sm:$0xff]  ;;  %v301_v26 = vld [vmem:[%s10007_s24 + $0x3d8] sm:$0xff] }
 0x346   : > { %5684 = vmatmul.mubr.bf16.gmra.mrb[44].mxu1 %v8170_v52  ;;  %7094 = vmatmul.mubr.bf16.gmra.mrb[44].mxu0 %v8174_v5  ;;  %v297_v52 = vld [vmem:[%s10007_s24 + $0x3b8] sm:$0xff]  ;;  %v8186_v5 = vcombine.low %v283_v10, %v287_v34  ;;  %v307_v34 = vld [vmem:[%s10007_s24 + $0x408] sm:$0xff] }
 0x347   : > { %5691 = vmatprep.mubr.bf16.mxu1 %v8179_v22  ;;  %8823 = vmatprep.mubr.msk.bf16.mxu0 %vm4601_vm1, %v8183_v41  ;;  %v8190_v22 = vcombine.low %v285_v30, %v289_v8  ;;  %v8195_v41 = vcombine.high %v291_v46, %v295_v45  ;;  %v8199_v3 = vcombine.high %v293_v50, %v297_v52  ;;  %v311_v30 = vld [vmem:[%s10007_s24 + $0x428] sm:$0xff]  ;;  %v309_v8 = vld [vmem:[%s10007_s24 + $0x418] sm:$0xff] }
 0x34e   : > { %5692 = vmatmul.mubr.bf16.gmra.mrb[48].mxu1 %v8178_v0  ;;  %7102 = vmatmul.mubr.bf16.gmra.mrb[48].mxu0 %v8182_v58  ;;  %v305_v0 = vld [vmem:[%s10007_s24 + $0x3f8] sm:$0xff]  ;;  %v8194_v58 = vcombine.low %v291_v46, %v295_v45  ;;  %v315_v45 = vld [vmem:[%s10007_s24 + $0x448] sm:$0xff] }
 0x34f   : > { %5699 = vmatprep.mubr.bf16.mxu1 %v8187_v11  ;;  %8824 = vmatprep.mubr.msk.bf16.mxu0 %vm4601_vm1, %v8191_v19  ;;  %v8198_v11 = vcombine.low %v293_v50, %v297_v52  ;;  %v8203_v19 = vcombine.high %v299_v40, %v303_v38  ;;  %v8207_v10 = vcombine.high %v301_v26, %v305_v0  ;;  %v319_v50 = vld [vmem:[%s10007_s24 + $0x468] sm:$0xff]  ;;  %v317_v52 = vld [vmem:[%s10007_s24 + $0x458] sm:$0xff] }
 0x356   : > { %5700 = vmatmul.mubr.bf16.gmra.mrb[52].mxu1 %v8186_v5  ;;  %7110 = vmatmul.mubr.bf16.gmra.mrb[52].mxu0 %v8190_v22  ;;  %v313_v5 = vld [vmem:[%s10007_s24 + $0x438] sm:$0xff]  ;;  %v8202_v22 = vcombine.low %v299_v40, %v303_v38  ;;  %v323_v38 = vld [vmem:[%s10007_s24 + $0x488] sm:$0xff] }
 0x357   : > { %5707 = vmatprep.mubr.bf16.mxu1 %v8195_v41  ;;  %8825 = vmatprep.mubr.msk.bf16.mxu0 %vm4601_vm1, %v8199_v3  ;;  %v8206_v41 = vcombine.low %v301_v26, %v305_v0  ;;  %v8211_v3 = vcombine.high %v307_v34, %v311_v30  ;;  %v8215_v46 = vcombine.high %v309_v8, %v313_v5  ;;  %v327_v26 = vld [vmem:[%s10007_s24 + $0x4a8] sm:$0xff]  ;;  %v325_v0 = vld [vmem:[%s10007_s24 + $0x498] sm:$0xff] }
 0x35e   : > { %5708 = vmatmul.mubr.bf16.gmra.mrb[56].mxu1 %v8194_v58  ;;  %7118 = vmatmul.mubr.bf16.gmra.mrb[56].mxu0 %v8198_v11  ;;  %v321_v58 = vld [vmem:[%s10007_s24 + $0x478] sm:$0xff]  ;;  %v8210_v11 = vcombine.low %v307_v34, %v311_v30  ;;  %v331_v30 = vld [vmem:[%s10007_s24 + $0x4c8] sm:$0xff] }
 0x35f   : > { %5715 = vmatprep.mubr.bf16.mxu1 %v8203_v19  ;;  %8826 = vmatprep.mubr.msk.bf16.mxu0 %vm4601_vm1, %v8207_v10  ;;  %v8214_v19 = vcombine.low %v309_v8, %v313_v5  ;;  %v8219_v10 = vcombine.high %v315_v45, %v319_v50  ;;  %v8223_v40 = vcombine.high %v317_v52, %v321_v58  ;;  %v335_v8 = vld [vmem:[%s10007_s24 + $0x4e8] sm:$0xff]  ;;  %v333_v5 = vld [vmem:[%s10007_s24 + $0x4d8] sm:$0xff] }
 0x366   : > { %5716 = vmatmul.mubr.bf16.gmra.mrb[60].mxu1 %v8202_v22  ;;  %7126 = vmatmul.mubr.bf16.gmra.mrb[60].mxu0 %v8206_v41  ;;  %v329_v22 = vld [vmem:[%s10007_s24 + $0x4b8] sm:$0xff]  ;;  %v8218_v41 = vcombine.low %v315_v45, %v319_v50  ;;  %v339_v50 = vld [vmem:[%s10007_s24 + $0x508] sm:$0xff] }
 0x367   : > { %5723 = vmatprep.mubr.bf16.mxu1 %v8211_v3  ;;  %8827 = vmatprep.mubr.msk.bf16.mxu0 %vm4601_vm1, %v8215_v46  ;;  %v8222_v3 = vcombine.low %v317_v52, %v321_v58  ;;  %v8227_v46 = vcombine.high %v323_v38, %v327_v26  ;;  %v8231_v34 = vcombine.high %v325_v0, %v329_v22  ;;  %v343_v52 = vld [vmem:[%s10007_s24 + $0x528] sm:$0xff]  ;;  %v341_v58 = vld [vmem:[%s10007_s24 + $0x518] sm:$0xff] }
 0x36e   : > { %5724 = vmatmul.mubr.bf16.gmra.mrb[64].mxu1 %v8210_v11  ;;  %7134 = vmatmul.mubr.bf16.gmra.mrb[64].mxu0 %v8214_v19  ;;  %v337_v11 = vld [vmem:[%s10007_s24 + $0x4f8] sm:$0xff]  ;;  %v8226_v19 = vcombine.low %v323_v38, %v327_v26  ;;  %v347_v26 = vld [vmem:[%s10007_s24 + $0x548] sm:$0xff] }
 0x36f   : > { %5731 = vmatprep.mubr.bf16.mxu1 %v8219_v10  ;;  %8828 = vmatprep.mubr.msk.bf16.mxu0 %vm4601_vm1, %v8223_v40  ;;  %v8230_v10 = vcombine.low %v325_v0, %v329_v22  ;;  %v8235_v40 = vcombine.high %v331_v30, %v335_v8  ;;  %v8239_v45 = vcombine.high %v333_v5, %v337_v11  ;;  %v351_v0 = vld [vmem:[%s10007_s24 + $0x568] sm:$0xff]  ;;  %v349_v22 = vld [vmem:[%s10007_s24 + $0x558] sm:$0xff] }
 0x376   : > { %5732 = vmatmul.mubr.bf16.gmra.mrb[68].mxu1 %v8218_v41  ;;  %7142 = vmatmul.mubr.bf16.gmra.mrb[68].mxu0 %v8222_v3  ;;  %v345_v41 = vld [vmem:[%s10007_s24 + $0x538] sm:$0xff]  ;;  %v8234_v3 = vcombine.low %v331_v30, %v335_v8  ;;  %v355_v8 = vld [vmem:[%s10007_s24 + $0x588] sm:$0xff] }
 0x377   : > { %5739 = vmatprep.mubr.bf16.mxu1 %v8227_v46  ;;  %8829 = vmatprep.mubr.msk.bf16.mxu0 %vm4601_vm1, %v8231_v34  ;;  %v8238_v46 = vcombine.low %v333_v5, %v337_v11  ;;  %v8243_v34 = vcombine.high %v339_v50, %v343_v52  ;;  %v8247_v38 = vcombine.high %v341_v58, %v345_v41  ;;  %v359_v5 = vld [vmem:[%s10007_s24 + $0x5a8] sm:$0xff]  ;;  %v357_v11 = vld [vmem:[%s10007_s24 + $0x598] sm:$0xff] }
 0x37e   : > { %5740 = vmatmul.mubr.bf16.gmra.mrb[72].mxu1 %v8226_v19  ;;  %7150 = vmatmul.mubr.bf16.gmra.mrb[72].mxu0 %v8230_v10  ;;  %v353_v19 = vld [vmem:[%s10007_s24 + $0x578] sm:$0xff]  ;;  %v8242_v10 = vcombine.low %v339_v50, %v343_v52  ;;  %v363_v52 = vld [vmem:[%s10007_s24 + $0x5c8] sm:$0xff] }
 0x37f   : > { %5747 = vmatprep.mubr.bf16.mxu1 %v8235_v40  ;;  %8830 = vmatprep.mubr.msk.bf16.mxu0 %vm4601_vm1, %v8239_v45  ;;  %v8246_v40 = vcombine.low %v341_v58, %v345_v41  ;;  %v8251_v45 = vcombine.high %v347_v26, %v351_v0  ;;  %v8255_v30 = vcombine.high %v349_v22, %v353_v19  ;;  %v367_v58 = vld [vmem:[%s10007_s24 + $0x5e8] sm:$0xff]  ;;  %v365_v41 = vld [vmem:[%s10007_s24 + $0x5d8] sm:$0xff] }
 0x386   : > { %5748 = vmatmul.mubr.bf16.gmra.mrb[76].mxu1 %v8234_v3  ;;  %7158 = vmatmul.mubr.bf16.gmra.mrb[76].mxu0 %v8238_v46  ;;  %v361_v3 = vld [vmem:[%s10007_s24 + $0x5b8] sm:$0xff]  ;;  %v8250_v46 = vcombine.low %v347_v26, %v351_v0  ;;  %v371_v0 = vld [vmem:[%s10007_s24 + $0x608] sm:$0xff] }
 0x387   : > { %5755 = vmatprep.mubr.bf16.mxu1 %v8243_v34  ;;  %8831 = vmatprep.mubr.msk.bf16.mxu0 %vm4601_vm1, %v8247_v38  ;;  %v8254_v34 = vcombine.low %v349_v22, %v353_v19  ;;  %v8259_v38 = vcombine.high %v355_v8, %v359_v5  ;;  %v8263_v50 = vcombine.high %v357_v11, %v361_v3  ;;  %v375_v22 = vld [vmem:[%s10007_s24 + $0x628] sm:$0xff]  ;;  %v373_v19 = vld [vmem:[%s10007_s24 + $0x618] sm:$0xff] }
 0x38e   : > { %5756 = vmatmul.mubr.bf16.gmra.mrb[80].mxu1 %v8242_v10  ;;  %7166 = vmatmul.mubr.bf16.gmra.mrb[80].mxu0 %v8246_v40  ;;  %v369_v10 = vld [vmem:[%s10007_s24 + $0x5f8] sm:$0xff]  ;;  %v8258_v40 = vcombine.low %v355_v8, %v359_v5  ;;  %v379_v5 = vld [vmem:[%s10007_s24 + $0x648] sm:$0xff] }
 0x38f   : > { %5763 = vmatprep.mubr.bf16.mxu1 %v8251_v45  ;;  %8832 = vmatprep.mubr.msk.bf16.mxu0 %vm4601_vm1, %v8255_v30  ;;  %v8262_v45 = vcombine.low %v357_v11, %v361_v3  ;;  %v8267_v30 = vcombine.high %v363_v52, %v367_v58  ;;  %v8271_v26 = vcombine.high %v365_v41, %v369_v10  ;;  %v383_v11 = vld [vmem:[%s10007_s24 + $0x668] sm:$0xff]  ;;  %v381_v3 = vld [vmem:[%s10007_s24 + $0x658] sm:$0xff] }
 0x396   : > { %5764 = vmatmul.mubr.bf16.gmra.mrb[84].mxu1 %v8250_v46  ;;  %7174 = vmatmul.mubr.bf16.gmra.mrb[84].mxu0 %v8254_v34  ;;  %v377_v46 = vld [vmem:[%s10007_s24 + $0x638] sm:$0xff]  ;;  %v8266_v34 = vcombine.low %v363_v52, %v367_v58  ;;  %v387_v58 = vld [vmem:[%s10007_s24 + $0x688] sm:$0xff] }
 0x397   : > { %5771 = vmatprep.mubr.bf16.mxu1 %v8259_v38  ;;  %8833 = vmatprep.mubr.msk.bf16.mxu0 %vm4601_vm1, %v8263_v50  ;;  %v8270_v38 = vcombine.low %v365_v41, %v369_v10  ;;  %v8275_v50 = vcombine.high %v371_v0, %v375_v22  ;;  %v8279_v8 = vcombine.high %v373_v19, %v377_v46  ;;  %v391_v41 = vld [vmem:[%s10007_s24 + $0x6a8] sm:$0xff]  ;;  %v389_v10 = vld [vmem:[%s10007_s24 + $0x698] sm:$0xff] }
 0x39e   : > { %5772 = vmatmul.mubr.bf16.gmra.mrb[88].mxu1 %v8258_v40  ;;  %7182 = vmatmul.mubr.bf16.gmra.mrb[88].mxu0 %v8262_v45  ;;  %v385_v40 = vld [vmem:[%s10007_s24 + $0x678] sm:$0xff]  ;;  %v8274_v45 = vcombine.low %v371_v0, %v375_v22  ;;  %v395_v22 = vld [vmem:[%s10007_s24 + $0x6c8] sm:$0xff] }
 0x39f   : > { %5779 = vmatprep.mubr.bf16.mxu1 %v8267_v30  ;;  %8834 = vmatprep.mubr.msk.bf16.mxu0 %vm4601_vm1, %v8271_v26  ;;  %v8278_v30 = vcombine.low %v373_v19, %v377_v46  ;;  %v8283_v26 = vcombine.high %v379_v5, %v383_v11  ;;  %v8287_v52 = vcombine.high %v381_v3, %v385_v40  ;;  %v399_v19 = vld [vmem:[%s10007_s24 + $0x6e8] sm:$0xff]  ;;  %v397_v46 = vld [vmem:[%s10007_s24 + $0x6d8] sm:$0xff] }
 0x3a6   : > { %5780 = vmatmul.mubr.bf16.gmra.mrb[92].mxu1 %v8266_v34  ;;  %7190 = vmatmul.mubr.bf16.gmra.mrb[92].mxu0 %v8270_v38  ;;  %v393_v34 = vld [vmem:[%s10007_s24 + $0x6b8] sm:$0xff]  ;;  %v8282_v38 = vcombine.low %v379_v5, %v383_v11  ;;  %v8299_v5 = vcombine.high %v395_v22, %v399_v19 }
 0x3a7   : > { %5787 = vmatprep.mubr.bf16.mxu1 %v8275_v50  ;;  %8835 = vmatprep.mubr.msk.bf16.mxu0 %vm4601_vm1, %v8279_v8  ;;  %v8286_v50 = vcombine.low %v381_v3, %v385_v40  ;;  %v8291_v8 = vcombine.high %v387_v58, %v391_v41  ;;  %v8295_v0 = vcombine.high %v389_v10, %v393_v34  ;;  %v403_v3 = vld [vmem:[%s10007_s24 + $0x708] sm:$0xff] }
 0x3a8   : > { %v407_v40 = vld [vmem:[%s10007_s24 + $0x728] sm:$0xff] }
 0x3ae   : > { %5788 = vmatmul.mubr.bf16.gmra.mrb[96].mxu1 %v8274_v45  ;;  %7198 = vmatmul.mubr.bf16.gmra.mrb[96].mxu0 %v8278_v30  ;;  %v401_v45 = vld [vmem:[%s10007_s24 + $0x6f8] sm:$0xff]  ;;  %v8290_v30 = vcombine.low %v387_v58, %v391_v41 }
 0x3af   : > { %5795 = vmatprep.mubr.bf16.mxu1 %v8283_v26  ;;  %8836 = vmatprep.mubr.msk.bf16.mxu0 %vm4601_vm1, %v8287_v52  ;;  %v8294_v26 = vcombine.low %v389_v10, %v393_v34  ;;  %v8303_v11 = vcombine.high %v397_v46, %v401_v45  ;;  %v10838_v52 = vld [vmem:[%s11727_s2] ss:$0 sm:$0xff]  ;;  %v8298_v34 = vcombine.low %v395_v22, %v399_v19 }
 0x3b6   : > { %5796 = vmatmul.mubr.bf16.gmra.mrb[100].mxu1 %v8282_v38  ;;  %7206 = vmatmul.mubr.bf16.gmra.mrb[100].mxu0 %v8286_v50  ;;  %v405_v50 = vld [vmem:[%s10007_s24 + $0x718] sm:$0xff] }
 0x3b7   : > { %5803 = vmatprep.mubr.bf16.mxu1 %v8291_v8  ;;  %8837 = vmatprep.mubr.msk.bf16.mxu0 %vm4601_vm1, %v8295_v0  ;;  %v409_v8 = vld [vmem:[%s10007_s24 + $0x738] sm:$0xff] }
 0x3b8   : > { %v8311_v62 = vcombine.high %v405_v50, %v409_v8 }
 0x3be   : > { %5804 = vmatmul.mubr.bf16.gmra.mrb[104].mxu1 %v8290_v30  ;;  %7214 = vmatmul.mubr.bf16.gmra.mrb[104].mxu0 %v8294_v26  ;;  %v8302_v26 = vcombine.low %v397_v46, %v401_v45  ;;  %v411_v45 = vld [vmem:[%s10007_s24 + $0x748] sm:$0xff] }
 0x3bf   : > { %5811 = vmatprep.mubr.bf16.mxu1 %v8299_v5  ;;  %8838 = vmatprep.mubr.msk.bf16.mxu0 %vm4601_vm1, %v8303_v11  ;;  %v8307_v5 = vcombine.high %v403_v3, %v407_v40 }
 0x3c1   : > { %v5597_v38 = vpop.f32.mrb[0].mxu1  ;;  %v7007_v41 = vpop.f32.mrb[0].mxu0 }
 0x3c2   : > { %v8898_v58 = vadd.f32 %v10838_v52, %v5597_v38  ;;  %v5599_v10 = vpop.f32.mrb[1].mxu1  ;;  %v7009_v0 = vpop.f32.mrb[1].mxu0  ;;  %v415_v38 = vld [vmem:[%s10007_s24 + $0x768] sm:$0xff] }
 0x3c3   : > { %v5600_v30 = vpop.f32.mrb[2].mxu1  ;;  %v7010_v17 = vpop.f32.mrb[2].mxu0  ;;  %v417_v10 = vld [vmem:[%s10007_s24 + $0x778] sm:$0xff] }
 0x3c4   : > { %v8899_v11 = vadd.f32 %v8898_v58, %v7007_v41  ;;  %v8900_v37 = vadd.f32 %v10838_v52, %v5600_v30  ;;  %v5602_v57 = vpop.f32.mrb[3].mxu1  ;;  %v7012_v22 = vpop.f32.mrb[3].mxu0  ;;  %v413_v41 = vld [vmem:[%s10007_s24 + $0x758] sm:$0xff] }
 0x3c6   : > { %v7678_v19 = vmax.f32 %v8899_v11, 0.0  ;;  %v8901_v46 = vadd.f32 %v8900_v37, %v7010_v17  ;;  %5812 = vmatmul.mubr.bf16.gmra.mrb[108].mxu1 %v8298_v34  ;;  %7222 = vmatmul.mubr.bf16.gmra.mrb[108].mxu0 %v8302_v26  ;;  %v8306_v17 = vcombine.low %v403_v3, %v407_v40  ;;  %v8310_v26 = vcombine.low %v405_v50, %v409_v8  ;;  %v419_v40 = vld [vmem:[%s10007_s24 + $0x788] sm:$0xff] }
 0x3c7   : > { %5819 = vmatprep.mubr.bf16.mxu1 %v8307_v5  ;;  %8839 = vmatprep.mubr.msk.bf16.mxu0 %vm4601_vm1, %v8311_v62  ;;  %v8315_v5 = vcombine.high %v411_v45, %v415_v38  ;;  %v423_v50 = vld [vmem:[%s10007_s24 + $0x7a8] sm:$0xff] }
 0x3c8   : > { %7847 = vst.msk [vmem:[%s10848_s5] sm:$0xff] %vm7846_vm2, %v7678_v19  ;;  %v7679_v57 = vmax.f32 %v8901_v46, 0.0 }
 0x3c9   : > { %v5605_v58 = vpop.f32.mrb[4].mxu1  ;;  %v7015_v30 = vpop.f32.mrb[4].mxu0 }
 0x3ca   : > { %7848 = vst.msk [vmem:[%s10848_s5 + $0x8] sm:$0xff] %vm7846_vm2, %v7679_v57  ;;  %v8902_v0 = vadd.f32 %v10838_v52, %v5605_v58  ;;  %v5607_v11 = vpop.f32.mrb[5].mxu1  ;;  %v7017_v37 = vpop.f32.mrb[5].mxu0  ;;  %v8319_v57 = vcombine.high %v413_v41, %v417_v10 }
 0x3cb   : > { %v5608_v34 = vpop.f32.mrb[6].mxu1  ;;  %v7018_v19 = vpop.f32.mrb[6].mxu0 }
 0x3cc   : > { %v8903_v62 = vadd.f32 %v8902_v0, %v7015_v30  ;;  %v8904_v22 = vadd.f32 %v10838_v52, %v5608_v34  ;;  %v5610_v46 = vpop.f32.mrb[7].mxu1  ;;  %v7020_v58 = vpop.f32.mrb[7].mxu0  ;;  %v421_v0 = vld [vmem:[%s10007_s24 + $0x798] sm:$0xff] }
 0x3cd   : > { %v425_v30 = vld [vmem:[%s10007_s24 + $0x7b8] sm:$0xff] }
 0x3ce   : > { %v7680_v53 = vmax.f32 %v8903_v62, 0.0  ;;  %v8905_v11 = vadd.f32 %v8904_v22, %v7018_v19  ;;  %5820 = vmatmul.mubr.bf16.gmra.mrb[112].mxu1 %v8306_v17  ;;  %7230 = vmatmul.mubr.bf16.gmra.mrb[112].mxu0 %v8310_v26  ;;  %v8314_v22 = vcombine.low %v411_v45, %v415_v38  ;;  %v427_v38 = vld [vmem:[%s10007_s24 + $0x7c8] sm:$0xff] }
 0x3cf   : > { %5827 = vmatprep.mubr.bf16.mxu1 %v8315_v5  ;;  %8840 = vmatprep.mubr.msk.bf16.mxu0 %vm4601_vm1, %v8319_v57  ;;  %v8318_v5 = vcombine.low %v413_v41, %v417_v10  ;;  %v431_v41 = vld [vmem:[%s10007_s24 + $0x7e8] sm:$0xff] }
 0x3d0   : > { %7849 = vst.msk [vmem:[%s10848_s5 + $0x10] sm:$0xff] %vm7846_vm2, %v7680_v53  ;;  %v7681_v3 = vmax.f32 %v8905_v11, 0.0  ;;  %v8323_v53 = vcombine.high %v419_v40, %v423_v50  ;;  %v8327_v11 = vcombine.high %v421_v0, %v425_v30 }
 0x3d1   : > { %v5613_v8 = vpop.f32.mrb[8].mxu1  ;;  %v7023_v34 = vpop.f32.mrb[8].mxu0 }
 0x3d2   : > { %7850 = vst.msk [vmem:[%s10848_s5 + $0x18] sm:$0xff] %vm7846_vm2, %v7681_v3  ;;  %v8906_v37 = vadd.f32 %v10838_v52, %v5613_v8  ;;  %v5615_v62 = vpop.f32.mrb[9].mxu1  ;;  %v7025_v17 = vpop.f32.mrb[9].mxu0 }
 0x3d3   : > { %v5616_v26 = vpop.f32.mrb[10].mxu1  ;;  %v7026_v57 = vpop.f32.mrb[10].mxu0 }
 0x3d4   : > { %v8907_v19 = vadd.f32 %v8906_v37, %v7023_v34  ;;  %v8908_v46 = vadd.f32 %v10838_v52, %v5616_v26  ;;  %v5618_v58 = vpop.f32.mrb[11].mxu1  ;;  %v7028_v3 = vpop.f32.mrb[11].mxu0  ;;  %v429_v37 = vld [vmem:[%s10007_s24 + $0x7d8] sm:$0xff] }
 0x3d5   : > { %v433_v34 = vld [vmem:[%s10007_s24 + $0x7f8] sm:$0xff] }
 0x3d6   : > { %v7682_v8 = vmax.f32 %v8907_v19, 0.0  ;;  %v8909_v62 = vadd.f32 %v8908_v46, %v7026_v57  ;;  %5828 = vmatmul.mubr.bf16.gmra.mrb[116].mxu1 %v8314_v22  ;;  %7238 = vmatmul.mubr.bf16.gmra.mrb[116].mxu0 %v8318_v5  ;;  %v8322_v46 = vcombine.low %v419_v40, %v423_v50  ;;  %v8331_v57 = vcombine.high %v427_v38, %v431_v41  ;;  %v435_v50 = vld [vmem:[%s10007_s24 + $0x808] sm:$0xff] }
 0x3d7   : > { %5835 = vmatprep.mubr.bf16.mxu1 %v8323_v53  ;;  %8841 = vmatprep.mubr.msk.bf16.mxu0 %vm4601_vm1, %v8327_v11  ;;  %v8326_v53 = vcombine.low %v421_v0, %v425_v30  ;;  %v439_v0 = vld [vmem:[%s10007_s24 + $0x828] sm:$0xff] }
 0x3d8   : > { %7851 = vst.msk [vmem:[%s10848_s5 + $0x20] sm:$0xff] %vm7846_vm2, %v7682_v8  ;;  %v7683_v45 = vmax.f32 %v8909_v62, 0.0  ;;  %v8335_v62 = vcombine.high %v429_v37, %v433_v34 }
 0x3d9   : > { %v5621_v10 = vpop.f32.mrb[12].mxu1  ;;  %v7031_v26 = vpop.f32.mrb[12].mxu0 }
 0x3da   : > { %7852 = vst.msk [vmem:[%s10848_s5 + $0x28] sm:$0xff] %vm7846_vm2, %v7683_v45  ;;  %v8910_v17 = vadd.f32 %v10838_v52, %v5621_v10  ;;  %v5623_v19 = vpop.f32.mrb[13].mxu1  ;;  %v7033_v22 = vpop.f32.mrb[13].mxu0 }
 0x3db   : > { %v5624_v5 = vpop.f32.mrb[14].mxu1  ;;  %v7034_v3 = vpop.f32.mrb[14].mxu0 }
 0x3dc   : > { %v8911_v58 = vadd.f32 %v8910_v17, %v7031_v26  ;;  %v8912_v11 = vadd.f32 %v10838_v52, %v5624_v5  ;;  %v5626_v8 = vpop.f32.mrb[15].mxu1  ;;  %v7036_v45 = vpop.f32.mrb[15].mxu0  ;;  %v437_v17 = vld [vmem:[%s10007_s24 + $0x818] sm:$0xff] }
 0x3dd   : > { %v441_v26 = vld [vmem:[%s10007_s24 + $0x838] sm:$0xff] }
 0x3de   : > { %v7684_v10 = vmax.f32 %v8911_v58, 0.0  ;;  %v8913_v19 = vadd.f32 %v8912_v11, %v7034_v3  ;;  %5836 = vmatmul.mubr.bf16.gmra.mrb[120].mxu1 %v8322_v46  ;;  %7246 = vmatmul.mubr.bf16.gmra.mrb[120].mxu0 %v8326_v53  ;;  %v8330_v11 = vcombine.low %v427_v38, %v431_v41  ;;  %v8339_v3 = vcombine.high %v435_v50, %v439_v0  ;;  %v443_v41 = vld [vmem:[%s10007_s24 + $0x848] sm:$0xff] }
 0x3df   : > { %5843 = vmatprep.mubr.bf16.mxu1 %v8331_v57  ;;  %8842 = vmatprep.mubr.msk.bf16.mxu0 %vm4601_vm1, %v8335_v62  ;;  %v8334_v57 = vcombine.low %v429_v37, %v433_v34  ;;  %v447_v37 = vld [vmem:[%s10007_s24 + $0x868] sm:$0xff] }
 0x3e0   : > { %7853 = vst.msk [vmem:[%s10848_s5 + $0x30] sm:$0xff] %vm7846_vm2, %v7684_v10  ;;  %v7685_v40 = vmax.f32 %v8913_v19, 0.0  ;;  %v8343_v19 = vcombine.high %v437_v17, %v441_v26 }
 0x3e1   : > { %v5629_v30 = vpop.f32.mrb[16].mxu1  ;;  %v7039_v5 = vpop.f32.mrb[16].mxu0 }
 0x3e2   : > { %7854 = vst.msk [vmem:[%s10848_s5 + $0x38] sm:$0xff] %vm7846_vm2, %v7685_v40  ;;  %v8914_v22 = vadd.f32 %v10838_v52, %v5629_v30  ;;  %v5631_v58 = vpop.f32.mrb[17].mxu1  ;;  %v7041_v46 = vpop.f32.mrb[17].mxu0 }
 0x3e3   : > { %v5632_v53 = vpop.f32.mrb[18].mxu1  ;;  %v7042_v45 = vpop.f32.mrb[18].mxu0 }
 0x3e4   : > { %v8915_v8 = vadd.f32 %v8914_v22, %v7039_v5  ;;  %v8916_v62 = vadd.f32 %v10838_v52, %v5632_v53  ;;  %v5634_v10 = vpop.f32.mrb[19].mxu1  ;;  %v7044_v40 = vpop.f32.mrb[19].mxu0  ;;  %v445_v22 = vld [vmem:[%s10007_s24 + $0x858] sm:$0xff] }
 0x3e5   : > { %v449_v5 = vld [vmem:[%s10007_s24 + $0x878] sm:$0xff] }
 0x3e6   : > { %v7686_v30 = vmax.f32 %v8915_v8, 0.0  ;;  %v8917_v58 = vadd.f32 %v8916_v62, %v7042_v45  ;;  %5844 = vmatmul.mubr.bf16.gmra.mrb[124].mxu1 %v8330_v11  ;;  %7254 = vmatmul.mubr.bf16.gmra.mrb[124].mxu0 %v8334_v57  ;;  %v8338_v62 = vcombine.low %v435_v50, %v439_v0  ;;  %v8347_v45 = vcombine.high %v443_v41, %v447_v37  ;;  %v451_v0 = vld [vmem:[%s10007_s24 + $0x888] sm:$0xff] }
 0x3e7   : > { %5851 = vmatprep.mubr.bf16.mxu1 %v8339_v3  ;;  %8843 = vmatprep.mubr.msk.bf16.mxu0 %vm4601_vm1, %v8343_v19  ;;  %v8342_v3 = vcombine.low %v437_v17, %v441_v26  ;;  %v455_v17 = vld [vmem:[%s10007_s24 + $0x8a8] sm:$0xff] }
 0x3e8   : > { %7855 = vst.msk [vmem:[%s10848_s5 + $0x40] sm:$0xff] %vm7846_vm2, %v7686_v30  ;;  %v7687_v38 = vmax.f32 %v8917_v58, 0.0  ;;  %v8351_v58 = vcombine.high %v445_v22, %v449_v5 }
 0x3e9   : > { %v5637_v34 = vpop.f32.mrb[20].mxu1  ;;  %v7047_v53 = vpop.f32.mrb[20].mxu0 }
 0x3ea   : > { %7856 = vst.msk [vmem:[%s10848_s5 + $0x48] sm:$0xff] %vm7846_vm2, %v7687_v38  ;;  %v8918_v46 = vadd.f32 %v10838_v52, %v5637_v34  ;;  %v5639_v8 = vpop.f32.mrb[21].mxu1  ;;  %v7049_v11 = vpop.f32.mrb[21].mxu0 }
 0x3eb   : > { %v5640_v57 = vpop.f32.mrb[22].mxu1  ;;  %v7050_v40 = vpop.f32.mrb[22].mxu0 }
 0x3ec   : > { %v8919_v10 = vadd.f32 %v8918_v46, %v7047_v53  ;;  %v8920_v19 = vadd.f32 %v10838_v52, %v5640_v57  ;;  %v5642_v30 = vpop.f32.mrb[23].mxu1  ;;  %v7052_v38 = vpop.f32.mrb[23].mxu0  ;;  %v453_v46 = vld [vmem:[%s10007_s24 + $0x898] sm:$0xff] }
 0x3ed   : > { %v457_v53 = vld [vmem:[%s10007_s24 + $0x8b8] sm:$0xff] }
 0x3ee   : > { %v7688_v34 = vmax.f32 %v8919_v10, 0.0  ;;  %v8921_v8 = vadd.f32 %v8920_v19, %v7050_v40  ;;  %5852 = vmatmul.mubr.bf16.gmra.mrb[128].mxu1 %v8338_v62  ;;  %7262 = vmatmul.mubr.bf16.gmra.mrb[128].mxu0 %v8342_v3  ;;  %v8346_v19 = vcombine.low %v443_v41, %v447_v37  ;;  %v8355_v40 = vcombine.high %v451_v0, %v455_v17  ;;  %v459_v37 = vld [vmem:[%s10007_s24 + $0x8c8] sm:$0xff] }
 0x3ef   : > { %5859 = vmatprep.mubr.bf16.mxu1 %v8347_v45  ;;  %8844 = vmatprep.mubr.msk.bf16.mxu0 %vm4601_vm1, %v8351_v58  ;;  %v8350_v45 = vcombine.low %v445_v22, %v449_v5  ;;  %v463_v22 = vld [vmem:[%s10007_s24 + $0x8e8] sm:$0xff] }
 0x3f0   : > { %7857 = vst.msk [vmem:[%s10848_s5 + $0x50] sm:$0xff] %vm7846_vm2, %v7688_v34  ;;  %v7689_v50 = vmax.f32 %v8921_v8, 0.0  ;;  %v8359_v8 = vcombine.high %v453_v46, %v457_v53 }
 0x3f1   : > { %v5645_v26 = vpop.f32.mrb[24].mxu1  ;;  %v7055_v57 = vpop.f32.mrb[24].mxu0 }
 0x3f2   : > { %7858 = vst.msk [vmem:[%s10848_s5 + $0x58] sm:$0xff] %vm7846_vm2, %v7689_v50  ;;  %v8922_v11 = vadd.f32 %v10838_v52, %v5645_v26  ;;  %v5647_v10 = vpop.f32.mrb[25].mxu1  ;;  %v7057_v62 = vpop.f32.mrb[25].mxu0 }
 0x3f3   : > { %v5648_v3 = vpop.f32.mrb[26].mxu1  ;;  %v7058_v38 = vpop.f32.mrb[26].mxu0 }
 0x3f4   : > { %v8923_v30 = vadd.f32 %v8922_v11, %v7055_v57  ;;  %v8924_v58 = vadd.f32 %v10838_v52, %v5648_v3  ;;  %v5650_v34 = vpop.f32.mrb[27].mxu1  ;;  %v7060_v50 = vpop.f32.mrb[27].mxu0  ;;  %v461_v11 = vld [vmem:[%s10007_s24 + $0x8d8] sm:$0xff] }
 0x3f5   : > { %v465_v57 = vld [vmem:[%s10007_s24 + $0x8f8] sm:$0xff] }
 0x3f6   : > { %v7690_v26 = vmax.f32 %v8923_v30, 0.0  ;;  %v8925_v10 = vadd.f32 %v8924_v58, %v7058_v38  ;;  %5860 = vmatmul.mubr.bf16.gmra.mrb[132].mxu1 %v8346_v19  ;;  %7270 = vmatmul.mubr.bf16.gmra.mrb[132].mxu0 %v8350_v45  ;;  %v8354_v58 = vcombine.low %v451_v0, %v455_v17  ;;  %v8363_v38 = vcombine.high %v459_v37, %v463_v22  ;;  %v467_v17 = vld [vmem:[%s10007_s24 + $0x908] sm:$0xff] }
 0x3f7   : > { %5867 = vmatprep.mubr.bf16.mxu1 %v8355_v40  ;;  %8845 = vmatprep.mubr.msk.bf16.mxu0 %vm4601_vm1, %v8359_v8  ;;  %v8358_v40 = vcombine.low %v453_v46, %v457_v53  ;;  %v471_v46 = vld [vmem:[%s10007_s24 + $0x928] sm:$0xff] }
 0x3f8   : > { %7859 = vst.msk [vmem:[%s10848_s5 + $0x60] sm:$0xff] %vm7846_vm2, %v7690_v26  ;;  %v7691_v41 = vmax.f32 %v8925_v10, 0.0  ;;  %v8367_v10 = vcombine.high %v461_v11, %v465_v57 }
 0x3f9   : > { %v5653_v5 = vpop.f32.mrb[28].mxu1  ;;  %v7063_v3 = vpop.f32.mrb[28].mxu0 }
 0x3fa   : > { %7860 = vst.msk [vmem:[%s10848_s5 + $0x68] sm:$0xff] %vm7846_vm2, %v7691_v41  ;;  %v8926_v62 = vadd.f32 %v10838_v52, %v5653_v5  ;;  %v5655_v30 = vpop.f32.mrb[29].mxu1  ;;  %v7065_v19 = vpop.f32.mrb[29].mxu0 }
 0x3fb   : > { %v5656_v45 = vpop.f32.mrb[30].mxu1  ;;  %v7066_v50 = vpop.f32.mrb[30].mxu0 }
 0x3fc   : > { %v8927_v34 = vadd.f32 %v8926_v62, %v7063_v3  ;;  %v8928_v8 = vadd.f32 %v10838_v52, %v5656_v45  ;;  %v5658_v26 = vpop.f32.mrb[31].mxu1  ;;  %v7068_v41 = vpop.f32.mrb[31].mxu0  ;;  %v469_v62 = vld [vmem:[%s10007_s24 + $0x918] sm:$0xff] }
 0x3fd   : > { %v473_v3 = vld [vmem:[%s10007_s24 + $0x938] sm:$0xff] }
 0x3fe   : > { %v7692_v5 = vmax.f32 %v8927_v34, 0.0  ;;  %v8929_v30 = vadd.f32 %v8928_v8, %v7066_v50  ;;  %5868 = vmatmul.mubr.bf16.gmra.mrb[136].mxu1 %v8354_v58  ;;  %7278 = vmatmul.mubr.bf16.gmra.mrb[136].mxu0 %v8358_v40  ;;  %v8362_v8 = vcombine.low %v459_v37, %v463_v22  ;;  %v8371_v50 = vcombine.high %v467_v17, %v471_v46  ;;  %v475_v22 = vld [vmem:[%s10007_s24 + $0x948] sm:$0xff] }
 0x3ff   : > { %5875 = vmatprep.mubr.bf16.mxu1 %v8363_v38  ;;  %8846 = vmatprep.mubr.msk.bf16.mxu0 %vm4601_vm1, %v8367_v10  ;;  %v8366_v38 = vcombine.low %v461_v11, %v465_v57  ;;  %v479_v11 = vld [vmem:[%s10007_s24 + $0x968] sm:$0xff] }
 0x400   : > { %7861 = vst.msk [vmem:[%s10848_s5 + $0x70] sm:$0xff] %vm7846_vm2, %v7692_v5  ;;  %v7693_v0 = vmax.f32 %v8929_v30, 0.0  ;;  %v8375_v30 = vcombine.high %v469_v62, %v473_v3 }
 0x401   : > { %v5661_v53 = vpop.f32.mrb[32].mxu1  ;;  %v7071_v45 = vpop.f32.mrb[32].mxu0 }
 0x402   : > { %7862 = vst.msk [vmem:[%s10848_s5 + $0x78] sm:$0xff] %vm7846_vm2, %v7693_v0  ;;  %v8930_v19 = vadd.f32 %v10838_v52, %v5661_v53  ;;  %v5663_v34 = vpop.f32.mrb[33].mxu1  ;;  %v7073_v58 = vpop.f32.mrb[33].mxu0 }
 0x403   : > { %v5664_v40 = vpop.f32.mrb[34].mxu1  ;;  %v7074_v41 = vpop.f32.mrb[34].mxu0 }
 0x404   : > { %v8931_v26 = vadd.f32 %v8930_v19, %v7071_v45  ;;  %v8932_v10 = vadd.f32 %v10838_v52, %v5664_v40  ;;  %v5666_v5 = vpop.f32.mrb[35].mxu1  ;;  %v7076_v0 = vpop.f32.mrb[35].mxu0  ;;  %v477_v19 = vld [vmem:[%s10007_s24 + $0x958] sm:$0xff] }
 0x405   : > { %v481_v45 = vld [vmem:[%s10007_s24 + $0x978] sm:$0xff] }
 0x406   : > { %v7694_v53 = vmax.f32 %v8931_v26, 0.0  ;;  %v8933_v34 = vadd.f32 %v8932_v10, %v7074_v41  ;;  %5876 = vmatmul.mubr.bf16.gmra.mrb[140].mxu1 %v8362_v8  ;;  %7286 = vmatmul.mubr.bf16.gmra.mrb[140].mxu0 %v8366_v38  ;;  %v8370_v10 = vcombine.low %v467_v17, %v471_v46  ;;  %v8379_v41 = vcombine.high %v475_v22, %v479_v11  ;;  %v483_v46 = vld [vmem:[%s10007_s24 + $0x988] sm:$0xff] }
 0x407   : > { %5883 = vmatprep.mubr.bf16.mxu1 %v8371_v50  ;;  %8847 = vmatprep.mubr.msk.bf16.mxu0 %vm4601_vm1, %v8375_v30  ;;  %v8374_v50 = vcombine.low %v469_v62, %v473_v3  ;;  %v487_v62 = vld [vmem:[%s10007_s24 + $0x9a8] sm:$0xff] }
 0x408   : > { %7863 = vst.msk [vmem:[%s10848_s5 + $0x80] sm:$0xff] %vm7846_vm2, %v7694_v53  ;;  %v7695_v37 = vmax.f32 %v8933_v34, 0.0  ;;  %v8383_v34 = vcombine.high %v477_v19, %v481_v45 }
 0x409   : > { %v5669_v57 = vpop.f32.mrb[36].mxu1  ;;  %v7079_v40 = vpop.f32.mrb[36].mxu0 }
 0x40a   : > { %7864 = vst.msk [vmem:[%s10848_s5 + $0x88] sm:$0xff] %vm7846_vm2, %v7695_v37  ;;  %v8934_v58 = vadd.f32 %v10838_v52, %v5669_v57  ;;  %v5671_v26 = vpop.f32.mrb[37].mxu1  ;;  %v7081_v8 = vpop.f32.mrb[37].mxu0 }
 0x40b   : > { %v5672_v38 = vpop.f32.mrb[38].mxu1  ;;  %v7082_v0 = vpop.f32.mrb[38].mxu0 }
 0x40c   : > { %v8935_v5 = vadd.f32 %v8934_v58, %v7079_v40  ;;  %v8936_v30 = vadd.f32 %v10838_v52, %v5672_v38  ;;  %v5674_v53 = vpop.f32.mrb[39].mxu1  ;;  %v7084_v37 = vpop.f32.mrb[39].mxu0  ;;  %v485_v58 = vld [vmem:[%s10007_s24 + $0x998] sm:$0xff] }
 0x40d   : > { %v489_v40 = vld [vmem:[%s10007_s24 + $0x9b8] sm:$0xff] }
 0x40e   : > { %v7696_v57 = vmax.f32 %v8935_v5, 0.0  ;;  %v8937_v26 = vadd.f32 %v8936_v30, %v7082_v0  ;;  %5884 = vmatmul.mubr.bf16.gmra.mrb[144].mxu1 %v8370_v10  ;;  %7294 = vmatmul.mubr.bf16.gmra.mrb[144].mxu0 %v8374_v50  ;;  %v8378_v30 = vcombine.low %v475_v22, %v479_v11  ;;  %v8387_v0 = vcombine.high %v483_v46, %v487_v62  ;;  %v491_v11 = vld [vmem:[%s10007_s24 + $0x9c8] sm:$0xff] }
 0x40f   : > { %5891 = vmatprep.mubr.bf16.mxu1 %v8379_v41  ;;  %8848 = vmatprep.mubr.msk.bf16.mxu0 %vm4601_vm1, %v8383_v34  ;;  %v8382_v41 = vcombine.low %v477_v19, %v481_v45  ;;  %v495_v19 = vld [vmem:[%s10007_s24 + $0x9e8] sm:$0xff] }
 0x410   : > { %7865 = vst.msk [vmem:[%s10848_s5 + $0x90] sm:$0xff] %vm7846_vm2, %v7696_v57  ;;  %v7697_v17 = vmax.f32 %v8937_v26, 0.0  ;;  %v8391_v26 = vcombine.high %v485_v58, %v489_v40 }
 0x411   : > { %v5677_v3 = vpop.f32.mrb[40].mxu1  ;;  %v7087_v38 = vpop.f32.mrb[40].mxu0 }
 0x412   : > { %7866 = vst.msk [vmem:[%s10848_s5 + $0x98] sm:$0xff] %vm7846_vm2, %v7697_v17  ;;  %v8938_v8 = vadd.f32 %v10838_v52, %v5677_v3  ;;  %v5679_v5 = vpop.f32.mrb[41].mxu1  ;;  %v7089_v10 = vpop.f32.mrb[41].mxu0 }
 0x413   : > { %v5680_v50 = vpop.f32.mrb[42].mxu1  ;;  %v7090_v37 = vpop.f32.mrb[42].mxu0 }
 0x414   : > { %v8939_v53 = vadd.f32 %v8938_v8, %v7087_v38  ;;  %v8940_v34 = vadd.f32 %v10838_v52, %v5680_v50  ;;  %v5682_v57 = vpop.f32.mrb[43].mxu1  ;;  %v7092_v17 = vpop.f32.mrb[43].mxu0  ;;  %v493_v8 = vld [vmem:[%s10007_s24 + $0x9d8] sm:$0xff] }
 0x415   : > { %v497_v38 = vld [vmem:[%s10007_s24 + $0x9f8] sm:$0xff] }
 0x416   : > { %v7698_v3 = vmax.f32 %v8939_v53, 0.0  ;;  %v8941_v5 = vadd.f32 %v8940_v34, %v7090_v37  ;;  %5892 = vmatmul.mubr.bf16.gmra.mrb[40].mxu1 %v8378_v30  ;;  %7302 = vmatmul.mubr.bf16.gmra.mrb[0].mxu0 %v8382_v41  ;;  %v8386_v34 = vcombine.low %v483_v46, %v487_v62  ;;  %v8395_v37 = vcombine.high %v491_v11, %v495_v19  ;;  %v499_v62 = vld [vmem:[%s10007_s24 + $0xa08] sm:$0xff] }
 0x417   : > { %5899 = vmatprep.mubr.bf16.mxu1 %v8387_v0  ;;  %8849 = vmatprep.mubr.msk.bf16.mxu0 %vm4601_vm1, %v8391_v26  ;;  %v8390_v0 = vcombine.low %v485_v58, %v489_v40  ;;  %v503_v58 = vld [vmem:[%s10007_s24 + $0xa28] sm:$0xff] }
 0x418   : > { %7867 = vst.msk [vmem:[%s10848_s5 + $0xa0] sm:$0xff] %vm7846_vm2, %v7698_v3  ;;  %v7699_v22 = vmax.f32 %v8941_v5, 0.0  ;;  %v8399_v5 = vcombine.high %v493_v8, %v497_v38 }
 0x419   : > { %v5685_v45 = vpop.f32.mrb[44].mxu1  ;;  %v7095_v50 = vpop.f32.mrb[44].mxu0 }
 0x41a   : > { %7868 = vst.msk [vmem:[%s10848_s5 + $0xa8] sm:$0xff] %vm7846_vm2, %v7699_v22  ;;  %v8942_v10 = vadd.f32 %v10838_v52, %v5685_v45  ;;  %v5687_v53 = vpop.f32.mrb[45].mxu1  ;;  %v7097_v30 = vpop.f32.mrb[45].mxu0 }
 0x41b   : > { %v5688_v41 = vpop.f32.mrb[46].mxu1  ;;  %v7098_v17 = vpop.f32.mrb[46].mxu0 }
 0x41c   : > { %v8943_v57 = vadd.f32 %v8942_v10, %v7095_v50  ;;  %v8944_v26 = vadd.f32 %v10838_v52, %v5688_v41  ;;  %v5690_v3 = vpop.f32.mrb[47].mxu1  ;;  %v7100_v22 = vpop.f32.mrb[47].mxu0  ;;  %v501_v10 = vld [vmem:[%s10007_s24 + $0xa18] sm:$0xff] }
 0x41d   : > { %v505_v50 = vld [vmem:[%s10007_s24 + $0xa38] sm:$0xff] }
 0x41e   : > { %v7700_v45 = vmax.f32 %v8943_v57, 0.0  ;;  %v8945_v53 = vadd.f32 %v8944_v26, %v7098_v17  ;;  %5900 = vmatmul.mubr.bf16.gmra.mrb[44].mxu1 %v8386_v34  ;;  %7310 = vmatmul.mubr.bf16.gmra.mrb[4].mxu0 %v8390_v0  ;;  %v8394_v26 = vcombine.low %v491_v11, %v495_v19  ;;  %v8403_v17 = vcombine.high %v499_v62, %v503_v58  ;;  %v507_v19 = vld [vmem:[%s10007_s24 + $0xa48] sm:$0xff] }
 0x41f   : > { %5907 = vmatprep.mubr.bf16.mxu1 %v8395_v37  ;;  %8850 = vmatprep.mubr.msk.bf16.mxu0 %vm4601_vm1, %v8399_v5  ;;  %v8398_v37 = vcombine.low %v493_v8, %v497_v38  ;;  %v511_v8 = vld [vmem:[%s10007_s24 + $0xa68] sm:$0xff] }
 0x420   : > { %7869 = vst.msk [vmem:[%s10848_s5 + $0xb0] sm:$0xff] %vm7846_vm2, %v7700_v45  ;;  %v7701_v46 = vmax.f32 %v8945_v53, 0.0  ;;  %v8407_v53 = vcombine.high %v501_v10, %v505_v50 }
 0x421   : > { %v5693_v40 = vpop.f32.mrb[48].mxu1  ;;  %v7103_v41 = vpop.f32.mrb[48].mxu0 }
 0x422   : > { %7870 = vst.msk [vmem:[%s10848_s5 + $0xb8] sm:$0xff] %vm7846_vm2, %v7701_v46  ;;  %v8946_v30 = vadd.f32 %v10838_v52, %v5693_v40  ;;  %v5695_v57 = vpop.f32.mrb[49].mxu1  ;;  %v7105_v34 = vpop.f32.mrb[49].mxu0 }
 0x423   : > { %v5696_v0 = vpop.f32.mrb[50].mxu1  ;;  %v7106_v22 = vpop.f32.mrb[50].mxu0 }
 0x424   : > { %v8947_v3 = vadd.f32 %v8946_v30, %v7103_v41  ;;  %v8948_v5 = vadd.f32 %v10838_v52, %v5696_v0  ;;  %v5698_v45 = vpop.f32.mrb[51].mxu1  ;;  %v7108_v46 = vpop.f32.mrb[51].mxu0  ;;  %v509_v30 = vld [vmem:[%s10007_s24 + $0xa58] sm:$0xff] }
 0x425   : > { %v513_v41 = vld [vmem:[%s10007_s24 + $0xa78] sm:$0xff] }
 0x426   : > { %v7702_v40 = vmax.f32 %v8947_v3, 0.0  ;;  %v8949_v57 = vadd.f32 %v8948_v5, %v7106_v22  ;;  %5908 = vmatmul.mubr.bf16.gmra.mrb[48].mxu1 %v8394_v26  ;;  %7318 = vmatmul.mubr.bf16.gmra.mrb[8].mxu0 %v8398_v37  ;;  %v8402_v5 = vcombine.low %v499_v62, %v503_v58  ;;  %v8411_v22 = vcombine.high %v507_v19, %v511_v8  ;;  %v515_v58 = vld [vmem:[%s10007_s24 + $0xa88] sm:$0xff] }
 0x427   : > { %5915 = vmatprep.mubr.bf16.mxu1 %v8403_v17  ;;  %8851 = vmatprep.mubr.msk.bf16.mxu0 %vm4601_vm1, %v8407_v53  ;;  %v8406_v17 = vcombine.low %v501_v10, %v505_v50  ;;  %v519_v10 = vld [vmem:[%s10007_s24 + $0xaa8] sm:$0xff] }
 0x428   : > { %7871 = vst.msk [vmem:[%s10848_s5 + $0xc0] sm:$0xff] %vm7846_vm2, %v7702_v40  ;;  %v7703_v11 = vmax.f32 %v8949_v57, 0.0  ;;  %v8415_v57 = vcombine.high %v509_v30, %v513_v41 }
 0x429   : > { %v5701_v38 = vpop.f32.mrb[52].mxu1  ;;  %v7111_v0 = vpop.f32.mrb[52].mxu0 }
 0x42a   : > { %7872 = vst.msk [vmem:[%s10848_s5 + $0xc8] sm:$0xff] %vm7846_vm2, %v7703_v11  ;;  %v8950_v34 = vadd.f32 %v10838_v52, %v5701_v38  ;;  %v5703_v3 = vpop.f32.mrb[53].mxu1  ;;  %v7113_v26 = vpop.f32.mrb[53].mxu0 }
 0x42b   : > { %v5704_v37 = vpop.f32.mrb[54].mxu1  ;;  %v7114_v46 = vpop.f32.mrb[54].mxu0 }
 0x42c   : > { %v8951_v45 = vadd.f32 %v8950_v34, %v7111_v0  ;;  %v8952_v53 = vadd.f32 %v10838_v52, %v5704_v37  ;;  %v5706_v40 = vpop.f32.mrb[55].mxu1  ;;  %v7116_v11 = vpop.f32.mrb[55].mxu0  ;;  %v517_v34 = vld [vmem:[%s10007_s24 + $0xa98] sm:$0xff] }
 0x42d   : > { %v521_v0 = vld [vmem:[%s10007_s24 + $0xab8] sm:$0xff] }
 0x42e   : > { %v7704_v38 = vmax.f32 %v8951_v45, 0.0  ;;  %v8953_v3 = vadd.f32 %v8952_v53, %v7114_v46  ;;  %5916 = vmatmul.mubr.bf16.gmra.mrb[52].mxu1 %v8402_v5  ;;  %7326 = vmatmul.mubr.bf16.gmra.mrb[12].mxu0 %v8406_v17  ;;  %v8410_v53 = vcombine.low %v507_v19, %v511_v8  ;;  %v8419_v46 = vcombine.high %v515_v58, %v519_v10  ;;  %v523_v8 = vld [vmem:[%s10007_s24 + $0xac8] sm:$0xff] }
 0x42f   : > { %5923 = vmatprep.mubr.bf16.mxu1 %v8411_v22  ;;  %8852 = vmatprep.mubr.msk.bf16.mxu0 %vm4601_vm1, %v8415_v57  ;;  %v8414_v22 = vcombine.low %v509_v30, %v513_v41  ;;  %v527_v30 = vld [vmem:[%s10007_s24 + $0xae8] sm:$0xff] }
 0x430   : > { %7873 = vst.msk [vmem:[%s10848_s5 + $0xd0] sm:$0xff] %vm7846_vm2, %v7704_v38  ;;  %v7705_v62 = vmax.f32 %v8953_v3, 0.0  ;;  %v8423_v3 = vcombine.high %v517_v34, %v521_v0 }
 0x431   : > { %v5709_v50 = vpop.f32.mrb[56].mxu1  ;;  %v7119_v37 = vpop.f32.mrb[56].mxu0 }
 0x432   : > { %7874 = vst.msk [vmem:[%s10848_s5 + $0xd8] sm:$0xff] %vm7846_vm2, %v7705_v62  ;;  %v8954_v26 = vadd.f32 %v10838_v52, %v5709_v50  ;;  %v5711_v45 = vpop.f32.mrb[57].mxu1  ;;  %v7121_v5 = vpop.f32.mrb[57].mxu0 }
 0x433   : > { %v5712_v17 = vpop.f32.mrb[58].mxu1  ;;  %v7122_v11 = vpop.f32.mrb[58].mxu0 }
 0x434   : > { %v8955_v40 = vadd.f32 %v8954_v26, %v7119_v37  ;;  %v8956_v57 = vadd.f32 %v10838_v52, %v5712_v17  ;;  %v5714_v38 = vpop.f32.mrb[59].mxu1  ;;  %v7124_v62 = vpop.f32.mrb[59].mxu0  ;;  %v525_v26 = vld [vmem:[%s10007_s24 + $0xad8] sm:$0xff] }
 0x435   : > { %v529_v37 = vld [vmem:[%s10007_s24 + $0xaf8] sm:$0xff] }
 0x436   : > { %v7706_v50 = vmax.f32 %v8955_v40, 0.0  ;;  %v8957_v45 = vadd.f32 %v8956_v57, %v7122_v11  ;;  %5924 = vmatmul.mubr.bf16.gmra.mrb[56].mxu1 %v8410_v53  ;;  %7334 = vmatmul.mubr.bf16.gmra.mrb[16].mxu0 %v8414_v22  ;;  %v8418_v57 = vcombine.low %v515_v58, %v519_v10  ;;  %v8427_v11 = vcombine.high %v523_v8, %v527_v30  ;;  %v531_v10 = vld [vmem:[%s10007_s24 + $0xb08] sm:$0xff] }
 0x437   : > { %5931 = vmatprep.mubr.bf16.mxu1 %v8419_v46  ;;  %8853 = vmatprep.mubr.msk.bf16.mxu0 %vm4601_vm1, %v8423_v3  ;;  %v8422_v46 = vcombine.low %v517_v34, %v521_v0  ;;  %v535_v34 = vld [vmem:[%s10007_s24 + $0xb28] sm:$0xff] }
 0x438   : > { %7875 = vst.msk [vmem:[%s10848_s5 + $0xe0] sm:$0xff] %vm7846_vm2, %v7706_v50  ;;  %v7707_v19 = vmax.f32 %v8957_v45, 0.0  ;;  %v8431_v45 = vcombine.high %v525_v26, %v529_v37 }
 0x439   : > { %v5717_v41 = vpop.f32.mrb[60].mxu1  ;;  %v7127_v17 = vpop.f32.mrb[60].mxu0 }
 0x43a   : > { %7876 = vst.msk [vmem:[%s10848_s5 + $0xe8] sm:$0xff] %vm7846_vm2, %v7707_v19  ;;  %v8958_v5 = vadd.f32 %v10838_v52, %v5717_v41  ;;  %v5719_v40 = vpop.f32.mrb[61].mxu1  ;;  %v7129_v53 = vpop.f32.mrb[61].mxu0 }
 0x43b   : > { %v5720_v22 = vpop.f32.mrb[62].mxu1  ;;  %v7130_v62 = vpop.f32.mrb[62].mxu0 }
 0x43c   : > { %v8959_v38 = vadd.f32 %v8958_v5, %v7127_v17  ;;  %v8960_v3 = vadd.f32 %v10838_v52, %v5720_v22  ;;  %v5722_v50 = vpop.f32.mrb[63].mxu1  ;;  %v7132_v19 = vpop.f32.mrb[63].mxu0  ;;  %v533_v5 = vld [vmem:[%s10007_s24 + $0xb18] sm:$0xff] }
 0x43d   : > { %v537_v17 = vld [vmem:[%s10007_s24 + $0xb38] sm:$0xff] }
 0x43e   : > { %v7708_v41 = vmax.f32 %v8959_v38, 0.0  ;;  %v8961_v40 = vadd.f32 %v8960_v3, %v7130_v62  ;;  %5932 = vmatmul.mubr.bf16.gmra.mrb[60].mxu1 %v8418_v57  ;;  %7342 = vmatmul.mubr.bf16.gmra.mrb[20].mxu0 %v8422_v46  ;;  %v8426_v3 = vcombine.low %v523_v8, %v527_v30  ;;  %v8435_v62 = vcombine.high %v531_v10, %v535_v34  ;;  %v539_v30 = vld [vmem:[%s10007_s24 + $0xb48] sm:$0xff] }
 0x43f   : > { %5939 = vmatprep.mubr.bf16.mxu1 %v8427_v11  ;;  %8854 = vmatprep.mubr.msk.bf16.mxu0 %vm4601_vm1, %v8431_v45  ;;  %v8430_v11 = vcombine.low %v525_v26, %v529_v37  ;;  %v543_v26 = vld [vmem:[%s10007_s24 + $0xb68] sm:$0xff] }
 0x440   : > { %7877 = vst.msk [vmem:[%s10848_s5 + $0xf0] sm:$0xff] %vm7846_vm2, %v7708_v41  ;;  %v7709_v58 = vmax.f32 %v8961_v40, 0.0  ;;  %v8439_v40 = vcombine.high %v533_v5, %v537_v17 }
 0x441   : > { %v5725_v0 = vpop.f32.mrb[64].mxu1  ;;  %v7135_v22 = vpop.f32.mrb[64].mxu0 }
 0x442   : > { %7878 = vst.msk [vmem:[%s10848_s5 + $0xf8] sm:$0xff] %vm7846_vm2, %v7709_v58  ;;  %v8962_v53 = vadd.f32 %v10838_v52, %v5725_v0  ;;  %v5727_v38 = vpop.f32.mrb[65].mxu1  ;;  %v7137_v57 = vpop.f32.mrb[65].mxu0 }
 0x443   : > { %v5728_v46 = vpop.f32.mrb[66].mxu1  ;;  %v7138_v19 = vpop.f32.mrb[66].mxu0 }
 0x444   : > { %v8963_v50 = vadd.f32 %v8962_v53, %v7135_v22  ;;  %v8964_v45 = vadd.f32 %v10838_v52, %v5728_v46  ;;  %v5730_v41 = vpop.f32.mrb[67].mxu1  ;;  %v7140_v58 = vpop.f32.mrb[67].mxu0  ;;  %v541_v53 = vld [vmem:[%s10007_s24 + $0xb58] sm:$0xff] }
 0x445   : > { %v545_v22 = vld [vmem:[%s10007_s24 + $0xb78] sm:$0xff] }
 0x446   : > { %v7710_v0 = vmax.f32 %v8963_v50, 0.0  ;;  %v8965_v38 = vadd.f32 %v8964_v45, %v7138_v19  ;;  %5940 = vmatmul.mubr.bf16.gmra.mrb[64].mxu1 %v8426_v3  ;;  %7350 = vmatmul.mubr.bf16.gmra.mrb[24].mxu0 %v8430_v11  ;;  %v8434_v45 = vcombine.low %v531_v10, %v535_v34  ;;  %v8443_v19 = vcombine.high %v539_v30, %v543_v26  ;;  %v547_v34 = vld [vmem:[%s10007_s24 + $0xb88] sm:$0xff] }
 0x447   : > { %5947 = vmatprep.mubr.bf16.mxu1 %v8435_v62  ;;  %8855 = vmatprep.mubr.msk.bf16.mxu0 %vm4601_vm1, %v8439_v40  ;;  %v8438_v62 = vcombine.low %v533_v5, %v537_v17  ;;  %v551_v5 = vld [vmem:[%s10007_s24 + $0xba8] sm:$0xff] }
 0x448   : > { %7879 = vst.msk [vmem:[%s10848_s5 + $0x100] sm:$0xff] %vm7846_vm2, %v7710_v0  ;;  %v7711_v8 = vmax.f32 %v8965_v38, 0.0  ;;  %v8447_v38 = vcombine.high %v541_v53, %v545_v22 }
 0x449   : > { %v5733_v37 = vpop.f32.mrb[68].mxu1  ;;  %v7143_v46 = vpop.f32.mrb[68].mxu0 }
 0x44a   : > { %7880 = vst.msk [vmem:[%s10848_s5 + $0x108] sm:$0xff] %vm7846_vm2, %v7711_v8  ;;  %v8966_v57 = vadd.f32 %v10838_v52, %v5733_v37  ;;  %v5735_v50 = vpop.f32.mrb[69].mxu1  ;;  %v7145_v3 = vpop.f32.mrb[69].mxu0 }
 0x44b   : > { %v5736_v11 = vpop.f32.mrb[70].mxu1  ;;  %v7146_v58 = vpop.f32.mrb[70].mxu0 }
 0x44c   : > { %v8967_v41 = vadd.f32 %v8966_v57, %v7143_v46  ;;  %v8968_v40 = vadd.f32 %v10838_v52, %v5736_v11  ;;  %v5738_v0 = vpop.f32.mrb[71].mxu1  ;;  %v7148_v8 = vpop.f32.mrb[71].mxu0  ;;  %v549_v57 = vld [vmem:[%s10007_s24 + $0xb98] sm:$0xff] }
 0x44d   : > { %v553_v46 = vld [vmem:[%s10007_s24 + $0xbb8] sm:$0xff] }
 0x44e   : > { %v7712_v37 = vmax.f32 %v8967_v41, 0.0  ;;  %v8969_v50 = vadd.f32 %v8968_v40, %v7146_v58  ;;  %5948 = vmatmul.mubr.bf16.gmra.mrb[68].mxu1 %v8434_v45  ;;  %7358 = vmatmul.mubr.bf16.gmra.mrb[28].mxu0 %v8438_v62  ;;  %v8442_v40 = vcombine.low %v539_v30, %v543_v26  ;;  %v8451_v58 = vcombine.high %v547_v34, %v551_v5 }
 0x44f   : > { %5955 = vmatprep.mubr.bf16.mxu1 %v8443_v19  ;;  %8856 = vmatprep.mubr.msk.bf16.mxu0 %vm4601_vm1, %v8447_v38  ;;  %v8446_v19 = vcombine.low %v541_v53, %v545_v22  ;;  %v11050_v38 = vld [vmem:[%s11727_s2] ss:$0 sm:$0xff]  ;;  %v8455_v30 = vcombine.high %v549_v57, %v553_v46 }
 0x450   : > { %7881 = vst.msk [vmem:[%s10848_s5 + $0x110] sm:$0xff] %vm7846_vm2, %v7712_v37  ;;  %v7713_v10 = vmax.f32 %v8969_v50, 0.0 }
 0x451   : > { %v5741_v17 = vpop.f32.mrb[72].mxu1  ;;  %v7151_v11 = vpop.f32.mrb[72].mxu0 }
 0x452   : > { %7882 = vst.msk [vmem:[%s10848_s5 + $0x118] sm:$0xff] %vm7846_vm2, %v7713_v10  ;;  %v8970_v3 = vadd.f32 %v10838_v52, %v5741_v17  ;;  %v5743_v41 = vpop.f32.mrb[73].mxu1  ;;  %v7153_v45 = vpop.f32.mrb[73].mxu0  ;;  %v555_v10 = vld [vmem:[%s10007_s24 + $0xbc8] sm:$0xff] }
 0x453   : > { %v5744_v62 = vpop.f32.mrb[74].mxu1  ;;  %v7154_v52 = vpop.f32.mrb[74].mxu0  ;;  %v559_v17 = vld [vmem:[%s10007_s24 + $0xbe8] sm:$0xff]  ;;  %v561_v41 = vld [vmem:[%s10007_s24 + $0xbf8] sm:$0xff] }
 0x454   : > { %v8971_v0 = vadd.f32 %v8970_v3, %v7151_v11  ;;  %v8972_v8 = vadd.f32 %v11050_v38, %v5744_v62  ;;  %v5746_v37 = vpop.f32.mrb[75].mxu1  ;;  %v7156_v26 = vpop.f32.mrb[75].mxu0  ;;  %v557_v11 = vld [vmem:[%s10007_s24 + $0xbd8] sm:$0xff] }
 0x456   : > { %v7714_v50 = vmax.f32 %v8971_v0, 0.0  ;;  %v8973_v53 = vadd.f32 %v8972_v8, %v7154_v52  ;;  %5956 = vmatmul.mubr.bf16.gmra.mrb[72].mxu1 %v8442_v40  ;;  %7366 = vmatmul.mubr.bf16.gmra.mrb[32].mxu0 %v8446_v19  ;;  %v8450_v8 = vcombine.low %v547_v34, %v551_v5  ;;  %v8459_v52 = vcombine.high %v555_v10, %v559_v17  ;;  %v563_v5 = vld [vmem:[%s10007_s24 + $0xc08] sm:$0xff] }
 0x457   : > { %5963 = vmatprep.mubr.bf16.mxu1 %v8451_v58  ;;  %8857 = vmatprep.mubr.msk.bf16.mxu0 %vm4601_vm1, %v8455_v30  ;;  %v8454_v58 = vcombine.low %v549_v57, %v553_v46  ;;  %v567_v57 = vld [vmem:[%s10007_s24 + $0xc28] sm:$0xff] }
 0x458   : > { %7883 = vst.msk [vmem:[%s10848_s5 + $0x120] sm:$0xff] %vm7846_vm2, %v7714_v50  ;;  %v7715_v22 = vmax.f32 %v8973_v53, 0.0  ;;  %v8463_v53 = vcombine.high %v557_v11, %v561_v41 }
 0x459   : > { %v5749_v3 = vpop.f32.mrb[76].mxu1  ;;  %v7159_v62 = vpop.f32.mrb[76].mxu0 }
 0x45a   : > { %7884 = vst.msk [vmem:[%s10848_s5 + $0x128] sm:$0xff] %vm7846_vm2, %v7715_v22  ;;  %v8974_v45 = vadd.f32 %v11050_v38, %v5749_v3  ;;  %v5751_v0 = vpop.f32.mrb[77].mxu1  ;;  %v7161_v40 = vpop.f32.mrb[77].mxu0 }
 0x45b   : > { %v5752_v19 = vpop.f32.mrb[78].mxu1  ;;  %v7162_v26 = vpop.f32.mrb[78].mxu0 }
 0x45c   : > { %v8975_v37 = vadd.f32 %v8974_v45, %v7159_v62  ;;  %v8976_v30 = vadd.f32 %v11050_v38, %v5752_v19  ;;  %v5754_v50 = vpop.f32.mrb[79].mxu1  ;;  %v7164_v22 = vpop.f32.mrb[79].mxu0  ;;  %v565_v45 = vld [vmem:[%s10007_s24 + $0xc18] sm:$0xff] }
 0x45d   : > { %v569_v62 = vld [vmem:[%s10007_s24 + $0xc38] sm:$0xff] }
 0x45e   : > { %v7716_v3 = vmax.f32 %v8975_v37, 0.0  ;;  %v8977_v0 = vadd.f32 %v8976_v30, %v7162_v26  ;;  %5964 = vmatmul.mubr.bf16.gmra.mrb[76].mxu1 %v8450_v8  ;;  %7374 = vmatmul.mubr.bf16.gmra.mrb[36].mxu0 %v8454_v58  ;;  %v8458_v30 = vcombine.low %v555_v10, %v559_v17  ;;  %v8467_v26 = vcombine.high %v563_v5, %v567_v57  ;;  %v571_v17 = vld [vmem:[%s10007_s24 + $0xc48] sm:$0xff] }
 0x45f   : > { %5971 = vmatprep.mubr.bf16.mxu1 %v8459_v52  ;;  %8858 = vmatprep.mubr.msk.bf16.mxu0 %vm4601_vm1, %v8463_v53  ;;  %v8462_v52 = vcombine.low %v557_v11, %v561_v41  ;;  %v575_v11 = vld [vmem:[%s10007_s24 + $0xc68] sm:$0xff] }
 0x460   : > { %7885 = vst.msk [vmem:[%s10848_s5 + $0x130] sm:$0xff] %vm7846_vm2, %v7716_v3  ;;  %v7717_v34 = vmax.f32 %v8977_v0, 0.0  ;;  %v8471_v0 = vcombine.high %v565_v45, %v569_v62 }
 0x461   : > { %v5757_v46 = vpop.f32.mrb[80].mxu1  ;;  %v7167_v40 = vpop.f32.mrb[80].mxu0 }
 0x462   : > { %7886 = vst.msk [vmem:[%s10848_s5 + $0x138] sm:$0xff] %vm7846_vm2, %v7717_v34  ;;  %v8978_v19 = vadd.f32 %v11050_v38, %v5757_v46  ;;  %v5759_v37 = vpop.f32.mrb[81].mxu1  ;;  %v7169_v8 = vpop.f32.mrb[81].mxu0 }
 0x463   : > { %v5760_v58 = vpop.f32.mrb[82].mxu1  ;;  %v7170_v53 = vpop.f32.mrb[82].mxu0 }
 0x464   : > { %v8979_v50 = vadd.f32 %v8978_v19, %v7167_v40  ;;  %v8980_v22 = vadd.f32 %v11050_v38, %v5760_v58  ;;  %v5762_v3 = vpop.f32.mrb[83].mxu1  ;;  %v7172_v34 = vpop.f32.mrb[83].mxu0  ;;  %v573_v40 = vld [vmem:[%s10007_s24 + $0xc58] sm:$0xff] }
 0x465   : > { %v577_v19 = vld [vmem:[%s10007_s24 + $0xc78] sm:$0xff] }
 0x466   : > { %v7718_v46 = vmax.f32 %v8979_v50, 0.0  ;;  %v8981_v37 = vadd.f32 %v8980_v22, %v7170_v53  ;;  %5972 = vmatmul.mubr.bf16.gmra.mrb[80].mxu1 %v8458_v30  ;;  %7382 = vmatmul.mubr.bf16.gmra.mrb[40].mxu0 %v8462_v52  ;;  %v8466_v53 = vcombine.low %v563_v5, %v567_v57  ;;  %v8475_v22 = vcombine.high %v571_v17, %v575_v11  ;;  %v579_v57 = vld [vmem:[%s10007_s24 + $0xc88] sm:$0xff] }
 0x467   : > { %5979 = vmatprep.mubr.bf16.mxu1 %v8467_v26  ;;  %8859 = vmatprep.mubr.msk.bf16.mxu0 %vm4601_vm1, %v8471_v0  ;;  %v8470_v26 = vcombine.low %v565_v45, %v569_v62  ;;  %v583_v45 = vld [vmem:[%s10007_s24 + $0xca8] sm:$0xff] }
 0x468   : > { %7887 = vst.msk [vmem:[%s10848_s5 + $0x140] sm:$0xff] %vm7846_vm2, %v7718_v46  ;;  %v7719_v10 = vmax.f32 %v8981_v37, 0.0  ;;  %v8479_v37 = vcombine.high %v573_v40, %v577_v19 }
 0x469   : > { %v5765_v41 = vpop.f32.mrb[84].mxu1  ;;  %v7175_v8 = vpop.f32.mrb[84].mxu0 }
 0x46a   : > { %7888 = vst.msk [vmem:[%s10848_s5 + $0x148] sm:$0xff] %vm7846_vm2, %v7719_v10  ;;  %v8982_v58 = vadd.f32 %v11050_v38, %v5765_v41  ;;  %v5767_v50 = vpop.f32.mrb[85].mxu1  ;;  %v7177_v30 = vpop.f32.mrb[85].mxu0 }
 0x46b   : > { %v5768_v52 = vpop.f32.mrb[86].mxu1  ;;  %v7178_v0 = vpop.f32.mrb[86].mxu0 }
 0x46c   : > { %v8983_v3 = vadd.f32 %v8982_v58, %v7175_v8  ;;  %v8984_v34 = vadd.f32 %v11050_v38, %v5768_v52  ;;  %v5770_v46 = vpop.f32.mrb[87].mxu1  ;;  %v7180_v10 = vpop.f32.mrb[87].mxu0  ;;  %v581_v8 = vld [vmem:[%s10007_s24 + $0xc98] sm:$0xff] }
 0x46d   : > { %v585_v58 = vld [vmem:[%s10007_s24 + $0xcb8] sm:$0xff] }
 0x46e   : > { %v7720_v41 = vmax.f32 %v8983_v3, 0.0  ;;  %v8985_v50 = vadd.f32 %v8984_v34, %v7178_v0  ;;  %5980 = vmatmul.mubr.bf16.gmra.mrb[84].mxu1 %v8466_v53  ;;  %7390 = vmatmul.mubr.bf16.gmra.mrb[44].mxu0 %v8470_v26  ;;  %v8474_v0 = vcombine.low %v571_v17, %v575_v11  ;;  %v8483_v34 = vcombine.high %v579_v57, %v583_v45  ;;  %v587_v11 = vld [vmem:[%s10007_s24 + $0xcc8] sm:$0xff] }
 0x46f   : > { %5987 = vmatprep.mubr.bf16.mxu1 %v8475_v22  ;;  %8860 = vmatprep.mubr.msk.bf16.mxu0 %vm4601_vm1, %v8479_v37  ;;  %v8478_v22 = vcombine.low %v573_v40, %v577_v19  ;;  %v591_v40 = vld [vmem:[%s10007_s24 + $0xce8] sm:$0xff] }
 0x470   : > { %7889 = vst.msk [vmem:[%s10848_s5 + $0x150] sm:$0xff] %vm7846_vm2, %v7720_v41  ;;  %v7721_v5 = vmax.f32 %v8985_v50, 0.0  ;;  %v8487_v50 = vcombine.high %v581_v8, %v585_v58 }
 0x471   : > { %v5773_v62 = vpop.f32.mrb[88].mxu1  ;;  %v7183_v30 = vpop.f32.mrb[88].mxu0 }
 0x472   : > { %7890 = vst.msk [vmem:[%s10848_s5 + $0x158] sm:$0xff] %vm7846_vm2, %v7721_v5  ;;  %v8986_v52 = vadd.f32 %v11050_v38, %v5773_v62  ;;  %v5775_v3 = vpop.f32.mrb[89].mxu1  ;;  %v7185_v53 = vpop.f32.mrb[89].mxu0 }
 0x473   : > { %v5776_v26 = vpop.f32.mrb[90].mxu1  ;;  %v7186_v37 = vpop.f32.mrb[90].mxu0 }
 0x474   : > { %v8987_v46 = vadd.f32 %v8986_v52, %v7183_v30  ;;  %v8988_v10 = vadd.f32 %v11050_v38, %v5776_v26  ;;  %v5778_v41 = vpop.f32.mrb[91].mxu1  ;;  %v7188_v5 = vpop.f32.mrb[91].mxu0  ;;  %v589_v30 = vld [vmem:[%s10007_s24 + $0xcd8] sm:$0xff] }
 0x475   : > { %v593_v52 = vld [vmem:[%s10007_s24 + $0xcf8] sm:$0xff] }
 0x476   : > { %v7722_v62 = vmax.f32 %v8987_v46, 0.0  ;;  %v8989_v3 = vadd.f32 %v8988_v10, %v7186_v37  ;;  %5988 = vmatmul.mubr.bf16.gmra.mrb[88].mxu1 %v8474_v0  ;;  %7398 = vmatmul.mubr.bf16.gmra.mrb[48].mxu0 %v8478_v22  ;;  %v8482_v37 = vcombine.low %v579_v57, %v583_v45  ;;  %v8491_v10 = vcombine.high %v587_v11, %v591_v40  ;;  %v595_v45 = vld [vmem:[%s10007_s24 + $0xd08] sm:$0xff] }
 0x477   : > { %5995 = vmatprep.mubr.bf16.mxu1 %v8483_v34  ;;  %8861 = vmatprep.mubr.msk.bf16.mxu0 %vm4601_vm1, %v8487_v50  ;;  %v8486_v34 = vcombine.low %v581_v8, %v585_v58  ;;  %v599_v8 = vld [vmem:[%s10007_s24 + $0xd28] sm:$0xff] }
 0x478   : > { %7891 = vst.msk [vmem:[%s10848_s5 + $0x160] sm:$0xff] %vm7846_vm2, %v7722_v62  ;;  %v7723_v17 = vmax.f32 %v8989_v3, 0.0  ;;  %v8495_v3 = vcombine.high %v589_v30, %v593_v52 }
 0x479   : > { %v5781_v19 = vpop.f32.mrb[92].mxu1  ;;  %v7191_v53 = vpop.f32.mrb[92].mxu0 }
 0x47a   : > { %7892 = vst.msk [vmem:[%s10848_s5 + $0x168] sm:$0xff] %vm7846_vm2, %v7723_v17  ;;  %v8990_v26 = vadd.f32 %v11050_v38, %v5781_v19  ;;  %v5783_v46 = vpop.f32.mrb[93].mxu1  ;;  %v7193_v0 = vpop.f32.mrb[93].mxu0 }
 0x47b   : > { %v5784_v22 = vpop.f32.mrb[94].mxu1  ;;  %v7194_v50 = vpop.f32.mrb[94].mxu0 }
 0x47c   : > { %v8991_v41 = vadd.f32 %v8990_v26, %v7191_v53  ;;  %v8992_v5 = vadd.f32 %v11050_v38, %v5784_v22  ;;  %v5786_v62 = vpop.f32.mrb[95].mxu1  ;;  %v7196_v17 = vpop.f32.mrb[95].mxu0  ;;  %v597_v53 = vld [vmem:[%s10007_s24 + $0xd18] sm:$0xff] }
 0x47d   : > { %v601_v26 = vld [vmem:[%s10007_s24 + $0xd38] sm:$0xff] }
 0x47e   : > { %v7724_v19 = vmax.f32 %v8991_v41, 0.0  ;;  %v8993_v46 = vadd.f32 %v8992_v5, %v7194_v50  ;;  %5996 = vmatmul.mubr.bf16.gmra.mrb[92].mxu1 %v8482_v37  ;;  %7406 = vmatmul.mubr.bf16.gmra.mrb[52].mxu0 %v8486_v34  ;;  %v8490_v50 = vcombine.low %v587_v11, %v591_v40  ;;  %v8499_v5 = vcombine.high %v595_v45, %v599_v8  ;;  %v603_v40 = vld [vmem:[%s10007_s24 + $0xd48] sm:$0xff] }
 0x47f   : > { %6003 = vmatprep.mubr.bf16.mxu1 %v8491_v10  ;;  %8862 = vmatprep.mubr.msk.bf16.mxu0 %vm4601_vm1, %v8495_v3  ;;  %v8494_v10 = vcombine.low %v589_v30, %v593_v52  ;;  %v607_v30 = vld [vmem:[%s10007_s24 + $0xd68] sm:$0xff] }
 0x480   : > { %7893 = vst.msk [vmem:[%s10848_s5 + $0x170] sm:$0xff] %vm7846_vm2, %v7724_v19  ;;  %v7725_v57 = vmax.f32 %v8993_v46, 0.0  ;;  %v8503_v46 = vcombine.high %v597_v53, %v601_v26 }
 0x481   : > { %v5789_v58 = vpop.f32.mrb[96].mxu1  ;;  %v7199_v0 = vpop.f32.mrb[96].mxu0 }
 0x482   : > { %7894 = vst.msk [vmem:[%s10848_s5 + $0x178] sm:$0xff] %vm7846_vm2, %v7725_v57  ;;  %v8994_v22 = vadd.f32 %v11050_v38, %v5789_v58  ;;  %v5791_v41 = vpop.f32.mrb[97].mxu1  ;;  %v7201_v37 = vpop.f32.mrb[97].mxu0 }
 0x483   : > { %v5792_v34 = vpop.f32.mrb[98].mxu1  ;;  %v7202_v3 = vpop.f32.mrb[98].mxu0 }
 0x484   : > { %v8995_v62 = vadd.f32 %v8994_v22, %v7199_v0  ;;  %v8996_v17 = vadd.f32 %v11050_v38, %v5792_v34  ;;  %v5794_v19 = vpop.f32.mrb[99].mxu1  ;;  %v7204_v57 = vpop.f32.mrb[99].mxu0  ;;  %v605_v0 = vld [vmem:[%s10007_s24 + $0xd58] sm:$0xff] }
 0x485   : > { %v609_v22 = vld [vmem:[%s10007_s24 + $0xd78] sm:$0xff] }
 0x486   : > { %v7726_v58 = vmax.f32 %v8995_v62, 0.0  ;;  %v8997_v41 = vadd.f32 %v8996_v17, %v7202_v3  ;;  %6004 = vmatmul.mubr.bf16.gmra.mrb[96].mxu1 %v8490_v50  ;;  %7414 = vmatmul.mubr.bf16.gmra.mrb[56].mxu0 %v8494_v10  ;;  %v8498_v3 = vcombine.low %v595_v45, %v599_v8  ;;  %v8507_v17 = vcombine.high %v603_v40, %v607_v30  ;;  %v611_v8 = vld [vmem:[%s10007_s24 + $0xd88] sm:$0xff] }
 0x487   : > { %6011 = vmatprep.mubr.bf16.mxu1 %v8499_v5  ;;  %8863 = vmatprep.mubr.msk.bf16.mxu0 %vm4601_vm1, %v8503_v46  ;;  %v8502_v5 = vcombine.low %v597_v53, %v601_v26  ;;  %v615_v53 = vld [vmem:[%s10007_s24 + $0xda8] sm:$0xff] }
 0x488   : > { %7895 = vst.msk [vmem:[%s10848_s5 + $0x180] sm:$0xff] %vm7846_vm2, %v7726_v58  ;;  %v7727_v11 = vmax.f32 %v8997_v41, 0.0  ;;  %v8511_v41 = vcombine.high %v605_v0, %v609_v22 }
 0x489   : > { %v5797_v52 = vpop.f32.mrb[100].mxu1  ;;  %v7207_v37 = vpop.f32.mrb[100].mxu0 }
 0x48a   : > { %7896 = vst.msk [vmem:[%s10848_s5 + $0x188] sm:$0xff] %vm7846_vm2, %v7727_v11  ;;  %v8998_v34 = vadd.f32 %v11050_v38, %v5797_v52  ;;  %v5799_v62 = vpop.f32.mrb[101].mxu1  ;;  %v7209_v50 = vpop.f32.mrb[101].mxu0 }
 0x48b   : > { %v5800_v10 = vpop.f32.mrb[102].mxu1  ;;  %v7210_v46 = vpop.f32.mrb[102].mxu0 }
 0x48c   : > { %v8999_v19 = vadd.f32 %v8998_v34, %v7207_v37  ;;  %v9000_v57 = vadd.f32 %v11050_v38, %v5800_v10  ;;  %v5802_v58 = vpop.f32.mrb[103].mxu1  ;;  %v7212_v11 = vpop.f32.mrb[103].mxu0  ;;  %v613_v37 = vld [vmem:[%s10007_s24 + $0xd98] sm:$0xff] }
 0x48d   : > { %v617_v34 = vld [vmem:[%s10007_s24 + $0xdb8] sm:$0xff] }
 0x48e   : > { %v7728_v52 = vmax.f32 %v8999_v19, 0.0  ;;  %v9001_v62 = vadd.f32 %v9000_v57, %v7210_v46  ;;  %6012 = vmatmul.mubr.bf16.gmra.mrb[100].mxu1 %v8498_v3  ;;  %7422 = vmatmul.mubr.bf16.gmra.mrb[60].mxu0 %v8502_v5  ;;  %v8506_v46 = vcombine.low %v603_v40, %v607_v30  ;;  %v8515_v57 = vcombine.high %v611_v8, %v615_v53  ;;  %v619_v30 = vld [vmem:[%s10007_s24 + $0xdc8] sm:$0xff] }
 0x48f   : > { %6019 = vmatprep.mubr.bf16.mxu1 %v8507_v17  ;;  %8864 = vmatprep.mubr.msk.bf16.mxu0 %vm4601_vm1, %v8511_v41  ;;  %v8510_v17 = vcombine.low %v605_v0, %v609_v22  ;;  %v623_v0 = vld [vmem:[%s10007_s24 + $0xde8] sm:$0xff] }
 0x490   : > { %7897 = vst.msk [vmem:[%s10848_s5 + $0x190] sm:$0xff] %vm7846_vm2, %v7728_v52  ;;  %v7729_v45 = vmax.f32 %v9001_v62, 0.0  ;;  %v8519_v62 = vcombine.high %v613_v37, %v617_v34 }
 0x491   : > { %v5805_v26 = vpop.f32.mrb[104].mxu1  ;;  %v7215_v50 = vpop.f32.mrb[104].mxu0 }
 0x492   : > { %7898 = vst.msk [vmem:[%s10848_s5 + $0x198] sm:$0xff] %vm7846_vm2, %v7729_v45  ;;  %v9002_v10 = vadd.f32 %v11050_v38, %v5805_v26  ;;  %v5807_v19 = vpop.f32.mrb[105].mxu1  ;;  %v7217_v3 = vpop.f32.mrb[105].mxu0 }
 0x493   : > { %v5808_v5 = vpop.f32.mrb[106].mxu1  ;;  %v7218_v41 = vpop.f32.mrb[106].mxu0 }
 0x494   : > { %v9003_v58 = vadd.f32 %v9002_v10, %v7215_v50  ;;  %v9004_v11 = vadd.f32 %v11050_v38, %v5808_v5  ;;  %v5810_v52 = vpop.f32.mrb[107].mxu1  ;;  %v7220_v45 = vpop.f32.mrb[107].mxu0  ;;  %v621_v50 = vld [vmem:[%s10007_s24 + $0xdd8] sm:$0xff] }
 0x495   : > { %v625_v10 = vld [vmem:[%s10007_s24 + $0xdf8] sm:$0xff] }
 0x496   : > { %v7730_v26 = vmax.f32 %v9003_v58, 0.0  ;;  %v9005_v19 = vadd.f32 %v9004_v11, %v7218_v41  ;;  %6020 = vmatmul.mubr.bf16.gmra.mrb[104].mxu1 %v8506_v46  ;;  %7430 = vmatmul.mubr.bf16.gmra.mrb[64].mxu0 %v8510_v17  ;;  %v8514_v41 = vcombine.low %v611_v8, %v615_v53  ;;  %v8523_v11 = vcombine.high %v619_v30, %v623_v0  ;;  %v627_v53 = vld [vmem:[%s10007_s24 + $0xe08] sm:$0xff] }
 0x497   : > { %6027 = vmatprep.mubr.bf16.mxu1 %v8515_v57  ;;  %8865 = vmatprep.mubr.msk.bf16.mxu0 %vm4601_vm1, %v8519_v62  ;;  %v8518_v57 = vcombine.low %v613_v37, %v617_v34  ;;  %v631_v37 = vld [vmem:[%s10007_s24 + $0xe28] sm:$0xff] }
 0x498   : > { %7899 = vst.msk [vmem:[%s10848_s5 + $0x1a0] sm:$0xff] %vm7846_vm2, %v7730_v26  ;;  %v7731_v40 = vmax.f32 %v9005_v19, 0.0  ;;  %v8527_v19 = vcombine.high %v621_v50, %v625_v10 }
 0x499   : > { %v5813_v22 = vpop.f32.mrb[108].mxu1  ;;  %v7223_v3 = vpop.f32.mrb[108].mxu0 }
 0x49a   : > { %7900 = vst.msk [vmem:[%s10848_s5 + $0x1a8] sm:$0xff] %vm7846_vm2, %v7731_v40  ;;  %v9006_v5 = vadd.f32 %v11050_v38, %v5813_v22  ;;  %v5815_v58 = vpop.f32.mrb[109].mxu1  ;;  %v7225_v46 = vpop.f32.mrb[109].mxu0 }
 0x49b   : > { %v5816_v17 = vpop.f32.mrb[110].mxu1  ;;  %v7226_v62 = vpop.f32.mrb[110].mxu0 }
 0x49c   : > { %v9007_v52 = vadd.f32 %v9006_v5, %v7223_v3  ;;  %v9008_v45 = vadd.f32 %v11050_v38, %v5816_v17  ;;  %v5818_v26 = vpop.f32.mrb[111].mxu1  ;;  %v7228_v40 = vpop.f32.mrb[111].mxu0  ;;  %v629_v3 = vld [vmem:[%s10007_s24 + $0xe18] sm:$0xff] }
 0x49d   : > { %v633_v5 = vld [vmem:[%s10007_s24 + $0xe38] sm:$0xff] }
 0x49e   : > { %v7732_v22 = vmax.f32 %v9007_v52, 0.0  ;;  %v9009_v58 = vadd.f32 %v9008_v45, %v7226_v62  ;;  %6028 = vmatmul.mubr.bf16.gmra.mrb[108].mxu1 %v8514_v41  ;;  %7438 = vmatmul.mubr.bf16.gmra.mrb[68].mxu0 %v8518_v57  ;;  %v8522_v62 = vcombine.low %v619_v30, %v623_v0  ;;  %v8531_v45 = vcombine.high %v627_v53, %v631_v37  ;;  %v635_v0 = vld [vmem:[%s10007_s24 + $0xe48] sm:$0xff] }
 0x49f   : > { %6035 = vmatprep.mubr.bf16.mxu1 %v8523_v11  ;;  %8866 = vmatprep.mubr.msk.bf16.mxu0 %vm4601_vm1, %v8527_v19  ;;  %v8526_v11 = vcombine.low %v621_v50, %v625_v10  ;;  %v639_v50 = vld [vmem:[%s10007_s24 + $0xe68] sm:$0xff] }
 0x4a0   : > { %7901 = vst.msk [vmem:[%s10848_s5 + $0x1b0] sm:$0xff] %vm7846_vm2, %v7732_v22  ;;  %v7733_v8 = vmax.f32 %v9009_v58, 0.0  ;;  %v8535_v58 = vcombine.high %v629_v3, %v633_v5 }
 0x4a1   : > { %v5821_v34 = vpop.f32.mrb[112].mxu1  ;;  %v7231_v46 = vpop.f32.mrb[112].mxu0 }
 0x4a2   : > { %7902 = vst.msk [vmem:[%s10848_s5 + $0x1b8] sm:$0xff] %vm7846_vm2, %v7733_v8  ;;  %v9010_v17 = vadd.f32 %v11050_v38, %v5821_v34  ;;  %v5823_v52 = vpop.f32.mrb[113].mxu1  ;;  %v7233_v41 = vpop.f32.mrb[113].mxu0 }
 0x4a3   : > { %v5824_v57 = vpop.f32.mrb[114].mxu1  ;;  %v7234_v19 = vpop.f32.mrb[114].mxu0 }
 0x4a4   : > { %v9011_v26 = vadd.f32 %v9010_v17, %v7231_v46  ;;  %v9012_v40 = vadd.f32 %v11050_v38, %v5824_v57  ;;  %v5826_v22 = vpop.f32.mrb[115].mxu1  ;;  %v7236_v8 = vpop.f32.mrb[115].mxu0  ;;  %v637_v46 = vld [vmem:[%s10007_s24 + $0xe58] sm:$0xff] }
 0x4a5   : > { %v641_v17 = vld [vmem:[%s10007_s24 + $0xe78] sm:$0xff] }
 0x4a6   : > { %v7734_v34 = vmax.f32 %v9011_v26, 0.0  ;;  %v9013_v52 = vadd.f32 %v9012_v40, %v7234_v19  ;;  %6036 = vmatmul.mubr.bf16.gmra.mrb[112].mxu1 %v8522_v62  ;;  %7446 = vmatmul.mubr.bf16.gmra.mrb[72].mxu0 %v8526_v11  ;;  %v8530_v19 = vcombine.low %v627_v53, %v631_v37  ;;  %v8539_v40 = vcombine.high %v635_v0, %v639_v50  ;;  %v643_v37 = vld [vmem:[%s10007_s24 + $0xe88] sm:$0xff] }
 0x4a7   : > { %6043 = vmatprep.mubr.bf16.mxu1 %v8531_v45  ;;  %8867 = vmatprep.mubr.msk.bf16.mxu0 %vm4601_vm1, %v8535_v58  ;;  %v8534_v45 = vcombine.low %v629_v3, %v633_v5  ;;  %v647_v3 = vld [vmem:[%s10007_s24 + $0xea8] sm:$0xff] }
 0x4a8   : > { %7903 = vst.msk [vmem:[%s10848_s5 + $0x1c0] sm:$0xff] %vm7846_vm2, %v7734_v34  ;;  %v7735_v30 = vmax.f32 %v9013_v52, 0.0  ;;  %v8543_v52 = vcombine.high %v637_v46, %v641_v17 }
 0x4a9   : > { %v5829_v10 = vpop.f32.mrb[116].mxu1  ;;  %v7239_v41 = vpop.f32.mrb[116].mxu0 }
 0x4aa   : > { %7904 = vst.msk [vmem:[%s10848_s5 + $0x1c8] sm:$0xff] %vm7846_vm2, %v7735_v30  ;;  %v9014_v57 = vadd.f32 %v11050_v38, %v5829_v10  ;;  %v5831_v26 = vpop.f32.mrb[117].mxu1  ;;  %v7241_v62 = vpop.f32.mrb[117].mxu0 }
 0x4ab   : > { %v5832_v11 = vpop.f32.mrb[118].mxu1  ;;  %v7242_v58 = vpop.f32.mrb[118].mxu0 }
 0x4ac   : > { %v9015_v22 = vadd.f32 %v9014_v57, %v7239_v41  ;;  %v9016_v8 = vadd.f32 %v11050_v38, %v5832_v11  ;;  %v5834_v34 = vpop.f32.mrb[119].mxu1  ;;  %v7244_v30 = vpop.f32.mrb[119].mxu0  ;;  %v645_v41 = vld [vmem:[%s10007_s24 + $0xe98] sm:$0xff] }
 0x4ad   : > { %v649_v57 = vld [vmem:[%s10007_s24 + $0xeb8] sm:$0xff] }
 0x4ae   : > { %v7736_v10 = vmax.f32 %v9015_v22, 0.0  ;;  %v9017_v26 = vadd.f32 %v9016_v8, %v7242_v58  ;;  %6044 = vmatmul.mubr.bf16.gmra.mrb[116].mxu1 %v8530_v19  ;;  %7454 = vmatmul.mubr.bf16.gmra.mrb[76].mxu0 %v8534_v45  ;;  %v8538_v58 = vcombine.low %v635_v0, %v639_v50  ;;  %v8547_v8 = vcombine.high %v643_v37, %v647_v3  ;;  %v651_v50 = vld [vmem:[%s10007_s24 + $0xec8] sm:$0xff] }
 0x4af   : > { %6051 = vmatprep.mubr.bf16.mxu1 %v8539_v40  ;;  %8868 = vmatprep.mubr.msk.bf16.mxu0 %vm4601_vm1, %v8543_v52  ;;  %v8542_v40 = vcombine.low %v637_v46, %v641_v17  ;;  %v655_v46 = vld [vmem:[%s10007_s24 + $0xee8] sm:$0xff] }
 0x4b0   : > { %7905 = vst.msk [vmem:[%s10848_s5 + $0x1d0] sm:$0xff] %vm7846_vm2, %v7736_v10  ;;  %v7737_v53 = vmax.f32 %v9017_v26, 0.0  ;;  %v8551_v26 = vcombine.high %v645_v41, %v649_v57 }
 0x4b1   : > { %v5837_v5 = vpop.f32.mrb[120].mxu1  ;;  %v7247_v11 = vpop.f32.mrb[120].mxu0 }
 0x4b2   : > { %7906 = vst.msk [vmem:[%s10848_s5 + $0x1d8] sm:$0xff] %vm7846_vm2, %v7737_v53  ;;  %v9018_v62 = vadd.f32 %v11050_v38, %v5837_v5  ;;  %v5839_v22 = vpop.f32.mrb[121].mxu1  ;;  %v7249_v19 = vpop.f32.mrb[121].mxu0 }
 0x4b3   : > { %v5840_v45 = vpop.f32.mrb[122].mxu1  ;;  %v7250_v30 = vpop.f32.mrb[122].mxu0 }
 0x4b4   : > { %v9019_v34 = vadd.f32 %v9018_v62, %v7247_v11  ;;  %v9020_v52 = vadd.f32 %v11050_v38, %v5840_v45  ;;  %v5842_v10 = vpop.f32.mrb[123].mxu1  ;;  %v7252_v53 = vpop.f32.mrb[123].mxu0  ;;  %v653_v62 = vld [vmem:[%s10007_s24 + $0xed8] sm:$0xff] }
 0x4b5   : > { %v657_v11 = vld [vmem:[%s10007_s24 + $0xef8] sm:$0xff] }
 0x4b6   : > { %v7738_v5 = vmax.f32 %v9019_v34, 0.0  ;;  %v9021_v22 = vadd.f32 %v9020_v52, %v7250_v30  ;;  %6052 = vmatmul.mubr.bf16.gmra.mrb[228].mxu1 %v8538_v58  ;;  %7462 = vmatmul.mubr.bf16.gmra.mrb[228].mxu0 %v8542_v40  ;;  %v8546_v52 = vcombine.low %v643_v37, %v647_v3  ;;  %v8555_v30 = vcombine.high %v651_v50, %v655_v46  ;;  %v659_v3 = vld [vmem:[%s10007_s24 + $0xf08] sm:$0xff] }
 0x4b7   : > { %6059 = vmatprep.mubr.bf16.mxu1 %v8547_v8  ;;  %8869 = vmatprep.mubr.msk.bf16.mxu0 %vm4601_vm1, %v8551_v26  ;;  %v8550_v8 = vcombine.low %v645_v41, %v649_v57  ;;  %v663_v41 = vld [vmem:[%s10007_s24 + $0xf28] sm:$0xff] }
 0x4b8   : > { %7907 = vst.msk [vmem:[%s10848_s5 + $0x1e0] sm:$0xff] %vm7846_vm2, %v7738_v5  ;;  %v7739_v0 = vmax.f32 %v9021_v22, 0.0  ;;  %v8559_v22 = vcombine.high %v653_v62, %v657_v11 }
 0x4b9   : > { %v5845_v17 = vpop.f32.mrb[124].mxu1  ;;  %v7255_v45 = vpop.f32.mrb[124].mxu0 }
 0x4ba   : > { %7908 = vst.msk [vmem:[%s10848_s5 + $0x1e8] sm:$0xff] %vm7846_vm2, %v7739_v0  ;;  %v9022_v19 = vadd.f32 %v11050_v38, %v5845_v17  ;;  %v5847_v34 = vpop.f32.mrb[125].mxu1  ;;  %v7257_v58 = vpop.f32.mrb[125].mxu0 }
 0x4bb   : > { %v5848_v40 = vpop.f32.mrb[126].mxu1  ;;  %v7258_v53 = vpop.f32.mrb[126].mxu0 }
 0x4bc   : > { %v9023_v10 = vadd.f32 %v9022_v19, %v7255_v45  ;;  %v9024_v26 = vadd.f32 %v11050_v38, %v5848_v40  ;;  %v5850_v5 = vpop.f32.mrb[127].mxu1  ;;  %v7260_v0 = vpop.f32.mrb[127].mxu0  ;;  %v661_v19 = vld [vmem:[%s10007_s24 + $0xf18] sm:$0xff] }
 0x4bd   : > { %v665_v45 = vld [vmem:[%s10007_s24 + $0xf38] sm:$0xff] }
 0x4be   : > { %v7740_v17 = vmax.f32 %v9023_v10, 0.0  ;;  %v9025_v34 = vadd.f32 %v9024_v26, %v7258_v53  ;;  %6060 = vmatmul.mubr.bf16.gmra.mrb[232].mxu1 %v8546_v52  ;;  %7470 = vmatmul.mubr.bf16.gmra.mrb[232].mxu0 %v8550_v8  ;;  %v8554_v26 = vcombine.low %v651_v50, %v655_v46  ;;  %v8563_v53 = vcombine.high %v659_v3, %v663_v41  ;;  %v667_v46 = vld [vmem:[%s10007_s24 + $0xf48] sm:$0xff] }
 0x4bf   : > { %6067 = vmatprep.mubr.bf16.mxu1 %v8555_v30  ;;  %8870 = vmatprep.mubr.msk.bf16.mxu0 %vm4601_vm1, %v8559_v22  ;;  %v8558_v30 = vcombine.low %v653_v62, %v657_v11  ;;  %v671_v62 = vld [vmem:[%s10007_s24 + $0xf68] sm:$0xff] }
 0x4c0   : > { %7909 = vst.msk [vmem:[%s10848_s5 + $0x1f0] sm:$0xff] %vm7846_vm2, %v7740_v17  ;;  %v7741_v37 = vmax.f32 %v9025_v34, 0.0  ;;  %v8567_v34 = vcombine.high %v661_v19, %v665_v45 }
 0x4c1   : > { %v5853_v57 = vpop.f32.mrb[128].mxu1  ;;  %v7263_v40 = vpop.f32.mrb[128].mxu0 }
 0x4c2   : > { %7910 = vst.msk [vmem:[%s10848_s5 + $0x1f8] sm:$0xff] %vm7846_vm2, %v7741_v37  ;;  %v9026_v58 = vadd.f32 %v11050_v38, %v5853_v57  ;;  %v5855_v10 = vpop.f32.mrb[129].mxu1  ;;  %v7265_v52 = vpop.f32.mrb[129].mxu0 }
 0x4c3   : > { %v5856_v8 = vpop.f32.mrb[130].mxu1  ;;  %v7266_v0 = vpop.f32.mrb[130].mxu0 }
 0x4c4   : > { %v9027_v5 = vadd.f32 %v9026_v58, %v7263_v40  ;;  %v9028_v22 = vadd.f32 %v11050_v38, %v5856_v8  ;;  %v5858_v17 = vpop.f32.mrb[131].mxu1  ;;  %v7268_v37 = vpop.f32.mrb[131].mxu0  ;;  %v669_v58 = vld [vmem:[%s10007_s24 + $0xf58] sm:$0xff] }
 0x4c5   : > { %v673_v40 = vld [vmem:[%s10007_s24 + $0xf78] sm:$0xff] }
 0x4c6   : > { %v7742_v57 = vmax.f32 %v9027_v5, 0.0  ;;  %v9029_v10 = vadd.f32 %v9028_v22, %v7266_v0  ;;  %6068 = vmatmul.mubr.bf16.gmra.mrb[236].mxu1 %v8554_v26  ;;  %7478 = vmatmul.mubr.bf16.gmra.mrb[236].mxu0 %v8558_v30  ;;  %v8562_v22 = vcombine.low %v659_v3, %v663_v41  ;;  %v8571_v0 = vcombine.high %v667_v46, %v671_v62  ;;  %v675_v41 = vld [vmem:[%s10007_s24 + $0xf88] sm:$0xff] }
 0x4c7   : > { %6075 = vmatprep.mubr.bf16.mxu1 %v8563_v53  ;;  %8871 = vmatprep.mubr.msk.bf16.mxu0 %vm4601_vm1, %v8567_v34  ;;  %v8566_v53 = vcombine.low %v661_v19, %v665_v45  ;;  %v679_v19 = vld [vmem:[%s10007_s24 + $0xfa8] sm:$0xff] }
 0x4c8   : > { %7911 = vst.msk [vmem:[%s10848_s5 + $0x200] sm:$0xff] %vm7846_vm2, %v7742_v57  ;;  %v7743_v50 = vmax.f32 %v9029_v10, 0.0  ;;  %v8575_v10 = vcombine.high %v669_v58, %v673_v40 }
 0x4c9   : > { %v5861_v11 = vpop.f32.mrb[132].mxu1  ;;  %v7271_v8 = vpop.f32.mrb[132].mxu0 }
 0x4ca   : > { %7912 = vst.msk [vmem:[%s10848_s5 + $0x208] sm:$0xff] %vm7846_vm2, %v7743_v50  ;;  %v9030_v52 = vadd.f32 %v11050_v38, %v5861_v11  ;;  %v5863_v5 = vpop.f32.mrb[133].mxu1  ;;  %v7273_v26 = vpop.f32.mrb[133].mxu0 }
 0x4cb   : > { %v5864_v30 = vpop.f32.mrb[134].mxu1  ;;  %v7274_v37 = vpop.f32.mrb[134].mxu0 }
 0x4cc   : > { %v9031_v17 = vadd.f32 %v9030_v52, %v7271_v8  ;;  %v9032_v34 = vadd.f32 %v11050_v38, %v5864_v30  ;;  %v5866_v57 = vpop.f32.mrb[135].mxu1  ;;  %v7276_v50 = vpop.f32.mrb[135].mxu0  ;;  %v677_v52 = vld [vmem:[%s10007_s24 + $0xf98] sm:$0xff] }
 0x4cd   : > { %v681_v8 = vld [vmem:[%s10007_s24 + $0xfb8] sm:$0xff] }
 0x4ce   : > { %v7744_v11 = vmax.f32 %v9031_v17, 0.0  ;;  %v9033_v5 = vadd.f32 %v9032_v34, %v7274_v37  ;;  %6076 = vmatmul.mubr.bf16.gmra.mrb[240].mxu1 %v8562_v22  ;;  %7486 = vmatmul.mubr.bf16.gmra.mrb[240].mxu0 %v8566_v53  ;;  %v8570_v34 = vcombine.low %v667_v46, %v671_v62  ;;  %v8579_v37 = vcombine.high %v675_v41, %v679_v19  ;;  %v683_v62 = vld [vmem:[%s10007_s24 + $0xfc8] sm:$0xff] }
 0x4cf   : > { %6083 = vmatprep.mubr.bf16.mxu1 %v8571_v0  ;;  %8872 = vmatprep.mubr.msk.bf16.mxu0 %vm4601_vm1, %v8575_v10  ;;  %v8574_v0 = vcombine.low %v669_v58, %v673_v40  ;;  %v687_v58 = vld [vmem:[%s10007_s24 + $0xfe8] sm:$0xff] }
 0x4d0   : > { %7913 = vst.msk [vmem:[%s10848_s5 + $0x210] sm:$0xff] %vm7846_vm2, %v7744_v11  ;;  %v7745_v3 = vmax.f32 %v9033_v5, 0.0  ;;  %v8583_v5 = vcombine.high %v677_v52, %v681_v8 }
 0x4d1   : > { %v5869_v45 = vpop.f32.mrb[136].mxu1  ;;  %v7279_v30 = vpop.f32.mrb[136].mxu0 }
 0x4d2   : > { %7914 = vst.msk [vmem:[%s10848_s5 + $0x218] sm:$0xff] %vm7846_vm2, %v7745_v3  ;;  %v9034_v26 = vadd.f32 %v11050_v38, %v5869_v45  ;;  %v5871_v17 = vpop.f32.mrb[137].mxu1  ;;  %v7281_v22 = vpop.f32.mrb[137].mxu0 }
 0x4d3   : > { %v5872_v53 = vpop.f32.mrb[138].mxu1  ;;  %v7282_v50 = vpop.f32.mrb[138].mxu0 }
 0x4d4   : > { %v9035_v57 = vadd.f32 %v9034_v26, %v7279_v30  ;;  %v9036_v10 = vadd.f32 %v11050_v38, %v5872_v53  ;;  %v5874_v11 = vpop.f32.mrb[139].mxu1  ;;  %v7284_v3 = vpop.f32.mrb[139].mxu0  ;;  %v685_v26 = vld [vmem:[%s10007_s24 + $0xfd8] sm:$0xff] }
 0x4d5   : > { %v689_v30 = vld [vmem:[%s10007_s24 + $0xff8] sm:$0xff] }
 0x4d6   : > { %v7746_v45 = vmax.f32 %v9035_v57, 0.0  ;;  %v9037_v17 = vadd.f32 %v9036_v10, %v7282_v50  ;;  %6084 = vmatmul.mubr.bf16.gmra.mrb[244].mxu1 %v8570_v34  ;;  %7494 = vmatmul.mubr.bf16.gmra.mrb[244].mxu0 %v8574_v0  ;;  %v8578_v10 = vcombine.low %v675_v41, %v679_v19  ;;  %v8587_v50 = vcombine.high %v683_v62, %v687_v58  ;;  %v691_v19 = vld [vmem:[%s10007_s24 + $0x1008] sm:$0xff] }
 0x4d7   : > { %6091 = vmatprep.mubr.bf16.mxu1 %v8579_v37  ;;  %8873 = vmatprep.mubr.msk.bf16.mxu0 %vm4601_vm1, %v8583_v5  ;;  %v8582_v37 = vcombine.low %v677_v52, %v681_v8  ;;  %v695_v52 = vld [vmem:[%s10007_s24 + $0x1028] sm:$0xff] }
 0x4d8   : > { %7915 = vst.msk [vmem:[%s10848_s5 + $0x220] sm:$0xff] %vm7846_vm2, %v7746_v45  ;;  %v7747_v46 = vmax.f32 %v9037_v17, 0.0  ;;  %v8591_v17 = vcombine.high %v685_v26, %v689_v30 }
 0x4d9   : > { %v5877_v40 = vpop.f32.mrb[140].mxu1  ;;  %v7287_v53 = vpop.f32.mrb[140].mxu0 }
 0x4da   : > { %7916 = vst.msk [vmem:[%s10848_s5 + $0x228] sm:$0xff] %vm7846_vm2, %v7747_v46  ;;  %v9038_v22 = vadd.f32 %v11050_v38, %v5877_v40  ;;  %v5879_v57 = vpop.f32.mrb[141].mxu1  ;;  %v7289_v34 = vpop.f32.mrb[141].mxu0 }
 0x4db   : > { %v5880_v0 = vpop.f32.mrb[142].mxu1  ;;  %v7290_v3 = vpop.f32.mrb[142].mxu0 }
 0x4dc   : > { %v9039_v11 = vadd.f32 %v9038_v22, %v7287_v53  ;;  %v9040_v5 = vadd.f32 %v11050_v38, %v5880_v0  ;;  %v5882_v45 = vpop.f32.mrb[143].mxu1  ;;  %v7292_v46 = vpop.f32.mrb[143].mxu0  ;;  %v693_v22 = vld [vmem:[%s10007_s24 + $0x1018] sm:$0xff] }
 0x4dd   : > { %v697_v53 = vld [vmem:[%s10007_s24 + $0x1038] sm:$0xff] }
 0x4de   : > { %v7748_v40 = vmax.f32 %v9039_v11, 0.0  ;;  %v9041_v57 = vadd.f32 %v9040_v5, %v7290_v3  ;;  %6092 = vmatmul.mubr.bf16.gmra.mrb[248].mxu1 %v8578_v10  ;;  %7502 = vmatmul.mubr.bf16.gmra.mrb[248].mxu0 %v8582_v37  ;;  %v8586_v5 = vcombine.low %v683_v62, %v687_v58  ;;  %v8595_v3 = vcombine.high %v691_v19, %v695_v52 }
 0x4df   : > { %6099 = vmatprep.mubr.bf16.mxu1 %v8587_v50  ;;  %8874 = vmatprep.mubr.msk.bf16.mxu0 %vm4601_vm1, %v8591_v17  ;;  %v8590_v50 = vcombine.low %v685_v26, %v689_v30  ;;  %v699_v26 = vld [vmem:[%s10007_s24 + $0x1048] sm:$0xff] }
 0x4e0   : > { %7917 = vst.msk [vmem:[%s10848_s5 + $0x230] sm:$0xff] %vm7846_vm2, %v7748_v40  ;;  %v7749_v41 = vmax.f32 %v9041_v57, 0.0  ;;  %v8599_v57 = vcombine.high %v693_v22, %v697_v53  ;;  %v703_v30 = vld [vmem:[%s10007_s24 + $0x1068] sm:$0xff] }
 0x4e1   : > { %v5885_v8 = vpop.f32.mrb[144].mxu1  ;;  %v7295_v0 = vpop.f32.mrb[144].mxu0 }
 0x4e2   : > { %7918 = vst.msk [vmem:[%s10848_s5 + $0x238] sm:$0xff] %vm7846_vm2, %v7749_v41  ;;  %v9042_v34 = vadd.f32 %v11050_v38, %v5885_v8  ;;  %v5887_v11 = vpop.f32.mrb[145].mxu1  ;;  %v7297_v10 = vpop.f32.mrb[145].mxu0 }
 0x4e3   : > { %v5888_v37 = vpop.f32.mrb[146].mxu1  ;;  %v7298_v46 = vpop.f32.mrb[146].mxu0 }
 0x4e4   : > { %v9043_v45 = vadd.f32 %v9042_v34, %v7295_v0  ;;  %v9044_v17 = vadd.f32 %v11050_v38, %v5888_v37  ;;  %v5890_v40 = vpop.f32.mrb[147].mxu1  ;;  %v7300_v41 = vpop.f32.mrb[147].mxu0  ;;  %v11256_v38 = vld [vmem:[%s11727_s2] ss:$0 sm:$0xff]  ;;  %v701_v0 = vld [vmem:[%s10007_s24 + $0x1058] sm:$0xff] }
 0x4e5   : > { %v5189_v58 = vadd.f32 %v11256_v38, %v10459_v13  ;;  %v8598_v40 = vcombine.low %v693_v22, %v697_v53  ;;  %v8603_v13 = vcombine.high %v699_v26, %v703_v30  ;;  %v707_v22 = vld [vmem:[%s10007_s24 + $0x1088] sm:$0xff] }
 0x4e6   : > { %v7750_v8 = vmax.f32 %v9043_v45, 0.0  ;;  %v9045_v11 = vadd.f32 %v9044_v17, %v7298_v46  ;;  %6100 = vmatmul.mubr.bf16.gmra.mrb[252].mxu1 %v8586_v5  ;;  %7510 = vmatmul.mubr.bf16.gmra.mrb[252].mxu0 %v8590_v50  ;;  %v705_v5 = vld [vmem:[%s10007_s24 + $0x1078] sm:$0xff]  ;;  %v8594_v45 = vcombine.low %v691_v19, %v695_v52  ;;  %v711_v53 = vld [vmem:[%s10007_s24 + $0x10a8] sm:$0xff] }
 0x4e7   : > { %6107 = vmatprep.mubr.bf16.mxu1 %v8595_v3  ;;  %8875 = vmatprep.mubr.msk.bf16.mxu0 %vm4601_vm1, %v8599_v57  ;;  %v5192_v3 = vadd.f32 %v11256_v38, %v10465_v20 }
 0x4e8   : > { %7919 = vst.msk [vmem:[%s10848_s5 + $0x240] sm:$0xff] %vm7846_vm2, %v7750_v8  ;;  %v7751_v62 = vmax.f32 %v9045_v11, 0.0 }
 0x4e9   : > { %v5893_v34 = vpop.f32.mrb[40].mxu1  ;;  %v7303_v37 = vpop.f32.mrb[0].mxu0 }
 0x4ea   : > { %7920 = vst.msk [vmem:[%s10848_s5 + $0x248] sm:$0xff] %vm7846_vm2, %v7751_v62  ;;  %v5894_v10 = vadd.f32 %v5893_v34, %v5189_v58  ;;  %v5895_v50 = vpop.f32.mrb[41].mxu1  ;;  %v7305_v17 = vpop.f32.mrb[1].mxu0  ;;  %v8607_v62 = vcombine.high %v701_v0, %v705_v5 }
 0x4eb   : > { %v5896_v46 = vpop.f32.mrb[42].mxu1  ;;  %v7306_v8 = vpop.f32.mrb[2].mxu0  ;;  %v709_v50 = vld [vmem:[%s10007_s24 + $0x1098] sm:$0xff] }
 0x4ec   : > { %v6599_v57 = vadd.f32 %v10463_v16, %v5894_v10  ;;  %v5897_v41 = vadd.f32 %v5896_v46, %v5192_v3  ;;  %v5898_v11 = vpop.f32.mrb[43].mxu1  ;;  %v7308_v58 = vpop.f32.mrb[3].mxu0  ;;  %v5197_v16 = vadd.f32 %v11256_v38, %v10471_v29  ;;  %v713_v3 = vld [vmem:[%s10007_s24 + $0x10b8] sm:$0xff]  ;;  %v5200_v46 = vadd.f32 %v11256_v38, %v10477_v36 }
 0x4ee   : > { %v7304_v34 = vadd.f32 %v7303_v37, %v6599_v57  ;;  %v6602_v20 = vadd.f32 %v10467_v23, %v5897_v41  ;;  %6108 = vmatmul.mubr.bf16.gmra.mrb[148].mxu1 %v8594_v45  ;;  %7518 = vmatmul.mubr.bf16.gmra.mrb[148].mxu0 %v8598_v40  ;;  %v8602_v40 = vcombine.low %v699_v26, %v703_v30 }
 0x4ef   : > { %6115 = vmatprep.mubr.bf16.mxu1 %v8603_v13  ;;  %8876 = vmatprep.mubr.msk.bf16.mxu0 %vm4601_vm1, %v8607_v62  ;;  %v8606_v57 = vcombine.low %v701_v0, %v705_v5  ;;  %v8611_v41 = vcombine.high %v707_v22, %v711_v53  ;;  %v715_v5 = vld [vmem:[%s10007_s24 + $0x10c8] sm:$0xff] }
 0x4f0   : > { %v7752_v19 = vmax.f32 %v7304_v34, 0.0  ;;  %v7307_v52 = vadd.f32 %v7306_v8, %v6602_v20  ;;  %v8615_v34 = vcombine.high %v709_v50, %v713_v3 }
 0x4f1   : > { %v5901_v10 = vpop.f32.mrb[44].mxu1  ;;  %v7311_v45 = vpop.f32.mrb[4].mxu0 }
 0x4f2   : > { %7921 = vst.msk [vmem:[%s10848_s5 + $0x250] sm:$0xff] %vm7846_vm2, %v7752_v19  ;;  %v7753_v37 = vmax.f32 %v7307_v52, 0.0  ;;  %v5902_v23 = vadd.f32 %v5901_v10, %v5197_v16  ;;  %v5903_v17 = vpop.f32.mrb[45].mxu1  ;;  %v7313_v13 = vpop.f32.mrb[5].mxu0  ;;  %v719_v19 = vld [vmem:[%s10007_s24 + $0x10e8] sm:$0xff]  ;;  %v717_v16 = vld [vmem:[%s10007_s24 + $0x10d8] sm:$0xff] }
 0x4f3   : > { %v5904_v29 = vpop.f32.mrb[46].mxu1  ;;  %v7314_v62 = vpop.f32.mrb[6].mxu0  ;;  %v721_v10 = vld [vmem:[%s10007_s24 + $0x10f8] sm:$0xff]  ;;  %v5208_v17 = vadd.f32 %v11256_v38, %v10489_v51  ;;  %v8614_v13 = vcombine.low %v709_v50, %v713_v3  ;;  %v723_v3 = vld [vmem:[%s10007_s24 + $0x1108] sm:$0xff] }
 0x4f4   : > { %7922 = vst.msk [vmem:[%s10848_s5 + $0x258] sm:$0xff] %vm7846_vm2, %v7753_v37  ;;  %v6607_v8 = vadd.f32 %v10475_v32, %v5902_v23  ;;  %v5905_v11 = vadd.f32 %v5904_v29, %v5200_v46  ;;  %v5906_v58 = vpop.f32.mrb[47].mxu1  ;;  %v7316_v20 = vpop.f32.mrb[7].mxu0  ;;  %v5205_v32 = vadd.f32 %v11256_v38, %v10483_v44  ;;  %v8610_v46 = vcombine.low %v707_v22, %v711_v53 }
 0x4f5   : > { %v8619_v29 = vcombine.high %v715_v5, %v719_v19 }
 0x4f6   : > { %v7312_v36 = vadd.f32 %v7311_v45, %v6607_v8  ;;  %v6610_v26 = vadd.f32 %v10479_v39, %v5905_v11  ;;  %6116 = vmatmul.mubr.bf16.gmra.mrb[152].mxu1 %v8602_v40  ;;  %7526 = vmatmul.mubr.bf16.gmra.mrb[152].mxu0 %v8606_v57 }
 0x4f7   : > { %6123 = vmatprep.mubr.bf16.mxu1 %v8611_v41  ;;  %8877 = vmatprep.mubr.msk.bf16.mxu0 %vm4601_vm1, %v8615_v34  ;;  %v727_v34 = vld [vmem:[%s10007_s24 + $0x1128] sm:$0xff] }
 0x4f8   : > { %v7754_v30 = vmax.f32 %v7312_v36, 0.0  ;;  %v7315_v0 = vadd.f32 %v7314_v62, %v6610_v26  ;;  %v8623_v62 = vcombine.high %v717_v16, %v721_v10  ;;  %v725_v36 = vld [vmem:[%s10007_s24 + $0x1118] sm:$0xff] }
 0x4f9   : > { %v5909_v52 = vpop.f32.mrb[48].mxu1  ;;  %v7319_v23 = vpop.f32.mrb[8].mxu0  ;;  %v729_v26 = vld [vmem:[%s10007_s24 + $0x1138] sm:$0xff] }
 0x4fa   : > { %7923 = vst.msk [vmem:[%s10848_s5 + $0x260] sm:$0xff] %vm7846_vm2, %v7754_v30  ;;  %v7755_v37 = vmax.f32 %v7315_v0, 0.0  ;;  %v5910_v39 = vadd.f32 %v5909_v52, %v5205_v32  ;;  %v5911_v45 = vpop.f32.mrb[49].mxu1  ;;  %v7321_v40 = vpop.f32.mrb[9].mxu0  ;;  %v5216_v52 = vadd.f32 %v11256_v38, %v10501_v4 }
 0x4fb   : > { %v5912_v44 = vpop.f32.mrb[50].mxu1  ;;  %v7322_v8 = vpop.f32.mrb[10].mxu0  ;;  %v8627_v45 = vcombine.high %v723_v3, %v727_v34 }
 0x4fc   : > { %7924 = vst.msk [vmem:[%s10848_s5 + $0x268] sm:$0xff] %vm7846_vm2, %v7755_v37  ;;  %v6615_v57 = vadd.f32 %v10487_v47, %v5910_v39  ;;  %v5913_v41 = vadd.f32 %v5912_v44, %v5208_v17  ;;  %v5914_v11 = vpop.f32.mrb[51].mxu1  ;;  %v7324_v58 = vpop.f32.mrb[11].mxu0  ;;  %v5213_v47 = vadd.f32 %v11256_v38, %v10495_v60  ;;  %v8618_v37 = vcombine.low %v715_v5, %v719_v19 }
 0x4fd   : > { %v737_v11 = vld [vmem:[%s10007_s24 + $0x1178] sm:$0xff] }
 0x4fe   : > { %v7320_v51 = vadd.f32 %v7319_v23, %v6615_v57  ;;  %v6618_v22 = vadd.f32 %v10491_v54, %v5913_v41  ;;  %6124 = vmatmul.mubr.bf16.gmra.mrb[156].mxu1 %v8610_v46  ;;  %7534 = vmatmul.mubr.bf16.gmra.mrb[156].mxu0 %v8614_v13  ;;  %v8622_v23 = vcombine.low %v717_v16, %v721_v10  ;;  %v731_v10 = vld [vmem:[%s10007_s24 + $0x1148] sm:$0xff] }
 0x4ff   : > { %6131 = vmatprep.mubr.bf16.mxu1 %v8619_v29  ;;  %8878 = vmatprep.mubr.msk.bf16.mxu0 %vm4601_vm1, %v8623_v62  ;;  %v8631_v13 = vcombine.high %v725_v36, %v729_v26  ;;  %v735_v57 = vld [vmem:[%s10007_s24 + $0x1168] sm:$0xff] }
 0x500   : > { %v7756_v53 = vmax.f32 %v7320_v51, 0.0  ;;  %v7323_v50 = vadd.f32 %v7322_v8, %v6618_v22  ;;  %v733_v8 = vld [vmem:[%s10007_s24 + $0x1158] sm:$0xff]  ;;  %v5224_v22 = vadd.f32 %v11256_v38, %v10513_v24 }
 0x501   : > { %v5917_v20 = vpop.f32.mrb[52].mxu1  ;;  %v7327_v0 = vpop.f32.mrb[12].mxu0 }
 0x502   : > { %7925 = vst.msk [vmem:[%s10848_s5 + $0x270] sm:$0xff] %vm7846_vm2, %v7756_v53  ;;  %v7757_v30 = vmax.f32 %v7323_v50, 0.0  ;;  %v5918_v54 = vadd.f32 %v5917_v20, %v5213_v47  ;;  %v5919_v32 = vpop.f32.mrb[53].mxu1  ;;  %v7329_v39 = vpop.f32.mrb[13].mxu0  ;;  %v8626_v53 = vcombine.low %v723_v3, %v727_v34  ;;  %v8630_v47 = vcombine.low %v725_v36, %v729_v26  ;;  %v739_v26 = vld [vmem:[%s10007_s24 + $0x1188] sm:$0xff] }
 0x503   : > { %v5920_v60 = vpop.f32.mrb[54].mxu1  ;;  %v7330_v40 = vpop.f32.mrb[14].mxu0  ;;  %v8635_v20 = vcombine.high %v731_v10, %v735_v57  ;;  %v743_v39 = vld [vmem:[%s10007_s24 + $0x11a8] sm:$0xff] }
 0x504   : > { %7926 = vst.msk [vmem:[%s10848_s5 + $0x278] sm:$0xff] %vm7846_vm2, %v7757_v30  ;;  %v6623_v17 = vadd.f32 %v10499_v63, %v5918_v54  ;;  %v5921_v46 = vadd.f32 %v5920_v60, %v5216_v52  ;;  %v5922_v44 = vpop.f32.mrb[55].mxu1  ;;  %v7332_v29 = vpop.f32.mrb[15].mxu0  ;;  %v5221_v63 = vadd.f32 %v11256_v38, %v10507_v14  ;;  %v8639_v52 = vcombine.high %v733_v8, %v737_v11 }
 0x505   : > { %v5232_v44 = vadd.f32 %v11256_v38, %v10525_v43 }
 0x506   : > { %v7328_v4 = vadd.f32 %v7327_v0, %v6623_v17  ;;  %v6626_v5 = vadd.f32 %v10503_v7, %v5921_v46  ;;  %6132 = vmatmul.mubr.bf16.gmra.mrb[160].mxu1 %v8618_v37  ;;  %7542 = vmatmul.mubr.bf16.gmra.mrb[160].mxu0 %v8622_v23  ;;  %v741_v23 = vld [vmem:[%s10007_s24 + $0x1198] sm:$0xff] }
 0x507   : > { %6139 = vmatprep.mubr.bf16.mxu1 %v8627_v45  ;;  %8879 = vmatprep.mubr.msk.bf16.mxu0 %vm4601_vm1, %v8631_v13  ;;  %v745_v45 = vld [vmem:[%s10007_s24 + $0x11b8] sm:$0xff]  ;;  %v8634_v13 = vcombine.low %v731_v10, %v735_v57 }
 0x508   : > { %v7758_v19 = vmax.f32 %v7328_v4, 0.0  ;;  %v7331_v16 = vadd.f32 %v7330_v40, %v6626_v5  ;;  %v8638_v4 = vcombine.low %v733_v8, %v737_v11  ;;  %v8643_v5 = vcombine.high %v739_v26, %v743_v39  ;;  %v747_v11 = vld [vmem:[%s10007_s24 + $0x11c8] sm:$0xff] }
 0x509   : > { %v5925_v41 = vpop.f32.mrb[56].mxu1  ;;  %v7335_v58 = vpop.f32.mrb[16].mxu0 }
 0x50a   : > { %7927 = vst.msk [vmem:[%s10848_s5 + $0x280] sm:$0xff] %vm7846_vm2, %v7758_v19  ;;  %v7759_v62 = vmax.f32 %v7331_v16, 0.0  ;;  %v5926_v7 = vadd.f32 %v5925_v41, %v5221_v63  ;;  %v5927_v51 = vpop.f32.mrb[57].mxu1  ;;  %v7337_v50 = vpop.f32.mrb[17].mxu0 }
 0x50b   : > { %v5928_v14 = vpop.f32.mrb[58].mxu1  ;;  %v7338_v0 = vpop.f32.mrb[18].mxu0 }
 0x50c   : > { %7928 = vst.msk [vmem:[%s10848_s5 + $0x288] sm:$0xff] %vm7846_vm2, %v7759_v62  ;;  %v6631_v30 = vadd.f32 %v10511_v18, %v5926_v7  ;;  %v5929_v54 = vadd.f32 %v5928_v14, %v5224_v22  ;;  %v5930_v32 = vpop.f32.mrb[59].mxu1  ;;  %v7340_v37 = vpop.f32.mrb[19].mxu0  ;;  %v5229_v18 = vadd.f32 %v11256_v38, %v10519_v35  ;;  %v8647_v62 = vcombine.high %v741_v23, %v745_v45  ;;  %v749_v22 = vld [vmem:[%s10007_s24 + $0x11d8] sm:$0xff] }
 0x50e   : > { %v7336_v24 = vadd.f32 %v7335_v58, %v6631_v30  ;;  %v6634_v3 = vadd.f32 %v10515_v27, %v5929_v54  ;;  %6140 = vmatmul.mubr.bf16.gmra.mrb[164].mxu1 %v8626_v53  ;;  %7550 = vmatmul.mubr.bf16.gmra.mrb[164].mxu0 %v8630_v47  ;;  %v751_v58 = vld [vmem:[%s10007_s24 + $0x11e8] sm:$0xff]  ;;  %v753_v53 = vld [vmem:[%s10007_s24 + $0x11f8] sm:$0xff]  ;;  %v8642_v30 = vcombine.low %v739_v26, %v743_v39 }
 0x50f   : > { %6147 = vmatprep.mubr.bf16.mxu1 %v8635_v20  ;;  %8880 = vmatprep.mubr.msk.bf16.mxu0 %vm4601_vm1, %v8639_v52  ;;  %v5240_v20 = vadd.f32 %v11256_v38, %v10537_v2  ;;  %v8651_v32 = vcombine.high %v747_v11, %v751_v58 }
 0x510   : > { %v7760_v34 = vmax.f32 %v7336_v24, 0.0  ;;  %v7339_v36 = vadd.f32 %v7338_v0, %v6634_v3  ;;  %v8646_v0 = vcombine.low %v741_v23, %v745_v45  ;;  %v759_v23 = vld [vmem:[%s10007_s24 + $0x1228] sm:$0xff] }
 0x511   : > { %v5933_v60 = vpop.f32.mrb[60].mxu1  ;;  %v7343_v46 = vpop.f32.mrb[20].mxu0 }
 0x512   : > { %7929 = vst.msk [vmem:[%s10848_s5 + $0x290] sm:$0xff] %vm7846_vm2, %v7760_v34  ;;  %v7761_v17 = vmax.f32 %v7339_v36, 0.0  ;;  %v5934_v27 = vadd.f32 %v5933_v60, %v5229_v18  ;;  %v5935_v40 = vpop.f32.mrb[61].mxu1  ;;  %v7345_v29 = vpop.f32.mrb[21].mxu0  ;;  %v8655_v34 = vcombine.high %v749_v22, %v753_v53  ;;  %v755_v60 = vld [vmem:[%s10007_s24 + $0x1208] sm:$0xff] }
 0x513   : > { %v5936_v35 = vpop.f32.mrb[62].mxu1  ;;  %v7346_v63 = vpop.f32.mrb[22].mxu0  ;;  %v8650_v29 = vcombine.low %v747_v11, %v751_v58  ;;  %v765_v58 = vld [vmem:[%s10007_s24 + $0x1258] sm:$0xff] }
 0x514   : > { %7930 = vst.msk [vmem:[%s10848_s5 + $0x298] sm:$0xff] %vm7846_vm2, %v7761_v17  ;;  %v6639_v19 = vadd.f32 %v10523_v1, %v5934_v27  ;;  %v5937_v16 = vadd.f32 %v5936_v35, %v5232_v44  ;;  %v5938_v41 = vpop.f32.mrb[63].mxu1  ;;  %v7348_v7 = vpop.f32.mrb[23].mxu0  ;;  %v5237_v1 = vadd.f32 %v11256_v38, %v10531_v56  ;;  %v757_v17 = vld [vmem:[%s10007_s24 + $0x1218] sm:$0xff] }
 0x515   : > { %v761_v27 = vld [vmem:[%s10007_s24 + $0x1238] sm:$0xff] }
 0x516   : > { %v7344_v43 = vadd.f32 %v7343_v46, %v6639_v19  ;;  %v6642_v10 = vadd.f32 %v10527_v48, %v5937_v16  ;;  %6148 = vmatmul.mubr.bf16.gmra.mrb[168].mxu1 %v8634_v13  ;;  %7558 = vmatmul.mubr.bf16.gmra.mrb[168].mxu0 %v8638_v4  ;;  %v5248_v13 = vadd.f32 %v11256_v38, %v10549_v28 }
 0x517   : > { %6155 = vmatprep.mubr.bf16.mxu1 %v8643_v5  ;;  %8881 = vmatprep.mubr.msk.bf16.mxu0 %vm4601_vm1, %v8647_v62  ;;  %v8654_v4 = vcombine.low %v749_v22, %v753_v53  ;;  %v8659_v5 = vcombine.high %v755_v60, %v759_v23  ;;  %v8663_v62 = vcombine.high %v757_v17, %v761_v27 }
 0x518   : > { %v7762_v57 = vmax.f32 %v7344_v43, 0.0  ;;  %v7347_v8 = vadd.f32 %v7346_v63, %v6642_v10 }
 0x519   : > { %v5941_v51 = vpop.f32.mrb[64].mxu1  ;;  %v7351_v14 = vpop.f32.mrb[24].mxu0 }
 0x51a   : > { %7931 = vst.msk [vmem:[%s10848_s5 + $0x2a0] sm:$0xff] %vm7846_vm2, %v7762_v57  ;;  %v7763_v50 = vmax.f32 %v7347_v8, 0.0  ;;  %v5942_v48 = vadd.f32 %v5941_v51, %v5237_v1  ;;  %v5943_v47 = vpop.f32.mrb[65].mxu1  ;;  %v7353_v54 = vpop.f32.mrb[25].mxu0  ;;  %v763_v8 = vld [vmem:[%s10007_s24 + $0x1248] sm:$0xff]  ;;  %v769_v51 = vld [vmem:[%s10007_s24 + $0x1278] sm:$0xff] }
 0x51b   : > { %v5944_v56 = vpop.f32.mrb[66].mxu1  ;;  %v7354_v24 = vpop.f32.mrb[26].mxu0  ;;  %v767_v1 = vld [vmem:[%s10007_s24 + $0x1268] sm:$0xff] }
 0x51c   : > { %7932 = vst.msk [vmem:[%s10848_s5 + $0x2a8] sm:$0xff] %vm7846_vm2, %v7763_v50  ;;  %v6647_v52 = vadd.f32 %v10535_v59, %v5942_v48  ;;  %v5945_v37 = vadd.f32 %v5944_v56, %v5240_v20  ;;  %v5946_v3 = vpop.f32.mrb[67].mxu1  ;;  %v7356_v36 = vpop.f32.mrb[27].mxu0  ;;  %v5245_v59 = vadd.f32 %v11256_v38, %v10543_v15  ;;  %v5256_v48 = vadd.f32 %v11256_v38, %v10561_v55 }
 0x51d   : > { %v8662_v20 = vcombine.low %v757_v17, %v761_v27  ;;  %v771_v36 = vld [vmem:[%s10007_s24 + $0x1288] sm:$0xff]  ;;  %v8666_v17 = vcombine.low %v763_v8, %v767_v1 }
 0x51e   : > { %v7352_v2 = vadd.f32 %v7351_v14, %v6647_v52  ;;  %v6650_v18 = vadd.f32 %v10539_v6, %v5945_v37  ;;  %6156 = vmatmul.mubr.bf16.gmra.mrb[172].mxu1 %v8642_v30  ;;  %7566 = vmatmul.mubr.bf16.gmra.mrb[172].mxu0 %v8646_v0  ;;  %v8658_v14 = vcombine.low %v755_v60, %v759_v23 }
 0x51f   : > { %6163 = vmatprep.mubr.bf16.mxu1 %v8651_v32  ;;  %8882 = vmatprep.mubr.msk.bf16.mxu0 %vm4601_vm1, %v8655_v34  ;;  %v8667_v30 = vcombine.high %v763_v8, %v767_v1  ;;  %v8671_v52 = vcombine.high %v765_v58, %v769_v51 }
 0x520   : > { %v7764_v26 = vmax.f32 %v7352_v2, 0.0  ;;  %v7355_v39 = vadd.f32 %v7354_v24, %v6650_v18  ;;  %v775_v2 = vld [vmem:[%s10007_s24 + $0x12a8] sm:$0xff] }
 0x521   : > { %v5949_v45 = vpop.f32.mrb[68].mxu1  ;;  %v7359_v40 = vpop.f32.mrb[28].mxu0  ;;  %v8674_v1 = vcombine.low %v771_v36, %v775_v2 }
 0x522   : > { %7933 = vst.msk [vmem:[%s10848_s5 + $0x2b0] sm:$0xff] %vm7846_vm2, %v7764_v26  ;;  %v7765_v46 = vmax.f32 %v7355_v39, 0.0  ;;  %v5950_v6 = vadd.f32 %v5949_v45, %v5245_v59  ;;  %v5951_v44 = vpop.f32.mrb[69].mxu1  ;;  %v7361_v35 = vpop.f32.mrb[29].mxu0  ;;  %v773_v26 = vld [vmem:[%s10007_s24 + $0x1298] sm:$0xff]  ;;  %v5264_v45 = vadd.f32 %v11256_v38, %v10573_v25 }
 0x523   : > { %v5952_v15 = vpop.f32.mrb[70].mxu1  ;;  %v7362_v63 = vpop.f32.mrb[30].mxu0  ;;  %v777_v39 = vld [vmem:[%s10007_s24 + $0x12b8] sm:$0xff] }
 0x524   : > { %7934 = vst.msk [vmem:[%s10848_s5 + $0x2b8] sm:$0xff] %vm7846_vm2, %v7765_v46  ;;  %v6655_v19 = vadd.f32 %v10547_v21, %v5950_v6  ;;  %v5953_v16 = vadd.f32 %v5952_v15, %v5248_v13  ;;  %v5954_v41 = vpop.f32.mrb[71].mxu1  ;;  %v7364_v7 = vpop.f32.mrb[31].mxu0  ;;  %v5253_v21 = vadd.f32 %v11256_v38, %v10555_v42  ;;  %v8670_v46 = vcombine.low %v765_v58, %v769_v51 }
 0x525   : > { %v8675_v6 = vcombine.high %v771_v36, %v775_v2  ;;  %v8679_v35 = vcombine.high %v773_v26, %v777_v39  ;;  %v783_v41 = vld [vmem:[%s10007_s24 + $0x12e8] sm:$0xff]  ;;  %v781_v7 = vld [vmem:[%s10007_s24 + $0x12d8] sm:$0xff]  ;;  %v8678_v51 = vcombine.low %v773_v26, %v777_v39  ;;  %v11774_v26 = vld [vmem:[#allocation8_spill] sm:$0xff] }
 0x526   : > { %v7360_v28 = vadd.f32 %v7359_v40, %v6655_v19  ;;  %v6658_v43 = vadd.f32 %v10551_v33, %v5953_v16  ;;  %6164 = vmatmul.mubr.bf16.gmra.mrb[176].mxu1 %v8650_v29  ;;  %7574 = vmatmul.mubr.bf16.gmra.mrb[176].mxu0 %v8654_v4  ;;  %v11769_v16 = vld [vmem:[#allocation2_spill] sm:$0xff]  ;;  %v5280_v39 = vadd.f32 %v11256_v38, %v11774_v26 }
 0x527   : > { %6171 = vmatprep.mubr.bf16.mxu1 %v8659_v5  ;;  %8883 = vmatprep.mubr.msk.bf16.mxu0 %vm4601_vm1, %v8663_v62 }
 0x528   : > { %v7766_v10 = vmax.f32 %v7360_v28, 0.0  ;;  %v7363_v57 = vadd.f32 %v7362_v63, %v6658_v43  ;;  %v779_v63 = vld [vmem:[%s10007_s24 + $0x12c8] sm:$0xff]  ;;  %v785_v28 = vld [vmem:[%s10007_s24 + $0x12f8] sm:$0xff] }
 0x529   : > { %v5957_v11 = vpop.f32.mrb[72].mxu1  ;;  %v7367_v53 = vpop.f32.mrb[32].mxu0 }
 0x52a   : > { %7935 = vst.msk [vmem:[%s10848_s5 + $0x2c0] sm:$0xff] %vm7846_vm2, %v7766_v10  ;;  %v7767_v22 = vmax.f32 %v7363_v57, 0.0  ;;  %v5958_v33 = vadd.f32 %v5957_v11, %v5253_v21  ;;  %v5959_v50 = vpop.f32.mrb[73].mxu1  ;;  %v7369_v47 = vpop.f32.mrb[33].mxu0  ;;  %v11770_v21 = vld [vmem:[#allocation4_spill] sm:$0xff] }
 0x52b   : > { %v5960_v42 = vpop.f32.mrb[74].mxu1  ;;  %v7370_v0 = vpop.f32.mrb[34].mxu0  ;;  %v5272_v8 = vadd.f32 %v11256_v38, %v11770_v21  ;;  %v8687_v47 = vcombine.high %v781_v7, %v785_v28 }
 0x52c   : > { %7936 = vst.msk [vmem:[%s10848_s5 + $0x2c8] sm:$0xff] %vm7846_vm2, %v7767_v22  ;;  %v6663_v54 = vadd.f32 %v10559_v49, %v5958_v33  ;;  %v5961_v56 = vadd.f32 %v5960_v42, %v5256_v48  ;;  %v5962_v32 = vpop.f32.mrb[75].mxu1  ;;  %v7372_v37 = vpop.f32.mrb[35].mxu0  ;;  %v5261_v49 = vadd.f32 %v11256_v38, %v10567_v9  ;;  %v8683_v22 = vcombine.high %v779_v63, %v783_v41  ;;  %v11771_v33 = vld [vmem:[#allocation3_spill] sm:$0xff] }
 0x52d   : > { %v11773_v32 = vld [vmem:[#allocation6_spill] sm:$0xff]  ;;  %v787_v37 = vld [vmem:[%s10007_s24 + $0x1308] sm:$0xff] }
 0x52e   : > { %v7368_v55 = vadd.f32 %v7367_v53, %v6663_v54  ;;  %v6666_v24 = vadd.f32 %v10563_v61, %v5961_v56  ;;  %6172 = vmatmul.mubr.bf16.gmra.mrb[180].mxu1 %v8658_v14  ;;  %7582 = vmatmul.mubr.bf16.gmra.mrb[180].mxu0 %v8662_v20 }
 0x52f   : > { %6179 = vmatprep.mubr.bf16.mxu1 %v8667_v30  ;;  %8884 = vmatprep.mubr.msk.bf16.mxu0 %vm4601_vm1, %v8671_v52  ;;  %v11772_v30 = vld [vmem:[#allocation5_spill] sm:$0xff]  ;;  %v5277_v52 = vadd.f32 %v11256_v38, %v11773_v32  ;;  %v807_v32 = vld [vmem:[%s10007_s24 + $0x13a8] sm:$0xff] }
 0x530   : > { %v7768_v3 = vmax.f32 %v7368_v55, 0.0  ;;  %v7371_v34 = vadd.f32 %v7370_v0, %v6666_v24  ;;  %v791_v55 = vld [vmem:[%s10007_s24 + $0x1328] sm:$0xff] }
 0x531   : > { %v5965_v18 = vpop.f32.mrb[76].mxu1  ;;  %v7375_v60 = vpop.f32.mrb[36].mxu0 }
 0x532   : > { %7937 = vst.msk [vmem:[%s10848_s5 + $0x2d0] sm:$0xff] %vm7846_vm2, %v7768_v3  ;;  %v7769_v59 = vmax.f32 %v7371_v34, 0.0  ;;  %v5966_v61 = vadd.f32 %v5965_v18, %v5261_v49  ;;  %v5967_v23 = vpop.f32.mrb[77].mxu1  ;;  %v7377_v27 = vpop.f32.mrb[37].mxu0  ;;  %v789_v3 = vld [vmem:[%s10007_s24 + $0x1318] sm:$0xff] }
 0x533   : > { %v5968_v9 = vpop.f32.mrb[78].mxu1  ;;  %v7378_v13 = vpop.f32.mrb[38].mxu0  ;;  %v793_v34 = vld [vmem:[%s10007_s24 + $0x1338] sm:$0xff]  ;;  %v8686_v23 = vcombine.low %v781_v7, %v785_v28 }
 0x534   : > { %7938 = vst.msk [vmem:[%s10848_s5 + $0x2d8] sm:$0xff] %vm7846_vm2, %v7769_v59  ;;  %v6671_v40 = vadd.f32 %v10571_v12, %v5966_v61  ;;  %v5969_v44 = vadd.f32 %v5968_v9, %v5264_v45  ;;  %v5970_v29 = vpop.f32.mrb[79].mxu1  ;;  %v7380_v15 = vpop.f32.mrb[39].mxu0  ;;  %v5269_v12 = vadd.f32 %v11256_v38, %v11769_v16  ;;  %v8682_v59 = vcombine.low %v779_v63, %v783_v41  ;;  %v799_v16 = vld [vmem:[%s10007_s24 + $0x1368] sm:$0xff]  ;;  %v797_v63 = vld [vmem:[%s10007_s24 + $0x1358] sm:$0xff] }
 0x535   : > { %v8691_v45 = vcombine.high %v787_v37, %v791_v55  ;;  %v11776_v29 = vld [vmem:[#allocation9_spill] sm:$0xff] }
 0x536   : > { %v7376_v25 = vadd.f32 %v7375_v60, %v6671_v40  ;;  %v6674_v4 = vadd.f32 %v10575_v31, %v5969_v44  ;;  %6180 = vmatmul.mubr.bf16.gmra.mrb[184].mxu1 %v8666_v17  ;;  %7590 = vmatmul.mubr.bf16.gmra.mrb[184].mxu0 %v8670_v46  ;;  %v11775_v17 = vld [vmem:[#allocation7_spill] sm:$0xff]  ;;  %v8695_v40 = vcombine.high %v789_v3, %v793_v34  ;;  %v801_v41 = vld [vmem:[%s10007_s24 + $0x1378] sm:$0xff] }
 0x537   : > { %6187 = vmatprep.mubr.bf16.mxu1 %v8675_v6  ;;  %8885 = vmatprep.mubr.msk.bf16.mxu0 %vm4601_vm1, %v8679_v35 }
 0x538   : > { %v7770_v5 = vmax.f32 %v7376_v25, 0.0  ;;  %v7379_v19 = vadd.f32 %v7378_v13, %v6674_v4  ;;  %v11777_v4 = vld [vmem:[#allocation10_spill] sm:$0xff] }
 0x539   : > { %v5973_v62 = vpop.f32.mrb[80].mxu1  ;;  %v7383_v10 = vpop.f32.mrb[40].mxu0 }
 0x53a   : > { %7939 = vst.msk [vmem:[%s10848_s5 + $0x2e0] sm:$0xff] %vm7846_vm2, %v7770_v5  ;;  %v7771_v43 = vmax.f32 %v7379_v19, 0.0  ;;  %v5974_v31 = vadd.f32 %v5973_v62, %v5269_v12  ;;  %v5975_v57 = vpop.f32.mrb[81].mxu1  ;;  %v7385_v11 = vpop.f32.mrb[41].mxu0  ;;  %v5285_v5 = vadd.f32 %v11256_v38, %v11777_v4  ;;  %v795_v19 = vld [vmem:[%s10007_s24 + $0x1348] sm:$0xff] }
 0x53b   : > { %v5976_v58 = vpop.f32.mrb[82].mxu1  ;;  %v7386_v48 = vpop.f32.mrb[42].mxu0  ;;  %v8690_v57 = vcombine.low %v787_v37, %v791_v55  ;;  %v8699_v11 = vcombine.high %v795_v19, %v799_v16  ;;  %v805_v37 = vld [vmem:[%s10007_s24 + $0x1398] sm:$0xff]  ;;  %v815_v4 = vld [vmem:[%s10007_s24 + $0x13e8] sm:$0xff] }
 0x53c   : > { %7940 = vst.msk [vmem:[%s10848_s5 + $0x2e8] sm:$0xff] %vm7846_vm2, %v7771_v43  ;;  %v6679_v53 = vadd.f32 %v11771_v33, %v5974_v31  ;;  %v5977_v50 = vadd.f32 %v5976_v58, %v5272_v8  ;;  %v5978_v14 = vpop.f32.mrb[83].mxu1  ;;  %v7388_v42 = vpop.f32.mrb[43].mxu0  ;;  %v11778_v31 = vld [vmem:[#allocation12_spill] sm:$0xff]  ;;  %v11779_v58 = vld [vmem:[#allocation11_spill] sm:$0xff]  ;;  %v809_v55 = vld [vmem:[%s10007_s24 + $0x13b8] sm:$0xff] }
 0x53e   : > { %v7384_v20 = vadd.f32 %v7383_v10, %v6679_v53  ;;  %v6682_v54 = vadd.f32 %v11772_v30, %v5977_v50  ;;  %6188 = vmatmul.mubr.bf16.gmra.mrb[188].mxu1 %v8674_v1  ;;  %7598 = vmatmul.mubr.bf16.gmra.mrb[188].mxu0 %v8678_v51  ;;  %v5288_v10 = vadd.f32 %v11256_v38, %v11778_v31 }
 0x53f   : > { %6195 = vmatprep.mubr.bf16.mxu1 %v8683_v22  ;;  %8886 = vmatprep.mubr.msk.bf16.mxu0 %vm4601_vm1, %v8687_v47  ;;  %v8694_v1 = vcombine.low %v789_v3, %v793_v34  ;;  %v8703_v50 = vcombine.high %v797_v63, %v801_v41  ;;  %v11780_v47 = vld [vmem:[#allocation13_spill] sm:$0xff] }
 0x540   : > { %v7772_v56 = vmax.f32 %v7384_v20, 0.0  ;;  %v7387_v0 = vadd.f32 %v7386_v48, %v6682_v54  ;;  %v11781_v54 = vld [vmem:[#allocation14_spill] sm:$0xff] }
 0x541   : > { %v5981_v24 = vpop.f32.mrb[84].mxu1  ;;  %v7391_v2 = vpop.f32.mrb[44].mxu0 }
 0x542   : > { %7941 = vst.msk [vmem:[%s10848_s5 + $0x2f0] sm:$0xff] %vm7846_vm2, %v7772_v56  ;;  %v7773_v49 = vmax.f32 %v7387_v0, 0.0  ;;  %v5982_v36 = vadd.f32 %v5981_v24, %v5277_v52  ;;  %v5983_v18 = vpop.f32.mrb[85].mxu1  ;;  %v7393_v61 = vpop.f32.mrb[45].mxu0  ;;  %v5293_v56 = vadd.f32 %v11256_v38, %v11781_v54  ;;  %v803_v0 = vld [vmem:[%s10007_s24 + $0x1388] sm:$0xff] }
 0x543   : > { %v5984_v60 = vpop.f32.mrb[86].mxu1  ;;  %v7394_v46 = vpop.f32.mrb[46].mxu0  ;;  %v8698_v18 = vcombine.low %v795_v19, %v799_v16  ;;  %v8707_v61 = vcombine.high %v803_v0, %v807_v32  ;;  %v813_v19 = vld [vmem:[%s10007_s24 + $0x13d8] sm:$0xff]  ;;  %v823_v54 = vld [vmem:[%s10007_s24 + $0x1428] sm:$0xff] }
 0x544   : > { %7942 = vst.msk [vmem:[%s10848_s5 + $0x2f8] sm:$0xff] %vm7846_vm2, %v7773_v49  ;;  %v6687_v27 = vadd.f32 %v11775_v17, %v5982_v36  ;;  %v5985_v9 = vadd.f32 %v5984_v60, %v5280_v39  ;;  %v5986_v6 = vpop.f32.mrb[87].mxu1  ;;  %v7396_v44 = vpop.f32.mrb[47].mxu0  ;;  %v11782_v36 = vld [vmem:[#allocation16_spill] sm:$0xff]  ;;  %v11783_v60 = vld [vmem:[#allocation15_spill] sm:$0xff]  ;;  %v817_v16 = vld [vmem:[%s10007_s24 + $0x13f8] sm:$0xff] }
 0x546   : > { %v7392_v13 = vadd.f32 %v7391_v2, %v6687_v27  ;;  %v6690_v35 = vadd.f32 %v11776_v29, %v5985_v9  ;;  %6196 = vmatmul.mubr.bf16.gmra.mrb[192].mxu1 %v8682_v59  ;;  %7606 = vmatmul.mubr.bf16.gmra.mrb[192].mxu0 %v8686_v23  ;;  %v5296_v2 = vadd.f32 %v11256_v38, %v11782_v36 }
 0x547   : > { %6203 = vmatprep.mubr.bf16.mxu1 %v8691_v45  ;;  %8887 = vmatprep.mubr.msk.bf16.mxu0 %vm4601_vm1, %v8695_v40  ;;  %v8702_v59 = vcombine.low %v797_v63, %v801_v41  ;;  %v8711_v9 = vcombine.high %v805_v37, %v809_v55  ;;  %v11784_v40 = vld [vmem:[#allocation17_spill] sm:$0xff] }
 0x548   : > { %v7774_v15 = vmax.f32 %v7392_v13, 0.0  ;;  %v7395_v25 = vadd.f32 %v7394_v46, %v6690_v35  ;;  %v11785_v35 = vld [vmem:[#allocation18_spill] sm:$0xff] }
 0x549   : > { %v5989_v12 = vpop.f32.mrb[88].mxu1  ;;  %v7399_v28 = vpop.f32.mrb[48].mxu0 }
 0x54a   : > { %7943 = vst.msk [vmem:[%s10848_s5 + $0x300] sm:$0xff] %vm7846_vm2, %v7774_v15  ;;  %v7775_v62 = vmax.f32 %v7395_v25, 0.0  ;;  %v5990_v7 = vadd.f32 %v5989_v12, %v5285_v5  ;;  %v5991_v43 = vpop.f32.mrb[89].mxu1  ;;  %v7401_v21 = vpop.f32.mrb[49].mxu0  ;;  %v5301_v15 = vadd.f32 %v11256_v38, %v11785_v35  ;;  %v811_v25 = vld [vmem:[%s10007_s24 + $0x13c8] sm:$0xff] }
 0x54b   : > { %v5992_v8 = vpop.f32.mrb[90].mxu1  ;;  %v7402_v33 = vpop.f32.mrb[50].mxu0  ;;  %v8706_v43 = vcombine.low %v803_v0, %v807_v32  ;;  %v8715_v21 = vcombine.high %v811_v25, %v815_v4  ;;  %v821_v0 = vld [vmem:[%s10007_s24 + $0x1418] sm:$0xff]  ;;  %v831_v35 = vld [vmem:[%s10007_s24 + $0x1468] sm:$0xff] }
 0x54c   : > { %7944 = vst.msk [vmem:[%s10848_s5 + $0x308] sm:$0xff] %vm7846_vm2, %v7775_v62  ;;  %v6695_v51 = vadd.f32 %v11779_v58, %v5990_v7  ;;  %v5993_v22 = vadd.f32 %v5992_v8, %v5288_v10  ;;  %v5994_v53 = vpop.f32.mrb[91].mxu1  ;;  %v7404_v48 = vpop.f32.mrb[51].mxu0  ;;  %v11786_v7 = vld [vmem:[#allocation20_spill] sm:$0xff]  ;;  %v11787_v8 = vld [vmem:[#allocation19_spill] sm:$0xff]  ;;  %v825_v32 = vld [vmem:[%s10007_s24 + $0x1438] sm:$0xff] }
 0x54e   : > { %v7400_v14 = vadd.f32 %v7399_v28, %v6695_v51  ;;  %v6698_v42 = vadd.f32 %v11780_v47, %v5993_v22  ;;  %6204 = vmatmul.mubr.bf16.gmra.mrb[196].mxu1 %v8690_v57  ;;  %7614 = vmatmul.mubr.bf16.gmra.mrb[196].mxu0 %v8694_v1  ;;  %v5304_v28 = vadd.f32 %v11256_v38, %v11786_v7 }
 0x54f   : > { %6211 = vmatprep.mubr.bf16.mxu1 %v8699_v11  ;;  %8888 = vmatprep.mubr.msk.bf16.mxu0 %vm4601_vm1, %v8703_v50  ;;  %v8710_v57 = vcombine.low %v805_v37, %v809_v55  ;;  %v8719_v22 = vcombine.high %v813_v19, %v817_v16  ;;  %v11788_v50 = vld [vmem:[#allocation21_spill] sm:$0xff] }
 0x550   : > { %v7776_v20 = vmax.f32 %v7400_v14, 0.0  ;;  %v7403_v30 = vadd.f32 %v7402_v33, %v6698_v42  ;;  %v11789_v42 = vld [vmem:[#allocation22_spill] sm:$0xff] }
 0x551   : > { %v5997_v52 = vpop.f32.mrb[92].mxu1  ;;  %v7407_v34 = vpop.f32.mrb[52].mxu0 }
 0x552   : > { %7945 = vst.msk [vmem:[%s10848_s5 + $0x310] sm:$0xff] %vm7846_vm2, %v7776_v20  ;;  %v7777_v24 = vmax.f32 %v7403_v30, 0.0  ;;  %v5998_v3 = vadd.f32 %v5997_v52, %v5293_v56  ;;  %v5999_v49 = vpop.f32.mrb[93].mxu1  ;;  %v7409_v26 = vpop.f32.mrb[53].mxu0  ;;  %v5309_v20 = vadd.f32 %v11256_v38, %v11789_v42  ;;  %v819_v30 = vld [vmem:[%s10007_s24 + $0x1408] sm:$0xff] }
 0x553   : > { %v6000_v39 = vpop.f32.mrb[94].mxu1  ;;  %v7410_v17 = vpop.f32.mrb[54].mxu0  ;;  %v8714_v49 = vcombine.low %v811_v25, %v815_v4  ;;  %v8723_v26 = vcombine.high %v819_v30, %v823_v54  ;;  %v829_v25 = vld [vmem:[%s10007_s24 + $0x1458] sm:$0xff]  ;;  %v839_v42 = vld [vmem:[%s10007_s24 + $0x14a8] sm:$0xff] }
 0x554   : > { %7946 = vst.msk [vmem:[%s10848_s5 + $0x318] sm:$0xff] %vm7846_vm2, %v7777_v24  ;;  %v6703_v23 = vadd.f32 %v11783_v60, %v5998_v3  ;;  %v6001_v45 = vadd.f32 %v6000_v39, %v5296_v2  ;;  %v6002_v27 = vpop.f32.mrb[95].mxu1  ;;  %v7412_v46 = vpop.f32.mrb[55].mxu0  ;;  %v11790_v3 = vld [vmem:[#allocation24_spill] sm:$0xff]  ;;  %v11791_v39 = vld [vmem:[#allocation23_spill] sm:$0xff]  ;;  %v833_v4 = vld [vmem:[%s10007_s24 + $0x1478] sm:$0xff] }
 0x556   : > { %v7408_v6 = vadd.f32 %v7407_v34, %v6703_v23  ;;  %v6706_v44 = vadd.f32 %v11784_v40, %v6001_v45  ;;  %6212 = vmatmul.mubr.bf16.gmra.mrb[200].mxu1 %v8698_v18  ;;  %7622 = vmatmul.mubr.bf16.gmra.mrb[200].mxu0 %v8702_v59  ;;  %v5312_v34 = vadd.f32 %v11256_v38, %v11790_v3 }
 0x557   : > { %6219 = vmatprep.mubr.bf16.mxu1 %v8707_v61  ;;  %8889 = vmatprep.mubr.msk.bf16.mxu0 %vm4601_vm1, %v8711_v9  ;;  %v8718_v18 = vcombine.low %v813_v19, %v817_v16  ;;  %v8727_v45 = vcombine.high %v821_v0, %v825_v32  ;;  %v11792_v9 = vld [vmem:[#allocation25_spill] sm:$0xff] }
 0x558   : > { %v7778_v13 = vmax.f32 %v7408_v6, 0.0  ;;  %v7411_v29 = vadd.f32 %v7410_v17, %v6706_v44  ;;  %v11793_v44 = vld [vmem:[#allocation26_spill] sm:$0xff] }
 0x559   : > { %v6005_v5 = vpop.f32.mrb[96].mxu1  ;;  %v7415_v41 = vpop.f32.mrb[56].mxu0 }
 0x55a   : > { %7947 = vst.msk [vmem:[%s10848_s5 + $0x320] sm:$0xff] %vm7846_vm2, %v7778_v13  ;;  %v7779_v12 = vmax.f32 %v7411_v29, 0.0  ;;  %v6006_v63 = vadd.f32 %v6005_v5, %v5301_v15  ;;  %v6007_v62 = vpop.f32.mrb[97].mxu1  ;;  %v7417_v31 = vpop.f32.mrb[57].mxu0  ;;  %v5317_v13 = vadd.f32 %v11256_v38, %v11793_v44  ;;  %v827_v29 = vld [vmem:[%s10007_s24 + $0x1448] sm:$0xff]  ;;  %v11794_v38 = vld [vmem:[#allocation28_spill] sm:$0xff] }
 0x55b   : > { %v6008_v10 = vpop.f32.mrb[98].mxu1  ;;  %v7418_v58 = vpop.f32.mrb[58].mxu0  ;;  %v8722_v62 = vcombine.low %v819_v30, %v823_v54  ;;  %v8731_v31 = vcombine.high %v827_v29, %v831_v35  ;;  %v837_v30 = vld [vmem:[%s10007_s24 + $0x1498] sm:$0xff]  ;;  %v847_v44 = vld [vmem:[%s10007_s24 + $0x14e8] sm:$0xff] }
 0x55c   : > { %7948 = vst.msk [vmem:[%s10848_s5 + $0x328] sm:$0xff] %vm7846_vm2, %v7779_v12  ;;  %v6711_v1 = vadd.f32 %v11787_v8, %v6006_v63  ;;  %v6009_v11 = vadd.f32 %v6008_v10, %v5304_v28  ;;  %v6010_v51 = vpop.f32.mrb[99].mxu1  ;;  %v7420_v33 = vpop.f32.mrb[59].mxu0  ;;  %v11508_v63 = vld [vmem:[%s11727_s2] ss:$0 sm:$0xff]  ;;  %v11795_v10 = vld [vmem:[#allocation27_spill] sm:$0xff] }
 0x55d   : > { %v841_v54 = vld [vmem:[%s10007_s24 + $0x14b8] sm:$0xff] }
 0x55e   : > { %v7416_v53 = vadd.f32 %v7415_v41, %v6711_v1  ;;  %v6714_v48 = vadd.f32 %v11788_v50, %v6009_v11  ;;  %6220 = vmatmul.mubr.bf16.gmra.mrb[204].mxu1 %v8706_v43  ;;  %7630 = vmatmul.mubr.bf16.gmra.mrb[204].mxu0 %v8710_v57  ;;  %v5320_v41 = vadd.f32 %v11508_v63, %v11794_v38 }
 0x55f   : > { %6227 = vmatprep.mubr.bf16.mxu1 %v8715_v21  ;;  %8890 = vmatprep.mubr.msk.bf16.mxu0 %vm4601_vm1, %v8719_v22  ;;  %v8726_v43 = vcombine.low %v821_v0, %v825_v32  ;;  %v8735_v11 = vcombine.high %v829_v25, %v833_v4  ;;  %v11796_v22 = vld [vmem:[#allocation29_spill] sm:$0xff] }
 0x560   : > { %v7780_v14 = vmax.f32 %v7416_v53, 0.0  ;;  %v7419_v47 = vadd.f32 %v7418_v58, %v6714_v48  ;;  %v11797_v48 = vld [vmem:[#allocation30_spill] sm:$0xff] }
 0x561   : > { %v6013_v56 = vpop.f32.mrb[100].mxu1  ;;  %v7423_v55 = vpop.f32.mrb[60].mxu0 }
 0x562   : > { %7949 = vst.msk [vmem:[%s10848_s5 + $0x330] sm:$0xff] %vm7846_vm2, %v7780_v14  ;;  %v7781_v52 = vmax.f32 %v7419_v47, 0.0  ;;  %v6014_v37 = vadd.f32 %v6013_v56, %v5309_v20  ;;  %v6015_v24 = vpop.f32.mrb[101].mxu1  ;;  %v7425_v36 = vpop.f32.mrb[61].mxu0  ;;  %v5325_v14 = vadd.f32 %v11508_v63, %v11797_v48  ;;  %v835_v47 = vld [vmem:[%s10007_s24 + $0x1488] sm:$0xff] }
 0x563   : > { %v6016_v2 = vpop.f32.mrb[102].mxu1  ;;  %v7426_v60 = vpop.f32.mrb[62].mxu0  ;;  %v8730_v24 = vcombine.low %v827_v29, %v831_v35  ;;  %v8739_v36 = vcombine.high %v835_v47, %v839_v42  ;;  %v845_v29 = vld [vmem:[%s10007_s24 + $0x14d8] sm:$0xff] }
 0x564   : > { %7950 = vst.msk [vmem:[%s10848_s5 + $0x338] sm:$0xff] %vm7846_vm2, %v7781_v52  ;;  %v6719_v59 = vadd.f32 %v11791_v39, %v6014_v37  ;;  %v6017_v61 = vadd.f32 %v6016_v2, %v5312_v34  ;;  %v6018_v23 = vpop.f32.mrb[103].mxu1  ;;  %v7428_v17 = vpop.f32.mrb[63].mxu0  ;;  %v11798_v37 = vld [vmem:[#allocation32_spill] sm:$0xff]  ;;  %v11799_v2 = vld [vmem:[#allocation31_spill] sm:$0xff]  ;;  %v849_v35 = vld [vmem:[%s10007_s24 + $0x14f8] sm:$0xff] }
 0x566   : > { %v7424_v27 = vadd.f32 %v7423_v55, %v6719_v59  ;;  %v6722_v46 = vadd.f32 %v11792_v9, %v6017_v61  ;;  %6228 = vmatmul.mubr.bf16.gmra.mrb[208].mxu1 %v8714_v49  ;;  %7638 = vmatmul.mubr.bf16.gmra.mrb[208].mxu0 %v8718_v18  ;;  %v5328_v55 = vadd.f32 %v11508_v63, %v11798_v37 }
 0x567   : > { %6235 = vmatprep.mubr.bf16.mxu1 %v8723_v26  ;;  %8891 = vmatprep.mubr.msk.bf16.mxu0 %vm4601_vm1, %v8727_v45  ;;  %v8734_v49 = vcombine.low %v829_v25, %v833_v4  ;;  %v8743_v61 = vcombine.high %v837_v30, %v841_v54  ;;  %v11800_v45 = vld [vmem:[#allocation33_spill] sm:$0xff] }
 0x568   : > { %v7782_v6 = vmax.f32 %v7424_v27, 0.0  ;;  %v7427_v40 = vadd.f32 %v7426_v60, %v6722_v46  ;;  %v11801_v46 = vld [vmem:[#allocation34_spill] sm:$0xff] }
 0x569   : > { %v6021_v15 = vpop.f32.mrb[104].mxu1  ;;  %v7431_v16 = vpop.f32.mrb[64].mxu0 }
 0x56a   : > { %7951 = vst.msk [vmem:[%s10848_s5 + $0x340] sm:$0xff] %vm7846_vm2, %v7782_v6  ;;  %v7783_v5 = vmax.f32 %v7427_v40, 0.0  ;;  %v6022_v19 = vadd.f32 %v6021_v15, %v5317_v13  ;;  %v6023_v12 = vpop.f32.mrb[105].mxu1  ;;  %v7433_v7 = vpop.f32.mrb[65].mxu0  ;;  %v5333_v6 = vadd.f32 %v11508_v63, %v11801_v46  ;;  %v843_v40 = vld [vmem:[%s10007_s24 + $0x14c8] sm:$0xff] }
 0x56b   : > { %v6024_v28 = vpop.f32.mrb[106].mxu1  ;;  %v7434_v8 = vpop.f32.mrb[66].mxu0  ;;  %v8738_v12 = vcombine.low %v835_v47, %v839_v42  ;;  %v8747_v7 = vcombine.high %v843_v40, %v847_v44 }
 0x56c   : > { %7952 = vst.msk [vmem:[%s10848_s5 + $0x348] sm:$0xff] %vm7846_vm2, %v7783_v5  ;;  %v6727_v57 = vadd.f32 %v11795_v10, %v6022_v19  ;;  %v6025_v21 = vadd.f32 %v6024_v28, %v5320_v41  ;;  %v6026_v1 = vpop.f32.mrb[107].mxu1  ;;  %v7436_v58 = vpop.f32.mrb[67].mxu0  ;;  %v11802_v19 = vld [vmem:[#allocation36_spill] sm:$0xff]  ;;  %v11803_v28 = vld [vmem:[#allocation35_spill] sm:$0xff] }
 0x56e   : > { %v7432_v51 = vadd.f32 %v7431_v16, %v6727_v57  ;;  %v6730_v33 = vadd.f32 %v11796_v22, %v6025_v21  ;;  %6236 = vmatmul.mubr.bf16.gmra.mrb[212].mxu1 %v8722_v62  ;;  %7646 = vmatmul.mubr.bf16.gmra.mrb[212].mxu0 %v8726_v43  ;;  %v5336_v16 = vadd.f32 %v11508_v63, %v11802_v19 }
 0x56f   : > { %6243 = vmatprep.mubr.bf16.mxu1 %v8731_v31  ;;  %8892 = vmatprep.mubr.msk.bf16.mxu0 %vm4601_vm1, %v8735_v11  ;;  %v8742_v62 = vcombine.low %v837_v30, %v841_v54  ;;  %v8751_v21 = vcombine.high %v845_v29, %v849_v35  ;;  %v11804_v11 = vld [vmem:[#allocation37_spill] sm:$0xff]  ;;  %v8746_v54 = vcombine.low %v843_v40, %v847_v44 }
 0x570   : > { %v7784_v53 = vmax.f32 %v7432_v51, 0.0  ;;  %v7435_v50 = vadd.f32 %v7434_v8, %v6730_v33  ;;  %v11805_v33 = vld [vmem:[#allocation38_spill] sm:$0xff] }
 0x571   : > { %v6029_v20 = vpop.f32.mrb[108].mxu1  ;;  %v7439_v32 = vpop.f32.mrb[68].mxu0 }
 0x572   : > { %7953 = vst.msk [vmem:[%s10848_s5 + $0x350] sm:$0xff] %vm7846_vm2, %v7784_v53  ;;  %v7785_v56 = vmax.f32 %v7435_v50, 0.0  ;;  %v6030_v0 = vadd.f32 %v6029_v20, %v5325_v14  ;;  %v6031_v52 = vpop.f32.mrb[109].mxu1  ;;  %v7441_v3 = vpop.f32.mrb[69].mxu0  ;;  %v5341_v53 = vadd.f32 %v11508_v63, %v11805_v33  ;;  %v11806_v20 = vld [vmem:[#allocation40_spill] sm:$0xff] }
 0x573   : > { %v6032_v34 = vpop.f32.mrb[110].mxu1  ;;  %v7442_v39 = vpop.f32.mrb[70].mxu0  ;;  %v5344_v30 = vadd.f32 %v11508_v63, %v11806_v20  ;;  %v11807_v52 = vld [vmem:[#allocation39_spill] sm:$0xff] }
 0x574   : > { %7954 = vst.msk [vmem:[%s10848_s5 + $0x358] sm:$0xff] %vm7846_vm2, %v7785_v56  ;;  %v6735_v18 = vadd.f32 %v11799_v2, %v6030_v0  ;;  %v6033_v26 = vadd.f32 %v6032_v34, %v5328_v55  ;;  %v6034_v59 = vpop.f32.mrb[111].mxu1  ;;  %v7444_v60 = vpop.f32.mrb[71].mxu0 }
 0x576   : > { %v7440_v23 = vadd.f32 %v7439_v32, %v6735_v18  ;;  %v6738_v17 = vadd.f32 %v11800_v45, %v6033_v26  ;;  %6244 = vmatmul.mubr.bf16.gmra.mrb[216].mxu1 %v8730_v24  ;;  %7654 = vmatmul.mubr.bf16.gmra.mrb[216].mxu0 %v8734_v49  ;;  %v8750_v32 = vcombine.low %v845_v29, %v849_v35 }
 0x577   : > { %6251 = vmatprep.mubr.bf16.mxu1 %v8739_v36  ;;  %8893 = vmatprep.mubr.msk.bf16.mxu0 %vm4601_vm1, %v8743_v61  ;;  %v11808_v36 = vld [vmem:[#allocation41_spill] sm:$0xff] }
 0x578   : > { %v7786_v27 = vmax.f32 %v7440_v23, 0.0  ;;  %v7443_v9 = vadd.f32 %v7442_v39, %v6738_v17 }
 0x579   : > { %v6037_v13 = vpop.f32.mrb[112].mxu1  ;;  %v7447_v4 = vpop.f32.mrb[72].mxu0 }
 0x57a   : > { %7955 = vst.msk [vmem:[%s10848_s5 + $0x360] sm:$0xff] %vm7846_vm2, %v7786_v27  ;;  %v7787_v15 = vmax.f32 %v7443_v9, 0.0  ;;  %v6038_v25 = vadd.f32 %v6037_v13, %v5333_v6  ;;  %v6039_v5 = vpop.f32.mrb[113].mxu1  ;;  %v7449_v38 = vpop.f32.mrb[73].mxu0 }
 0x57b   : > { %v6040_v41 = vpop.f32.mrb[114].mxu1  ;;  %v7450_v10 = vpop.f32.mrb[74].mxu0 }
 0x57c   : > { %7956 = vst.msk [vmem:[%s10848_s5 + $0x368] sm:$0xff] %vm7846_vm2, %v7787_v15  ;;  %v6743_v43 = vadd.f32 %v11803_v28, %v6038_v25  ;;  %v6041_v31 = vadd.f32 %v6040_v41, %v5336_v16  ;;  %v6042_v57 = vpop.f32.mrb[115].mxu1  ;;  %v7452_v8 = vpop.f32.mrb[75].mxu0 }
 0x57e   : > { %v7448_v1 = vadd.f32 %v7447_v4, %v6743_v43  ;;  %v6746_v58 = vadd.f32 %v11804_v11, %v6041_v31  ;;  %6252 = vmatmul.mubr.bf16.gmra.mrb[220].mxu1 %v8738_v12  ;;  %7662 = vmatmul.mubr.bf16.gmra.mrb[220].mxu0 %v8742_v62 }
 0x57f   : > { %6259 = vmatprep.mubr.bf16.mxu1 %v8747_v7  ;;  %8894 = vmatprep.mubr.msk.bf16.mxu0 %vm4601_vm1, %v8751_v21 }
 0x580   : > { %v7788_v51 = vmax.f32 %v7448_v1, 0.0  ;;  %v7451_v22 = vadd.f32 %v7450_v10, %v6746_v58 }
 0x581   : > { %v6045_v50 = vpop.f32.mrb[116].mxu1  ;;  %v7455_v47 = vpop.f32.mrb[76].mxu0 }
 0x582   : > { %7957 = vst.msk [vmem:[%s10848_s5 + $0x370] sm:$0xff] %vm7846_vm2, %v7788_v51  ;;  %v7789_v48 = vmax.f32 %v7451_v22, 0.0  ;;  %v6046_v14 = vadd.f32 %v6045_v50, %v5341_v53  ;;  %v6047_v42 = vpop.f32.mrb[117].mxu1  ;;  %v7457_v56 = vpop.f32.mrb[77].mxu0 }
 0x583   : > { %v6048_v0 = vpop.f32.mrb[118].mxu1  ;;  %v7458_v24 = vpop.f32.mrb[78].mxu0 }
 0x584   : > { %7958 = vst.msk [vmem:[%s10848_s5 + $0x378] sm:$0xff] %vm7846_vm2, %v7789_v48  ;;  %v6751_v37 = vadd.f32 %v11807_v52, %v6046_v14  ;;  %v6049_v55 = vadd.f32 %v6048_v0, %v5344_v30  ;;  %v6050_v3 = vpop.f32.mrb[119].mxu1  ;;  %v7460_v34 = vpop.f32.mrb[79].mxu0 }
 0x586   : > { %v7456_v49 = vadd.f32 %v7455_v47, %v6751_v37  ;;  %v6754_v2 = vadd.f32 %v11808_v36, %v6049_v55  ;;  %6260 = vmatmul.mubr.bf16.gmra.mrb[224].mxu1 %v8746_v54  ;;  %7670 = vmatmul.mubr.bf16.gmra.mrb[224].mxu0 %v8750_v32 }
 0x588   : > { %v7790_v18 = vmax.f32 %v7456_v49, 0.0  ;;  %v7459_v26 = vadd.f32 %v7458_v24, %v6754_v2 }
 0x589   : > { %v6053_v39 = vpop.f32.mrb[228].mxu1  ;;  %v7463_v60 = vpop.f32.mrb[228].mxu0 }
 0x58a   : > { %7959 = vst.msk [vmem:[%s10848_s5 + $0x380] sm:$0xff] %vm7846_vm2, %v7790_v18  ;;  %v7791_v59 = vmax.f32 %v7459_v26, 0.0  ;;  %v9206_v61 = vadd.f32 %v11508_v63, %v6053_v39  ;;  %v6055_v23 = vpop.f32.mrb[229].mxu1  ;;  %v7465_v45 = vpop.f32.mrb[229].mxu0 }
 0x58b   : > { %v6056_v17 = vpop.f32.mrb[230].mxu1  ;;  %v7466_v46 = vpop.f32.mrb[230].mxu0 }
 0x58c   : > { %7960 = vst.msk [vmem:[%s10848_s5 + $0x388] sm:$0xff] %vm7846_vm2, %v7791_v59  ;;  %v9207_v27 = vadd.f32 %v9206_v61, %v7463_v60  ;;  %v9208_v9 = vadd.f32 %v11508_v63, %v6056_v17  ;;  %v6058_v6 = vpop.f32.mrb[231].mxu1  ;;  %v7468_v40 = vpop.f32.mrb[231].mxu0 }
 0x58e   : > { %v7792_v44 = vmax.f32 %v9207_v27, 0.0  ;;  %v9209_v13 = vadd.f32 %v9208_v9, %v7466_v46 }
 0x590   : > { %7961 = vst.msk [vmem:[%s10848_s5 + $0x390] sm:$0xff] %vm7846_vm2, %v7792_v44  ;;  %v7793_v29 = vmax.f32 %v9209_v13, 0.0 }
 0x591   : > { %v6061_v35 = vpop.f32.mrb[232].mxu1  ;;  %v7471_v25 = vpop.f32.mrb[232].mxu0 }
 0x592   : > { %7962 = vst.msk [vmem:[%s10848_s5 + $0x398] sm:$0xff] %vm7846_vm2, %v7793_v29  ;;  %v9210_v15 = vadd.f32 %v11508_v63, %v6061_v35  ;;  %v6063_v4 = vpop.f32.mrb[233].mxu1  ;;  %v7473_v5 = vpop.f32.mrb[233].mxu0 }
 0x593   : > { %v6064_v19 = vpop.f32.mrb[234].mxu1  ;;  %v7474_v38 = vpop.f32.mrb[234].mxu0 }
 0x594   : > { %v9211_v16 = vadd.f32 %v9210_v15, %v7471_v25  ;;  %v9212_v12 = vadd.f32 %v11508_v63, %v6064_v19  ;;  %v6066_v41 = vpop.f32.mrb[235].mxu1  ;;  %v7476_v62 = vpop.f32.mrb[235].mxu0 }
 0x596   : > { %v7794_v7 = vmax.f32 %v9211_v16, 0.0  ;;  %v9213_v28 = vadd.f32 %v9212_v12, %v7474_v38 }
 0x598   : > { %7963 = vst.msk [vmem:[%s10848_s5 + $0x3a0] sm:$0xff] %vm7846_vm2, %v7794_v7  ;;  %v7795_v43 = vmax.f32 %v9213_v28, 0.0 }
 0x599   : > { %v6069_v31 = vpop.f32.mrb[236].mxu1  ;;  %v7479_v57 = vpop.f32.mrb[236].mxu0 }
 0x59a   : > { %7964 = vst.msk [vmem:[%s10848_s5 + $0x3a8] sm:$0xff] %vm7846_vm2, %v7795_v43  ;;  %v9214_v10 = vadd.f32 %v11508_v63, %v6069_v31  ;;  %v6071_v21 = vpop.f32.mrb[237].mxu1  ;;  %v7481_v8 = vpop.f32.mrb[237].mxu0 }
 0x59b   : > { %v6072_v1 = vpop.f32.mrb[238].mxu1  ;;  %v7482_v51 = vpop.f32.mrb[238].mxu0 }
 0x59c   : > { %v9215_v11 = vadd.f32 %v9214_v10, %v7479_v57  ;;  %v9216_v58 = vadd.f32 %v11508_v63, %v6072_v1  ;;  %v6074_v22 = vpop.f32.mrb[239].mxu1  ;;  %v7484_v33 = vpop.f32.mrb[239].mxu0 }
 0x59e   : > { %v7796_v53 = vmax.f32 %v9215_v11, 0.0  ;;  %v9217_v50 = vadd.f32 %v9216_v58, %v7482_v51 }
 0x5a0   : > { %7965 = vst.msk [vmem:[%s10848_s5 + $0x3b0] sm:$0xff] %vm7846_vm2, %v7796_v53  ;;  %v7797_v48 = vmax.f32 %v9217_v50, 0.0 }
 0x5a1   : > { %v6077_v14 = vpop.f32.mrb[240].mxu1  ;;  %v7487_v42 = vpop.f32.mrb[240].mxu0 }
 0x5a2   : > { %7966 = vst.msk [vmem:[%s10848_s5 + $0x3b8] sm:$0xff] %vm7846_vm2, %v7797_v48  ;;  %v9218_v47 = vadd.f32 %v11508_v63, %v6077_v14  ;;  %v6079_v20 = vpop.f32.mrb[241].mxu1  ;;  %v7489_v30 = vpop.f32.mrb[241].mxu0 }
 0x5a3   : > { %v6080_v54 = vpop.f32.mrb[242].mxu1  ;;  %v7490_v32 = vpop.f32.mrb[242].mxu0 }
 0x5a4   : > { %v9219_v56 = vadd.f32 %v9218_v47, %v7487_v42  ;;  %v9220_v0 = vadd.f32 %v11508_v63, %v6080_v54  ;;  %v6082_v52 = vpop.f32.mrb[243].mxu1  ;;  %v7492_v37 = vpop.f32.mrb[243].mxu0 }
 0x5a6   : > { %v7798_v55 = vmax.f32 %v9219_v56, 0.0  ;;  %v9221_v24 = vadd.f32 %v9220_v0, %v7490_v32 }
 0x5a8   : > { %7967 = vst.msk [vmem:[%s10848_s5 + $0x3c0] sm:$0xff] %vm7846_vm2, %v7798_v55  ;;  %v7799_v3 = vmax.f32 %v9221_v24, 0.0 }
 0x5a9   : > { %v6085_v34 = vpop.f32.mrb[244].mxu1  ;;  %v7495_v36 = vpop.f32.mrb[244].mxu0 }
 0x5aa   : > { %7968 = vst.msk [vmem:[%s10848_s5 + $0x3c8] sm:$0xff] %vm7846_vm2, %v7799_v3  ;;  %v9222_v49 = vadd.f32 %v11508_v63, %v6085_v34  ;;  %v6087_v2 = vpop.f32.mrb[245].mxu1  ;;  %v7497_v18 = vpop.f32.mrb[245].mxu0 }
 0x5ab   : > { %v6088_v26 = vpop.f32.mrb[246].mxu1  ;;  %v7498_v61 = vpop.f32.mrb[246].mxu0 }
 0x5ac   : > { %v9223_v39 = vadd.f32 %v9222_v49, %v7495_v36  ;;  %v9224_v59 = vadd.f32 %v11508_v63, %v6088_v26  ;;  %v6090_v60 = vpop.f32.mrb[247].mxu1  ;;  %v7500_v23 = vpop.f32.mrb[247].mxu0 }
 0x5ae   : > { %v7800_v45 = vmax.f32 %v9223_v39, 0.0  ;;  %v9225_v17 = vadd.f32 %v9224_v59, %v7498_v61 }
 0x5b0   : > { %7969 = vst.msk [vmem:[%s10848_s5 + $0x3d0] sm:$0xff] %vm7846_vm2, %v7800_v45  ;;  %v7801_v27 = vmax.f32 %v9225_v17, 0.0 }
 0x5b1   : > { %v6093_v9 = vpop.f32.mrb[248].mxu1  ;;  %v7503_v6 = vpop.f32.mrb[248].mxu0 }
 0x5b2   : > { %7970 = vst.msk [vmem:[%s10848_s5 + $0x3d8] sm:$0xff] %vm7846_vm2, %v7801_v27  ;;  %v9226_v46 = vadd.f32 %v11508_v63, %v6093_v9  ;;  %v6095_v40 = vpop.f32.mrb[249].mxu1  ;;  %v7505_v44 = vpop.f32.mrb[249].mxu0 }
 0x5b3   : > { %v6096_v13 = vpop.f32.mrb[250].mxu1  ;;  %v7506_v15 = vpop.f32.mrb[250].mxu0 }
 0x5b4   : > { %v9227_v29 = vadd.f32 %v9226_v46, %v7503_v6  ;;  %v9228_v35 = vadd.f32 %v11508_v63, %v6096_v13  ;;  %v6098_v25 = vpop.f32.mrb[251].mxu1  ;;  %v7508_v4 = vpop.f32.mrb[251].mxu0 }
 0x5b6   : > { %v7802_v5 = vmax.f32 %v9227_v29, 0.0  ;;  %v9229_v19 = vadd.f32 %v9228_v35, %v7506_v15 }
 0x5b8   : > { %7971 = vst.msk [vmem:[%s10848_s5 + $0x3e0] sm:$0xff] %vm7846_vm2, %v7802_v5  ;;  %v7803_v16 = vmax.f32 %v9229_v19, 0.0 }
 0x5b9   : > { %v6101_v12 = vpop.f32.mrb[252].mxu1  ;;  %v7511_v41 = vpop.f32.mrb[252].mxu0 }
 0x5ba   : > { %7972 = vst.msk [vmem:[%s10848_s5 + $0x3e8] sm:$0xff] %vm7846_vm2, %v7803_v16  ;;  %v9230_v38 = vadd.f32 %v11508_v63, %v6101_v12  ;;  %v6103_v62 = vpop.f32.mrb[253].mxu1  ;;  %v7513_v7 = vpop.f32.mrb[253].mxu0 }
 0x5bb   : > { %v6104_v28 = vpop.f32.mrb[254].mxu1  ;;  %v7514_v10 = vpop.f32.mrb[254].mxu0 }
 0x5bc   : > { %v9231_v43 = vadd.f32 %v9230_v38, %v7511_v41  ;;  %v9232_v31 = vadd.f32 %v11508_v63, %v6104_v28  ;;  %v6106_v57 = vpop.f32.mrb[255].mxu1  ;;  %v7516_v21 = vpop.f32.mrb[255].mxu0 }
 0x5be   : > { %v7804_v8 = vmax.f32 %v9231_v43, 0.0  ;;  %v9233_v1 = vadd.f32 %v9232_v31, %v7514_v10 }
 0x5c0   : > { %7973 = vst.msk [vmem:[%s10848_s5 + $0x3f0] sm:$0xff] %vm7846_vm2, %v7804_v8  ;;  %v7805_v11 = vmax.f32 %v9233_v1, 0.0 }
 0x5c1   : > { %v6109_v58 = vpop.f32.mrb[148].mxu1  ;;  %v7519_v22 = vpop.f32.mrb[148].mxu0 }
 0x5c2   : > { %7974 = vst.msk [vmem:[%s10848_s5 + $0x3f8] sm:$0xff] %vm7846_vm2, %v7805_v11  ;;  %v9234_v51 = vadd.f32 %v11508_v63, %v6109_v58  ;;  %v6111_v33 = vpop.f32.mrb[149].mxu1  ;;  %v7521_v53 = vpop.f32.mrb[149].mxu0 }
 0x5c3   : > { %v6112_v50 = vpop.f32.mrb[150].mxu1  ;;  %v7522_v47 = vpop.f32.mrb[150].mxu0 }
 0x5c4   : > { %v9235_v48 = vadd.f32 %v9234_v51, %v7519_v22  ;;  %v9236_v14 = vadd.f32 %v11508_v63, %v6112_v50  ;;  %v6114_v42 = vpop.f32.mrb[151].mxu1  ;;  %v7524_v20 = vpop.f32.mrb[151].mxu0 }
 0x5c6   : > { %v7806_v30 = vmax.f32 %v9235_v48, 0.0  ;;  %v9237_v54 = vadd.f32 %v9236_v14, %v7522_v47 }
 0x5c8   : > { %7975 = vst.msk [vmem:[%s10848_s5 + $0x400] sm:$0xff] %vm7846_vm2, %v7806_v30  ;;  %v7807_v56 = vmax.f32 %v9237_v54, 0.0 }
 0x5c9   : > { %v6117_v0 = vpop.f32.mrb[152].mxu1  ;;  %v7527_v52 = vpop.f32.mrb[152].mxu0 }
 0x5ca   : > { %7976 = vst.msk [vmem:[%s10848_s5 + $0x408] sm:$0xff] %vm7846_vm2, %v7807_v56  ;;  %v9238_v32 = vadd.f32 %v11508_v63, %v6117_v0  ;;  %v6119_v37 = vpop.f32.mrb[153].mxu1  ;;  %v7529_v55 = vpop.f32.mrb[153].mxu0 }
 0x5cb   : > { %v6120_v24 = vpop.f32.mrb[154].mxu1  ;;  %v7530_v49 = vpop.f32.mrb[154].mxu0 }
 0x5cc   : > { %v9239_v3 = vadd.f32 %v9238_v32, %v7527_v52  ;;  %v9240_v34 = vadd.f32 %v11508_v63, %v6120_v24  ;;  %v6122_v36 = vpop.f32.mrb[155].mxu1  ;;  %v7532_v2 = vpop.f32.mrb[155].mxu0 }
 0x5ce   : > { %v7808_v18 = vmax.f32 %v9239_v3, 0.0  ;;  %v9241_v26 = vadd.f32 %v9240_v34, %v7530_v49 }
 0x5d0   : > { %7977 = vst.msk [vmem:[%s10848_s5 + $0x410] sm:$0xff] %vm7846_vm2, %v7808_v18  ;;  %v7809_v39 = vmax.f32 %v9241_v26, 0.0 }
 0x5d1   : > { %v6125_v59 = vpop.f32.mrb[156].mxu1  ;;  %v7535_v60 = vpop.f32.mrb[156].mxu0 }
 0x5d2   : > { %7978 = vst.msk [vmem:[%s10848_s5 + $0x418] sm:$0xff] %vm7846_vm2, %v7809_v39  ;;  %v9242_v61 = vadd.f32 %v11508_v63, %v6125_v59  ;;  %v6127_v23 = vpop.f32.mrb[157].mxu1  ;;  %v7537_v45 = vpop.f32.mrb[157].mxu0 }
 0x5d3   : > { %v6128_v17 = vpop.f32.mrb[158].mxu1  ;;  %v7538_v46 = vpop.f32.mrb[158].mxu0 }
 0x5d4   : > { %v9243_v27 = vadd.f32 %v9242_v61, %v7535_v60  ;;  %v9244_v9 = vadd.f32 %v11508_v63, %v6128_v17  ;;  %v6130_v6 = vpop.f32.mrb[159].mxu1  ;;  %v7540_v40 = vpop.f32.mrb[159].mxu0 }
 0x5d6   : > { %v7810_v44 = vmax.f32 %v9243_v27, 0.0  ;;  %v9245_v13 = vadd.f32 %v9244_v9, %v7538_v46 }
 0x5d8   : > { %7979 = vst.msk [vmem:[%s10848_s5 + $0x420] sm:$0xff] %vm7846_vm2, %v7810_v44  ;;  %v7811_v29 = vmax.f32 %v9245_v13, 0.0 }
 0x5d9   : > { %v6133_v35 = vpop.f32.mrb[160].mxu1  ;;  %v7543_v25 = vpop.f32.mrb[160].mxu0 }
 0x5da   : > { %7980 = vst.msk [vmem:[%s10848_s5 + $0x428] sm:$0xff] %vm7846_vm2, %v7811_v29  ;;  %v9246_v15 = vadd.f32 %v11508_v63, %v6133_v35  ;;  %v6135_v4 = vpop.f32.mrb[161].mxu1  ;;  %v7545_v5 = vpop.f32.mrb[161].mxu0 }
 0x5db   : > { %v6136_v19 = vpop.f32.mrb[162].mxu1  ;;  %v7546_v38 = vpop.f32.mrb[162].mxu0 }
 0x5dc   : > { %v9247_v16 = vadd.f32 %v9246_v15, %v7543_v25  ;;  %v9248_v12 = vadd.f32 %v11508_v63, %v6136_v19  ;;  %v6138_v41 = vpop.f32.mrb[163].mxu1  ;;  %v7548_v62 = vpop.f32.mrb[163].mxu0 }
 0x5de   : > { %v7812_v7 = vmax.f32 %v9247_v16, 0.0  ;;  %v9249_v28 = vadd.f32 %v9248_v12, %v7546_v38 }
 0x5e0   : > { %7981 = vst.msk [vmem:[%s10848_s5 + $0x430] sm:$0xff] %vm7846_vm2, %v7812_v7  ;;  %v7813_v43 = vmax.f32 %v9249_v28, 0.0 }
 0x5e1   : > { %v6141_v31 = vpop.f32.mrb[164].mxu1  ;;  %v7551_v57 = vpop.f32.mrb[164].mxu0 }
 0x5e2   : > { %7982 = vst.msk [vmem:[%s10848_s5 + $0x438] sm:$0xff] %vm7846_vm2, %v7813_v43  ;;  %v9250_v10 = vadd.f32 %v11508_v63, %v6141_v31  ;;  %v6143_v21 = vpop.f32.mrb[165].mxu1  ;;  %v7553_v8 = vpop.f32.mrb[165].mxu0 }
 0x5e3   : > { %v6144_v1 = vpop.f32.mrb[166].mxu1  ;;  %v7554_v51 = vpop.f32.mrb[166].mxu0 }
 0x5e4   : > { %v9251_v11 = vadd.f32 %v9250_v10, %v7551_v57  ;;  %v9252_v58 = vadd.f32 %v11508_v63, %v6144_v1  ;;  %v6146_v22 = vpop.f32.mrb[167].mxu1  ;;  %v7556_v33 = vpop.f32.mrb[167].mxu0 }
 0x5e6   : > { %v7814_v53 = vmax.f32 %v9251_v11, 0.0  ;;  %v9253_v50 = vadd.f32 %v9252_v58, %v7554_v51 }
 0x5e8   : > { %7983 = vst.msk [vmem:[%s10848_s5 + $0x440] sm:$0xff] %vm7846_vm2, %v7814_v53  ;;  %v7815_v48 = vmax.f32 %v9253_v50, 0.0 }
 0x5e9   : > { %v6149_v14 = vpop.f32.mrb[168].mxu1  ;;  %v7559_v42 = vpop.f32.mrb[168].mxu0 }
 0x5ea   : > { %7984 = vst.msk [vmem:[%s10848_s5 + $0x448] sm:$0xff] %vm7846_vm2, %v7815_v48  ;;  %v9254_v47 = vadd.f32 %v11508_v63, %v6149_v14  ;;  %v6151_v20 = vpop.f32.mrb[169].mxu1  ;;  %v7561_v30 = vpop.f32.mrb[169].mxu0 }
 0x5eb   : > { %v6152_v54 = vpop.f32.mrb[170].mxu1  ;;  %v7562_v32 = vpop.f32.mrb[170].mxu0 }
 0x5ec   : > { %v9255_v56 = vadd.f32 %v9254_v47, %v7559_v42  ;;  %v9256_v0 = vadd.f32 %v11508_v63, %v6152_v54  ;;  %v6154_v52 = vpop.f32.mrb[171].mxu1  ;;  %v7564_v37 = vpop.f32.mrb[171].mxu0 }
 0x5ee   : > { %v7816_v55 = vmax.f32 %v9255_v56, 0.0  ;;  %v9257_v24 = vadd.f32 %v9256_v0, %v7562_v32 }
 0x5f0   : > { %7985 = vst.msk [vmem:[%s10848_s5 + $0x450] sm:$0xff] %vm7846_vm2, %v7816_v55  ;;  %v7817_v3 = vmax.f32 %v9257_v24, 0.0 }
 0x5f1   : > { %v6157_v34 = vpop.f32.mrb[172].mxu1  ;;  %v7567_v36 = vpop.f32.mrb[172].mxu0 }
 0x5f2   : > { %7986 = vst.msk [vmem:[%s10848_s5 + $0x458] sm:$0xff] %vm7846_vm2, %v7817_v3  ;;  %v9258_v49 = vadd.f32 %v11508_v63, %v6157_v34  ;;  %v6159_v2 = vpop.f32.mrb[173].mxu1  ;;  %v7569_v18 = vpop.f32.mrb[173].mxu0 }
 0x5f3   : > { %v6160_v26 = vpop.f32.mrb[174].mxu1  ;;  %v7570_v61 = vpop.f32.mrb[174].mxu0 }
 0x5f4   : > { %v9259_v39 = vadd.f32 %v9258_v49, %v7567_v36  ;;  %v9260_v59 = vadd.f32 %v11508_v63, %v6160_v26  ;;  %v6162_v60 = vpop.f32.mrb[175].mxu1  ;;  %v7572_v23 = vpop.f32.mrb[175].mxu0 }
 0x5f6   : > { %v7818_v45 = vmax.f32 %v9259_v39, 0.0  ;;  %v9261_v17 = vadd.f32 %v9260_v59, %v7570_v61 }
 0x5f8   : > { %7987 = vst.msk [vmem:[%s10848_s5 + $0x460] sm:$0xff] %vm7846_vm2, %v7818_v45  ;;  %v7819_v27 = vmax.f32 %v9261_v17, 0.0 }
 0x5f9   : > { %v6165_v9 = vpop.f32.mrb[176].mxu1  ;;  %v7575_v6 = vpop.f32.mrb[176].mxu0 }
 0x5fa   : > { %7988 = vst.msk [vmem:[%s10848_s5 + $0x468] sm:$0xff] %vm7846_vm2, %v7819_v27  ;;  %v9262_v46 = vadd.f32 %v11508_v63, %v6165_v9  ;;  %v6167_v40 = vpop.f32.mrb[177].mxu1  ;;  %v7577_v44 = vpop.f32.mrb[177].mxu0 }
 0x5fb   : > { %v6168_v13 = vpop.f32.mrb[178].mxu1  ;;  %v7578_v15 = vpop.f32.mrb[178].mxu0 }
 0x5fc   : > { %v9263_v29 = vadd.f32 %v9262_v46, %v7575_v6  ;;  %v9264_v35 = vadd.f32 %v11508_v63, %v6168_v13  ;;  %v6170_v25 = vpop.f32.mrb[179].mxu1  ;;  %v7580_v4 = vpop.f32.mrb[179].mxu0 }
 0x5fe   : > { %v7820_v5 = vmax.f32 %v9263_v29, 0.0  ;;  %v9265_v19 = vadd.f32 %v9264_v35, %v7578_v15 }
 0x600   : > { %7989 = vst.msk [vmem:[%s10848_s5 + $0x470] sm:$0xff] %vm7846_vm2, %v7820_v5  ;;  %v7821_v16 = vmax.f32 %v9265_v19, 0.0 }
 0x601   : > { %v6173_v12 = vpop.f32.mrb[180].mxu1  ;;  %v7583_v41 = vpop.f32.mrb[180].mxu0 }
 0x602   : > { %7990 = vst.msk [vmem:[%s10848_s5 + $0x478] sm:$0xff] %vm7846_vm2, %v7821_v16  ;;  %v9266_v38 = vadd.f32 %v11508_v63, %v6173_v12  ;;  %v6175_v62 = vpop.f32.mrb[181].mxu1  ;;  %v7585_v7 = vpop.f32.mrb[181].mxu0 }
 0x603   : > { %v6176_v28 = vpop.f32.mrb[182].mxu1  ;;  %v7586_v10 = vpop.f32.mrb[182].mxu0 }
 0x604   : > { %v9267_v43 = vadd.f32 %v9266_v38, %v7583_v41  ;;  %v9268_v31 = vadd.f32 %v11508_v63, %v6176_v28  ;;  %v6178_v57 = vpop.f32.mrb[183].mxu1  ;;  %v7588_v21 = vpop.f32.mrb[183].mxu0 }
 0x606   : > { %v7822_v8 = vmax.f32 %v9267_v43, 0.0  ;;  %v9269_v1 = vadd.f32 %v9268_v31, %v7586_v10 }
 0x608   : > { %7991 = vst.msk [vmem:[%s10848_s5 + $0x480] sm:$0xff] %vm7846_vm2, %v7822_v8  ;;  %v7823_v11 = vmax.f32 %v9269_v1, 0.0 }
 0x609   : > { %v6181_v58 = vpop.f32.mrb[184].mxu1  ;;  %v7591_v22 = vpop.f32.mrb[184].mxu0 }
 0x60a   : > { %7992 = vst.msk [vmem:[%s10848_s5 + $0x488] sm:$0xff] %vm7846_vm2, %v7823_v11  ;;  %v9270_v51 = vadd.f32 %v11508_v63, %v6181_v58  ;;  %v6183_v33 = vpop.f32.mrb[185].mxu1  ;;  %v7593_v53 = vpop.f32.mrb[185].mxu0 }
 0x60b   : > { %v6184_v50 = vpop.f32.mrb[186].mxu1  ;;  %v7594_v47 = vpop.f32.mrb[186].mxu0 }
 0x60c   : > { %v9271_v48 = vadd.f32 %v9270_v51, %v7591_v22  ;;  %v9272_v14 = vadd.f32 %v11508_v63, %v6184_v50  ;;  %v6186_v42 = vpop.f32.mrb[187].mxu1  ;;  %v7596_v20 = vpop.f32.mrb[187].mxu0 }
 0x60e   : > { %v7824_v30 = vmax.f32 %v9271_v48, 0.0  ;;  %v9273_v54 = vadd.f32 %v9272_v14, %v7594_v47 }
 0x610   : > { %7993 = vst.msk [vmem:[%s10848_s5 + $0x490] sm:$0xff] %vm7846_vm2, %v7824_v30  ;;  %v7825_v56 = vmax.f32 %v9273_v54, 0.0 }
 0x611   : > { %v6189_v0 = vpop.f32.mrb[188].mxu1  ;;  %v7599_v52 = vpop.f32.mrb[188].mxu0 }
 0x612   : > { %7994 = vst.msk [vmem:[%s10848_s5 + $0x498] sm:$0xff] %vm7846_vm2, %v7825_v56  ;;  %v9274_v32 = vadd.f32 %v11508_v63, %v6189_v0  ;;  %v6191_v37 = vpop.f32.mrb[189].mxu1  ;;  %v7601_v55 = vpop.f32.mrb[189].mxu0 }
 0x613   : > { %v6192_v24 = vpop.f32.mrb[190].mxu1  ;;  %v7602_v49 = vpop.f32.mrb[190].mxu0 }
 0x614   : > { %v9275_v3 = vadd.f32 %v9274_v32, %v7599_v52  ;;  %v9276_v34 = vadd.f32 %v11508_v63, %v6192_v24  ;;  %v6194_v36 = vpop.f32.mrb[191].mxu1  ;;  %v7604_v2 = vpop.f32.mrb[191].mxu0 }
 0x616   : > { %v7826_v18 = vmax.f32 %v9275_v3, 0.0  ;;  %v9277_v26 = vadd.f32 %v9276_v34, %v7602_v49 }
 0x618   : > { %7995 = vst.msk [vmem:[%s10848_s5 + $0x4a0] sm:$0xff] %vm7846_vm2, %v7826_v18  ;;  %v7827_v39 = vmax.f32 %v9277_v26, 0.0 }
 0x619   : > { %v6197_v59 = vpop.f32.mrb[192].mxu1  ;;  %v7607_v60 = vpop.f32.mrb[192].mxu0 }
 0x61a   : > { %7996 = vst.msk [vmem:[%s10848_s5 + $0x4a8] sm:$0xff] %vm7846_vm2, %v7827_v39  ;;  %v9278_v61 = vadd.f32 %v11508_v63, %v6197_v59  ;;  %v6199_v23 = vpop.f32.mrb[193].mxu1  ;;  %v7609_v45 = vpop.f32.mrb[193].mxu0 }
 0x61b   : > { %v6200_v17 = vpop.f32.mrb[194].mxu1  ;;  %v7610_v46 = vpop.f32.mrb[194].mxu0 }
 0x61c   : > { %v9279_v27 = vadd.f32 %v9278_v61, %v7607_v60  ;;  %v9280_v9 = vadd.f32 %v11508_v63, %v6200_v17  ;;  %v6202_v6 = vpop.f32.mrb[195].mxu1  ;;  %v7612_v40 = vpop.f32.mrb[195].mxu0 }
 0x61e   : > { %v7828_v44 = vmax.f32 %v9279_v27, 0.0  ;;  %v9281_v13 = vadd.f32 %v9280_v9, %v7610_v46 }
 0x620   : > { %7997 = vst.msk [vmem:[%s10848_s5 + $0x4b0] sm:$0xff] %vm7846_vm2, %v7828_v44  ;;  %v7829_v29 = vmax.f32 %v9281_v13, 0.0 }
 0x621   : > { %v6205_v35 = vpop.f32.mrb[196].mxu1  ;;  %v7615_v25 = vpop.f32.mrb[196].mxu0 }
 0x622   : > { %7998 = vst.msk [vmem:[%s10848_s5 + $0x4b8] sm:$0xff] %vm7846_vm2, %v7829_v29  ;;  %v9282_v15 = vadd.f32 %v11508_v63, %v6205_v35  ;;  %v6207_v4 = vpop.f32.mrb[197].mxu1  ;;  %v7617_v5 = vpop.f32.mrb[197].mxu0 }
 0x623   : > { %v6208_v19 = vpop.f32.mrb[198].mxu1  ;;  %v7618_v38 = vpop.f32.mrb[198].mxu0 }
 0x624   : > { %v9283_v16 = vadd.f32 %v9282_v15, %v7615_v25  ;;  %v9284_v12 = vadd.f32 %v11508_v63, %v6208_v19  ;;  %v6210_v41 = vpop.f32.mrb[199].mxu1  ;;  %v7620_v62 = vpop.f32.mrb[199].mxu0 }
 0x626   : > { %v7830_v7 = vmax.f32 %v9283_v16, 0.0  ;;  %v9285_v28 = vadd.f32 %v9284_v12, %v7618_v38 }
 0x628   : > { %7999 = vst.msk [vmem:[%s10848_s5 + $0x4c0] sm:$0xff] %vm7846_vm2, %v7830_v7  ;;  %v7831_v43 = vmax.f32 %v9285_v28, 0.0 }
 0x629   : > { %v6213_v31 = vpop.f32.mrb[200].mxu1  ;;  %v7623_v57 = vpop.f32.mrb[200].mxu0 }
 0x62a   : > { %8000 = vst.msk [vmem:[%s10848_s5 + $0x4c8] sm:$0xff] %vm7846_vm2, %v7831_v43  ;;  %v9286_v10 = vadd.f32 %v11508_v63, %v6213_v31  ;;  %v6215_v21 = vpop.f32.mrb[201].mxu1  ;;  %v7625_v8 = vpop.f32.mrb[201].mxu0 }
 0x62b   : > { %v6216_v1 = vpop.f32.mrb[202].mxu1  ;;  %v7626_v51 = vpop.f32.mrb[202].mxu0 }
 0x62c   : > { %v9287_v11 = vadd.f32 %v9286_v10, %v7623_v57  ;;  %v9288_v58 = vadd.f32 %v11508_v63, %v6216_v1  ;;  %v6218_v22 = vpop.f32.mrb[203].mxu1  ;;  %v7628_v33 = vpop.f32.mrb[203].mxu0 }
 0x62e   : > { %v7832_v53 = vmax.f32 %v9287_v11, 0.0  ;;  %v9289_v50 = vadd.f32 %v9288_v58, %v7626_v51  ;;  %v9897_v51 = vld [vmem:[%s11727_s2] ss:$0 sm:$0xff] }
 0x630   : > { %8001 = vst.msk [vmem:[%s10848_s5 + $0x4d0] sm:$0xff] %vm7846_vm2, %v7832_v53  ;;  %v7833_v48 = vmax.f32 %v9289_v50, 0.0 }
 0x631   : > { %v6221_v14 = vpop.f32.mrb[204].mxu1  ;;  %v7631_v42 = vpop.f32.mrb[204].mxu0 }
 0x632   : > { %8002 = vst.msk [vmem:[%s10848_s5 + $0x4d8] sm:$0xff] %vm7846_vm2, %v7833_v48  ;;  %v9290_v47 = vadd.f32 %v11508_v63, %v6221_v14  ;;  %v6223_v20 = vpop.f32.mrb[205].mxu1  ;;  %v7633_v30 = vpop.f32.mrb[205].mxu0 }
 0x633   : > { %v6224_v54 = vpop.f32.mrb[206].mxu1  ;;  %v7634_v32 = vpop.f32.mrb[206].mxu0 }
 0x634   : > { %v9291_v56 = vadd.f32 %v9290_v47, %v7631_v42  ;;  %v9292_v0 = vadd.f32 %v11508_v63, %v6224_v54  ;;  %v6226_v52 = vpop.f32.mrb[207].mxu1  ;;  %v7636_v37 = vpop.f32.mrb[207].mxu0 }
 0x636   : > { %v7834_v55 = vmax.f32 %v9291_v56, 0.0  ;;  %v9293_v24 = vadd.f32 %v9292_v0, %v7634_v32 }
 0x638   : > { %8003 = vst.msk [vmem:[%s10848_s5 + $0x4e0] sm:$0xff] %vm7846_vm2, %v7834_v55  ;;  %v7835_v3 = vmax.f32 %v9293_v24, 0.0 }
 0x639   : > { %v6229_v34 = vpop.f32.mrb[208].mxu1  ;;  %v7639_v36 = vpop.f32.mrb[208].mxu0 }
 0x63a   : > { %8004 = vst.msk [vmem:[%s10848_s5 + $0x4e8] sm:$0xff] %vm7846_vm2, %v7835_v3  ;;  %v9294_v49 = vadd.f32 %v11508_v63, %v6229_v34  ;;  %v6231_v2 = vpop.f32.mrb[209].mxu1  ;;  %v7641_v18 = vpop.f32.mrb[209].mxu0 }
 0x63b   : > { %v6232_v26 = vpop.f32.mrb[210].mxu1  ;;  %v7642_v61 = vpop.f32.mrb[210].mxu0 }
 0x63c   : > { %v9295_v39 = vadd.f32 %v9294_v49, %v7639_v36  ;;  %v9296_v59 = vadd.f32 %v11508_v63, %v6232_v26  ;;  %v6234_v60 = vpop.f32.mrb[211].mxu1  ;;  %v7644_v23 = vpop.f32.mrb[211].mxu0 }
 0x63e   : > { %v7836_v45 = vmax.f32 %v9295_v39, 0.0  ;;  %v9297_v17 = vadd.f32 %v9296_v59, %v7642_v61 }
 0x640   : > { %8005 = vst.msk [vmem:[%s10848_s5 + $0x4f0] sm:$0xff] %vm7846_vm2, %v7836_v45  ;;  %v7837_v27 = vmax.f32 %v9297_v17, 0.0 }
 0x641   : > { %v6237_v9 = vpop.f32.mrb[212].mxu1  ;;  %v7647_v6 = vpop.f32.mrb[212].mxu0 }
 0x642   : > { %8006 = vst.msk [vmem:[%s10848_s5 + $0x4f8] sm:$0xff] %vm7846_vm2, %v7837_v27  ;;  %v9298_v46 = vadd.f32 %v11508_v63, %v6237_v9  ;;  %v6239_v40 = vpop.f32.mrb[213].mxu1  ;;  %v7649_v44 = vpop.f32.mrb[213].mxu0 }
 0x643   : > { %v6240_v13 = vpop.f32.mrb[214].mxu1  ;;  %v7650_v15 = vpop.f32.mrb[214].mxu0 }
 0x644   : > { %v9299_v29 = vadd.f32 %v9298_v46, %v7647_v6  ;;  %v9300_v35 = vadd.f32 %v11508_v63, %v6240_v13  ;;  %v6242_v25 = vpop.f32.mrb[215].mxu1  ;;  %v7652_v4 = vpop.f32.mrb[215].mxu0 }
 0x646   : > { %v7838_v5 = vmax.f32 %v9299_v29, 0.0  ;;  %v9301_v19 = vadd.f32 %v9300_v35, %v7650_v15 }
 0x648   : > { %8007 = vst.msk [vmem:[%s10848_s5 + $0x500] sm:$0xff] %vm7846_vm2, %v7838_v5  ;;  %v7839_v16 = vmax.f32 %v9301_v19, 0.0 }
 0x649   : > { %v6245_v12 = vpop.f32.mrb[216].mxu1  ;;  %v7655_v41 = vpop.f32.mrb[216].mxu0 }
 0x64a   : > { %8008 = vst.msk [vmem:[%s10848_s5 + $0x508] sm:$0xff] %vm7846_vm2, %v7839_v16  ;;  %v9302_v38 = vadd.f32 %v11508_v63, %v6245_v12  ;;  %v6247_v62 = vpop.f32.mrb[217].mxu1  ;;  %v7657_v7 = vpop.f32.mrb[217].mxu0 }
 0x64b   : > { %v6248_v28 = vpop.f32.mrb[218].mxu1  ;;  %v7658_v10 = vpop.f32.mrb[218].mxu0 }
 0x64c   : > { %v9303_v43 = vadd.f32 %v9302_v38, %v7655_v41  ;;  %v9304_v31 = vadd.f32 %v11508_v63, %v6248_v28  ;;  %v6250_v57 = vpop.f32.mrb[219].mxu1  ;;  %v7660_v21 = vpop.f32.mrb[219].mxu0 }
 0x64e   : > { %v7840_v8 = vmax.f32 %v9303_v43, 0.0  ;;  %v9305_v1 = vadd.f32 %v9304_v31, %v7658_v10 }
 0x650   : > { %8009 = vst.msk [vmem:[%s10848_s5 + $0x510] sm:$0xff] %vm7846_vm2, %v7840_v8  ;;  %v7841_v11 = vmax.f32 %v9305_v1, 0.0 }
 0x651   : > { %v6253_v58 = vpop.f32.mrb[220].mxu1  ;;  %v7663_v33 = vpop.f32.mrb[220].mxu0 }
 0x652   : > { %8010 = vst.msk [vmem:[%s10848_s5 + $0x518] sm:$0xff] %vm7846_vm2, %v7841_v11  ;;  %v9306_v22 = vadd.f32 %v9897_v51, %v6253_v58  ;;  %v6255_v63 = vpop.f32.mrb[221].mxu1  ;;  %v7665_v53 = vpop.f32.mrb[221].mxu0 }
 0x653   : > { %v6256_v50 = vpop.f32.mrb[222].mxu1  ;;  %v7666_v47 = vpop.f32.mrb[222].mxu0 }
 0x654   : > { %v9307_v48 = vadd.f32 %v9306_v22, %v7663_v33  ;;  %v9308_v14 = vadd.f32 %v9897_v51, %v6256_v50  ;;  %v6258_v42 = vpop.f32.mrb[223].mxu1  ;;  %v7668_v20 = vpop.f32.mrb[223].mxu0 }
 0x656   : > { %v7842_v30 = vmax.f32 %v9307_v48, 0.0  ;;  %v9309_v54 = vadd.f32 %v9308_v14, %v7666_v47 }
 0x658   : > { %8011 = vst.msk [vmem:[%s10848_s5 + $0x520] sm:$0xff] %vm7846_vm2, %v7842_v30  ;;  %v7843_v56 = vmax.f32 %v9309_v54, 0.0 }
 0x659   : > { %v6261_v0 = vpop.f32.mrb[224].mxu1  ;;  %v7671_v52 = vpop.f32.mrb[224].mxu0 }
 0x65a   : > { %8012 = vst.msk [vmem:[%s10848_s5 + $0x528] sm:$0xff] %vm7846_vm2, %v7843_v56  ;;  %v9310_v32 = vadd.f32 %v9897_v51, %v6261_v0  ;;  %v6263_v37 = vpop.f32.mrb[225].mxu1  ;;  %v7673_v55 = vpop.f32.mrb[225].mxu0 }
 0x65b   : > { %v6264_v24 = vpop.f32.mrb[226].mxu1  ;;  %v7674_v49 = vpop.f32.mrb[226].mxu0 }
 0x65c   : > { %v9311_v3 = vadd.f32 %v9310_v32, %v7671_v52  ;;  %v9312_v34 = vadd.f32 %v9897_v51, %v6264_v24  ;;  %v6266_v36 = vpop.f32.mrb[227].mxu1  ;;  %v7676_v2 = vpop.f32.mrb[227].mxu0 }
 0x65e   : > { %v7844_v18 = vmax.f32 %v9311_v3, 0.0  ;;  %v9313_v26 = vadd.f32 %v9312_v34, %v7674_v49 }
 0x660   : > { %8013 = vst.msk [vmem:[%s10848_s5 + $0x530] sm:$0xff] %vm7846_vm2, %v7844_v18  ;;  %v7845_v39 = vmax.f32 %v9313_v26, 0.0 }
 0x662   : > { %8014 = vst.msk [vmem:[%s10848_s5 + $0x538] sm:$0xff] %vm7846_vm2, %v7845_v39 }
 0x663 PF: > { %s13_s12 = sadd.s32 1, %s9904_s12  }
 0x664   : > { %p10_p4 = scmp.ge.s32.totalorder %s13_s12, 4  }
 0x666   :  { %12 = sbr.rel (!%p10_p4) target bundleno = 1 (0x1), region = 62 }

// kernel: forward.4
= control target key start
LH: loop header
LB: loop body
LE: loop exit
PB: predicated region body
PF: predicated region fallthrough
CT: control target
= control target key end

     0   :  { %v3005_v0 = vmov 0   ;;  %v3006_v2 = vmov 0.0   ;;  %vm3007_vm0 = vmmov 0   ;;  %vm1193_vm1 = vcmask 1043456   ;;  %s4231_s1 = inlined_call_operand.vmem [shape: bf16[360,54], index: 1, kind: input, shape index: {}]   ;;  %s4232_s0 = inlined_call_operand.vmem [shape: bf16[720,360], index: 0, kind: input, shape index: {}]   ;;  %s4233_s2 = inlined_call_operand.vmem [shape: f32[1,54], index: 2, kind: input, shape index: {}]   ;;  %s4234_s3 = inlined_call_operand.vmem [shape: f32[720,54], index: 3, kind: output, shape index: {}]  }
   0x1   :  { %1197 = vmatprep.subr.bf16.mxu1 %v3005_v0  ;;  %v2801_v1 = vld [vmem:[%s4231_s1] sm:$0xff]   ;;  %2424 = vmatprep.subr.bf16.mxu0 %v3006_v2  ;;  %v2802_v3 = vld [vmem:[%s4231_s1 + $0x8] sm:$0xff]   ;;  %v2803_v4 = vld [vmem:[%s4231_s1 + $0x10] sm:$0xff]   ;;  %vm1057_vm2 = vcmask 850944   ;;  %vm2073_vm3 = vcmask 441344  }
   0x2   :  { %2438 = vmatprep.mubr.msk.bf16.mxu0 %vm3007_vm0, %v3006_v2  ;;  %1198 = vmatpush1.bf16.msra.mxu1 %v2801_v1  ;;  %v2810_v5 = vld [vmem:[%s4231_s1 + $0x80] sm:$0xff]   ;;  %v2804_v6 = vld [vmem:[%s4231_s1 + $0x18] sm:$0xff]   ;;  %v2812_v7 = vld [vmem:[%s4231_s1 + $0x88] sm:$0xff]  }
   0x3   :  { %1199 = vmatprep.subr.bf16.mxu1 %v3005_v0  ;;  %2425 = vmatpush3.bf16.msra.mxu0 %v2810_v5  ;;  %v2805_v8 = vld [vmem:[%s4231_s1 + $0x20] sm:$0xff]   ;;  %v2814_v9 = vld [vmem:[%s4231_s1 + $0x90] sm:$0xff]   ;;  %v2806_v10 = vld [vmem:[%s4231_s1 + $0x28] sm:$0xff]  }
   0x4   :  { %2426 = vmatprep.subr.bf16.mxu0 %v3006_v2  ;;  %v2816_v11 = vld [vmem:[%s4231_s1 + $0x98] sm:$0xff]   ;;  %v2807_v12 = vld [vmem:[%s4231_s1 + $0x30] sm:$0xff]   ;;  %v2818_v13 = vld [vmem:[%s4231_s1 + $0xa0] sm:$0xff]  }
   0x5   :  { %v2826_v14 = vld [vmem:[%s4232_s0 + $0x4] ss:$12 sps:$4 sm:$0xff]   ;;  %v2808_v15 = vld [vmem:[%s4231_s1 + $0x38] sm:$0xff]   ;;  %v2820_v16 = vld [vmem:[%s4231_s1 + $0xa8] sm:$0xff]  }
   0x6   :  { %1200 = vmatpush1.bf16.msra.mxu1 %v2802_v3  ;;  %1229 = vmatprep.mubr.bf16.mxu1 %v2826_v14  ;;  %v2822_v17 = vld [vmem:[%s4231_s1 + $0xb0] ss:$0 sps:$4 sm:$0xff]   ;;  %v2809_v18 = vld [vmem:[%s4231_s1 + $0x40] sm:$0xff]   ;;  %v2811_v20 = vld [vmem:[%s4231_s1 + $0x48] sm:$0xff]  }
   0x7   :  { %1201 = vmatprep.subr.bf16.mxu1 %v3005_v0  ;;  %2427 = vmatpush3.bf16.msra.mxu0 %v2812_v7  ;;  %v1195_v19 = vsel %vm1193_vm1, %v2822_v17, 0  ;;  %v2827_v21 = vld [vmem:[%s4232_s0 + $0x8] ss:$12 sps:$4 sm:$0xff]   ;;  %v2815_v23 = vld [vmem:[%s4231_s1 + $0x58] sm:$0xff]   ;;  %v2830_v24 = vld [vmem:[%s4232_s0 + $0x20] ss:$12 sps:$4 sm:$0xff]  }
   0x8   :  { %2428 = vmatprep.subr.bf16.mxu0 %v3006_v2  ;;  %v2813_v22 = vld [vmem:[%s4231_s1 + $0x50] sm:$0xff]   ;;  %v2817_v25 = vld [vmem:[%s4231_s1 + $0x60] sm:$0xff]   ;;  %v2819_v26 = vld [vmem:[%s4231_s1 + $0x68] sm:$0xff]  }
   0x9   :  { %v2834_v27 = vld [vmem:[%s4232_s0 + $0x38] ss:$12 sps:$4 sm:$0xff]   ;;  %v2821_v28 = vld [vmem:[%s4231_s1 + $0x70] sm:$0xff]   ;;  %v2824_v31 = vld [vmem:[%s4232_s0] ss:$12 sps:$4 sm:$0xff]  }
   0xa   :  { %1202 = vmatpush1.bf16.msra.mxu1 %v2803_v4  ;;  %v2823_v29 = vld [vmem:[%s4231_s1 + $0x78] sm:$0xff]   ;;  %v2842_v33 = vld [vmem:[%s4232_s0 + $0x68] ss:$12 sps:$4 sm:$0xff]   ;;  %v2846_v36 = vld [vmem:[%s4232_s0 + $0x80] ss:$12 sps:$4 sm:$0xff]  }
   0xb   :  { %1203 = vmatprep.subr.bf16.mxu1 %v3005_v0  ;;  %2429 = vmatpush3.bf16.msra.mxu0 %v2814_v9  ;;  %v2838_v30 = vld [vmem:[%s4232_s0 + $0x50] ss:$12 sps:$4 sm:$0xff]   ;;  %v2831_v34 = vld [vmem:[%s4232_s0 + $0x18] ss:$12 sps:$4 sm:$0xff]   ;;  %v2832_v35 = vld [vmem:[%s4232_s0 + $0x34] ss:$12 sps:$4 sm:$0xff]  }
   0xc   :  { %2430 = vmatprep.subr.bf16.mxu0 %v3006_v2  ;;  %v2828_v32 = vld [vmem:[%s4232_s0 + $0x1c] ss:$12 sps:$4 sm:$0xff]   ;;  %v2836_v38 = vld [vmem:[%s4232_s0 + $0x4c] ss:$12 sps:$4 sm:$0xff]   ;;  %v2840_v41 = vld [vmem:[%s4232_s0 + $0x64] ss:$12 sps:$4 sm:$0xff]  }
   0xd   :  { %v2835_v37 = vld [vmem:[%s4232_s0 + $0x30] ss:$12 sps:$4 sm:$0xff]   ;;  %v2850_v39 = vld [vmem:[%s4232_s0 + $0x98] ss:$12 sps:$4 sm:$0xff]   ;;  %v2839_v40 = vld [vmem:[%s4232_s0 + $0x48] ss:$12 sps:$4 sm:$0xff]  }
   0xe   :  { %1204 = vmatpush1.bf16.msra.mxu1 %v2804_v6  ;;  %v2854_v42 = vld [vmem:[%s4232_s0 + $0xb0] ss:$12 sps:$4 sm:$0xff]   ;;  %v2843_v43 = vld [vmem:[%s4232_s0 + $0x60] ss:$12 sps:$4 sm:$0xff]   ;;  %v2858_v45 = vld [vmem:[%s4232_s0 + $0xc8] ss:$12 sps:$4 sm:$0xff]  }
   0xf   :  { %1205 = vmatprep.subr.bf16.mxu1 %v3005_v0  ;;  %2431 = vmatpush3.bf16.msra.mxu0 %v2816_v11  ;;  %v2844_v44 = vld [vmem:[%s4232_s0 + $0x7c] ss:$12 sps:$4 sm:$0xff]   ;;  %v2847_v46 = vld [vmem:[%s4232_s0 + $0x78] ss:$12 sps:$4 sm:$0xff]   ;;  %v2848_v47 = vld [vmem:[%s4232_s0 + $0x94] ss:$12 sps:$4 sm:$0xff]  }
  0x10   :  { %2432 = vmatprep.subr.bf16.mxu0 %v3006_v2  ;;  %v2862_v48 = vld [vmem:[%s4232_s0 + $0xe0] ss:$12 sps:$4 sm:$0xff]   ;;  %v2851_v49 = vld [vmem:[%s4232_s0 + $0x90] ss:$12 sps:$4 sm:$0xff]   ;;  %v2866_v51 = vld [vmem:[%s4232_s0 + $0xf8] ss:$12 sps:$4 sm:$0xff]  }
  0x11   :  { %v2852_v50 = vld [vmem:[%s4232_s0 + $0xac] ss:$12 sps:$4 sm:$0xff]   ;;  %v2855_v52 = vld [vmem:[%s4232_s0 + $0xa8] ss:$12 sps:$4 sm:$0xff]   ;;  %v2856_v53 = vld [vmem:[%s4232_s0 + $0xc4] ss:$12 sps:$4 sm:$0xff]  }
  0x12   :  { %1206 = vmatpush1.bf16.msra.mxu1 %v2805_v8  ;;  %v2870_v54 = vld [vmem:[%s4232_s0 + $0x110] ss:$12 sps:$4 sm:$0xff]   ;;  %v2859_v55 = vld [vmem:[%s4232_s0 + $0xc0] ss:$12 sps:$4 sm:$0xff]   ;;  %v2874_v57 = vld [vmem:[%s4232_s0 + $0x128] ss:$12 sps:$4 sm:$0xff]  }
  0x13   :  { %1207 = vmatprep.subr.bf16.mxu1 %v3005_v0  ;;  %2433 = vmatpush3.bf16.msra.mxu0 %v2818_v13  ;;  %v2860_v56 = vld [vmem:[%s4232_s0 + $0xdc] ss:$12 sps:$4 sm:$0xff]   ;;  %v2863_v58 = vld [vmem:[%s4232_s0 + $0xd8] ss:$12 sps:$4 sm:$0xff]   ;;  %v2864_v59 = vld [vmem:[%s4232_s0 + $0xf4] ss:$12 sps:$4 sm:$0xff]  }
  0x14   :  { %2434 = vmatprep.subr.bf16.mxu0 %v3006_v2  ;;  %v2878_v60 = vld [vmem:[%s4232_s0 + $0x140] ss:$12 sps:$4 sm:$0xff]   ;;  %v2867_v61 = vld [vmem:[%s4232_s0 + $0xf0] ss:$12 sps:$4 sm:$0xff]   ;;  %v2882_v63 = vld [vmem:[%s4232_s0 + $0x158] ss:$12 sps:$4 sm:$0xff]  }
  0x15   :  { %v2868_v62 = vld [vmem:[%s4232_s0 + $0x10c] ss:$12 sps:$4 sm:$0xff]   ;;  %v2872_v1 = vld [vmem:[%s4232_s0 + $0x124] ss:$12 sps:$4 sm:$0xff]   ;;  %v2876_v5 = vld [vmem:[%s4232_s0 + $0x13c] ss:$12 sps:$4 sm:$0xff]  }
  0x16   :  { %1208 = vmatpush1.bf16.msra.mxu1 %v2806_v10  ;;  %v2886_v3 = vld [vmem:[%s4232_s0 + $0x170] ss:$12 sps:$4 sm:$0xff]   ;;  %v2875_v4 = vld [vmem:[%s4232_s0 + $0x120] ss:$12 sps:$4 sm:$0xff]   ;;  %v2890_v6 = vld [vmem:[%s4232_s0 + $0x188] ss:$12 sps:$4 sm:$0xff]  }
  0x17   :  { %1209 = vmatprep.subr.bf16.mxu1 %v3005_v0  ;;  %2435 = vmatpush3.bf16.msra.mxu0 %v2820_v16  ;;  %v2879_v7 = vld [vmem:[%s4232_s0 + $0x138] ss:$12 sps:$4 sm:$0xff]   ;;  %v2880_v8 = vld [vmem:[%s4232_s0 + $0x154] ss:$12 sps:$4 sm:$0xff]   ;;  %v2883_v10 = vld [vmem:[%s4232_s0 + $0x150] ss:$12 sps:$4 sm:$0xff]  }
  0x18   :  { %2436 = vmatprep.subr.bf16.mxu0 %v3006_v2  ;;  %v2894_v9 = vld [vmem:[%s4232_s0 + $0x1a0] ss:$12 sps:$4 sm:$0xff]   ;;  %v2887_v13 = vld [vmem:[%s4232_s0 + $0x168] ss:$12 sps:$4 sm:$0xff]   ;;  %v2888_v14 = vld [vmem:[%s4232_s0 + $0x184] ss:$12 sps:$4 sm:$0xff]  }
  0x19   :  { %v2884_v11 = vld [vmem:[%s4232_s0 + $0x16c] ss:$12 sps:$4 sm:$0xff]   ;;  %v2892_v17 = vld [vmem:[%s4232_s0 + $0x19c] ss:$12 sps:$4 sm:$0xff]  }
  0x1a   :  { %1210 = vmatpush1.bf16.msra.mxu1 %v2807_v12  ;;  %v2898_v12 = vld [vmem:[%s4232_s0 + $0x1b8] ss:$12 sps:$4 sm:$0xff]   ;;  %v2891_v16 = vld [vmem:[%s4232_s0 + $0x180] ss:$12 sps:$4 sm:$0xff]  }
  0x1b   :  { %1211 = vmatprep.subr.bf16.mxu1 %v3005_v0  ;;  %2437 = vmatpush3.bf16.msra.mxu0 %v1195_v19  ;;  %v2895_v19 = vld [vmem:[%s4232_s0 + $0x198] ss:$12 sps:$4 sm:$0xff]  }
  0x1e   :  { %1212 = vmatpush1.bf16.msra.mxu1 %v2808_v15  ;;  %2439 = vmatmul.mubr.msk.bf16.vlgmr.msra.gmra.mrb[0].mxu0 %vm1057_vm2, %v2827_v21  ;;  %v2902_v15 = vld [vmem:[%s4232_s0 + $0x1d0] ss:$12 sps:$4 sm:$0xff]   ;;  %v2910_v21 = vld [vmem:[%s4232_s0 + $0x200] ss:$12 sps:$4 sm:$0xff]  }
  0x1f   :  { %1213 = vmatprep.subr.bf16.mxu1 %v3005_v0  ;;  %2442 = vmatprep.mubr.msk.bf16.mxu0 %vm3007_vm0, %v3006_v2 }
  0x22   :  { %1214 = vmatpush1.bf16.msra.mxu1 %v2809_v18  ;;  %v2906_v18 = vld [vmem:[%s4232_s0 + $0x1e8] ss:$12 sps:$4 sm:$0xff]  }
  0x23   :  { %1215 = vmatprep.subr.bf16.mxu1 %v3005_v0 }
  0x26   :  { %1216 = vmatpush1.bf16.msra.mxu1 %v2811_v20  ;;  %2443 = vmatmul.mubr.msk.bf16.gmra.mrb[4].mxu0 %vm1057_vm2, %v2830_v24  ;;  %v2896_v20 = vld [vmem:[%s4232_s0 + $0x1b4] ss:$12 sps:$4 sm:$0xff]   ;;  %v2914_v24 = vld [vmem:[%s4232_s0 + $0x218] ss:$12 sps:$4 sm:$0xff]  }
  0x27   :  { %1217 = vmatprep.subr.bf16.mxu1 %v3005_v0  ;;  %2446 = vmatprep.mubr.msk.bf16.mxu0 %vm3007_vm0, %v3006_v2 }
  0x2a   :  { %1218 = vmatpush1.bf16.msra.mxu1 %v2813_v22  ;;  %v2899_v22 = vld [vmem:[%s4232_s0 + $0x1b0] ss:$12 sps:$4 sm:$0xff]  }
  0x2b   :  { %1219 = vmatprep.subr.bf16.mxu1 %v3005_v0 }
  0x2e   :  { %1220 = vmatpush1.bf16.msra.mxu1 %v2815_v23  ;;  %2447 = vmatmul.mubr.msk.bf16.gmra.mrb[8].mxu0 %vm1057_vm2, %v2834_v27  ;;  %v2900_v23 = vld [vmem:[%s4232_s0 + $0x1cc] ss:$12 sps:$4 sm:$0xff]   ;;  %v2918_v27 = vld [vmem:[%s4232_s0 + $0x230] ss:$12 sps:$4 sm:$0xff]  }
  0x2f   :  { %1221 = vmatprep.subr.bf16.mxu1 %v3005_v0  ;;  %2450 = vmatprep.mubr.msk.bf16.mxu0 %vm3007_vm0, %v3006_v2 }
  0x32   :  { %1222 = vmatpush1.bf16.msra.mxu1 %v2817_v25  ;;  %v2903_v25 = vld [vmem:[%s4232_s0 + $0x1c8] ss:$12 sps:$4 sm:$0xff]  }
  0x33   :  { %1223 = vmatprep.subr.bf16.mxu1 %v3005_v0 }
  0x36   :  { %1224 = vmatpush1.bf16.msra.mxu1 %v2819_v26  ;;  %2451 = vmatmul.mubr.msk.bf16.gmra.mrb[12].mxu0 %vm1057_vm2, %v2838_v30  ;;  %v2904_v26 = vld [vmem:[%s4232_s0 + $0x1e4] ss:$12 sps:$4 sm:$0xff]   ;;  %v2922_v30 = vld [vmem:[%s4232_s0 + $0x248] ss:$12 sps:$4 sm:$0xff]  }
  0x37   :  { %1225 = vmatprep.subr.bf16.mxu1 %v3005_v0  ;;  %2454 = vmatprep.mubr.msk.bf16.mxu0 %vm3007_vm0, %v3006_v2 }
  0x3a   :  { %1226 = vmatpush1.bf16.msra.mxu1 %v2821_v28  ;;  %v2907_v28 = vld [vmem:[%s4232_s0 + $0x1e0] ss:$12 sps:$4 sm:$0xff]  }
  0x3b   :  { %1227 = vmatprep.subr.bf16.mxu1 %v3005_v0  ;;  %v2871_v0 = vld [vmem:[%s4232_s0 + $0x108] ss:$12 sps:$4 sm:$0xff]  }
  0x3e   :  { %1228 = vmatpush1.bf16.msra.mxu1 %v2823_v29  ;;  %2455 = vmatmul.mubr.msk.bf16.gmra.mrb[16].mxu0 %vm1057_vm2, %v2842_v33  ;;  %v2908_v29 = vld [vmem:[%s4232_s0 + $0x1fc] ss:$12 sps:$4 sm:$0xff]   ;;  %v2926_v33 = vld [vmem:[%s4232_s0 + $0x260] ss:$12 sps:$4 sm:$0xff]  }
  0x3f   :  { %2458 = vmatprep.mubr.msk.bf16.mxu0 %vm3007_vm0, %v3006_v2 }
  0x41   :  { %1230 = vmatmul.mubr.bf16.vlgmr.msra.gmra.mrb[0].mxu1 %v2824_v31  ;;  %v2911_v31 = vld [vmem:[%s4232_s0 + $0x1f8] ss:$12 sps:$4 sm:$0xff]  }
  0x42   :  { %1237 = vmatprep.mubr.bf16.mxu1 %v2828_v32  ;;  %v2912_v32 = vld [vmem:[%s4232_s0 + $0x214] ss:$12 sps:$4 sm:$0xff]  }
  0x46   :  { %2459 = vmatmul.mubr.msk.bf16.gmra.mrb[20].mxu0 %vm1057_vm2, %v2846_v36  ;;  %v2930_v36 = vld [vmem:[%s4232_s0 + $0x278] ss:$12 sps:$4 sm:$0xff]  }
  0x47   :  { %2462 = vmatprep.mubr.msk.bf16.mxu0 %vm3007_vm0, %v3006_v2 }
  0x49   :  { %1238 = vmatmul.mubr.bf16.gmra.mrb[4].mxu1 %v2831_v34  ;;  %v2915_v34 = vld [vmem:[%s4232_s0 + $0x210] ss:$12 sps:$4 sm:$0xff]  }
  0x4a   :  { %1245 = vmatprep.mubr.bf16.mxu1 %v2832_v35  ;;  %v2916_v35 = vld [vmem:[%s4232_s0 + $0x22c] ss:$12 sps:$4 sm:$0xff]  }
  0x4e   :  { %2463 = vmatmul.mubr.msk.bf16.gmra.mrb[24].mxu0 %vm1057_vm2, %v2850_v39 }
  0x4f   :  { %2466 = vmatprep.mubr.msk.bf16.mxu0 %vm3007_vm0, %v3006_v2 }
  0x51   :  { %1246 = vmatmul.mubr.bf16.gmra.mrb[8].mxu1 %v2835_v37  ;;  %v2919_v37 = vld [vmem:[%s4232_s0 + $0x228] ss:$12 sps:$4 sm:$0xff]  }
  0x52   :  { %1253 = vmatprep.mubr.bf16.mxu1 %v2836_v38  ;;  %v2920_v38 = vld [vmem:[%s4232_s0 + $0x244] ss:$12 sps:$4 sm:$0xff]  }
  0x56   :  { %2467 = vmatmul.mubr.msk.bf16.gmra.mrb[28].mxu0 %vm1057_vm2, %v2854_v42 }
  0x57   :  { %2470 = vmatprep.mubr.msk.bf16.mxu0 %vm3007_vm0, %v3006_v2 }
  0x59   :  { %1254 = vmatmul.mubr.bf16.gmra.mrb[12].mxu1 %v2839_v40 }
  0x5a   :  { %1261 = vmatprep.mubr.bf16.mxu1 %v2840_v41  ;;  %v2934_v41 = vld [vmem:[%s4232_s0 + $0x290] ss:$12 sps:$4 sm:$0xff]  }
  0x5e   :  { %2471 = vmatmul.mubr.msk.bf16.gmra.mrb[32].mxu0 %vm1057_vm2, %v2858_v45  ;;  %v2924_v45 = vld [vmem:[%s4232_s0 + $0x25c] ss:$12 sps:$4 sm:$0xff]  }
  0x5f   :  { %2474 = vmatprep.mubr.msk.bf16.mxu0 %vm3007_vm0, %v3006_v2 }
  0x61   :  { %1262 = vmatmul.mubr.bf16.gmra.mrb[16].mxu1 %v2843_v43 }
  0x62   :  { %1269 = vmatprep.mubr.bf16.mxu1 %v2844_v44  ;;  %v2923_v44 = vld [vmem:[%s4232_s0 + $0x240] ss:$12 sps:$4 sm:$0xff]  }
  0x66   :  { %2475 = vmatmul.mubr.msk.bf16.gmra.mrb[36].mxu0 %vm1057_vm2, %v2862_v48  ;;  %v2938_v48 = vld [vmem:[%s4232_s0 + $0x2a8] ss:$12 sps:$4 sm:$0xff]  }
  0x67   :  { %2478 = vmatprep.mubr.msk.bf16.mxu0 %vm3007_vm0, %v3006_v2 }
  0x69   :  { %1270 = vmatmul.mubr.bf16.gmra.mrb[20].mxu1 %v2847_v46 }
  0x6a   :  { %1277 = vmatprep.mubr.bf16.mxu1 %v2848_v47 }
  0x6e   :  { %2479 = vmatmul.mubr.msk.bf16.gmra.mrb[40].mxu0 %vm1057_vm2, %v2866_v51  ;;  %v2927_v51 = vld [vmem:[%s4232_s0 + $0x258] ss:$12 sps:$4 sm:$0xff]  }
  0x6f   :  { %2482 = vmatprep.mubr.msk.bf16.mxu0 %vm3007_vm0, %v3006_v2 }
  0x71   :  { %1278 = vmatmul.mubr.bf16.gmra.mrb[24].mxu1 %v2851_v49 }
  0x72   :  { %1285 = vmatprep.mubr.bf16.mxu1 %v2852_v50 }
  0x76   :  { %2483 = vmatmul.mubr.msk.bf16.gmra.mrb[44].mxu0 %vm1057_vm2, %v2870_v54 }
  0x77   :  { %2486 = vmatprep.mubr.msk.bf16.mxu0 %vm3007_vm0, %v3006_v2 }
  0x79   :  { %1286 = vmatmul.mubr.bf16.gmra.mrb[28].mxu1 %v2855_v52  ;;  %v2928_v52 = vld [vmem:[%s4232_s0 + $0x274] ss:$12 sps:$4 sm:$0xff]  }
  0x7a   :  { %1293 = vmatprep.mubr.bf16.mxu1 %v2856_v53 }
  0x7e   :  { %2487 = vmatmul.mubr.msk.bf16.gmra.mrb[48].mxu0 %vm1057_vm2, %v2874_v57 }
  0x7f   :  { %2490 = vmatprep.mubr.msk.bf16.mxu0 %vm3007_vm0, %v3006_v2 }
  0x81   :  { %1294 = vmatmul.mubr.bf16.gmra.mrb[32].mxu1 %v2859_v55  ;;  %v2942_v55 = vld [vmem:[%s4232_s0 + $0x2c0] ss:$12 sps:$4 sm:$0xff]  }
  0x82   :  { %1301 = vmatprep.mubr.bf16.mxu1 %v2860_v56 }
  0x86   :  { %2491 = vmatmul.mubr.msk.bf16.gmra.mrb[52].mxu0 %vm1057_vm2, %v2878_v60 }
  0x87   :  { %2494 = vmatprep.mubr.msk.bf16.mxu0 %vm3007_vm0, %v3006_v2 }
  0x89   :  { %1302 = vmatmul.mubr.bf16.gmra.mrb[36].mxu1 %v2863_v58  ;;  %v2931_v58 = vld [vmem:[%s4232_s0 + $0x270] ss:$12 sps:$4 sm:$0xff]  }
  0x8a   :  { %1309 = vmatprep.mubr.bf16.mxu1 %v2864_v59  ;;  %v2932_v59 = vld [vmem:[%s4232_s0 + $0x28c] ss:$12 sps:$4 sm:$0xff]  }
  0x8e   :  { %2495 = vmatmul.mubr.msk.bf16.gmra.mrb[56].mxu0 %vm1057_vm2, %v2882_v63  ;;  %v2946_v63 = vld [vmem:[%s4232_s0 + $0x2d8] ss:$12 sps:$4 sm:$0xff]  }
  0x8f   :  { %2498 = vmatprep.mubr.msk.bf16.mxu0 %vm3007_vm0, %v3006_v2 }
  0x91   :  { %1310 = vmatmul.mubr.bf16.gmra.mrb[40].mxu1 %v2867_v61  ;;  %v3478_v61 = vld [vmem:[%s4233_s2] ss:$0 sm:$0xff] }
  0x92   :  { %1317 = vmatprep.mubr.bf16.mxu1 %v2868_v62 }
  0x96   :  { %2499 = vmatmul.mubr.msk.bf16.gmra.mrb[60].mxu0 %vm1057_vm2, %v2886_v3 }
  0x97   :  { %2502 = vmatprep.mubr.msk.bf16.mxu0 %vm3007_vm0, %v3006_v2 }
  0x99   :  { %1318 = vmatmul.mubr.bf16.gmra.mrb[44].mxu1 %v2871_v0 }
  0x9a   :  { %1325 = vmatprep.mubr.bf16.mxu1 %v2872_v1 }
  0x9e   :  { %2503 = vmatmul.mubr.msk.bf16.gmra.mrb[64].mxu0 %vm1057_vm2, %v2890_v6  ;;  %v2935_v6 = vld [vmem:[%s4232_s0 + $0x288] ss:$12 sps:$4 sm:$0xff]  }
  0x9f   :  { %2506 = vmatprep.mubr.msk.bf16.mxu0 %vm3007_vm0, %v3006_v2 }
  0xa1   :  { %1326 = vmatmul.mubr.bf16.gmra.mrb[48].mxu1 %v2875_v4 }
  0xa2   :  { %1333 = vmatprep.mubr.bf16.mxu1 %v2876_v5 }
  0xa6   :  { %2507 = vmatmul.mubr.msk.bf16.gmra.mrb[68].mxu0 %vm1057_vm2, %v2894_v9 }
  0xa7   :  { %2510 = vmatprep.mubr.msk.bf16.mxu0 %vm3007_vm0, %v3006_v2 }
  0xa9   :  { %1334 = vmatmul.mubr.bf16.gmra.mrb[52].mxu1 %v2879_v7 }
  0xaa   :  { %1341 = vmatprep.mubr.bf16.mxu1 %v2880_v8  ;;  %v2936_v8 = vld [vmem:[%s4232_s0 + $0x2a4] ss:$12 sps:$4 sm:$0xff]  }
  0xae   :  { %2511 = vmatmul.mubr.msk.bf16.gmra.mrb[72].mxu0 %vm1057_vm2, %v2898_v12 }
  0xaf   :  { %2514 = vmatprep.mubr.msk.bf16.mxu0 %vm3007_vm0, %v3006_v2 }
  0xb1   :  { %1342 = vmatmul.mubr.bf16.gmra.mrb[56].mxu1 %v2883_v10 }
  0xb2   :  { %1349 = vmatprep.mubr.bf16.mxu1 %v2884_v11 }
  0xb6   :  { %2515 = vmatmul.mubr.msk.bf16.gmra.mrb[76].mxu0 %vm1057_vm2, %v2902_v15 }
  0xb7   :  { %2518 = vmatprep.mubr.msk.bf16.mxu0 %vm3007_vm0, %v3006_v2 }
  0xb9   :  { %1350 = vmatmul.mubr.bf16.gmra.mrb[60].mxu1 %v2887_v13 }
  0xba   :  { %1357 = vmatprep.mubr.bf16.mxu1 %v2888_v14 }
  0xbe   :  { %2519 = vmatmul.mubr.msk.bf16.gmra.mrb[80].mxu0 %vm1057_vm2, %v2906_v18 }
  0xbf   :  { %2522 = vmatprep.mubr.msk.bf16.mxu0 %vm3007_vm0, %v3006_v2 }
  0xc1   :  { %1358 = vmatmul.mubr.bf16.gmra.mrb[64].mxu1 %v2891_v16  ;;  %v2950_v16 = vld [vmem:[%s4232_s0 + $0x2f0] ss:$12 sps:$4 sm:$0xff]  }
  0xc2   :  { %1365 = vmatprep.mubr.bf16.mxu1 %v2892_v17 }
  0xc6   :  { %2523 = vmatmul.mubr.msk.bf16.gmra.mrb[84].mxu0 %vm1057_vm2, %v2910_v21 }
  0xc7   :  { %2526 = vmatprep.mubr.msk.bf16.mxu0 %vm3007_vm0, %v3006_v2 }
  0xc9   :  { %1366 = vmatmul.mubr.bf16.gmra.mrb[68].mxu1 %v2895_v19 }
  0xca   :  { %1373 = vmatprep.mubr.bf16.mxu1 %v2896_v20 }
  0xce   :  { %2527 = vmatmul.mubr.msk.bf16.gmra.mrb[88].mxu0 %vm1057_vm2, %v2914_v24 }
  0xcf   :  { %2530 = vmatprep.mubr.msk.bf16.mxu0 %vm3007_vm0, %v3006_v2 }
  0xd1   :  { %1374 = vmatmul.mubr.bf16.gmra.mrb[72].mxu1 %v2899_v22 }
  0xd2   :  { %1381 = vmatprep.mubr.bf16.mxu1 %v2900_v23  ;;  %v2939_v23 = vld [vmem:[%s4232_s0 + $0x2a0] ss:$12 sps:$4 sm:$0xff]  }
  0xd6   :  { %2531 = vmatmul.mubr.msk.bf16.gmra.mrb[92].mxu0 %vm1057_vm2, %v2918_v27 }
  0xd7   :  { %2534 = vmatprep.mubr.msk.bf16.mxu0 %vm3007_vm0, %v3006_v2 }
  0xd9   :  { %1382 = vmatmul.mubr.bf16.gmra.mrb[76].mxu1 %v2903_v25  ;;  %v2940_v25 = vld [vmem:[%s4232_s0 + $0x2bc] ss:$12 sps:$4 sm:$0xff]  }
  0xda   :  { %1389 = vmatprep.mubr.bf16.mxu1 %v2904_v26 }
  0xde   :  { %2535 = vmatmul.mubr.msk.bf16.gmra.mrb[96].mxu0 %vm1057_vm2, %v2922_v30 }
  0xdf   :  { %2538 = vmatprep.mubr.msk.bf16.mxu0 %vm3007_vm0, %v3006_v2 }
  0xe1   :  { %1390 = vmatmul.mubr.bf16.gmra.mrb[80].mxu1 %v2907_v28 }
  0xe2   :  { %1397 = vmatprep.mubr.bf16.mxu1 %v2908_v29 }
  0xe6   :  { %2539 = vmatmul.mubr.msk.bf16.gmra.mrb[100].mxu0 %vm1057_vm2, %v2926_v33  ;;  %v2954_v33 = vld [vmem:[%s4232_s0 + $0x308] ss:$12 sps:$4 sm:$0xff]  }
  0xe7   :  { %2542 = vmatprep.mubr.msk.bf16.mxu0 %vm3007_vm0, %v3006_v2 }
  0xe9   :  { %1398 = vmatmul.mubr.bf16.gmra.mrb[84].mxu1 %v2911_v31 }
  0xea   :  { %1405 = vmatprep.mubr.bf16.mxu1 %v2912_v32 }
  0xee   :  { %2543 = vmatmul.mubr.msk.bf16.gmra.mrb[104].mxu0 %vm1057_vm2, %v2930_v36 }
  0xef   :  { %2546 = vmatprep.mubr.msk.bf16.mxu0 %vm3007_vm0, %v3006_v2 }
  0xf1   :  { %1406 = vmatmul.mubr.bf16.gmra.mrb[88].mxu1 %v2915_v34  ;;  %v1624_v39 = vpop.f32.mrb[0].mxu0 }
  0xf2   :  { %1413 = vmatprep.mubr.bf16.mxu1 %v2916_v35  ;;  %v2440_v40 = vpop.f32.mrb[1].mxu0 }
  0xf3   :  { %v1627_v42 = vpop.f32.mrb[2].mxu0  ;;  %v2943_v40 = vld [vmem:[%s4232_s0 + $0x2b8] ss:$12 sps:$4 sm:$0xff]  }
  0xf4   :  { %v2441_v43 = vpop.f32.mrb[3].mxu0 }
  0xf6   :  { %2547 = vmatmul.mubr.msk.bf16.gmra.mrb[108].mxu0 %vm1057_vm2, %v2934_v41 }
  0xf7   :  { %2550 = vmatprep.mubr.msk.bf16.mxu0 %vm3007_vm0, %v3006_v2 }
  0xf9   :  { %1414 = vmatmul.mubr.bf16.gmra.mrb[92].mxu1 %v2919_v37  ;;  %v1632_v46 = vpop.f32.mrb[4].mxu0 }
  0xfa   :  { %1421 = vmatprep.mubr.bf16.mxu1 %v2920_v38  ;;  %v2444_v47 = vpop.f32.mrb[5].mxu0 }
  0xfb   :  { %v3446_v49 = vpop.f32.mrb[6].mxu0 }
  0xfc   :  { %v2445_v50 = vpop.f32.mrb[7].mxu0 }
  0xfd   :  { %v2958_v50 = vld [vmem:[%s4232_s0 + $0x320] ss:$12 sps:$4 sm:$0xff]  }
  0xfe   :  { %2551 = vmatmul.mubr.msk.bf16.gmra.mrb[112].mxu0 %vm1057_vm2, %v2938_v48 }
  0xff   :  { %2554 = vmatprep.mubr.msk.bf16.mxu0 %vm3007_vm0, %v3006_v2 }
 0x101   :  { %1422 = vmatmul.mubr.bf16.gmra.mrb[96].mxu1 %v2923_v44  ;;  %v3457_v53 = vpop.f32.mrb[8].mxu0 }
 0x102   :  { %1429 = vmatprep.mubr.bf16.mxu1 %v2924_v45  ;;  %v2448_v54 = vpop.f32.mrb[9].mxu0 }
 0x103   :  { %v3462_v56 = vpop.f32.mrb[10].mxu0 }
 0x104   :  { %v2449_v57 = vpop.f32.mrb[11].mxu0 }
 0x105   :  { %v2947_v57 = vld [vmem:[%s4232_s0 + $0x2d0] ss:$12 sps:$4 sm:$0xff]  }
 0x106   :  { %2555 = vmatmul.mubr.msk.bf16.gmra.mrb[116].mxu0 %vm1057_vm2, %v2942_v55 }
 0x107   :  { %2558 = vmatprep.mubr.msk.bf16.mxu0 %vm3007_vm0, %v3006_v2 }
 0x109   :  { %1430 = vmatmul.mubr.bf16.gmra.mrb[100].mxu1 %v2927_v51  ;;  %v3473_v60 = vpop.f32.mrb[12].mxu0 }
 0x10a   :  { %1437 = vmatprep.mubr.bf16.mxu1 %v2928_v52  ;;  %v2452_v62 = vpop.f32.mrb[13].mxu0 }
 0x10b   :  { %v3483_v0 = vpop.f32.mrb[14].mxu0 }
 0x10c   :  { %v2453_v3 = vpop.f32.mrb[15].mxu0 }
 0x10e   :  { %2559 = vmatmul.mubr.msk.bf16.gmra.mrb[120].mxu0 %vm1057_vm2, %v2946_v63 }
 0x10f   :  { %2562 = vmatprep.mubr.msk.bf16.mxu0 %vm3007_vm0, %v3006_v2 }
 0x111   :  { %1438 = vmatmul.mubr.bf16.gmra.mrb[104].mxu1 %v2931_v58  ;;  %v3496_v14 = vpop.f32.mrb[16].mxu0 }
 0x112   :  { %1445 = vmatprep.mubr.bf16.mxu1 %v2932_v59  ;;  %v2456_v15 = vpop.f32.mrb[17].mxu0  ;;  %v2948_v59 = vld [vmem:[%s4232_s0 + $0x2ec] ss:$12 sps:$4 sm:$0xff]  }
 0x113   :  { %v3505_v18 = vpop.f32.mrb[18].mxu0  ;;  %v2952_v15 = vld [vmem:[%s4232_s0 + $0x304] ss:$12 sps:$4 sm:$0xff]  }
 0x114   :  { %v1231_v1 = vpop.f32.mrb[0].mxu1  ;;  %v2457_v20 = vpop.f32.mrb[19].mxu0 }
 0x115   :  { %v1232_v4 = vadd.f32 %v3478_v61, %v1231_v1  ;;  %v1233_v5 = vpop.f32.mrb[1].mxu1 }
 0x116   :  { %v1234_v7 = vpop.f32.mrb[2].mxu1  ;;  %2563 = vmatmul.mubr.msk.bf16.gmra.mrb[124].mxu0 %vm1057_vm2, %v2950_v16 }
 0x117   :  { %v1625_v9 = vadd.f32 %v1624_v39, %v1232_v4  ;;  %v1235_v10 = vadd.f32 %v3478_v61, %v1234_v7  ;;  %v1236_v11 = vpop.f32.mrb[3].mxu1  ;;  %2566 = vmatprep.mubr.msk.bf16.mxu0 %vm3007_vm0, %v3006_v2  ;;  %v2962_v7 = vld [vmem:[%s4232_s0 + $0x338] ss:$12 sps:$4 sm:$0xff]  }
 0x119   :  { %v1983_v12 = vmax.f32 %v1625_v9, 0.0  ;;  %v1628_v13 = vadd.f32 %v1627_v42, %v1235_v10  ;;  %1446 = vmatmul.mubr.bf16.gmra.mrb[108].mxu1 %v2935_v6  ;;  %v3523_v31 = vpop.f32.mrb[20].mxu0  ;;  %v2944_v42 = vld [vmem:[%s4232_s0 + $0x2d4] ss:$12 sps:$4 sm:$0xff]  }
 0x11a   :  { %1453 = vmatprep.mubr.bf16.mxu1 %v2936_v8  ;;  %v2460_v32 = vpop.f32.mrb[21].mxu0 }
 0x11b   :  { %2074 = vst.msk [vmem:[%s4234_s3] sm:$0xff] %vm2073_vm3, %v1983_v12  ;;  %v1984_v17 = vmax.f32 %v1628_v13, 0.0  ;;  %v3532_v35 = vpop.f32.mrb[22].mxu0  ;;  %v2951_v12 = vld [vmem:[%s4232_s0 + $0x2e8] ss:$12 sps:$4 sm:$0xff]  }
 0x11c   :  { %v1239_v19 = vpop.f32.mrb[4].mxu1  ;;  %v2461_v37 = vpop.f32.mrb[23].mxu0  ;;  %v2956_v32 = vld [vmem:[%s4232_s0 + $0x31c] ss:$12 sps:$4 sm:$0xff]  }
 0x11d   :  { %2075 = vst.msk [vmem:[%s4234_s3 + $0x8] sm:$0xff] %vm2073_vm3, %v1984_v17  ;;  %v1240_v21 = vadd.f32 %v3478_v61, %v1239_v19  ;;  %v1241_v22 = vpop.f32.mrb[5].mxu1 }
 0x11e   :  { %v1242_v24 = vpop.f32.mrb[6].mxu1  ;;  %2567 = vmatmul.mubr.msk.bf16.gmra.mrb[128].mxu0 %vm1057_vm2, %v2954_v33 }
 0x11f   :  { %v1633_v26 = vadd.f32 %v1632_v46, %v1240_v21  ;;  %v1243_v27 = vadd.f32 %v3478_v61, %v1242_v24  ;;  %v1244_v28 = vpop.f32.mrb[7].mxu1  ;;  %2570 = vmatprep.mubr.msk.bf16.mxu0 %vm3007_vm0, %v3006_v2  ;;  %v2966_v24 = vld [vmem:[%s4232_s0 + $0x350] ss:$12 sps:$4 sm:$0xff]  }
 0x121   :  { %v1985_v29 = vmax.f32 %v1633_v26, 0.0  ;;  %v1636_v30 = vadd.f32 %v3446_v49, %v1243_v27  ;;  %1454 = vmatmul.mubr.bf16.gmra.mrb[112].mxu1 %v2939_v23  ;;  %v3551_v48 = vpop.f32.mrb[24].mxu0 }
 0x122   :  { %1461 = vmatprep.mubr.bf16.mxu1 %v2940_v25  ;;  %v2464_v49 = vpop.f32.mrb[25].mxu0 }
 0x123   :  { %2076 = vst.msk [vmem:[%s4234_s3 + $0x10] sm:$0xff] %vm2073_vm3, %v1985_v29  ;;  %v1986_v34 = vmax.f32 %v1636_v30, 0.0  ;;  %v3560_v52 = vpop.f32.mrb[26].mxu0  ;;  %v2955_v29 = vld [vmem:[%s4232_s0 + $0x300] ss:$12 sps:$4 sm:$0xff]  }
 0x124   :  { %v1247_v36 = vpop.f32.mrb[8].mxu1  ;;  %v2465_v54 = vpop.f32.mrb[27].mxu0  ;;  %v2960_v49 = vld [vmem:[%s4232_s0 + $0x334] ss:$12 sps:$4 sm:$0xff]  }
 0x125   :  { %2077 = vst.msk [vmem:[%s4234_s3 + $0x18] sm:$0xff] %vm2073_vm3, %v1986_v34  ;;  %v1248_v38 = vadd.f32 %v3478_v61, %v1247_v36  ;;  %v1249_v39 = vpop.f32.mrb[9].mxu1 }
 0x126   :  { %v1250_v41 = vpop.f32.mrb[10].mxu1  ;;  %2571 = vmatmul.mubr.msk.bf16.gmra.mrb[132].mxu0 %vm1057_vm2, %v2958_v50 }
 0x127   :  { %v1641_v43 = vadd.f32 %v3457_v53, %v1248_v38  ;;  %v1251_v44 = vadd.f32 %v3478_v61, %v1250_v41  ;;  %v1252_v45 = vpop.f32.mrb[11].mxu1  ;;  %2574 = vmatprep.mubr.msk.bf16.mxu0 %vm3007_vm0, %v3006_v2  ;;  %v2970_v41 = vld [vmem:[%s4232_s0 + $0x368] ss:$12 sps:$4 sm:$0xff]  }
 0x129   :  { %v1987_v46 = vmax.f32 %v1641_v43, 0.0  ;;  %v1644_v47 = vadd.f32 %v3462_v56, %v1251_v44  ;;  %1462 = vmatmul.mubr.bf16.gmra.mrb[116].mxu1 %v2943_v40  ;;  %v3579_v5 = vpop.f32.mrb[28].mxu0 }
 0x12a   :  { %1469 = vmatprep.mubr.bf16.mxu1 %v2944_v42  ;;  %v2468_v6 = vpop.f32.mrb[29].mxu0 }
 0x12b   :  { %2078 = vst.msk [vmem:[%s4234_s3 + $0x20] sm:$0xff] %vm2073_vm3, %v1987_v46  ;;  %v1988_v51 = vmax.f32 %v1644_v47, 0.0  ;;  %v3588_v8 = vpop.f32.mrb[30].mxu0  ;;  %v2959_v46 = vld [vmem:[%s4232_s0 + $0x318] ss:$12 sps:$4 sm:$0xff]  }
 0x12c   :  { %v1255_v53 = vpop.f32.mrb[12].mxu1  ;;  %v2469_v10 = vpop.f32.mrb[31].mxu0  ;;  %v2964_v6 = vld [vmem:[%s4232_s0 + $0x34c] ss:$12 sps:$4 sm:$0xff]  }
 0x12d   :  { %2079 = vst.msk [vmem:[%s4234_s3 + $0x28] sm:$0xff] %vm2073_vm3, %v1988_v51  ;;  %v1256_v55 = vadd.f32 %v3478_v61, %v1255_v53  ;;  %v1257_v56 = vpop.f32.mrb[13].mxu1 }
 0x12e   :  { %v1258_v58 = vpop.f32.mrb[14].mxu1  ;;  %2575 = vmatmul.mubr.msk.bf16.gmra.mrb[136].mxu0 %vm1057_vm2, %v2962_v7 }
 0x12f   :  { %v1649_v62 = vadd.f32 %v3473_v60, %v1256_v55  ;;  %v1259_v63 = vadd.f32 %v3478_v61, %v1258_v58  ;;  %v1260_v1 = vpop.f32.mrb[15].mxu1  ;;  %2578 = vmatprep.mubr.msk.bf16.mxu0 %vm3007_vm0, %v3006_v2  ;;  %v2974_v58 = vld [vmem:[%s4232_s0 + $0x380] ss:$12 sps:$4 sm:$0xff]  }
 0x131   :  { %v1989_v3 = vmax.f32 %v1649_v62, 0.0  ;;  %v1652_v4 = vadd.f32 %v3483_v0, %v1259_v63  ;;  %1470 = vmatmul.mubr.bf16.gmra.mrb[120].mxu1 %v2947_v57  ;;  %v3607_v22 = vpop.f32.mrb[32].mxu0 }
 0x132   :  { %1477 = vmatprep.mubr.bf16.mxu1 %v2948_v59  ;;  %v2472_v23 = vpop.f32.mrb[33].mxu0 }
 0x133   :  { %2080 = vst.msk [vmem:[%s4234_s3 + $0x30] sm:$0xff] %vm2073_vm3, %v1989_v3  ;;  %v1990_v60 = vmax.f32 %v1652_v4, 0.0  ;;  %v3616_v25 = vpop.f32.mrb[34].mxu0  ;;  %v2963_v3 = vld [vmem:[%s4232_s0 + $0x330] ss:$12 sps:$4 sm:$0xff]  }
 0x134   :  { %v1263_v9 = vpop.f32.mrb[16].mxu1  ;;  %v2473_v27 = vpop.f32.mrb[35].mxu0  ;;  %v2968_v23 = vld [vmem:[%s4232_s0 + $0x364] ss:$12 sps:$4 sm:$0xff]  }
 0x135   :  { %2081 = vst.msk [vmem:[%s4234_s3 + $0x38] sm:$0xff] %vm2073_vm3, %v1990_v60  ;;  %v1264_v0 = vadd.f32 %v3478_v61, %v1263_v9  ;;  %v1265_v11 = vpop.f32.mrb[17].mxu1 }
 0x136   :  { %v1266_v13 = vpop.f32.mrb[18].mxu1  ;;  %2579 = vmatmul.mubr.msk.bf16.gmra.mrb[140].mxu0 %vm1057_vm2, %v2966_v24 }
 0x137   :  { %v1657_v16 = vadd.f32 %v3496_v14, %v1264_v0  ;;  %v1267_v17 = vadd.f32 %v3478_v61, %v1266_v13  ;;  %v1268_v19 = vpop.f32.mrb[19].mxu1  ;;  %2582 = vmatprep.mubr.msk.bf16.mxu0 %vm3007_vm0, %v3006_v2  ;;  %v2978_v13 = vld [vmem:[%s4232_s0 + $0x398] ss:$12 sps:$4 sm:$0xff]  }
 0x139   :  { %v1991_v20 = vmax.f32 %v1657_v16, 0.0  ;;  %v1660_v21 = vadd.f32 %v3505_v18, %v1267_v17  ;;  %1478 = vmatmul.mubr.bf16.gmra.mrb[124].mxu1 %v2951_v12  ;;  %v3635_v39 = vpop.f32.mrb[36].mxu0 }
 0x13a   :  { %1485 = vmatprep.mubr.bf16.mxu1 %v2952_v15  ;;  %v2476_v40 = vpop.f32.mrb[37].mxu0 }
 0x13b   :  { %2082 = vst.msk [vmem:[%s4234_s3 + $0x40] sm:$0xff] %vm2073_vm3, %v1991_v20  ;;  %v1992_v14 = vmax.f32 %v1660_v21, 0.0  ;;  %v3644_v42 = vpop.f32.mrb[38].mxu0  ;;  %v2967_v20 = vld [vmem:[%s4232_s0 + $0x348] ss:$12 sps:$4 sm:$0xff]  }
 0x13c   :  { %v1271_v26 = vpop.f32.mrb[20].mxu1  ;;  %v2477_v44 = vpop.f32.mrb[39].mxu0  ;;  %v2972_v40 = vld [vmem:[%s4232_s0 + $0x37c] ss:$12 sps:$4 sm:$0xff]  }
 0x13d   :  { %2083 = vst.msk [vmem:[%s4234_s3 + $0x48] sm:$0xff] %vm2073_vm3, %v1992_v14  ;;  %v1272_v18 = vadd.f32 %v3478_v61, %v1271_v26  ;;  %v1273_v28 = vpop.f32.mrb[21].mxu1 }
 0x13e   :  { %v1274_v30 = vpop.f32.mrb[22].mxu1  ;;  %2583 = vmatmul.mubr.msk.bf16.gmra.mrb[144].mxu0 %vm1057_vm2, %v2970_v41 }
 0x13f   :  { %v1665_v33 = vadd.f32 %v3523_v31, %v1272_v18  ;;  %v1275_v34 = vadd.f32 %v3478_v61, %v1274_v30  ;;  %v1276_v36 = vpop.f32.mrb[23].mxu1  ;;  %2586 = vmatprep.mubr.msk.bf16.mxu0 %vm3007_vm0, %v3006_v2  ;;  %v2982_v30 = vld [vmem:[%s4232_s0 + $0x3b0] ss:$12 sps:$4 sm:$0xff]  }
 0x141   :  { %v1993_v37 = vmax.f32 %v1665_v33, 0.0  ;;  %v1668_v38 = vadd.f32 %v3532_v35, %v1275_v34  ;;  %1486 = vmatmul.mubr.bf16.gmra.mrb[128].mxu1 %v2955_v29  ;;  %v3663_v56 = vpop.f32.mrb[40].mxu0 }
 0x142   :  { %1493 = vmatprep.mubr.bf16.mxu1 %v2956_v32  ;;  %v2480_v57 = vpop.f32.mrb[41].mxu0 }
 0x143   :  { %2084 = vst.msk [vmem:[%s4234_s3 + $0x50] sm:$0xff] %vm2073_vm3, %v1993_v37  ;;  %v1994_v31 = vmax.f32 %v1668_v38, 0.0  ;;  %v3672_v59 = vpop.f32.mrb[42].mxu0  ;;  %v2971_v37 = vld [vmem:[%s4232_s0 + $0x360] ss:$12 sps:$4 sm:$0xff]  }
 0x144   :  { %v1279_v43 = vpop.f32.mrb[24].mxu1  ;;  %v2481_v63 = vpop.f32.mrb[43].mxu0  ;;  %v2976_v57 = vld [vmem:[%s4232_s0 + $0x394] ss:$12 sps:$4 sm:$0xff]  }
 0x145   :  { %2085 = vst.msk [vmem:[%s4234_s3 + $0x58] sm:$0xff] %vm2073_vm3, %v1994_v31  ;;  %v1280_v35 = vadd.f32 %v3478_v61, %v1279_v43  ;;  %v1281_v45 = vpop.f32.mrb[25].mxu1 }
 0x146   :  { %v1282_v47 = vpop.f32.mrb[26].mxu1  ;;  %2587 = vmatmul.mubr.msk.bf16.gmra.mrb[148].mxu0 %vm1057_vm2, %v2974_v58 }
 0x147   :  { %v1673_v50 = vadd.f32 %v3551_v48, %v1280_v35  ;;  %v1283_v51 = vadd.f32 %v3478_v61, %v1282_v47  ;;  %v1284_v53 = vpop.f32.mrb[27].mxu1  ;;  %2590 = vmatprep.mubr.msk.bf16.mxu0 %vm3007_vm0, %v3006_v2  ;;  %v2986_v47 = vld [vmem:[%s4232_s0 + $0x3c8] ss:$12 sps:$4 sm:$0xff]  }
 0x149   :  { %v1995_v54 = vmax.f32 %v1673_v50, 0.0  ;;  %v1676_v55 = vadd.f32 %v3560_v52, %v1283_v51  ;;  %1494 = vmatmul.mubr.bf16.gmra.mrb[132].mxu1 %v2959_v46  ;;  %v3691_v11 = vpop.f32.mrb[44].mxu0 }
 0x14a   :  { %1501 = vmatprep.mubr.bf16.mxu1 %v2960_v49  ;;  %v2484_v12 = vpop.f32.mrb[45].mxu0 }
 0x14b   :  { %2086 = vst.msk [vmem:[%s4234_s3 + $0x60] sm:$0xff] %vm2073_vm3, %v1995_v54  ;;  %v1996_v48 = vmax.f32 %v1676_v55, 0.0  ;;  %v3700_v15 = vpop.f32.mrb[46].mxu0  ;;  %v2975_v54 = vld [vmem:[%s4232_s0 + $0x378] ss:$12 sps:$4 sm:$0xff]  }
 0x14c   :  { %v1287_v62 = vpop.f32.mrb[28].mxu1  ;;  %v2485_v17 = vpop.f32.mrb[47].mxu0  ;;  %v2980_v12 = vld [vmem:[%s4232_s0 + $0x3ac] ss:$12 sps:$4 sm:$0xff]  }
 0x14d   :  { %2087 = vst.msk [vmem:[%s4234_s3 + $0x68] sm:$0xff] %vm2073_vm3, %v1996_v48  ;;  %v1288_v52 = vadd.f32 %v3478_v61, %v1287_v62  ;;  %v1289_v1 = vpop.f32.mrb[29].mxu1 }
 0x14e   :  { %v1290_v4 = vpop.f32.mrb[30].mxu1  ;;  %2591 = vmatmul.mubr.msk.bf16.gmra.mrb[152].mxu0 %vm1057_vm2, %v2978_v13 }
 0x14f   :  { %v1681_v7 = vadd.f32 %v3579_v5, %v1288_v52  ;;  %v1291_v60 = vadd.f32 %v3478_v61, %v1290_v4  ;;  %v1292_v9 = vpop.f32.mrb[31].mxu1  ;;  %2594 = vmatprep.mubr.msk.bf16.mxu0 %vm3007_vm0, %v3006_v2  ;;  %v2990_v4 = vld [vmem:[%s4232_s0 + $0x3e0] ss:$12 sps:$4 sm:$0xff]  }
 0x151   :  { %v1997_v10 = vmax.f32 %v1681_v7, 0.0  ;;  %v1684_v0 = vadd.f32 %v3588_v8, %v1291_v60  ;;  %1502 = vmatmul.mubr.bf16.gmra.mrb[136].mxu1 %v2963_v3  ;;  %v3719_v28 = vpop.f32.mrb[48].mxu0 }
 0x152   :  { %1509 = vmatprep.mubr.bf16.mxu1 %v2964_v6  ;;  %v2488_v29 = vpop.f32.mrb[49].mxu0 }
 0x153   :  { %2088 = vst.msk [vmem:[%s4234_s3 + $0x70] sm:$0xff] %vm2073_vm3, %v1997_v10  ;;  %v1998_v5 = vmax.f32 %v1684_v0, 0.0  ;;  %v3728_v32 = vpop.f32.mrb[50].mxu0  ;;  %v2979_v10 = vld [vmem:[%s4232_s0 + $0x390] ss:$12 sps:$4 sm:$0xff]  }
 0x154   :  { %v1295_v16 = vpop.f32.mrb[32].mxu1  ;;  %v2489_v34 = vpop.f32.mrb[51].mxu0  ;;  %v2984_v29 = vld [vmem:[%s4232_s0 + $0x3c4] ss:$12 sps:$4 sm:$0xff]  }
 0x155   :  { %2089 = vst.msk [vmem:[%s4234_s3 + $0x78] sm:$0xff] %vm2073_vm3, %v1998_v5  ;;  %v1296_v8 = vadd.f32 %v3478_v61, %v1295_v16  ;;  %v1297_v19 = vpop.f32.mrb[33].mxu1 }
 0x156   :  { %v1298_v21 = vpop.f32.mrb[34].mxu1  ;;  %2595 = vmatmul.mubr.msk.bf16.gmra.mrb[156].mxu0 %vm1057_vm2, %v2982_v30 }
 0x157   :  { %v1689_v24 = vadd.f32 %v3607_v22, %v1296_v8  ;;  %v1299_v14 = vadd.f32 %v3478_v61, %v1298_v21  ;;  %v1300_v26 = vpop.f32.mrb[35].mxu1  ;;  %2598 = vmatprep.mubr.msk.bf16.mxu0 %vm3007_vm0, %v3006_v2  ;;  %v2994_v21 = vld [vmem:[%s4232_s0 + $0x3f8] ss:$12 sps:$4 sm:$0xff]  }
 0x159   :  { %v1999_v27 = vmax.f32 %v1689_v24, 0.0  ;;  %v1692_v18 = vadd.f32 %v3616_v25, %v1299_v14  ;;  %1510 = vmatmul.mubr.bf16.gmra.mrb[140].mxu1 %v2967_v20  ;;  %v3747_v45 = vpop.f32.mrb[52].mxu0 }
 0x15a   :  { %1517 = vmatprep.mubr.bf16.mxu1 %v2968_v23  ;;  %v2492_v46 = vpop.f32.mrb[53].mxu0 }
 0x15b   :  { %2090 = vst.msk [vmem:[%s4234_s3 + $0x80] sm:$0xff] %vm2073_vm3, %v1999_v27  ;;  %v2000_v22 = vmax.f32 %v1692_v18, 0.0  ;;  %v3756_v49 = vpop.f32.mrb[54].mxu0  ;;  %v2983_v27 = vld [vmem:[%s4232_s0 + $0x3a8] ss:$12 sps:$4 sm:$0xff]  }
 0x15c   :  { %v1303_v33 = vpop.f32.mrb[36].mxu1  ;;  %v2493_v51 = vpop.f32.mrb[55].mxu0  ;;  %v2988_v46 = vld [vmem:[%s4232_s0 + $0x3dc] ss:$12 sps:$4 sm:$0xff]  }
 0x15d   :  { %2091 = vst.msk [vmem:[%s4234_s3 + $0x88] sm:$0xff] %vm2073_vm3, %v2000_v22  ;;  %v1304_v25 = vadd.f32 %v3478_v61, %v1303_v33  ;;  %v1305_v36 = vpop.f32.mrb[37].mxu1 }
 0x15e   :  { %v1306_v38 = vpop.f32.mrb[38].mxu1  ;;  %2599 = vmatmul.mubr.msk.bf16.gmra.mrb[160].mxu0 %vm1057_vm2, %v2986_v47 }
 0x15f   :  { %v1697_v41 = vadd.f32 %v3635_v39, %v1304_v25  ;;  %v1307_v31 = vadd.f32 %v3478_v61, %v1306_v38  ;;  %v1308_v43 = vpop.f32.mrb[39].mxu1  ;;  %2602 = vmatprep.mubr.msk.bf16.mxu0 %vm3007_vm0, %v3006_v2  ;;  %v2998_v38 = vld [vmem:[%s4232_s0 + $0x410] ss:$12 sps:$4 sm:$0xff]  }
 0x161   :  { %v2001_v44 = vmax.f32 %v1697_v41, 0.0  ;;  %v1700_v35 = vadd.f32 %v3644_v42, %v1307_v31  ;;  %1518 = vmatmul.mubr.bf16.gmra.mrb[144].mxu1 %v2971_v37  ;;  %v3775_v1 = vpop.f32.mrb[56].mxu0 }
 0x162   :  { %1525 = vmatprep.mubr.bf16.mxu1 %v2972_v40  ;;  %v2496_v3 = vpop.f32.mrb[57].mxu0 }
 0x163   :  { %2092 = vst.msk [vmem:[%s4234_s3 + $0x90] sm:$0xff] %vm2073_vm3, %v2001_v44  ;;  %v2002_v39 = vmax.f32 %v1700_v35, 0.0  ;;  %v3784_v6 = vpop.f32.mrb[58].mxu0  ;;  %v2987_v44 = vld [vmem:[%s4232_s0 + $0x3c0] ss:$12 sps:$4 sm:$0xff]  }
 0x164   :  { %v1311_v50 = vpop.f32.mrb[40].mxu1  ;;  %v2497_v60 = vpop.f32.mrb[59].mxu0 }
 0x165   :  { %2093 = vst.msk [vmem:[%s4234_s3 + $0x98] sm:$0xff] %vm2073_vm3, %v2002_v39  ;;  %v1312_v42 = vadd.f32 %v3478_v61, %v1311_v50  ;;  %v1313_v53 = vpop.f32.mrb[41].mxu1 }
 0x166   :  { %v1314_v55 = vpop.f32.mrb[42].mxu1  ;;  %2603 = vmatmul.mubr.msk.bf16.gmra.mrb[164].mxu0 %vm1057_vm2, %v2990_v4 }
 0x167   :  { %v1705_v58 = vadd.f32 %v3663_v56, %v1312_v42  ;;  %v1315_v48 = vadd.f32 %v3478_v61, %v1314_v55  ;;  %v1316_v62 = vpop.f32.mrb[43].mxu1  ;;  %2606 = vmatprep.mubr.msk.bf16.mxu0 %vm3007_vm0, %v3006_v2  ;;  %v3002_v55 = vld [vmem:[%s4232_s0 + $0x428] ss:$12 sps:$4 sm:$0xff]  }
 0x168   :  { %v2991_v62 = vld [vmem:[%s4232_s0 + $0x3d8] ss:$12 sps:$4 sm:$0xff]  }
 0x169   :  { %v2003_v63 = vmax.f32 %v1705_v58, 0.0  ;;  %v1708_v52 = vadd.f32 %v3672_v59, %v1315_v48  ;;  %1526 = vmatmul.mubr.bf16.gmra.mrb[148].mxu1 %v2975_v54  ;;  %v3803_v19 = vpop.f32.mrb[60].mxu0 }
 0x16a   :  { %1533 = vmatprep.mubr.bf16.mxu1 %v2976_v57  ;;  %v2500_v20 = vpop.f32.mrb[61].mxu0 }
 0x16b   :  { %2094 = vst.msk [vmem:[%s4234_s3 + $0xa0] sm:$0xff] %vm2073_vm3, %v2003_v63  ;;  %v2004_v56 = vmax.f32 %v1708_v52, 0.0  ;;  %v3812_v23 = vpop.f32.mrb[62].mxu0  ;;  %v2992_v52 = vld [vmem:[%s4232_s0 + $0x3f4] ss:$12 sps:$4 sm:$0xff]  }
 0x16c   :  { %v1319_v7 = vpop.f32.mrb[44].mxu1  ;;  %v2501_v14 = vpop.f32.mrb[63].mxu0 }
 0x16d   :  { %2095 = vst.msk [vmem:[%s4234_s3 + $0xa8] sm:$0xff] %vm2073_vm3, %v2004_v56  ;;  %v1320_v59 = vadd.f32 %v3478_v61, %v1319_v7  ;;  %v1321_v9 = vpop.f32.mrb[45].mxu1 }
 0x16e   :  { %v1322_v0 = vpop.f32.mrb[46].mxu1  ;;  %2607 = vmatmul.mubr.msk.bf16.gmra.mrb[168].mxu0 %vm1057_vm2, %v2994_v21 }
 0x16f   :  { %v1713_v13 = vadd.f32 %v3691_v11, %v1320_v59  ;;  %v1323_v5 = vadd.f32 %v3478_v61, %v1322_v0  ;;  %v1324_v16 = vpop.f32.mrb[47].mxu1  ;;  %2610 = vmatprep.mubr.msk.bf16.mxu0 %vm3007_vm0, %v3006_v2 }
 0x171   :  { %v2005_v17 = vmax.f32 %v1713_v13, 0.0  ;;  %v1716_v8 = vadd.f32 %v3700_v15, %v1323_v5  ;;  %1534 = vmatmul.mubr.bf16.gmra.mrb[152].mxu1 %v2979_v10  ;;  %v3831_v36 = vpop.f32.mrb[64].mxu0  ;;  %v2995_v5 = vld [vmem:[%s4232_s0 + $0x3f0] ss:$12 sps:$4 sm:$0xff]  }
 0x172   :  { %1541 = vmatprep.mubr.bf16.mxu1 %v2980_v12  ;;  %v2504_v37 = vpop.f32.mrb[65].mxu0 }
 0x173   :  { %2096 = vst.msk [vmem:[%s4234_s3 + $0xb0] sm:$0xff] %vm2073_vm3, %v2005_v17  ;;  %v2006_v11 = vmax.f32 %v1716_v8, 0.0  ;;  %v3840_v40 = vpop.f32.mrb[66].mxu0  ;;  %v2996_v17 = vld [vmem:[%s4232_s0 + $0x40c] ss:$12 sps:$4 sm:$0xff]  }
 0x174   :  { %v1327_v24 = vpop.f32.mrb[48].mxu1  ;;  %v2505_v31 = vpop.f32.mrb[67].mxu0 }
 0x175   :  { %2097 = vst.msk [vmem:[%s4234_s3 + $0xb8] sm:$0xff] %vm2073_vm3, %v2006_v11  ;;  %v1328_v15 = vadd.f32 %v3478_v61, %v1327_v24  ;;  %v1329_v26 = vpop.f32.mrb[49].mxu1 }
 0x176   :  { %v1330_v18 = vpop.f32.mrb[50].mxu1  ;;  %2611 = vmatmul.mubr.msk.bf16.gmra.mrb[172].mxu0 %vm1057_vm2, %v2998_v38 }
 0x177   :  { %v1721_v30 = vadd.f32 %v3719_v28, %v1328_v15  ;;  %v1331_v22 = vadd.f32 %v3478_v61, %v1330_v18  ;;  %v1332_v33 = vpop.f32.mrb[51].mxu1  ;;  %2614 = vmatprep.mubr.msk.bf16.mxu0 %vm3007_vm0, %v3006_v2 }
 0x178   :  { %v3000_v33 = vld [vmem:[%s4232_s0 + $0x424] ss:$12 sps:$4 sm:$0xff]  }
 0x179   :  { %v2007_v34 = vmax.f32 %v1721_v30, 0.0  ;;  %v1724_v25 = vadd.f32 %v3728_v32, %v1331_v22  ;;  %1542 = vmatmul.mubr.bf16.gmra.mrb[156].mxu1 %v2983_v27  ;;  %v3859_v53 = vpop.f32.mrb[68].mxu0  ;;  %v2999_v30 = vld [vmem:[%s4232_s0 + $0x408] ss:$12 sps:$4 sm:$0xff]  }
 0x17a   :  { %1549 = vmatprep.mubr.bf16.mxu1 %v2984_v29  ;;  %v2508_v54 = vpop.f32.mrb[69].mxu0 }
 0x17b   :  { %2098 = vst.msk [vmem:[%s4234_s3 + $0xc0] sm:$0xff] %vm2073_vm3, %v2007_v34  ;;  %v2008_v28 = vmax.f32 %v1724_v25, 0.0  ;;  %v3868_v57 = vpop.f32.mrb[70].mxu0 }
 0x17c   :  { %v1335_v41 = vpop.f32.mrb[52].mxu1  ;;  %v2509_v58 = vpop.f32.mrb[71].mxu0 }
 0x17d   :  { %2099 = vst.msk [vmem:[%s4234_s3 + $0xc8] sm:$0xff] %vm2073_vm3, %v2008_v28  ;;  %v1336_v32 = vadd.f32 %v3478_v61, %v1335_v41  ;;  %v1337_v43 = vpop.f32.mrb[53].mxu1 }
 0x17e   :  { %v1338_v35 = vpop.f32.mrb[54].mxu1  ;;  %2615 = vmatmul.mubr.msk.bf16.gmra.mrb[176].mxu0 %vm1057_vm2, %v3002_v55 }
 0x17f   :  { %v1729_v47 = vadd.f32 %v3747_v45, %v1336_v32  ;;  %v1339_v39 = vadd.f32 %v3478_v61, %v1338_v35  ;;  %v1340_v50 = vpop.f32.mrb[55].mxu1 }
 0x181   :  { %v2009_v51 = vmax.f32 %v1729_v47, 0.0  ;;  %v1732_v42 = vadd.f32 %v3756_v49, %v1339_v39  ;;  %1550 = vmatmul.mubr.bf16.gmra.mrb[160].mxu1 %v2987_v44  ;;  %v3885_v59 = vpop.f32.mrb[72].mxu0 }
 0x182   :  { %1557 = vmatprep.mubr.bf16.mxu1 %v2988_v46  ;;  %v2512_v9 = vpop.f32.mrb[73].mxu0  ;;  %v3003_v46 = vld [vmem:[%s4232_s0 + $0x420] ss:$12 sps:$4 sm:$0xff]  }
 0x183   :  { %2100 = vst.msk [vmem:[%s4234_s3 + $0xd0] sm:$0xff] %vm2073_vm3, %v2009_v51  ;;  %v2010_v45 = vmax.f32 %v1732_v42, 0.0  ;;  %v3891_v0 = vpop.f32.mrb[74].mxu0 }
 0x184   :  { %v1343_v2 = vpop.f32.mrb[56].mxu1  ;;  %v2513_v12 = vpop.f32.mrb[75].mxu0 }
 0x185   :  { %2101 = vst.msk [vmem:[%s4234_s3 + $0xd8] sm:$0xff] %vm2073_vm3, %v2010_v45  ;;  %v1344_v49 = vadd.f32 %v3478_v61, %v1343_v2  ;;  %v1345_v48 = vpop.f32.mrb[57].mxu1 }
 0x186   :  { %v1346_v63 = vpop.f32.mrb[58].mxu1 }
 0x187   :  { %v1737_v3 = vadd.f32 %v3775_v1, %v1344_v49  ;;  %v1347_v4 = vadd.f32 %v3478_v61, %v1346_v63  ;;  %v1348_v56 = vpop.f32.mrb[59].mxu1 }
 0x189   :  { %v2011_v7 = vmax.f32 %v1737_v3, 0.0  ;;  %v1740_v60 = vadd.f32 %v3784_v6, %v1347_v4  ;;  %1558 = vmatmul.mubr.bf16.gmra.mrb[164].mxu1 %v2991_v62  ;;  %v3907_v14 = vpop.f32.mrb[76].mxu0 }
 0x18a   :  { %1565 = vmatprep.mubr.bf16.mxu1 %v2992_v52  ;;  %v2516_v15 = vpop.f32.mrb[77].mxu0 }
 0x18b   :  { %2102 = vst.msk [vmem:[%s4234_s3 + $0xe0] sm:$0xff] %vm2073_vm3, %v2011_v7  ;;  %v2012_v10 = vmax.f32 %v1740_v60, 0.0  ;;  %v3913_v27 = vpop.f32.mrb[78].mxu0 }
 0x18c   :  { %v1351_v1 = vpop.f32.mrb[60].mxu1  ;;  %v2517_v18 = vpop.f32.mrb[79].mxu0 }
 0x18d   :  { %2103 = vst.msk [vmem:[%s4234_s3 + $0xe8] sm:$0xff] %vm2073_vm3, %v2012_v10  ;;  %v1352_v6 = vadd.f32 %v3478_v61, %v1351_v1  ;;  %v1353_v13 = vpop.f32.mrb[61].mxu1 }
 0x18e   :  { %v1354_v16 = vpop.f32.mrb[62].mxu1 }
 0x18f   :  { %v1745_v8 = vadd.f32 %v3803_v19, %v1352_v6  ;;  %v1355_v20 = vadd.f32 %v3478_v61, %v1354_v16  ;;  %v1356_v21 = vpop.f32.mrb[63].mxu1 }
 0x191   :  { %v2013_v11 = vmax.f32 %v1745_v8, 0.0  ;;  %v1748_v24 = vadd.f32 %v3812_v23, %v1355_v20  ;;  %1566 = vmatmul.mubr.bf16.gmra.mrb[168].mxu1 %v2995_v5  ;;  %v1784_v41 = vpop.f32.mrb[80].mxu0 }
 0x192   :  { %1573 = vmatprep.mubr.bf16.mxu1 %v2996_v17  ;;  %v2520_v31 = vpop.f32.mrb[81].mxu0 }
 0x193   :  { %2104 = vst.msk [vmem:[%s4234_s3 + $0xf0] sm:$0xff] %vm2073_vm3, %v2013_v11  ;;  %v2014_v26 = vmax.f32 %v1748_v24, 0.0  ;;  %v1787_v43 = vpop.f32.mrb[82].mxu0 }
 0x194   :  { %v1359_v19 = vpop.f32.mrb[64].mxu1  ;;  %v2521_v35 = vpop.f32.mrb[83].mxu0 }
 0x195   :  { %2105 = vst.msk [vmem:[%s4234_s3 + $0xf8] sm:$0xff] %vm2073_vm3, %v2014_v26  ;;  %v1360_v23 = vadd.f32 %v3478_v61, %v1359_v19  ;;  %v1361_v29 = vpop.f32.mrb[65].mxu1 }
 0x196   :  { %v1362_v22 = vpop.f32.mrb[66].mxu1 }
 0x197   :  { %v1753_v34 = vadd.f32 %v3831_v36, %v1360_v23  ;;  %v1363_v25 = vadd.f32 %v3478_v61, %v1362_v22  ;;  %v1364_v37 = vpop.f32.mrb[67].mxu1 }
 0x199   :  { %v2015_v38 = vmax.f32 %v1753_v34, 0.0  ;;  %v1756_v28 = vadd.f32 %v3840_v40, %v1363_v25  ;;  %1574 = vmatmul.mubr.bf16.gmra.mrb[172].mxu1 %v2999_v30  ;;  %v1792_v55 = vpop.f32.mrb[84].mxu0 }
 0x19a   :  { %1581 = vmatprep.mubr.bf16.mxu1 %v3000_v33  ;;  %v2524_v45 = vpop.f32.mrb[85].mxu0 }
 0x19b   :  { %2106 = vst.msk [vmem:[%s4234_s3 + $0x100] sm:$0xff] %vm2073_vm3, %v2015_v38  ;;  %v2016_v32 = vmax.f32 %v1756_v28, 0.0  ;;  %v1795_v58 = vpop.f32.mrb[86].mxu0 }
 0x19c   :  { %v1367_v44 = vpop.f32.mrb[68].mxu1  ;;  %v2525_v48 = vpop.f32.mrb[87].mxu0 }
 0x19d   :  { %2107 = vst.msk [vmem:[%s4234_s3 + $0x108] sm:$0xff] %vm2073_vm3, %v2016_v32  ;;  %v1368_v36 = vadd.f32 %v3478_v61, %v1367_v44  ;;  %v1369_v40 = vpop.f32.mrb[69].mxu1 }
 0x19e   :  { %v1370_v47 = vpop.f32.mrb[70].mxu1 }
 0x19f   :  { %v1761_v39 = vadd.f32 %v3859_v53, %v1368_v36  ;;  %v1371_v50 = vadd.f32 %v3478_v61, %v1370_v47  ;;  %v1372_v51 = vpop.f32.mrb[71].mxu1 }
 0x1a1   :  { %v2017_v42 = vmax.f32 %v1761_v39, 0.0  ;;  %v1764_v54 = vadd.f32 %v3868_v57, %v1371_v50  ;;  %1582 = vmatmul.mubr.bf16.gmra.mrb[176].mxu1 %v3003_v46  ;;  %v1800_v7 = vpop.f32.mrb[88].mxu0 }
 0x1a2   :  { %v2528_v60 = vpop.f32.mrb[89].mxu0 }
 0x1a3   :  { %2108 = vst.msk [vmem:[%s4234_s3 + $0x110] sm:$0xff] %vm2073_vm3, %v2017_v42  ;;  %v2018_v2 = vmax.f32 %v1764_v54, 0.0  ;;  %v1803_v10 = vpop.f32.mrb[90].mxu0 }
 0x1a4   :  { %v1375_v49 = vpop.f32.mrb[72].mxu1  ;;  %v2529_v12 = vpop.f32.mrb[91].mxu0 }
 0x1a5   :  { %2109 = vst.msk [vmem:[%s4234_s3 + $0x118] sm:$0xff] %vm2073_vm3, %v2018_v2  ;;  %v1376_v53 = vadd.f32 %v3478_v61, %v1375_v49  ;;  %v1377_v57 = vpop.f32.mrb[73].mxu1 }
 0x1a6   :  { %v1378_v62 = vpop.f32.mrb[74].mxu1 }
 0x1a7   :  { %v1769_v63 = vadd.f32 %v3885_v59, %v1376_v53  ;;  %v1379_v52 = vadd.f32 %v3478_v61, %v1378_v62  ;;  %v1380_v3 = vpop.f32.mrb[75].mxu1 }
 0x1a9   :  { %v2019_v4 = vmax.f32 %v1769_v63, 0.0  ;;  %v1772_v56 = vadd.f32 %v3891_v0, %v1379_v52  ;;  %v1808_v20 = vpop.f32.mrb[92].mxu0 }
 0x1aa   :  { %v2532_v21 = vpop.f32.mrb[93].mxu0 }
 0x1ab   :  { %2110 = vst.msk [vmem:[%s4234_s3 + $0x120] sm:$0xff] %vm2073_vm3, %v2019_v4  ;;  %v2020_v9 = vmax.f32 %v1772_v56, 0.0  ;;  %v1811_v24 = vpop.f32.mrb[94].mxu0 }
 0x1ac   :  { %v1383_v1 = vpop.f32.mrb[76].mxu1  ;;  %v2533_v26 = vpop.f32.mrb[95].mxu0 }
 0x1ad   :  { %2111 = vst.msk [vmem:[%s4234_s3 + $0x128] sm:$0xff] %vm2073_vm3, %v2020_v9  ;;  %v1384_v59 = vadd.f32 %v3478_v61, %v1383_v1  ;;  %v1385_v6 = vpop.f32.mrb[77].mxu1 }
 0x1ae   :  { %v1386_v0 = vpop.f32.mrb[78].mxu1 }
 0x1af   :  { %v1777_v13 = vadd.f32 %v3907_v14, %v1384_v59  ;;  %v1387_v5 = vadd.f32 %v3478_v61, %v1386_v0  ;;  %v1388_v16 = vpop.f32.mrb[79].mxu1 }
 0x1b1   :  { %v2021_v17 = vmax.f32 %v1777_v13, 0.0  ;;  %v1780_v8 = vadd.f32 %v3913_v27, %v1387_v5  ;;  %v1816_v33 = vpop.f32.mrb[96].mxu0 }
 0x1b2   :  { %v2536_v34 = vpop.f32.mrb[97].mxu0 }
 0x1b3   :  { %2112 = vst.msk [vmem:[%s4234_s3 + $0x130] sm:$0xff] %vm2073_vm3, %v2021_v17  ;;  %v2022_v11 = vmax.f32 %v1780_v8, 0.0  ;;  %v1819_v37 = vpop.f32.mrb[98].mxu0 }
 0x1b4   :  { %v1391_v15 = vpop.f32.mrb[80].mxu1  ;;  %v2537_v28 = vpop.f32.mrb[99].mxu0 }
 0x1b5   :  { %2113 = vst.msk [vmem:[%s4234_s3 + $0x138] sm:$0xff] %vm2073_vm3, %v2022_v11  ;;  %v1392_v14 = vadd.f32 %v3478_v61, %v1391_v15  ;;  %v1393_v19 = vpop.f32.mrb[81].mxu1 }
 0x1b6   :  { %v1394_v27 = vpop.f32.mrb[82].mxu1 }
 0x1b7   :  { %v1785_v18 = vadd.f32 %v1784_v41, %v1392_v14  ;;  %v1395_v23 = vadd.f32 %v3478_v61, %v1394_v27  ;;  %v1396_v29 = vpop.f32.mrb[83].mxu1 }
 0x1b9   :  { %v2023_v30 = vmax.f32 %v1785_v18, 0.0  ;;  %v1788_v22 = vadd.f32 %v1787_v43, %v1395_v23  ;;  %v1824_v46 = vpop.f32.mrb[100].mxu0 }
 0x1ba   :  { %v2540_v47 = vpop.f32.mrb[101].mxu0 }
 0x1bb   :  { %2114 = vst.msk [vmem:[%s4234_s3 + $0x140] sm:$0xff] %vm2073_vm3, %v2023_v30  ;;  %v2024_v25 = vmax.f32 %v1788_v22, 0.0  ;;  %v1827_v50 = vpop.f32.mrb[102].mxu0 }
 0x1bc   :  { %v1399_v38 = vpop.f32.mrb[84].mxu1  ;;  %v2541_v42 = vpop.f32.mrb[103].mxu0 }
 0x1bd   :  { %2115 = vst.msk [vmem:[%s4234_s3 + $0x148] sm:$0xff] %vm2073_vm3, %v2024_v25  ;;  %v1400_v41 = vadd.f32 %v3478_v61, %v1399_v38  ;;  %v1401_v31 = vpop.f32.mrb[85].mxu1 }
 0x1be   :  { %v1402_v32 = vpop.f32.mrb[86].mxu1 }
 0x1bf   :  { %v1793_v43 = vadd.f32 %v1792_v55, %v1400_v41  ;;  %v1403_v44 = vadd.f32 %v3478_v61, %v1402_v32  ;;  %v1404_v35 = vpop.f32.mrb[87].mxu1 }
 0x1c1   :  { %v2025_v36 = vmax.f32 %v1793_v43, 0.0  ;;  %v1796_v40 = vadd.f32 %v1795_v58, %v1403_v44  ;;  %v1832_v57 = vpop.f32.mrb[104].mxu0 }
 0x1c2   :  { %v2544_v62 = vpop.f32.mrb[105].mxu0 }
 0x1c3   :  { %2116 = vst.msk [vmem:[%s4234_s3 + $0x150] sm:$0xff] %vm2073_vm3, %v2025_v36  ;;  %v2026_v39 = vmax.f32 %v1796_v40, 0.0  ;;  %v1835_v52 = vpop.f32.mrb[106].mxu0 }
 0x1c4   :  { %v1407_v51 = vpop.f32.mrb[88].mxu1  ;;  %v2545_v4 = vpop.f32.mrb[107].mxu0 }
 0x1c5   :  { %2117 = vst.msk [vmem:[%s4234_s3 + $0x158] sm:$0xff] %vm2073_vm3, %v2026_v39  ;;  %v1408_v54 = vadd.f32 %v3478_v61, %v1407_v51  ;;  %v1409_v55 = vpop.f32.mrb[89].mxu1 }
 0x1c6   :  { %v1410_v45 = vpop.f32.mrb[90].mxu1 }
 0x1c7   :  { %v1801_v2 = vadd.f32 %v1800_v7, %v1408_v54  ;;  %v1411_v58 = vadd.f32 %v3478_v61, %v1410_v45  ;;  %v1412_v49 = vpop.f32.mrb[91].mxu1 }
 0x1c9   :  { %v2027_v48 = vmax.f32 %v1801_v2, 0.0  ;;  %v1804_v53 = vadd.f32 %v1803_v10, %v1411_v58  ;;  %v1840_v6 = vpop.f32.mrb[108].mxu0 }
 0x1ca   :  { %v2548_v0 = vpop.f32.mrb[109].mxu0 }
 0x1cb   :  { %2118 = vst.msk [vmem:[%s4234_s3 + $0x160] sm:$0xff] %vm2073_vm3, %v2027_v48  ;;  %v2028_v63 = vmax.f32 %v1804_v53, 0.0  ;;  %v1843_v5 = vpop.f32.mrb[110].mxu0 }
 0x1cc   :  { %v1415_v3 = vpop.f32.mrb[92].mxu1  ;;  %v2549_v17 = vpop.f32.mrb[111].mxu0 }
 0x1cd   :  { %2119 = vst.msk [vmem:[%s4234_s3 + $0x168] sm:$0xff] %vm2073_vm3, %v2028_v63  ;;  %v1416_v56 = vadd.f32 %v3478_v61, %v1415_v3  ;;  %v1417_v7 = vpop.f32.mrb[93].mxu1 }
 0x1ce   :  { %v1418_v60 = vpop.f32.mrb[94].mxu1 }
 0x1cf   :  { %v1809_v9 = vadd.f32 %v1808_v20, %v1416_v56  ;;  %v1419_v10 = vadd.f32 %v3478_v61, %v1418_v60  ;;  %v1420_v1 = vpop.f32.mrb[95].mxu1 }
 0x1d1   :  { %v2029_v12 = vmax.f32 %v1809_v9, 0.0  ;;  %v1812_v59 = vadd.f32 %v1811_v24, %v1419_v10  ;;  %v1848_v19 = vpop.f32.mrb[112].mxu0 }
 0x1d2   :  { %v2552_v27 = vpop.f32.mrb[113].mxu0 }
 0x1d3   :  { %2120 = vst.msk [vmem:[%s4234_s3 + $0x170] sm:$0xff] %vm2073_vm3, %v2029_v12  ;;  %v2030_v13 = vmax.f32 %v1812_v59, 0.0  ;;  %v1851_v23 = vpop.f32.mrb[114].mxu0 }
 0x1d4   :  { %v1423_v16 = vpop.f32.mrb[96].mxu1  ;;  %v2553_v30 = vpop.f32.mrb[115].mxu0 }
 0x1d5   :  { %2121 = vst.msk [vmem:[%s4234_s3 + $0x178] sm:$0xff] %vm2073_vm3, %v2030_v13  ;;  %v1424_v8 = vadd.f32 %v3478_v61, %v1423_v16  ;;  %v1425_v20 = vpop.f32.mrb[97].mxu1 }
 0x1d6   :  { %v1426_v21 = vpop.f32.mrb[98].mxu1 }
 0x1d7   :  { %v1817_v11 = vadd.f32 %v1816_v33, %v1424_v8  ;;  %v1427_v24 = vadd.f32 %v3478_v61, %v1426_v21  ;;  %v1428_v15 = vpop.f32.mrb[99].mxu1  ;;  %v4029_v61 = vld [vmem:[%s4233_s2] ss:$0 sm:$0xff] }
 0x1d9   :  { %v2031_v26 = vmax.f32 %v1817_v11, 0.0  ;;  %v1820_v14 = vadd.f32 %v1819_v37, %v1427_v24  ;;  %v1856_v31 = vpop.f32.mrb[116].mxu0 }
 0x1da   :  { %v2556_v32 = vpop.f32.mrb[117].mxu0 }
 0x1db   :  { %2122 = vst.msk [vmem:[%s4234_s3 + $0x180] sm:$0xff] %vm2073_vm3, %v2031_v26  ;;  %v2032_v18 = vmax.f32 %v1820_v14, 0.0  ;;  %v1859_v44 = vpop.f32.mrb[118].mxu0 }
 0x1dc   :  { %v1431_v29 = vpop.f32.mrb[100].mxu1  ;;  %v2557_v36 = vpop.f32.mrb[119].mxu0 }
 0x1dd   :  { %2123 = vst.msk [vmem:[%s4234_s3 + $0x188] sm:$0xff] %vm2073_vm3, %v2032_v18  ;;  %v1432_v22 = vadd.f32 %v4029_v61, %v1431_v29  ;;  %v1433_v33 = vpop.f32.mrb[101].mxu1 }
 0x1de   :  { %v1434_v34 = vpop.f32.mrb[102].mxu1 }
 0x1df   :  { %v1825_v25 = vadd.f32 %v1824_v46, %v1432_v22  ;;  %v1435_v37 = vadd.f32 %v4029_v61, %v1434_v34  ;;  %v1436_v38 = vpop.f32.mrb[103].mxu1 }
 0x1e1   :  { %v2033_v28 = vmax.f32 %v1825_v25, 0.0  ;;  %v1828_v41 = vadd.f32 %v1827_v50, %v1435_v37  ;;  %v1864_v55 = vpop.f32.mrb[120].mxu0 }
 0x1e2   :  { %v2560_v45 = vpop.f32.mrb[121].mxu0 }
 0x1e3   :  { %2124 = vst.msk [vmem:[%s4234_s3 + $0x190] sm:$0xff] %vm2073_vm3, %v2033_v28  ;;  %v2034_v43 = vmax.f32 %v1828_v41, 0.0  ;;  %v1867_v58 = vpop.f32.mrb[122].mxu0 }
 0x1e4   :  { %v1439_v35 = vpop.f32.mrb[104].mxu1  ;;  %v2561_v48 = vpop.f32.mrb[123].mxu0 }
 0x1e5   :  { %2125 = vst.msk [vmem:[%s4234_s3 + $0x198] sm:$0xff] %vm2073_vm3, %v2034_v43  ;;  %v1440_v40 = vadd.f32 %v4029_v61, %v1439_v35  ;;  %v1441_v46 = vpop.f32.mrb[105].mxu1 }
 0x1e6   :  { %v1442_v47 = vpop.f32.mrb[106].mxu1 }
 0x1e7   :  { %v1833_v39 = vadd.f32 %v1832_v57, %v1440_v40  ;;  %v1443_v50 = vadd.f32 %v4029_v61, %v1442_v47  ;;  %v1444_v51 = vpop.f32.mrb[107].mxu1 }
 0x1e9   :  { %v2035_v42 = vmax.f32 %v1833_v39, 0.0  ;;  %v1836_v54 = vadd.f32 %v1835_v52, %v1443_v50  ;;  %v1872_v7 = vpop.f32.mrb[124].mxu0 }
 0x1ea   :  { %v2564_v60 = vpop.f32.mrb[125].mxu0 }
 0x1eb   :  { %2126 = vst.msk [vmem:[%s4234_s3 + $0x1a0] sm:$0xff] %vm2073_vm3, %v2035_v42  ;;  %v2036_v2 = vmax.f32 %v1836_v54, 0.0  ;;  %v1875_v10 = vpop.f32.mrb[126].mxu0 }
 0x1ec   :  { %v1447_v49 = vpop.f32.mrb[108].mxu1  ;;  %v2565_v12 = vpop.f32.mrb[127].mxu0 }
 0x1ed   :  { %2127 = vst.msk [vmem:[%s4234_s3 + $0x1a8] sm:$0xff] %vm2073_vm3, %v2036_v2  ;;  %v1448_v53 = vadd.f32 %v4029_v61, %v1447_v49  ;;  %v1449_v57 = vpop.f32.mrb[109].mxu1 }
 0x1ee   :  { %v1450_v62 = vpop.f32.mrb[110].mxu1 }
 0x1ef   :  { %v1841_v63 = vadd.f32 %v1840_v6, %v1448_v53  ;;  %v1451_v52 = vadd.f32 %v4029_v61, %v1450_v62  ;;  %v1452_v3 = vpop.f32.mrb[111].mxu1 }
 0x1f1   :  { %v2037_v4 = vmax.f32 %v1841_v63, 0.0  ;;  %v1844_v56 = vadd.f32 %v1843_v5, %v1451_v52  ;;  %v1880_v20 = vpop.f32.mrb[128].mxu0 }
 0x1f2   :  { %v2568_v21 = vpop.f32.mrb[129].mxu0 }
 0x1f3   :  { %2128 = vst.msk [vmem:[%s4234_s3 + $0x1b0] sm:$0xff] %vm2073_vm3, %v2037_v4  ;;  %v2038_v9 = vmax.f32 %v1844_v56, 0.0  ;;  %v1883_v24 = vpop.f32.mrb[130].mxu0 }
 0x1f4   :  { %v1455_v1 = vpop.f32.mrb[112].mxu1  ;;  %v2569_v26 = vpop.f32.mrb[131].mxu0 }
 0x1f5   :  { %2129 = vst.msk [vmem:[%s4234_s3 + $0x1b8] sm:$0xff] %vm2073_vm3, %v2038_v9  ;;  %v1456_v59 = vadd.f32 %v4029_v61, %v1455_v1  ;;  %v1457_v6 = vpop.f32.mrb[113].mxu1 }
 0x1f6   :  { %v1458_v0 = vpop.f32.mrb[114].mxu1 }
 0x1f7   :  { %v1849_v13 = vadd.f32 %v1848_v19, %v1456_v59  ;;  %v1459_v5 = vadd.f32 %v4029_v61, %v1458_v0  ;;  %v1460_v16 = vpop.f32.mrb[115].mxu1 }
 0x1f9   :  { %v2039_v17 = vmax.f32 %v1849_v13, 0.0  ;;  %v1852_v8 = vadd.f32 %v1851_v23, %v1459_v5  ;;  %v1888_v33 = vpop.f32.mrb[132].mxu0 }
 0x1fa   :  { %v2572_v34 = vpop.f32.mrb[133].mxu0 }
 0x1fb   :  { %2130 = vst.msk [vmem:[%s4234_s3 + $0x1c0] sm:$0xff] %vm2073_vm3, %v2039_v17  ;;  %v2040_v11 = vmax.f32 %v1852_v8, 0.0  ;;  %v1891_v37 = vpop.f32.mrb[134].mxu0 }
 0x1fc   :  { %v1463_v15 = vpop.f32.mrb[116].mxu1  ;;  %v2573_v28 = vpop.f32.mrb[135].mxu0 }
 0x1fd   :  { %2131 = vst.msk [vmem:[%s4234_s3 + $0x1c8] sm:$0xff] %vm2073_vm3, %v2040_v11  ;;  %v1464_v14 = vadd.f32 %v4029_v61, %v1463_v15  ;;  %v1465_v19 = vpop.f32.mrb[117].mxu1 }
 0x1fe   :  { %v1466_v27 = vpop.f32.mrb[118].mxu1 }
 0x1ff   :  { %v1857_v18 = vadd.f32 %v1856_v31, %v1464_v14  ;;  %v1467_v23 = vadd.f32 %v4029_v61, %v1466_v27  ;;  %v1468_v29 = vpop.f32.mrb[119].mxu1 }
 0x201   :  { %v2041_v30 = vmax.f32 %v1857_v18, 0.0  ;;  %v1860_v22 = vadd.f32 %v1859_v44, %v1467_v23  ;;  %v1896_v46 = vpop.f32.mrb[136].mxu0 }
 0x202   :  { %v2576_v47 = vpop.f32.mrb[137].mxu0 }
 0x203   :  { %2132 = vst.msk [vmem:[%s4234_s3 + $0x1d0] sm:$0xff] %vm2073_vm3, %v2041_v30  ;;  %v2042_v25 = vmax.f32 %v1860_v22, 0.0  ;;  %v1899_v50 = vpop.f32.mrb[138].mxu0 }
 0x204   :  { %v1471_v38 = vpop.f32.mrb[120].mxu1  ;;  %v2577_v42 = vpop.f32.mrb[139].mxu0 }
 0x205   :  { %2133 = vst.msk [vmem:[%s4234_s3 + $0x1d8] sm:$0xff] %vm2073_vm3, %v2042_v25  ;;  %v1472_v41 = vadd.f32 %v4029_v61, %v1471_v38  ;;  %v1473_v31 = vpop.f32.mrb[121].mxu1 }
 0x206   :  { %v1474_v32 = vpop.f32.mrb[122].mxu1 }
 0x207   :  { %v1865_v43 = vadd.f32 %v1864_v55, %v1472_v41  ;;  %v1475_v44 = vadd.f32 %v4029_v61, %v1474_v32  ;;  %v1476_v35 = vpop.f32.mrb[123].mxu1 }
 0x209   :  { %v2043_v36 = vmax.f32 %v1865_v43, 0.0  ;;  %v1868_v40 = vadd.f32 %v1867_v58, %v1475_v44  ;;  %v1904_v57 = vpop.f32.mrb[140].mxu0 }
 0x20a   :  { %v2580_v62 = vpop.f32.mrb[141].mxu0 }
 0x20b   :  { %2134 = vst.msk [vmem:[%s4234_s3 + $0x1e0] sm:$0xff] %vm2073_vm3, %v2043_v36  ;;  %v2044_v39 = vmax.f32 %v1868_v40, 0.0  ;;  %v1907_v52 = vpop.f32.mrb[142].mxu0 }
 0x20c   :  { %v1479_v51 = vpop.f32.mrb[124].mxu1  ;;  %v2581_v4 = vpop.f32.mrb[143].mxu0 }
 0x20d   :  { %2135 = vst.msk [vmem:[%s4234_s3 + $0x1e8] sm:$0xff] %vm2073_vm3, %v2044_v39  ;;  %v1480_v54 = vadd.f32 %v4029_v61, %v1479_v51  ;;  %v1481_v55 = vpop.f32.mrb[125].mxu1 }
 0x20e   :  { %v1482_v45 = vpop.f32.mrb[126].mxu1 }
 0x20f   :  { %v1873_v2 = vadd.f32 %v1872_v7, %v1480_v54  ;;  %v1483_v58 = vadd.f32 %v4029_v61, %v1482_v45  ;;  %v1484_v49 = vpop.f32.mrb[127].mxu1 }
 0x211   :  { %v2045_v48 = vmax.f32 %v1873_v2, 0.0  ;;  %v1876_v53 = vadd.f32 %v1875_v10, %v1483_v58  ;;  %v1912_v6 = vpop.f32.mrb[144].mxu0 }
 0x212   :  { %v2584_v0 = vpop.f32.mrb[145].mxu0 }
 0x213   :  { %2136 = vst.msk [vmem:[%s4234_s3 + $0x1f0] sm:$0xff] %vm2073_vm3, %v2045_v48  ;;  %v2046_v63 = vmax.f32 %v1876_v53, 0.0  ;;  %v1915_v5 = vpop.f32.mrb[146].mxu0 }
 0x214   :  { %v1487_v3 = vpop.f32.mrb[128].mxu1  ;;  %v2585_v17 = vpop.f32.mrb[147].mxu0 }
 0x215   :  { %2137 = vst.msk [vmem:[%s4234_s3 + $0x1f8] sm:$0xff] %vm2073_vm3, %v2046_v63  ;;  %v1488_v56 = vadd.f32 %v4029_v61, %v1487_v3  ;;  %v1489_v7 = vpop.f32.mrb[129].mxu1 }
 0x216   :  { %v1490_v60 = vpop.f32.mrb[130].mxu1 }
 0x217   :  { %v1881_v9 = vadd.f32 %v1880_v20, %v1488_v56  ;;  %v1491_v10 = vadd.f32 %v4029_v61, %v1490_v60  ;;  %v1492_v1 = vpop.f32.mrb[131].mxu1 }
 0x219   :  { %v2047_v12 = vmax.f32 %v1881_v9, 0.0  ;;  %v1884_v59 = vadd.f32 %v1883_v24, %v1491_v10  ;;  %v1920_v19 = vpop.f32.mrb[148].mxu0 }
 0x21a   :  { %v2588_v27 = vpop.f32.mrb[149].mxu0 }
 0x21b   :  { %2138 = vst.msk [vmem:[%s4234_s3 + $0x200] sm:$0xff] %vm2073_vm3, %v2047_v12  ;;  %v2048_v13 = vmax.f32 %v1884_v59, 0.0  ;;  %v1923_v23 = vpop.f32.mrb[150].mxu0 }
 0x21c   :  { %v1495_v16 = vpop.f32.mrb[132].mxu1  ;;  %v2589_v30 = vpop.f32.mrb[151].mxu0 }
 0x21d   :  { %2139 = vst.msk [vmem:[%s4234_s3 + $0x208] sm:$0xff] %vm2073_vm3, %v2048_v13  ;;  %v1496_v8 = vadd.f32 %v4029_v61, %v1495_v16  ;;  %v1497_v20 = vpop.f32.mrb[133].mxu1 }
 0x21e   :  { %v1498_v21 = vpop.f32.mrb[134].mxu1 }
 0x21f   :  { %v1889_v11 = vadd.f32 %v1888_v33, %v1496_v8  ;;  %v1499_v24 = vadd.f32 %v4029_v61, %v1498_v21  ;;  %v1500_v15 = vpop.f32.mrb[135].mxu1 }
 0x221   :  { %v2049_v26 = vmax.f32 %v1889_v11, 0.0  ;;  %v1892_v14 = vadd.f32 %v1891_v37, %v1499_v24  ;;  %v1928_v31 = vpop.f32.mrb[152].mxu0 }
 0x222   :  { %v2592_v32 = vpop.f32.mrb[153].mxu0 }
 0x223   :  { %2140 = vst.msk [vmem:[%s4234_s3 + $0x210] sm:$0xff] %vm2073_vm3, %v2049_v26  ;;  %v2050_v18 = vmax.f32 %v1892_v14, 0.0  ;;  %v1931_v44 = vpop.f32.mrb[154].mxu0 }
 0x224   :  { %v1503_v29 = vpop.f32.mrb[136].mxu1  ;;  %v2593_v36 = vpop.f32.mrb[155].mxu0 }
 0x225   :  { %2141 = vst.msk [vmem:[%s4234_s3 + $0x218] sm:$0xff] %vm2073_vm3, %v2050_v18  ;;  %v1504_v22 = vadd.f32 %v4029_v61, %v1503_v29  ;;  %v1505_v33 = vpop.f32.mrb[137].mxu1 }
 0x226   :  { %v1506_v34 = vpop.f32.mrb[138].mxu1 }
 0x227   :  { %v1897_v25 = vadd.f32 %v1896_v46, %v1504_v22  ;;  %v1507_v37 = vadd.f32 %v4029_v61, %v1506_v34  ;;  %v1508_v38 = vpop.f32.mrb[139].mxu1 }
 0x229   :  { %v2051_v28 = vmax.f32 %v1897_v25, 0.0  ;;  %v1900_v41 = vadd.f32 %v1899_v50, %v1507_v37  ;;  %v1936_v55 = vpop.f32.mrb[156].mxu0 }
 0x22a   :  { %v2596_v45 = vpop.f32.mrb[157].mxu0 }
 0x22b   :  { %2142 = vst.msk [vmem:[%s4234_s3 + $0x220] sm:$0xff] %vm2073_vm3, %v2051_v28  ;;  %v2052_v43 = vmax.f32 %v1900_v41, 0.0  ;;  %v1939_v58 = vpop.f32.mrb[158].mxu0 }
 0x22c   :  { %v1511_v35 = vpop.f32.mrb[140].mxu1  ;;  %v2597_v48 = vpop.f32.mrb[159].mxu0 }
 0x22d   :  { %2143 = vst.msk [vmem:[%s4234_s3 + $0x228] sm:$0xff] %vm2073_vm3, %v2052_v43  ;;  %v1512_v40 = vadd.f32 %v4029_v61, %v1511_v35  ;;  %v1513_v46 = vpop.f32.mrb[141].mxu1 }
 0x22e   :  { %v1514_v47 = vpop.f32.mrb[142].mxu1 }
 0x22f   :  { %v1905_v39 = vadd.f32 %v1904_v57, %v1512_v40  ;;  %v1515_v50 = vadd.f32 %v4029_v61, %v1514_v47  ;;  %v1516_v51 = vpop.f32.mrb[143].mxu1 }
 0x231   :  { %v2053_v42 = vmax.f32 %v1905_v39, 0.0  ;;  %v1908_v54 = vadd.f32 %v1907_v52, %v1515_v50  ;;  %v1944_v7 = vpop.f32.mrb[160].mxu0 }
 0x232   :  { %v2600_v60 = vpop.f32.mrb[161].mxu0 }
 0x233   :  { %2144 = vst.msk [vmem:[%s4234_s3 + $0x230] sm:$0xff] %vm2073_vm3, %v2053_v42  ;;  %v2054_v2 = vmax.f32 %v1908_v54, 0.0  ;;  %v1947_v10 = vpop.f32.mrb[162].mxu0 }
 0x234   :  { %v1519_v49 = vpop.f32.mrb[144].mxu1  ;;  %v2601_v12 = vpop.f32.mrb[163].mxu0 }
 0x235   :  { %2145 = vst.msk [vmem:[%s4234_s3 + $0x238] sm:$0xff] %vm2073_vm3, %v2054_v2  ;;  %v1520_v53 = vadd.f32 %v4029_v61, %v1519_v49  ;;  %v1521_v57 = vpop.f32.mrb[145].mxu1 }
 0x236   :  { %v1522_v62 = vpop.f32.mrb[146].mxu1 }
 0x237   :  { %v1913_v63 = vadd.f32 %v1912_v6, %v1520_v53  ;;  %v1523_v52 = vadd.f32 %v4029_v61, %v1522_v62  ;;  %v1524_v3 = vpop.f32.mrb[147].mxu1 }
 0x239   :  { %v2055_v4 = vmax.f32 %v1913_v63, 0.0  ;;  %v1916_v56 = vadd.f32 %v1915_v5, %v1523_v52  ;;  %v1952_v20 = vpop.f32.mrb[164].mxu0 }
 0x23a   :  { %v2604_v21 = vpop.f32.mrb[165].mxu0 }
 0x23b   :  { %2146 = vst.msk [vmem:[%s4234_s3 + $0x240] sm:$0xff] %vm2073_vm3, %v2055_v4  ;;  %v2056_v9 = vmax.f32 %v1916_v56, 0.0  ;;  %v1955_v24 = vpop.f32.mrb[166].mxu0 }
 0x23c   :  { %v1527_v1 = vpop.f32.mrb[148].mxu1  ;;  %v2605_v26 = vpop.f32.mrb[167].mxu0 }
 0x23d   :  { %2147 = vst.msk [vmem:[%s4234_s3 + $0x248] sm:$0xff] %vm2073_vm3, %v2056_v9  ;;  %v1528_v59 = vadd.f32 %v4029_v61, %v1527_v1  ;;  %v1529_v6 = vpop.f32.mrb[149].mxu1 }
 0x23e   :  { %v1530_v0 = vpop.f32.mrb[150].mxu1 }
 0x23f   :  { %v1921_v13 = vadd.f32 %v1920_v19, %v1528_v59  ;;  %v1531_v5 = vadd.f32 %v4029_v61, %v1530_v0  ;;  %v1532_v16 = vpop.f32.mrb[151].mxu1 }
 0x241   :  { %v2057_v17 = vmax.f32 %v1921_v13, 0.0  ;;  %v1924_v8 = vadd.f32 %v1923_v23, %v1531_v5  ;;  %v1960_v33 = vpop.f32.mrb[168].mxu0 }
 0x242   :  { %v2608_v34 = vpop.f32.mrb[169].mxu0 }
 0x243   :  { %2148 = vst.msk [vmem:[%s4234_s3 + $0x250] sm:$0xff] %vm2073_vm3, %v2057_v17  ;;  %v2058_v11 = vmax.f32 %v1924_v8, 0.0  ;;  %v1963_v37 = vpop.f32.mrb[170].mxu0 }
 0x244   :  { %v1535_v15 = vpop.f32.mrb[152].mxu1  ;;  %v2609_v28 = vpop.f32.mrb[171].mxu0 }
 0x245   :  { %2149 = vst.msk [vmem:[%s4234_s3 + $0x258] sm:$0xff] %vm2073_vm3, %v2058_v11  ;;  %v1536_v14 = vadd.f32 %v4029_v61, %v1535_v15  ;;  %v1537_v19 = vpop.f32.mrb[153].mxu1 }
 0x246   :  { %v1538_v27 = vpop.f32.mrb[154].mxu1 }
 0x247   :  { %v1929_v18 = vadd.f32 %v1928_v31, %v1536_v14  ;;  %v1539_v23 = vadd.f32 %v4029_v61, %v1538_v27  ;;  %v1540_v29 = vpop.f32.mrb[155].mxu1 }
 0x249   :  { %v2059_v30 = vmax.f32 %v1929_v18, 0.0  ;;  %v1932_v22 = vadd.f32 %v1931_v44, %v1539_v23  ;;  %v1968_v46 = vpop.f32.mrb[172].mxu0 }
 0x24a   :  { %v2612_v47 = vpop.f32.mrb[173].mxu0 }
 0x24b   :  { %2150 = vst.msk [vmem:[%s4234_s3 + $0x260] sm:$0xff] %vm2073_vm3, %v2059_v30  ;;  %v2060_v25 = vmax.f32 %v1932_v22, 0.0  ;;  %v1971_v50 = vpop.f32.mrb[174].mxu0 }
 0x24c   :  { %v1543_v38 = vpop.f32.mrb[156].mxu1  ;;  %v2613_v42 = vpop.f32.mrb[175].mxu0 }
 0x24d   :  { %2151 = vst.msk [vmem:[%s4234_s3 + $0x268] sm:$0xff] %vm2073_vm3, %v2060_v25  ;;  %v1544_v41 = vadd.f32 %v4029_v61, %v1543_v38  ;;  %v1545_v31 = vpop.f32.mrb[157].mxu1 }
 0x24e   :  { %v1546_v32 = vpop.f32.mrb[158].mxu1 }
 0x24f   :  { %v1937_v43 = vadd.f32 %v1936_v55, %v1544_v41  ;;  %v1547_v44 = vadd.f32 %v4029_v61, %v1546_v32  ;;  %v1548_v35 = vpop.f32.mrb[159].mxu1 }
 0x251   :  { %v2061_v36 = vmax.f32 %v1937_v43, 0.0  ;;  %v1940_v40 = vadd.f32 %v1939_v58, %v1547_v44  ;;  %v1976_v57 = vpop.f32.mrb[176].mxu0 }
 0x252   :  { %v2616_v62 = vpop.f32.mrb[177].mxu0 }
 0x253   :  { %2152 = vst.msk [vmem:[%s4234_s3 + $0x270] sm:$0xff] %vm2073_vm3, %v2061_v36  ;;  %v2062_v39 = vmax.f32 %v1940_v40, 0.0  ;;  %v1979_v52 = vpop.f32.mrb[178].mxu0 }
 0x254   :  { %v1551_v51 = vpop.f32.mrb[160].mxu1  ;;  %v2617_v4 = vpop.f32.mrb[179].mxu0 }
 0x255   :  { %2153 = vst.msk [vmem:[%s4234_s3 + $0x278] sm:$0xff] %vm2073_vm3, %v2062_v39  ;;  %v1552_v54 = vadd.f32 %v4029_v61, %v1551_v51  ;;  %v1553_v55 = vpop.f32.mrb[161].mxu1 }
 0x256   :  { %v1554_v45 = vpop.f32.mrb[162].mxu1 }
 0x257   :  { %v1945_v2 = vadd.f32 %v1944_v7, %v1552_v54  ;;  %v1555_v58 = vadd.f32 %v4029_v61, %v1554_v45  ;;  %v1556_v49 = vpop.f32.mrb[163].mxu1 }
 0x259   :  { %v2063_v48 = vmax.f32 %v1945_v2, 0.0  ;;  %v1948_v53 = vadd.f32 %v1947_v10, %v1555_v58 }
 0x25b   :  { %2154 = vst.msk [vmem:[%s4234_s3 + $0x280] sm:$0xff] %vm2073_vm3, %v2063_v48  ;;  %v2064_v63 = vmax.f32 %v1948_v53, 0.0 }
 0x25c   :  { %v1559_v3 = vpop.f32.mrb[164].mxu1 }
 0x25d   :  { %2155 = vst.msk [vmem:[%s4234_s3 + $0x288] sm:$0xff] %vm2073_vm3, %v2064_v63  ;;  %v1560_v56 = vadd.f32 %v4029_v61, %v1559_v3  ;;  %v1561_v7 = vpop.f32.mrb[165].mxu1 }
 0x25e   :  { %v1562_v60 = vpop.f32.mrb[166].mxu1 }
 0x25f   :  { %v1953_v9 = vadd.f32 %v1952_v20, %v1560_v56  ;;  %v1563_v10 = vadd.f32 %v4029_v61, %v1562_v60  ;;  %v1564_v1 = vpop.f32.mrb[167].mxu1 }
 0x261   :  { %v2065_v12 = vmax.f32 %v1953_v9, 0.0  ;;  %v1956_v59 = vadd.f32 %v1955_v24, %v1563_v10 }
 0x263   :  { %2156 = vst.msk [vmem:[%s4234_s3 + $0x290] sm:$0xff] %vm2073_vm3, %v2065_v12  ;;  %v2066_v6 = vmax.f32 %v1956_v59, 0.0 }
 0x264   :  { %v1567_v0 = vpop.f32.mrb[168].mxu1 }
 0x265   :  { %2157 = vst.msk [vmem:[%s4234_s3 + $0x298] sm:$0xff] %vm2073_vm3, %v2066_v6  ;;  %v1568_v13 = vadd.f32 %v4029_v61, %v1567_v0  ;;  %v1569_v5 = vpop.f32.mrb[169].mxu1 }
 0x266   :  { %v1570_v16 = vpop.f32.mrb[170].mxu1 }
 0x267   :  { %v1961_v17 = vadd.f32 %v1960_v33, %v1568_v13  ;;  %v1571_v8 = vadd.f32 %v4029_v61, %v1570_v16  ;;  %v1572_v20 = vpop.f32.mrb[171].mxu1 }
 0x269   :  { %v2067_v21 = vmax.f32 %v1961_v17, 0.0  ;;  %v1964_v11 = vadd.f32 %v1963_v37, %v1571_v8 }
 0x26b   :  { %2158 = vst.msk [vmem:[%s4234_s3 + $0x2a0] sm:$0xff] %vm2073_vm3, %v2067_v21  ;;  %v2068_v24 = vmax.f32 %v1964_v11, 0.0 }
 0x26c   :  { %v1575_v15 = vpop.f32.mrb[172].mxu1 }
 0x26d   :  { %2159 = vst.msk [vmem:[%s4234_s3 + $0x2a8] sm:$0xff] %vm2073_vm3, %v2068_v24  ;;  %v1576_v26 = vadd.f32 %v4029_v61, %v1575_v15  ;;  %v1577_v14 = vpop.f32.mrb[173].mxu1 }
 0x26e   :  { %v1578_v19 = vpop.f32.mrb[174].mxu1 }
 0x26f   :  { %v1969_v27 = vadd.f32 %v1968_v46, %v1576_v26  ;;  %v1579_v18 = vadd.f32 %v4029_v61, %v1578_v19  ;;  %v1580_v23 = vpop.f32.mrb[175].mxu1 }
 0x271   :  { %v2069_v29 = vmax.f32 %v1969_v27, 0.0  ;;  %v1972_v30 = vadd.f32 %v1971_v50, %v1579_v18 }
 0x273   :  { %2160 = vst.msk [vmem:[%s4234_s3 + $0x2b0] sm:$0xff] %vm2073_vm3, %v2069_v29  ;;  %v2070_v22 = vmax.f32 %v1972_v30, 0.0 }
 0x274   :  { %v1583_v33 = vpop.f32.mrb[176].mxu1 }
 0x275   :  { %2161 = vst.msk [vmem:[%s4234_s3 + $0x2b8] sm:$0xff] %vm2073_vm3, %v2070_v22  ;;  %v1584_v34 = vadd.f32 %v4029_v61, %v1583_v33  ;;  %v1585_v25 = vpop.f32.mrb[177].mxu1 }
 0x276   :  { %v1586_v37 = vpop.f32.mrb[178].mxu1 }
 0x277   :  { %v1977_v38 = vadd.f32 %v1976_v57, %v1584_v34  ;;  %v1587_v28 = vadd.f32 %v4029_v61, %v1586_v37  ;;  %v1588_v41 = vpop.f32.mrb[179].mxu1 }
 0x279   :  { %v2071_v31 = vmax.f32 %v1977_v38, 0.0  ;;  %v1980_v32 = vadd.f32 %v1979_v52, %v1587_v28 }
 0x27b   :  { %2162 = vst.msk [vmem:[%s4234_s3 + $0x2c0] sm:$0xff] %vm2073_vm3, %v2071_v31  ;;  %v2072_v43 = vmax.f32 %v1980_v32, 0.0 }
 0x27d   :  { %2163 = vst.msk [vmem:[%s4234_s3 + $0x2c8] sm:$0xff] %vm2073_vm3, %v2072_v43 }

// kernel: forward.5
= control target key start
LH: loop header
LB: loop body
LE: loop exit
PB: predicated region body
PF: predicated region fallthrough
CT: control target
= control target key end

     0   :  { %v306_v27 = vlaneseq  ;;  %v2289_v35 = vmov 1966171168   ;;  %s2821_s0 = inlined_call_operand.vmem [shape: bf16[2,2160], index: 0, kind: input, shape index: {}]   ;;  %s2822_s1 = inlined_call_operand.vmem [shape: bf16[2160,128], index: 1, kind: input, shape index: {}]   ;;  %s2823_s2 = inlined_call_operand.vmem [shape: f32[1,128], index: 2, kind: input, shape index: {}]   ;;  %s2824_s3 = inlined_call_operand.vmem [shape: f32[128,6], index: 3, kind: input, shape index: {}]   ;;  %s2825_s4 = inlined_call_operand.hbm [shape: f32[2,6], index: 4, kind: output, shape index: {}]  }
   0x1   :  { %v2128_v0 = vld [vmem:[%s2822_s1 + $0x40] sm:$0xff]   ;;  %v2132_v4 = vld [vmem:[%s2822_s1 + $0x48] sm:$0xff]   ;;  %v2136_v8 = vld [vmem:[%s2822_s1 + $0x50] sm:$0xff]   ;;  %v304_v36 = vunpack.c.l.s4 %v2289_v35 }
   0x2   :  { %v2129_v1 = vld [vmem:[%s2822_s1] sm:$0xff]   ;;  %1845 = vmatprep.subr.bf16.mxu0 %v2128_v0  ;;  %v2133_v5 = vld [vmem:[%s2822_s1 + $0x8] sm:$0xff]   ;;  %v2137_v9 = vld [vmem:[%s2822_s1 + $0x10] sm:$0xff]   ;;  %v307_v32 = vshrl.u32 %v306_v27, 7 }
   0x3   :  { %v2130_v2 = vld [vmem:[%s2822_s1 + $0xc0] sm:$0xff]   ;;  %1846 = vmatpush3.bf16.msra.mxu0 %v2129_v1  ;;  %v2134_v6 = vld [vmem:[%s2822_s1 + $0xc8] sm:$0xff]   ;;  %v2138_v10 = vld [vmem:[%s2822_s1 + $0xd0] sm:$0xff]   ;;  %v305_v39 = vunpack.c.0.s8 %v304_v36 }
   0x4   :  { %v2131_v3 = vld [vmem:[%s2822_s1 + $0x80] sm:$0xff]   ;;  %1867 = vmatprep.subr.bf16.mxu1 %v2130_v2  ;;  %1847 = vmatprep.subr.bf16.mxu0 %v2132_v4  ;;  %v2135_v7 = vld [vmem:[%s2822_s1 + $0x88] sm:$0xff]   ;;  %v2139_v11 = vld [vmem:[%s2822_s1 + $0x90] sm:$0xff]  }
   0x5   :  { %1868 = vmatpush3.bf16.msra.mxu1 %v2131_v3  ;;  %v2140_v12 = vld [vmem:[%s2822_s1 + $0x58] sm:$0xff]   ;;  %v2144_v16 = vld [vmem:[%s2822_s1 + $0x60] sm:$0xff]   ;;  %v2148_v20 = vld [vmem:[%s2822_s1 + $0x68] sm:$0xff]   ;;  %v2424_v41 = vsub.s32 %v305_v39, %v307_v32 }
   0x6   :  { %1869 = vmatprep.subr.bf16.mxu1 %v2134_v6  ;;  %v2141_v13 = vld [vmem:[%s2822_s1 + $0x18] sm:$0xff]   ;;  %v2145_v17 = vld [vmem:[%s2822_s1 + $0x20] sm:$0xff]   ;;  %v2149_v21 = vld [vmem:[%s2822_s1 + $0x28] sm:$0xff]  }
   0x7   :  { %1848 = vmatpush3.bf16.msra.mxu0 %v2133_v5  ;;  %v2142_v14 = vld [vmem:[%s2822_s1 + $0xd8] sm:$0xff]   ;;  %v2146_v18 = vld [vmem:[%s2822_s1 + $0xe0] sm:$0xff]   ;;  %v2150_v22 = vld [vmem:[%s2822_s1 + $0xe8] sm:$0xff]  }
   0x8   :  { %1849 = vmatprep.subr.bf16.mxu0 %v2136_v8  ;;  %v2143_v15 = vld [vmem:[%s2822_s1 + $0x98] sm:$0xff]   ;;  %v2147_v19 = vld [vmem:[%s2822_s1 + $0xa0] sm:$0xff]   ;;  %v2151_v23 = vld [vmem:[%s2822_s1 + $0xa8] sm:$0xff]  }
   0x9   :  { %1870 = vmatpush3.bf16.msra.mxu1 %v2135_v7  ;;  %v2152_v24 = vld [vmem:[%s2822_s1 + $0x70] sm:$0xff]   ;;  %v2156_v29 = vld [vmem:[%s2822_s1 + $0x78] sm:$0xff]   ;;  %v19_v33 = vld [vmem:[%s2821_s0] sm:$0xff] }
   0xa   :  { %1871 = vmatprep.subr.bf16.mxu1 %v2138_v10  ;;  %v2153_v25 = vld [vmem:[%s2822_s1 + $0x30] sm:$0xff]   ;;  %v2157_v30 = vld [vmem:[%s2822_s1 + $0x38] sm:$0xff]   ;;  %v2161_v37 = vld [vmem:[%s2822_s1 + $0x140] sm:$0xff]   ;;  %v302_v38 = vcombine.high %v19_v33, %v19_v33  ;;  %v309_v42 = vrot.slane %v19_v33, %v2424_v41 }
   0xb   :  { %1850 = vmatpush3.bf16.msra.mxu0 %v2137_v9  ;;  %v2154_v26 = vld [vmem:[%s2822_s1 + $0xf0] sm:$0xff]   ;;  %v2158_v31 = vld [vmem:[%s2822_s1 + $0xf8] sm:$0xff]   ;;  %v2163_v40 = vld [vmem:[%s2822_s1 + $0x1c0] sm:$0xff]  }
   0xc   :  { %1851 = vmatprep.subr.bf16.mxu0 %v2140_v12  ;;  %v2155_v28 = vld [vmem:[%s2822_s1 + $0xb0] sm:$0xff]   ;;  %v2160_v34 = vld [vmem:[%s2822_s1 + $0xb8] sm:$0xff]   ;;  %v2428_v43 = vrot.slane %v302_v38, %v2424_v41  ;;  %v317_v44 = vcombine.high %v309_v42, %v309_v42  ;;  %v325_v45 = vrot.slane %v309_v42, %v2424_v41  ;;  %v2162_v48 = vld [vmem:[%s2822_s1 + $0x100] sm:$0xff]  }
   0xd   :  { %1872 = vmatpush3.bf16.msra.mxu1 %v2139_v11  ;;  %v2165_v51 = vld [vmem:[%s2822_s1 + $0x148] sm:$0xff]   ;;  %v2164_v53 = vld [vmem:[%s2822_s1 + $0x180] sm:$0xff]   ;;  %v2169_v57 = vld [vmem:[%s2822_s1 + $0x150] sm:$0xff]  }
   0xe   :  { %1873 = vmatprep.subr.bf16.mxu1 %v2142_v14  ;;  %v318_v46 = vcombine.high %v2428_v43, %v2428_v43  ;;  %v339_v47 = vrot.slane %v317_v44, %v2424_v41  ;;  %v347_v50 = vcombine.high %v325_v45, %v325_v45  ;;  %v2167_v54 = vld [vmem:[%s2822_s1 + $0x1c8] sm:$0xff]   ;;  %v2171_v59 = vld [vmem:[%s2822_s1 + $0x1d0] sm:$0xff]   ;;  %v2173_v61 = vld [vmem:[%s2822_s1 + $0x158] sm:$0xff]  }
   0xf   :  { %1852 = vmatpush3.bf16.msra.mxu0 %v2141_v13  ;;  %v2166_v56 = vld [vmem:[%s2822_s1 + $0x108] sm:$0xff]   ;;  %v2170_v60 = vld [vmem:[%s2822_s1 + $0x110] sm:$0xff]   ;;  %v2175_v63 = vld [vmem:[%s2822_s1 + $0x1d8] sm:$0xff]  }
  0x10   :  { %1853 = vmatprep.subr.bf16.mxu0 %v2144_v16  ;;  %v346_v49 = vrot.slane %v318_v46, %v2424_v41  ;;  %1276 = vmatprep.mubr.bf16.mxu0 %v339_v47  ;;  %v349_v52 = vcombine.high %v339_v47, %v339_v47  ;;  %v2168_v58 = vld [vmem:[%s2822_s1 + $0x188] sm:$0xff]   ;;  %v2172_v62 = vld [vmem:[%s2822_s1 + $0x190] sm:$0xff]   ;;  %v2174_v0 = vld [vmem:[%s2822_s1 + $0x118] sm:$0xff]  }
  0x11   :  { %1874 = vmatpush3.bf16.msra.mxu1 %v2143_v15  ;;  %v2177_v1 = vld [vmem:[%s2822_s1 + $0x160] sm:$0xff]   ;;  %v2176_v2 = vld [vmem:[%s2822_s1 + $0x198] sm:$0xff]   ;;  %v2181_v5 = vld [vmem:[%s2822_s1 + $0x168] sm:$0xff]  }
  0x12   :  { %1875 = vmatprep.subr.bf16.mxu1 %v2146_v18  ;;  %v350_v55 = vcombine.high %v346_v49, %v346_v49  ;;  %1316 = vmatprep.mubr.bf16.mxu1 %v349_v52  ;;  %v2179_v3 = vld [vmem:[%s2822_s1 + $0x1e0] sm:$0xff]   ;;  %v2183_v7 = vld [vmem:[%s2822_s1 + $0x1e8] sm:$0xff]   ;;  %v2185_v9 = vld [vmem:[%s2822_s1 + $0x170] sm:$0xff]  }
  0x13   :  { %1854 = vmatpush3.bf16.msra.mxu0 %v2145_v17  ;;  %v2178_v4 = vld [vmem:[%s2822_s1 + $0x120] sm:$0xff]   ;;  %v2182_v8 = vld [vmem:[%s2822_s1 + $0x128] sm:$0xff]   ;;  %v2187_v11 = vld [vmem:[%s2822_s1 + $0x1f0] sm:$0xff]   ;;  %v332_v17 = vrot.slane %v2428_v43, %v2424_v41 }
  0x14   :  { %1855 = vmatprep.subr.bf16.mxu0 %v2148_v20  ;;  %v2180_v6 = vld [vmem:[%s2822_s1 + $0x1a0] sm:$0xff]   ;;  %v2184_v10 = vld [vmem:[%s2822_s1 + $0x1a8] sm:$0xff]   ;;  %v2186_v12 = vld [vmem:[%s2822_s1 + $0x130] sm:$0xff]  }
  0x15   :  { %1876 = vmatpush3.bf16.msra.mxu1 %v2147_v19  ;;  %v2189_v13 = vld [vmem:[%s2822_s1 + $0x178] sm:$0xff]   ;;  %v2188_v14 = vld [vmem:[%s2822_s1 + $0x1b0] sm:$0xff]   ;;  %v2193_v18 = vld [vmem:[%s2822_s1 + $0x240] sm:$0xff]  }
  0x16   :  { %1877 = vmatprep.subr.bf16.mxu1 %v2150_v22  ;;  %v2191_v15 = vld [vmem:[%s2822_s1 + $0x1f8] sm:$0xff]   ;;  %v2195_v20 = vld [vmem:[%s2822_s1 + $0x2c0] sm:$0xff]   ;;  %v348_v22 = vcombine.high %v332_v17, %v332_v17  ;;  %v2201_v27 = vld [vmem:[%s2822_s1 + $0x250] sm:$0xff]  }
  0x17   :  { %1856 = vmatpush3.bf16.msra.mxu0 %v2149_v21  ;;  %v2190_v16 = vld [vmem:[%s2822_s1 + $0x138] sm:$0xff]   ;;  %v2194_v21 = vld [vmem:[%s2822_s1 + $0x200] sm:$0xff]   ;;  %v2204_v32 = vld [vmem:[%s2822_s1 + $0x290] sm:$0xff]  }
  0x18   :  { %1857 = vmatprep.subr.bf16.mxu0 %v2152_v24  ;;  %v2192_v19 = vld [vmem:[%s2822_s1 + $0x1b8] sm:$0xff]   ;;  %v2196_v24 = vld [vmem:[%s2822_s1 + $0x280] sm:$0xff]   ;;  %v2213_v39 = vld [vmem:[%s2822_s1 + $0x268] sm:$0xff]  }
  0x19   :  { %1878 = vmatpush3.bf16.msra.mxu1 %v2151_v23  ;;  %v2197_v23 = vld [vmem:[%s2822_s1 + $0x248] sm:$0xff]   ;;  %v2207_v33 = vld [vmem:[%s2822_s1 + $0x2d8] sm:$0xff]   ;;  %v2209_v35 = vld [vmem:[%s2822_s1 + $0x260] sm:$0xff]  }
  0x1a   :  { %1879 = vmatprep.subr.bf16.mxu1 %v2154_v26  ;;  %v2198_v26 = vld [vmem:[%s2822_s1 + $0x208] sm:$0xff]   ;;  %v2208_v36 = vld [vmem:[%s2822_s1 + $0x298] sm:$0xff]   ;;  %v2210_v38 = vld [vmem:[%s2822_s1 + $0x220] sm:$0xff]  }
  0x1b   :  { %1858 = vmatpush3.bf16.msra.mxu0 %v2153_v25  ;;  %v2199_v25 = vld [vmem:[%s2822_s1 + $0x2c8] sm:$0xff]   ;;  %v2217_v44 = vld [vmem:[%s2822_s1 + $0x270] sm:$0xff]  }
  0x1c   :  { %1859 = vmatprep.subr.bf16.mxu0 %v2156_v29  ;;  %v2203_v29 = vld [vmem:[%s2822_s1 + $0x2d0] sm:$0xff]   ;;  %v2215_v42 = vld [vmem:[%s2822_s1 + $0x2e8] sm:$0xff]  }
  0x1d   :  { %1880 = vmatpush3.bf16.msra.mxu1 %v2155_v28  ;;  %v2200_v28 = vld [vmem:[%s2822_s1 + $0x288] sm:$0xff]  }
  0x1e   :  { %1881 = vmatprep.subr.bf16.mxu1 %v2158_v31  ;;  %v2205_v31 = vld [vmem:[%s2822_s1 + $0x258] sm:$0xff]   ;;  %v2214_v43 = vld [vmem:[%s2822_s1 + $0x228] sm:$0xff]  }
  0x1f   :  { %1860 = vmatpush3.bf16.msra.mxu0 %v2157_v30  ;;  %v2202_v30 = vld [vmem:[%s2822_s1 + $0x210] sm:$0xff]   ;;  %v2216_v46 = vld [vmem:[%s2822_s1 + $0x2a8] sm:$0xff]  }
  0x20   :  { %1889 = vmatprep.subr.bf16.mxu0 %v2161_v37  ;;  %v2211_v37 = vld [vmem:[%s2822_s1 + $0x2e0] sm:$0xff]  }
  0x21   :  { %1882 = vmatpush3.bf16.msra.mxu1 %v2160_v34  ;;  %v2206_v34 = vld [vmem:[%s2822_s1 + $0x218] sm:$0xff]  }
  0x22   :  { %1911 = vmatprep.subr.bf16.mxu1 %v2163_v40  ;;  %1277 = vmatmul.mubr.bf16.vlgmr.msra.gmra.mrb[0].mxu0 %v325_v45  ;;  %v2212_v40 = vld [vmem:[%s2822_s1 + $0x2a0] sm:$0xff]   ;;  %v20_v45 = vld [vmem:[%s2821_s0 + $0x8] sm:$0xff] }
  0x23   :  { %1890 = vmatpush3.bf16.msra.mxu0 %v2162_v48  ;;  %1356 = vmatprep.mubr.bf16.mxu0 %v346_v49  ;;  %v358_v47 = vrot.slane %v20_v45, %v2424_v41  ;;  %v351_v48 = vcombine.high %v20_v45, %v20_v45  ;;  %v2219_v49 = vld [vmem:[%s2822_s1 + $0x2f0] sm:$0xff]  }
  0x24   :  { %1317 = vmatmul.mubr.bf16.vlgmr.msra.gmra.mrb[0].mxu1 %v347_v50  ;;  %1891 = vmatprep.subr.bf16.mxu0 %v2165_v51  ;;  %v2218_v50 = vld [vmem:[%s2822_s1 + $0x230] sm:$0xff]  }
  0x25   :  { %1912 = vmatpush3.bf16.msra.mxu1 %v2164_v53  ;;  %1396 = vmatprep.mubr.bf16.mxu1 %v350_v55  ;;  %v366_v51 = vcombine.high %v358_v47, %v358_v47  ;;  %v2613_v52 = vrot.slane %v351_v48, %v2424_v41  ;;  %v2221_v53 = vld [vmem:[%s2822_s1 + $0x278] sm:$0xff]  }
  0x26   :  { %1913 = vmatprep.subr.bf16.mxu1 %v2167_v54  ;;  %v2220_v54 = vld [vmem:[%s2822_s1 + $0x2b0] sm:$0xff]  }
  0x27   :  { %1892 = vmatpush3.bf16.msra.mxu0 %v2166_v56  ;;  %v388_v55 = vrot.slane %v366_v51, %v2424_v41  ;;  %v367_v56 = vcombine.high %v2613_v52, %v2613_v52 }
  0x28   :  { %1893 = vmatprep.subr.bf16.mxu0 %v2169_v57  ;;  %v2223_v57 = vld [vmem:[%s2822_s1 + $0x2f8] sm:$0xff]  }
  0x29   :  { %1914 = vmatpush3.bf16.msra.mxu1 %v2168_v58  ;;  %v2222_v58 = vld [vmem:[%s2822_s1 + $0x238] sm:$0xff]  }
  0x2a   :  { %1915 = vmatprep.subr.bf16.mxu1 %v2171_v59  ;;  %v398_v59 = vcombine.high %v388_v55, %v388_v55 }
  0x2b   :  { %1894 = vmatpush3.bf16.msra.mxu0 %v2170_v60  ;;  %v374_v60 = vrot.slane %v358_v47, %v2424_v41 }
  0x2c   :  { %1895 = vmatprep.subr.bf16.mxu0 %v2173_v61  ;;  %v2225_v61 = vld [vmem:[%s2822_s1 + $0x340] sm:$0xff]  }
  0x2d   :  { %1916 = vmatpush3.bf16.msra.mxu1 %v2172_v62  ;;  %v2224_v62 = vld [vmem:[%s2822_s1 + $0x2b8] sm:$0xff]  }
  0x2e   :  { %1917 = vmatprep.subr.bf16.mxu1 %v2175_v63  ;;  %v395_v63 = vrot.slane %v367_v56, %v2424_v41 }
  0x2f   :  { %1896 = vmatpush3.bf16.msra.mxu0 %v2174_v0  ;;  %v2227_v0 = vld [vmem:[%s2822_s1 + $0x3c0] sm:$0xff]  }
  0x30   :  { %1897 = vmatprep.subr.bf16.mxu0 %v2177_v1  ;;  %v2226_v1 = vld [vmem:[%s2822_s1 + $0x300] sm:$0xff]  }
  0x31   :  { %1918 = vmatpush3.bf16.msra.mxu1 %v2176_v2  ;;  %v396_v2 = vcombine.high %v374_v60, %v374_v60 }
  0x32   :  { %1919 = vmatprep.subr.bf16.mxu1 %v2179_v3  ;;  %v2229_v3 = vld [vmem:[%s2822_s1 + $0x348] sm:$0xff]  }
  0x33   :  { %1898 = vmatpush3.bf16.msra.mxu0 %v2178_v4  ;;  %v2228_v4 = vld [vmem:[%s2822_s1 + $0x380] sm:$0xff]  }
  0x34   :  { %1899 = vmatprep.subr.bf16.mxu0 %v2181_v5  ;;  %v399_v5 = vcombine.high %v395_v63, %v395_v63 }
  0x35   :  { %1920 = vmatpush3.bf16.msra.mxu1 %v2180_v6  ;;  %v2231_v6 = vld [vmem:[%s2822_s1 + $0x3c8] sm:$0xff]  }
  0x36   :  { %1921 = vmatprep.subr.bf16.mxu1 %v2183_v7  ;;  %v2230_v7 = vld [vmem:[%s2822_s1 + $0x308] sm:$0xff]  }
  0x37   :  { %1900 = vmatpush3.bf16.msra.mxu0 %v2182_v8  ;;  %v2233_v8 = vld [vmem:[%s2822_s1 + $0x350] sm:$0xff]  }
  0x38   :  { %1901 = vmatprep.subr.bf16.mxu0 %v2185_v9  ;;  %v2232_v9 = vld [vmem:[%s2822_s1 + $0x388] sm:$0xff]  }
  0x39   :  { %1922 = vmatpush3.bf16.msra.mxu1 %v2184_v10  ;;  %v2235_v10 = vld [vmem:[%s2822_s1 + $0x3d0] sm:$0xff]  }
  0x3a   :  { %1923 = vmatprep.subr.bf16.mxu1 %v2187_v11  ;;  %v2234_v11 = vld [vmem:[%s2822_s1 + $0x310] sm:$0xff]  }
  0x3b   :  { %1902 = vmatpush3.bf16.msra.mxu0 %v2186_v12  ;;  %v2237_v12 = vld [vmem:[%s2822_s1 + $0x358] sm:$0xff]  }
  0x3c   :  { %1903 = vmatprep.subr.bf16.mxu0 %v2189_v13  ;;  %v2236_v13 = vld [vmem:[%s2822_s1 + $0x390] sm:$0xff]  }
  0x3d   :  { %1924 = vmatpush3.bf16.msra.mxu1 %v2188_v14  ;;  %v2239_v14 = vld [vmem:[%s2822_s1 + $0x3d8] sm:$0xff]  }
  0x3e   :  { %1925 = vmatprep.subr.bf16.mxu1 %v2191_v15  ;;  %v2238_v15 = vld [vmem:[%s2822_s1 + $0x318] sm:$0xff]  }
  0x3f   :  { %1904 = vmatpush3.bf16.msra.mxu0 %v2190_v16  ;;  %v2241_v16 = vld [vmem:[%s2822_s1 + $0x360] sm:$0xff]  }
  0x40   :  { %1933 = vmatprep.subr.bf16.mxu0 %v2193_v18  ;;  %v2243_v18 = vld [vmem:[%s2822_s1 + $0x3e0] sm:$0xff]  }
  0x41   :  { %1926 = vmatpush3.bf16.msra.mxu1 %v2192_v19  ;;  %v2242_v19 = vld [vmem:[%s2822_s1 + $0x320] sm:$0xff]  }
  0x42   :  { %1357 = vmatmul.mubr.bf16.vlgmr.msra.gmra.mrb[4].mxu0 %v332_v17  ;;  %1955 = vmatprep.subr.bf16.mxu1 %v2195_v20  ;;  %v2240_v17 = vld [vmem:[%s2822_s1 + $0x398] sm:$0xff]   ;;  %v2245_v20 = vld [vmem:[%s2822_s1 + $0x368] sm:$0xff]  }
  0x43   :  { %1934 = vmatpush3.bf16.msra.mxu0 %v2194_v21  ;;  %1436 = vmatprep.mubr.bf16.mxu0 %v388_v55  ;;  %v2244_v21 = vld [vmem:[%s2822_s1 + $0x3a0] sm:$0xff]  }
  0x44   :  { %1397 = vmatmul.mubr.bf16.vlgmr.msra.gmra.mrb[4].mxu1 %v348_v22  ;;  %1935 = vmatprep.subr.bf16.mxu0 %v2197_v23  ;;  %v2247_v22 = vld [vmem:[%s2822_s1 + $0x3e8] sm:$0xff]  }
  0x45   :  { %1956 = vmatpush3.bf16.msra.mxu1 %v2196_v24  ;;  %1476 = vmatprep.mubr.bf16.mxu1 %v398_v59  ;;  %v2246_v23 = vld [vmem:[%s2822_s1 + $0x328] sm:$0xff]   ;;  %v2249_v24 = vld [vmem:[%s2822_s1 + $0x370] sm:$0xff]  }
  0x46   :  { %1957 = vmatprep.subr.bf16.mxu1 %v2199_v25  ;;  %v2248_v25 = vld [vmem:[%s2822_s1 + $0x3a8] sm:$0xff]  }
  0x47   :  { %1936 = vmatpush3.bf16.msra.mxu0 %v2198_v26  ;;  %v2251_v26 = vld [vmem:[%s2822_s1 + $0x3f0] sm:$0xff]  }
  0x48   :  { %1937 = vmatprep.subr.bf16.mxu0 %v2201_v27  ;;  %v2250_v27 = vld [vmem:[%s2822_s1 + $0x330] sm:$0xff]  }
  0x49   :  { %1958 = vmatpush3.bf16.msra.mxu1 %v2200_v28  ;;  %v2253_v28 = vld [vmem:[%s2822_s1 + $0x378] sm:$0xff]  }
  0x4a   :  { %1959 = vmatprep.subr.bf16.mxu1 %v2203_v29  ;;  %v2252_v29 = vld [vmem:[%s2822_s1 + $0x3b0] sm:$0xff]  }
  0x4b   :  { %1938 = vmatpush3.bf16.msra.mxu0 %v2202_v30  ;;  %v2255_v30 = vld [vmem:[%s2822_s1 + $0x3f8] sm:$0xff]  }
  0x4c   :  { %1939 = vmatprep.subr.bf16.mxu0 %v2205_v31  ;;  %v2254_v31 = vld [vmem:[%s2822_s1 + $0x338] sm:$0xff]  }
  0x4d   :  { %1960 = vmatpush3.bf16.msra.mxu1 %v2204_v32  ;;  %v381_v32 = vrot.slane %v2613_v52, %v2424_v41 }
  0x4e   :  { %1961 = vmatprep.subr.bf16.mxu1 %v2207_v33  ;;  %v2257_v33 = vld [vmem:[%s2822_s1 + $0x3b8] sm:$0xff]  }
  0x4f   :  { %1940 = vmatpush3.bf16.msra.mxu0 %v2206_v34 }
  0x50   :  { %1941 = vmatprep.subr.bf16.mxu0 %v2209_v35 }
  0x51   :  { %1962 = vmatpush3.bf16.msra.mxu1 %v2208_v36 }
  0x52   :  { %1963 = vmatprep.subr.bf16.mxu1 %v2211_v37 }
  0x53   :  { %1942 = vmatpush3.bf16.msra.mxu0 %v2210_v38 }
  0x54   :  { %1943 = vmatprep.subr.bf16.mxu0 %v2213_v39 }
  0x55   :  { %1964 = vmatpush3.bf16.msra.mxu1 %v2212_v40 }
  0x56   :  { %1965 = vmatprep.subr.bf16.mxu1 %v2215_v42 }
  0x57   :  { %1944 = vmatpush3.bf16.msra.mxu0 %v2214_v43 }
  0x58   :  { %1945 = vmatprep.subr.bf16.mxu0 %v2217_v44 }
  0x59   :  { %1966 = vmatpush3.bf16.msra.mxu1 %v2216_v46 }
  0x5a   :  { %1967 = vmatprep.subr.bf16.mxu1 %v2219_v49 }
  0x5b   :  { %1946 = vmatpush3.bf16.msra.mxu0 %v2218_v50 }
  0x5c   :  { %1947 = vmatprep.subr.bf16.mxu0 %v2221_v53 }
  0x5d   :  { %1968 = vmatpush3.bf16.msra.mxu1 %v2220_v54 }
  0x5e   :  { %1969 = vmatprep.subr.bf16.mxu1 %v2223_v57 }
  0x5f   :  { %1948 = vmatpush3.bf16.msra.mxu0 %v2222_v58 }
  0x60   :  { %1977 = vmatprep.subr.bf16.mxu0 %v2225_v61 }
  0x61   :  { %1970 = vmatpush3.bf16.msra.mxu1 %v2224_v62 }
  0x62   :  { %1437 = vmatmul.mubr.bf16.vlgmr.msra.gmra.mrb[8].mxu0 %v374_v60  ;;  %1999 = vmatprep.subr.bf16.mxu1 %v2227_v0 }
  0x63   :  { %1978 = vmatpush3.bf16.msra.mxu0 %v2226_v1  ;;  %1516 = vmatprep.mubr.bf16.mxu0 %v395_v63 }
  0x64   :  { %1477 = vmatmul.mubr.bf16.vlgmr.msra.gmra.mrb[8].mxu1 %v396_v2  ;;  %1979 = vmatprep.subr.bf16.mxu0 %v2229_v3 }
  0x65   :  { %2000 = vmatpush3.bf16.msra.mxu1 %v2228_v4  ;;  %1556 = vmatprep.mubr.bf16.mxu1 %v399_v5 }
  0x66   :  { %2001 = vmatprep.subr.bf16.mxu1 %v2231_v6 }
  0x67   :  { %1980 = vmatpush3.bf16.msra.mxu0 %v2230_v7 }
  0x68   :  { %1981 = vmatprep.subr.bf16.mxu0 %v2233_v8 }
  0x69   :  { %2002 = vmatpush3.bf16.msra.mxu1 %v2232_v9 }
  0x6a   :  { %2003 = vmatprep.subr.bf16.mxu1 %v2235_v10 }
  0x6b   :  { %1982 = vmatpush3.bf16.msra.mxu0 %v2234_v11 }
  0x6c   :  { %1983 = vmatprep.subr.bf16.mxu0 %v2237_v12 }
  0x6d   :  { %2004 = vmatpush3.bf16.msra.mxu1 %v2236_v13 }
  0x6e   :  { %2005 = vmatprep.subr.bf16.mxu1 %v2239_v14 }
  0x6f   :  { %1984 = vmatpush3.bf16.msra.mxu0 %v2238_v15 }
  0x70   :  { %1985 = vmatprep.subr.bf16.mxu0 %v2241_v16 }
  0x71   :  { %2006 = vmatpush3.bf16.msra.mxu1 %v2240_v17 }
  0x72   :  { %2007 = vmatprep.subr.bf16.mxu1 %v2243_v18 }
  0x73   :  { %1986 = vmatpush3.bf16.msra.mxu0 %v2242_v19 }
  0x74   :  { %1987 = vmatprep.subr.bf16.mxu0 %v2245_v20 }
  0x75   :  { %2008 = vmatpush3.bf16.msra.mxu1 %v2244_v21 }
  0x76   :  { %2009 = vmatprep.subr.bf16.mxu1 %v2247_v22 }
  0x77   :  { %1988 = vmatpush3.bf16.msra.mxu0 %v2246_v23 }
  0x78   :  { %1989 = vmatprep.subr.bf16.mxu0 %v2249_v24 }
  0x79   :  { %2010 = vmatpush3.bf16.msra.mxu1 %v2248_v25 }
  0x7a   :  { %2011 = vmatprep.subr.bf16.mxu1 %v2251_v26 }
  0x7b   :  { %1990 = vmatpush3.bf16.msra.mxu0 %v2250_v27 }
  0x7c   :  { %1991 = vmatprep.subr.bf16.mxu0 %v2253_v28 }
  0x7d   :  { %2012 = vmatpush3.bf16.msra.mxu1 %v2252_v29 }
  0x7e   :  { %9 = vsyncpa [#allocation3], 0  ;;  %2013 = vmatprep.subr.bf16.mxu1 %v2255_v30  ;;  %v2258_v34 = vld [vmem:[%s2822_s1 + $0x400] sm:$0xff]   ;;  %v2290_v35 = vmov 0.0   ;;  %v397_v36 = vcombine.high %v381_v32, %v381_v32  ;;  %v2259_v37 = vld [vmem:[%s2822_s1 + $0x408] sm:$0xff]   ;;  %vm2291_vm0 = vmmov 0  }
  0x7f   :  { %1992 = vmatpush3.bf16.msra.mxu0 %v2254_v31  ;;  %v2260_v38 = vld [vmem:[%s2822_s1 + $0x410] sm:$0xff]   ;;  %v2261_v39 = vld [vmem:[%s2822_s1 + $0x418] sm:$0xff]   ;;  %v2262_v40 = vld [vmem:[%s2822_s1 + $0x420] sm:$0xff]   ;;  %vm1240_vm1 = vcmask 916480   ;;  %v2292_v49 = vmov 0.0|0.0   ;;  %vm1691_vm2 = vcmask 41984  }
  0x80   :  { %2046 = vmatprep.subr.bf16.mxu0 %v2290_v35  ;;  %v2263_v42 = vld [vmem:[%s2822_s1 + $0x428] sm:$0xff]   ;;  %v2264_v43 = vld [vmem:[%s2822_s1 + $0x430] sm:$0xff]   ;;  %v1605_v46 = vld [vmem:[%s2824_s3] sm:$0xff] }
  0x81   :  { %2014 = vmatpush3.bf16.msra.mxu1 %v2257_v33  ;;  %v1708_v44 = vld.sshfl [vmem:[%s2821_s0 + $0x10] sm:$0x1 pattern:$0x75316420]  ;;  %v1606_v47 = vld [vmem:[%s2824_s3 + $0x8] sm:$0xff]  ;;  %v1608_v50 = vld [vmem:[%s2824_s3 + $0x18] sm:$0xff] }
  0x82   :  { %1517 = vmatmul.mubr.bf16.vlgmr.msra.gmra.mrb[12].mxu0 %v381_v32  ;;  %v413_v45 = vrot.slane %v1708_v44, %v2424_v41  ;;  %v2100_v48 = vpack.c.bf16 %v1606_v47, %v1605_v46  ;;  %2099 = vmatprep.subr.bf16.mxu1 %v2292_v49  ;;  %v1607_v41 = vld [vmem:[%s2824_s3 + $0x10] sm:$0xff]  ;;  %v1609_v52 = vld [vmem:[%s2824_s3 + $0x20] sm:$0xff]  ;;  %v1610_v53 = vld [vmem:[%s2824_s3 + $0x28] sm:$0xff] }
  0x83   :  { %2047 = vmatpush3.bf16.msra.mxu0 %v2258_v34  ;;  %2060 = vmatprep.mubr.msk.bf16.mxu0 %vm2291_vm0, %v2290_v35  ;;  %v2103_v51 = vpack.c.bf16 %v1608_v50, %v1607_v41  ;;  %v2106_v54 = vpack.c.bf16 %v1610_v53, %v1609_v52  ;;  %v1611_v55 = vld [vmem:[%s2824_s3 + $0x30] sm:$0xff]  ;;  %v1612_v56 = vld [vmem:[%s2824_s3 + $0x38] sm:$0xff]  ;;  %v1613_v58 = vld [vmem:[%s2824_s3 + $0x40] sm:$0xff] }
  0x84   :  { %1557 = vmatmul.mubr.bf16.vlgmr.msra.gmra.mrb[12].mxu1 %v397_v36  ;;  %2048 = vmatprep.subr.bf16.mxu0 %v2290_v35  ;;  %v2109_v57 = vpack.c.bf16 %v1612_v56, %v1611_v55  ;;  %v1614_v59 = vld [vmem:[%s2824_s3 + $0x48] sm:$0xff]  ;;  %v1615_v61 = vld [vmem:[%s2824_s3 + $0x50] sm:$0xff]  ;;  %v1616_v62 = vld [vmem:[%s2824_s3 + $0x58] sm:$0xff] }
  0x85   :  { %2096 = vmatprep.mubr.msk.f32.mxu1 %vm2291_vm0, %v2290_v35  ;;  %2101 = vmatpush3.bf16.msra.mxu1 %v2100_v48  ;;  %v2112_v60 = vpack.c.bf16 %v1614_v59, %v1613_v58  ;;  %v2115_v63 = vpack.c.bf16 %v1616_v62, %v1615_v61  ;;  %v1617_v0 = vld [vmem:[%s2824_s3 + $0x60] sm:$0xff]  ;;  %v1618_v1 = vld [vmem:[%s2824_s3 + $0x68] sm:$0xff]  ;;  %v1619_v3 = vld [vmem:[%s2824_s3 + $0x70] sm:$0xff] }
  0x86   :  { %2102 = vmatprep.subr.bf16.mxu1 %v2292_v49  ;;  %v2118_v2 = vpack.c.bf16 %v1618_v1, %v1617_v0  ;;  %v1620_v4 = vld [vmem:[%s2824_s3 + $0x78] sm:$0xff]  ;;  %v1707_v7 = vld [vmem:[%s2823_s2] ss:$0 sm:$0xff]  ;;  %s2293_s2 = smov [#allocation2]  }
  0x87   :  { %2049 = vmatpush3.bf16.msra.mxu0 %v2259_v37  ;;  %v2121_v5 = vpack.c.bf16 %v1620_v4, %v1619_v3  ;;  %s1699_s3 = sshll.u32 %s2293_s2, 4  ;;  %s1700_s3 = int_to_ptr.vmem [resolvable:$true] %s1699_s3 }
  0x88   :  { %2050 = vmatprep.subr.bf16.mxu0 %v2290_v35  ;;  %s2265_s9 = scalar_lea.vmem %s1700_s3, 32  ;;  %p2270_p1 = scmp.lt.s32.totalorder %s1700_s3, %s1700_s3 }
  0x89   :  { %2104 = vmatpush3.bf16.msra.mxu1 %v2103_v51  ;;  %p2266_p0 = scmp.ne.s32.totalorder %s1700_s3, %s2265_s9  ;;  %p2271_p2 = scmp.lt.s32.totalorder %s2265_s9, %s2265_s9 }
  0x8a   :  { %2105 = vmatprep.subr.bf16.mxu1 %v2292_v49 }
  0x8b   :  { %2051 = vmatpush3.bf16.msra.mxu0 %v2260_v38  ;;  %p2272_p3 = por %p2271_p2, %p2270_p1 }
  0x8c   :  { %2052 = vmatprep.subr.bf16.mxu0 %v2290_v35 }
  0x8d   :  { %2107 = vmatpush3.bf16.msra.mxu1 %v2106_v54  ;;  %p2273_p4 = pnand %p2272_p3, %p2266_p0 }
  0x8e   :  { %2108 = vmatprep.subr.bf16.mxu1 %v2292_v49 }
  0x8f   :  { %2053 = vmatpush3.bf16.msra.mxu0 %v2261_v39 }
  0x90   :  { %2054 = vmatprep.subr.bf16.mxu0 %v2290_v35 }
  0x91   :  { %2110 = vmatpush3.bf16.msra.mxu1 %v2109_v57 }
  0x92   :  { %2111 = vmatprep.subr.bf16.mxu1 %v2292_v49 }
  0x93   :  { %2055 = vmatpush3.bf16.msra.mxu0 %v2262_v40 }
  0x94   :  { %2056 = vmatprep.subr.bf16.mxu0 %v2290_v35 }
  0x95   :  { %2113 = vmatpush3.bf16.msra.mxu1 %v2112_v60 }
  0x96   :  { %2114 = vmatprep.subr.bf16.mxu1 %v2292_v49 }
  0x97   :  { %2057 = vmatpush3.bf16.msra.mxu0 %v2263_v42 }
  0x98   :  { %2058 = vmatprep.subr.bf16.mxu0 %v2290_v35 }
  0x99   :  { %2116 = vmatpush3.bf16.msra.mxu1 %v2115_v63 }
  0x9a   :  { %2117 = vmatprep.subr.bf16.mxu1 %v2292_v49 }
  0x9b   :  { %2059 = vmatpush3.bf16.msra.mxu0 %v2264_v43 }
  0x9d   :  { %2119 = vmatpush3.bf16.msra.mxu1 %v2118_v2 }
  0x9e   :  { %2061 = vmatmul.mubr.msk.bf16.vlgmr.msra.gmra.mrb[16].mxu0 %vm1240_vm1, %v413_v45  ;;  %2120 = vmatprep.subr.bf16.mxu1 %v2292_v49 }
  0xa1   :  { %2122 = vmatpush3.bf16.msra.mxu1 %v2121_v5 }
  0xf5   :  { %v1861_v6 = vpop.f32.mrb[0].mxu0 }
  0xf6   :  { %v1862_v8 = vpop.f32.mrb[1].mxu0 }
  0xf7   :  { %v1863_v9 = vadd.f32 %v1862_v8, %v1861_v6  ;;  %v1864_v10 = vpop.f32.mrb[2].mxu0  ;;  %v1883_v11 = vpop.f32.mrb[0].mxu1 }
  0xf8   :  { %v1865_v12 = vpop.f32.mrb[3].mxu0  ;;  %v1884_v13 = vpop.f32.mrb[1].mxu1 }
  0xf9   :  { %v1279_v14 = vadd.f32 %v1863_v9, %v1707_v7  ;;  %v1885_v15 = vadd.f32 %v1884_v13, %v1883_v11  ;;  %v1886_v16 = vpop.f32.mrb[2].mxu1 }
  0xfa   :  { %v1887_v17 = vpop.f32.mrb[3].mxu1 }
  0xfb   :  { %v1319_v18 = vadd.f32 %v1885_v15, %v1279_v14 }
 0x115   :  { %v1905_v19 = vpop.f32.mrb[4].mxu0 }
 0x116   :  { %v1906_v20 = vpop.f32.mrb[5].mxu0 }
 0x117   :  { %v1907_v21 = vadd.f32 %v1906_v20, %v1905_v19  ;;  %v1908_v22 = vpop.f32.mrb[6].mxu0  ;;  %v1927_v23 = vpop.f32.mrb[4].mxu1 }
 0x118   :  { %v1909_v24 = vpop.f32.mrb[7].mxu0  ;;  %v1928_v25 = vpop.f32.mrb[5].mxu1 }
 0x119   :  { %v1359_v26 = vadd.f32 %v1907_v21, %v1319_v18  ;;  %v1929_v27 = vadd.f32 %v1928_v25, %v1927_v23  ;;  %v1930_v28 = vpop.f32.mrb[6].mxu1 }
 0x11a   :  { %v1931_v29 = vpop.f32.mrb[7].mxu1 }
 0x11b   :  { %v1399_v30 = vadd.f32 %v1929_v27, %v1359_v26 }
 0x135   :  { %v1949_v31 = vpop.f32.mrb[8].mxu0 }
 0x136   :  { %v1950_v32 = vpop.f32.mrb[9].mxu0 }
 0x137   :  { %v1951_v33 = vadd.f32 %v1950_v32, %v1949_v31  ;;  %v1952_v34 = vpop.f32.mrb[10].mxu0  ;;  %v1971_v35 = vpop.f32.mrb[8].mxu1 }
 0x138   :  { %v1953_v36 = vpop.f32.mrb[11].mxu0  ;;  %v1972_v37 = vpop.f32.mrb[9].mxu1 }
 0x139   :  { %v1439_v38 = vadd.f32 %v1951_v33, %v1399_v30  ;;  %v1973_v39 = vadd.f32 %v1972_v37, %v1971_v35  ;;  %v1974_v40 = vpop.f32.mrb[10].mxu1 }
 0x13a   :  { %v1975_v42 = vpop.f32.mrb[11].mxu1 }
 0x13b   :  { %v1479_v43 = vadd.f32 %v1973_v39, %v1439_v38 }
 0x155   :  { %v1993_v44 = vpop.f32.mrb[12].mxu0 }
 0x156   :  { %v1994_v45 = vpop.f32.mrb[13].mxu0 }
 0x157   :  { %v1995_v46 = vadd.f32 %v1994_v45, %v1993_v44  ;;  %v1996_v47 = vpop.f32.mrb[14].mxu0  ;;  %v2015_v48 = vpop.f32.mrb[12].mxu1 }
 0x158   :  { %v1997_v49 = vpop.f32.mrb[15].mxu0  ;;  %v2016_v41 = vpop.f32.mrb[13].mxu1 }
 0x159   :  { %v1519_v50 = vadd.f32 %v1995_v46, %v1479_v43  ;;  %v2017_v51 = vadd.f32 %v2016_v41, %v2015_v48  ;;  %v2018_v52 = vpop.f32.mrb[14].mxu1 }
 0x15a   :  { %v2019_v53 = vpop.f32.mrb[15].mxu1 }
 0x15b   :  { %v1559_v54 = vadd.f32 %v2017_v51, %v1519_v50 }
 0x171   :  { %v1598_v55 = vpop.f32.mrb[16].mxu0 }
 0x172   :  { %v1599_v56 = vadd.f32 %v1598_v55, %v1559_v54  ;;  %v2062_v57 = vpop.f32.mrb[17].mxu0 }
 0x173   :  { %v1601_v58 = vpop.f32.mrb[18].mxu0 }
 0x174   :  { %v1604_v59 = vmax.f32 %v1599_v56, 0.0  ;;  %v2063_v60 = vpop.f32.mrb[19].mxu0 }
 0x176   :  { %2097 = vmatmul.mubr.f32.vlgmr.msra.gmra.mrb[16].mxu1 %v1604_v59 }
 0x249   :  { %v1687_v61 = vpop.f32.mrb[16].mxu1 }
 0x24a   :  { %1692 = vst.msk [vmem:[#allocation2] sm:$0x3] %vm1691_vm2, %v1687_v61  ;;  %v2098_v62 = vpop.f32.mrb[17].mxu1 }
 0x24b   :  { %2276 = shalt.err (!%p2273_p4)
}
 0x24c   :  { %s2277_s12 = scalar_lea.hbm %s2825_s4, 32 }
 0x24d   :  { %p2278_p5 = scmp.ne.s32.totalorder %s2825_s4, %s2277_s12  ;;  %p2281_p6 = scmp.lt.u32.totalorder %s2277_s12, %s2825_s4 }
 0x24f   :  { %p2283_p7 = pnand %p2281_p6, %p2278_p5 }
 0x251   :  { %2286 = shalt.err (!%p2283_p7)
}
 0x252   :  { %1702 = dma.vmem_to_hbm [thread:$0]  %s1700_s3, 32, %s2825_s4, [#allocation3]  }
 0x253   :  { %2287 = dma.done.wait [#allocation3], 32  }
 0x254   :  { %2288 = vsyncadd [#allocation3], 4294967264 }
 0x255   :  { %1706 = vsyncpa [#allocation3], 1 }

</bundles_post_ra>
